<compile_context>
chip_gen: v6e
topology: v6e:2x2x1
jax: 0.10.0
libtpu: 0.0.40
codegen_flags: <defaults>
</compile_context>

<pallas_src>
import jax
import jax.numpy as jnp
from jax.experimental import pallas as pl
from jax.experimental.pallas import tpu as pltpu


def qa_head_kernel(feat_ref, w0_ref, b0_ref, w1_ref, b1_ref, w2_ref, b2_ref, o_ref):
    # feat_ref: (Bt, 2048) bf16 pooled inception features (already bf16 from
    # the wrapper -> no in-kernel cast, half the feat DMA).
    feat = feat_ref[...]

    # inception.fc : Linear(2048 -> 1024). bf16 MXU matmul, f32 accumulation.
    h0 = jnp.dot(feat, w0_ref[...], preferred_element_type=jnp.float32) + b0_ref[...]

    # fc1 : Linear(1024 -> 512) on relu(act1).
    a1 = jnp.maximum(h0, 0.0)
    h1 = jnp.dot(a1.astype(jnp.bfloat16), w1_ref[...],
                 preferred_element_type=jnp.float32) + b1_ref[...]

    # fc2 : Linear(512 -> 1) on relu(act2). The single output column is padded
    # to 128 lanes (w2 is (512, 128) with real weights in column 0) so the
    # result/store is lane-dense (unmasked vst); the wrapper slices column 0.
    a2 = jnp.maximum(h1, 0.0)
    logit = jnp.dot(a2.astype(jnp.bfloat16), w2_ref[...],
                    preferred_element_type=jnp.float32) + b2_ref[...]

    o_ref[...] = jax.nn.sigmoid(logit)


@jax.jit
def qa_model_head(x_nchw, params):
    """x_nchw: (B, 2048, H, W) — the Inception-v3 backbone's final feature map."""
    B, C, H, W = x_nchw.shape
    assert C == 2048, "head expects 2048-channel inception features"

    # Adaptive average pool (1x1) done here: the big NCHW tensor is read from
    # HBM exactly once (no layout transpose); only a (B, 2048) bf16 tensor
    # reaches the kernel.
    feat = jnp.mean(x_nchw.astype(jnp.float32), axis=(2, 3)).astype(jnp.bfloat16)

    w0, b0, w1, b1, w2, b2 = params

    # Batch tile: 256 MXU rows per grid step when B allows (amortizes the
    # 256-wide MXU RHS push on v6e/v7x); otherwise pad to a multiple of 16
    # (bf16 sublane packing).
    if B >= 256:
        Bt = 256
    elif B >= 128:
        Bt = 128
    else:
        Bt = max(16, ((B + 15) // 16) * 16)
    B_pad = ((B + Bt - 1) // Bt) * Bt
    if B_pad != B:
        feat = jnp.pad(feat, ((0, B_pad - B), (0, 0)))

    # Weight/bias blocks never change block index across the batch grid ->
    # single-buffer them (saves ~5 MiB of VMEM headroom, important on v7x).
    resident = dict(pipeline_mode=pl.Buffered(1))

    out = pl.pallas_call(
        qa_head_kernel,
        out_shape=jax.ShapeDtypeStruct((B_pad, 128), jnp.float32),
        grid=(B_pad // Bt,),
        in_specs=[
            pl.BlockSpec((Bt, 2048), lambda i: (i, 0)),              # feat (bf16, tiled over B)
            pl.BlockSpec((2048, 1024), lambda i: (0, 0), **resident),  # w0 (bf16, resident)
            pl.BlockSpec((1, 1024), lambda i: (0, 0), **resident),     # b0 (f32)
            pl.BlockSpec((1024, 512), lambda i: (0, 0), **resident),   # w1 (bf16, resident)
            pl.BlockSpec((1, 512), lambda i: (0, 0), **resident),      # b1 (f32)
            pl.BlockSpec((512, 128), lambda i: (0, 0), **resident),    # w2 padded to 128 lanes (bf16)
            pl.BlockSpec((1, 128), lambda i: (0, 0), **resident),      # b2 padded to 128 lanes (f32)
        ],
        out_specs=pl.BlockSpec((Bt, 128), lambda i: (i, 0)),
        compiler_params=pltpu.CompilerParams(
            dimension_semantics=("parallel",),
            vmem_limit_bytes=32 << 20,
        ),
    )(feat, w0, b0, w1, b1, w2, b2)

    # Column 0 holds the real fc2 output; padded rows/columns are sliced off.
    return out[:B, :1]


def init_params(key):
    """Deterministic init matching torch.nn.Linear default U(-1/sqrt(fan_in), ..).

    Weights stored as (in, out) — the transpose of torch's (out, in) — so the
    kernel does row-major MXU matmuls directly. w0/w1/w2 are bf16 (halved HBM
    traffic, native MXU path); biases stay f32. fc2 is padded to 128 output
    lanes (real weights/bias in column 0, zeros elsewhere) for lane-dense
    stores.
    """
    def linear(k, fan_in, fan_out):
        kw, kb = jax.random.split(k)
        bound = 1.0 / float(fan_in) ** 0.5
        w = jax.random.uniform(kw, (fan_in, fan_out), jnp.float32, -bound, bound)
        b = jax.random.uniform(kb, (1, fan_out), jnp.float32, -bound, bound)
        return w, b

    k0, k1, k2 = jax.random.split(key, 3)
    w0, b0 = linear(k0, 2048, 1024)   # inception.fc (replaced)
    w1, b1 = linear(k1, 1024, 512)    # fc1
    w2, b2 = linear(k2, 512, 1)       # fc2
    w2p = jnp.pad(w2, ((0, 0), (0, 127)))   # (512, 128), real column = 0
    b2p = jnp.pad(b2, ((0, 0), (0, 127)))   # (1, 128),   real column = 0
    return (w0.astype(jnp.bfloat16), b0,
            w1.astype(jnp.bfloat16), b1,
            w2p.astype(jnp.bfloat16), b2p)


def reference_head(x_nchw, params):
    """Pure-JAX f32 reference of the same head (for a tolerance check)."""
    w0, b0, w1, b1, w2p, b2p = params
    feat = jnp.mean(x_nchw.astype(jnp.float32), axis=(2, 3))
    h0 = feat @ w0.astype(jnp.float32) + b0
    a1 = jnp.maximum(h0, 0.0)
    h1 = a1 @ w1.astype(jnp.float32) + b1
    a2 = jnp.maximum(h1, 0.0)
    logit = a2 @ w2p.astype(jnp.float32)[:, :1] + b2p[:, :1]
    return jax.nn.sigmoid(logit)


if __name__ == "__main__":
    key = jax.random.PRNGKey(0)
    kx, kp = jax.random.split(key)

    # Small synthetic backbone feature map: (batch=2, channels=2048, 4x4 spatial).
    B, C, H, W = 2, 2048, 4, 4
    x = jax.random.normal(kx, (B, C, H, W), jnp.float32)

    params = init_params(kp)
    out = qa_model_head(x, params)
    out = jax.block_until_ready(out)

    assert out.shape == (B, 1)
    assert bool(jnp.all((out >= 0.0) & (out <= 1.0)))

    ref = reference_head(x, params)
    assert bool(jnp.all(jnp.abs(out - ref) < 5e-2)), "mismatch vs f32 reference"

    print("KERNEL_OK")
</pallas_src>

<mosaic_0001>
module attributes {stable_mosaic.version = 11 : i64} {
  func.func @qa_head_kernel(%arg0: i32, %arg1: memref<16x2048xbf16, #tpu.memory_space<vmem>>, %arg2: memref<2048x1024xbf16, #tpu.memory_space<vmem>>, %arg3: memref<1x1024xf32, #tpu.memory_space<vmem>>, %arg4: memref<1024x512xbf16, #tpu.memory_space<vmem>>, %arg5: memref<1x512xf32, #tpu.memory_space<vmem>>, %arg6: memref<512x128xbf16, #tpu.memory_space<vmem>>, %arg7: memref<1x128xf32, #tpu.memory_space<vmem>>, %arg8: memref<16x128xf32, #tpu.memory_space<vmem>>) attributes {dimension_semantics = [#tpu.dimension_semantics<parallel>], iteration_bounds = array<i64: 1>, scalar_prefetch = 0 : i64, scratch_operands = 0 : i64, tpu.core_type = #tpu.core_type<tc>, window_params = [{transform_indices = @transform_0, window_bounds = array<i64: 16, 2048>}, {pipeline_mode = #tpu.pipeline_mode<synchronous>, transform_indices = @transform_1, window_bounds = array<i64: 2048, 1024>}, {pipeline_mode = #tpu.pipeline_mode<synchronous>, transform_indices = @transform_2, window_bounds = array<i64: 1, 1024>}, {pipeline_mode = #tpu.pipeline_mode<synchronous>, transform_indices = @transform_3, window_bounds = array<i64: 1024, 512>}, {pipeline_mode = #tpu.pipeline_mode<synchronous>, transform_indices = @transform_4, window_bounds = array<i64: 1, 512>}, {pipeline_mode = #tpu.pipeline_mode<synchronous>, transform_indices = @transform_5, window_bounds = array<i64: 512, 128>}, {pipeline_mode = #tpu.pipeline_mode<synchronous>, transform_indices = @transform_6, window_bounds = array<i64: 1, 128>}, {transform_indices = @transform_7, window_bounds = array<i64: 16, 128>}]} {
    %c0 = arith.constant 0 : index
    %c0_0 = arith.constant 0 : index
    %0 = vector.load %arg1[%c0, %c0_0] : memref<16x2048xbf16, #tpu.memory_space<vmem>>, vector<16x2048xbf16>
    %c0_1 = arith.constant 0 : index
    %c0_2 = arith.constant 0 : index
    %1 = vector.load %arg2[%c0_1, %c0_2] : memref<2048x1024xbf16, #tpu.memory_space<vmem>>, vector<2048x1024xbf16>
    %cst = arith.constant dense<0.000000e+00> : vector<16x1024xf32>
    %2 = tpu.matmul %0, %1, %cst {dimension_numbers = #tpu.dot_dimension_numbers<[1], [0], [0], [1], [0, 0, 1, 1], [], []>} : vector<16x2048xbf16>, vector<2048x1024xbf16>, vector<16x1024xf32> -> vector<16x1024xf32>
    %c0_3 = arith.constant 0 : index
    %c0_4 = arith.constant 0 : index
    %3 = vector.load %arg3[%c0_3, %c0_4] : memref<1x1024xf32, #tpu.memory_space<vmem>>, vector<1x1024xf32>
    %4 = vector.broadcast %3 : vector<1x1024xf32> to vector<16x1024xf32>
    %5 = arith.addf %2, %4 : vector<16x1024xf32>
    %cst_5 = arith.constant 0.000000e+00 : f32
    %6 = vector.broadcast %cst_5 : f32 to vector<16x1024xf32>
    %7 = arith.maximumf %5, %6 : vector<16x1024xf32>
    %8 = arith.truncf %7 : vector<16x1024xf32> to vector<16x1024xbf16>
    %c0_6 = arith.constant 0 : index
    %c0_7 = arith.constant 0 : index
    %9 = vector.load %arg4[%c0_6, %c0_7] : memref<1024x512xbf16, #tpu.memory_space<vmem>>, vector<1024x512xbf16>
    %cst_8 = arith.constant dense<0.000000e+00> : vector<16x512xf32>
    %10 = tpu.matmul %8, %9, %cst_8 {dimension_numbers = #tpu.dot_dimension_numbers<[1], [0], [0], [1], [0, 0, 1, 1], [], []>} : vector<16x1024xbf16>, vector<1024x512xbf16>, vector<16x512xf32> -> vector<16x512xf32>
    %c0_9 = arith.constant 0 : index
    %c0_10 = arith.constant 0 : index
    %11 = vector.load %arg5[%c0_9, %c0_10] : memref<1x512xf32, #tpu.memory_space<vmem>>, vector<1x512xf32>
    %12 = vector.broadcast %11 : vector<1x512xf32> to vector<16x512xf32>
    %13 = arith.addf %10, %12 : vector<16x512xf32>
    %cst_11 = arith.constant 0.000000e+00 : f32
    %14 = vector.broadcast %cst_11 : f32 to vector<16x512xf32>
    %15 = arith.maximumf %13, %14 : vector<16x512xf32>
    %16 = arith.truncf %15 : vector<16x512xf32> to vector<16x512xbf16>
    %c0_12 = arith.constant 0 : index
    %c0_13 = arith.constant 0 : index
    %17 = vector.load %arg6[%c0_12, %c0_13] : memref<512x128xbf16, #tpu.memory_space<vmem>>, vector<512x128xbf16>
    %cst_14 = arith.constant dense<0.000000e+00> : vector<16x128xf32>
    %18 = tpu.matmul %16, %17, %cst_14 {dimension_numbers = #tpu.dot_dimension_numbers<[1], [0], [0], [1], [0, 0, 1, 1], [], []>} : vector<16x512xbf16>, vector<512x128xbf16>, vector<16x128xf32> -> vector<16x128xf32>
    %c0_15 = arith.constant 0 : index
    %c0_16 = arith.constant 0 : index
    %19 = vector.load %arg7[%c0_15, %c0_16] : memref<1x128xf32, #tpu.memory_space<vmem>>, vector<1x128xf32>
    %20 = vector.broadcast %19 : vector<1x128xf32> to vector<16x128xf32>
    %21 = arith.addf %18, %20 : vector<16x128xf32>
    %22 = arith.negf %21 : vector<16x128xf32>
    %23 = math.exp %22 : vector<16x128xf32>
    %cst_17 = arith.constant 1.000000e+00 : f32
    %24 = vector.broadcast %cst_17 : f32 to vector<16x128xf32>
    %25 = arith.addf %24, %23 : vector<16x128xf32>
    %26 = arith.divf %24, %25 : vector<16x128xf32>
    %c0_18 = arith.constant 0 : index
    %c0_19 = arith.constant 0 : index
    %27 = vector.load %arg8[%c0_18, %c0_19] : memref<16x128xf32, #tpu.memory_space<vmem>>, vector<16x128xf32>
    tpu.vector_store %arg8[%c0_18, %c0_19], %26 {strides = array<i32>} : memref<16x128xf32, #tpu.memory_space<vmem>>, vector<16x128xf32>,
    return
  }
  func.func @transform_0(%arg0: i32) -> (i32, i32) {
    %c0_i32 = arith.constant 0 : i32
    %c0_i32_0 = arith.constant 0 : i32
    return %arg0, %c0_i32 : i32, i32
  }
  func.func @transform_1(%arg0: i32) -> (i32, i32) {
    %c0_i32 = arith.constant 0 : i32
    %c0_i32_0 = arith.constant 0 : i32
    %c0_i32_1 = arith.constant 0 : i32
    return %c0_i32, %c0_i32_0 : i32, i32
  }
  func.func @transform_2(%arg0: i32) -> (i32, i32) {
    %c0_i32 = arith.constant 0 : i32
    %c0_i32_0 = arith.constant 0 : i32
    %c0_i32_1 = arith.constant 0 : i32
    return %c0_i32, %c0_i32_0 : i32, i32
  }
  func.func @transform_3(%arg0: i32) -> (i32, i32) {
    %c0_i32 = arith.constant 0 : i32
    %c0_i32_0 = arith.constant 0 : i32
    %c0_i32_1 = arith.constant 0 : i32
    return %c0_i32, %c0_i32_0 : i32, i32
  }
  func.func @transform_4(%arg0: i32) -> (i32, i32) {
    %c0_i32 = arith.constant 0 : i32
    %c0_i32_0 = arith.constant 0 : i32
    %c0_i32_1 = arith.constant 0 : i32
    return %c0_i32, %c0_i32_0 : i32, i32
  }
  func.func @transform_5(%arg0: i32) -> (i32, i32) {
    %c0_i32 = arith.constant 0 : i32
    %c0_i32_0 = arith.constant 0 : i32
    %c0_i32_1 = arith.constant 0 : i32
    return %c0_i32, %c0_i32_0 : i32, i32
  }
  func.func @transform_6(%arg0: i32) -> (i32, i32) {
    %c0_i32 = arith.constant 0 : i32
    %c0_i32_0 = arith.constant 0 : i32
    %c0_i32_1 = arith.constant 0 : i32
    return %c0_i32, %c0_i32_0 : i32, i32
  }
  func.func @transform_7(%arg0: i32) -> (i32, i32) {
    %c0_i32 = arith.constant 0 : i32
    %c0_i32_0 = arith.constant 0 : i32
    return %arg0, %c0_i32 : i32, i32
  }
}

</mosaic_0001>

<bundles_post_ra>
// kernel: qa_model_head.1
= control target key start
LH: loop header
LB: loop body
LE: loop exit
PB: predicated region body
PF: predicated region fallthrough
CT: control target
= control target key end

     0   :  { %12 = vsyncpa [#allocation3], 0  ;;  %s12549_s0 = inlined_call_operand.vmem [shape: bf16[16,2048], index: 0, kind: input, shape index: {}]   ;;  %s12550_s1 = inlined_call_operand.hbm [shape: bf16[2048,1024], index: 1, kind: input, shape index: {}]   ;;  %s12551_s2 = inlined_call_operand.hbm [shape: f32[1,1024], index: 2, kind: input, shape index: {}]   ;;  %s12552_s3 = inlined_call_operand.hbm [shape: bf16[1024,512], index: 3, kind: input, shape index: {}]   ;;  %s12553_s4 = inlined_call_operand.hbm [shape: f32[1,512], index: 4, kind: input, shape index: {}]   ;;  %s12554_s5 = inlined_call_operand.hbm [shape: bf16[512,128], index: 5, kind: input, shape index: {}]   ;;  %s12555_s6 = inlined_call_operand.hbm [shape: f32[1,128], index: 6, kind: input, shape index: {}]   ;;  %s12556_s7 = inlined_call_operand.vmem [shape: f32[16,128], index: 7, kind: output, shape index: {}]  }
   0x1   :  { %13 = vsyncpa [#allocation5], 0 }
   0x2   :  { %14 = vsyncpa [#allocation8], 0 }
   0x3   :  { %15 = vsyncpa [#allocation11], 0  ;;  %s12008_s24 = smov [#allocation4]   ;;  %s12009_s26 = smov [#allocation7]  }
   0x4   :  { %s36_s25 = sshll.u32 %s12008_s24, 4  ;;  %s58_s27 = sshll.u32 %s12009_s26, 4  ;;  %s37_s25 = int_to_ptr.vmem [resolvable:$true] %s36_s25  ;;  %s59_s27 = int_to_ptr.vmem [resolvable:$true] %s58_s27 }
   0x5   :  { %s11888_s28 = scalar_lea.vmem %s37_s25, 128  ;;  %p11893_p1 = scmp.lt.s32.totalorder %s37_s25, %s37_s25 }
   0x6   :  { %p11889_p0 = scmp.ne.s32.totalorder %s37_s25, %s11888_s28  ;;  %p11894_p2 = scmp.lt.s32.totalorder %s11888_s28, %s11888_s28 }
   0x8   :  { %p11895_p3 = por %p11894_p2, %p11893_p1 }
   0xa   :  { %p11896_p4 = pnand %p11895_p3, %p11889_p0 }
   0xc   :  { %11899 = shalt.err (!%p11896_p4)
}
   0xd   :  { %39 = dma.hbm_to_vmem [thread:$0]  %s12551_s2, 128, %s37_s25, [#allocation5]  }
   0xe   :  { %s11908_s8 = scalar_lea.vmem %s59_s27, 64  ;;  %p11913_p6 = scmp.lt.s32.totalorder %s59_s27, %s59_s27 }
   0xf   :  { %p11909_p5 = scmp.ne.s32.totalorder %s59_s27, %s11908_s8  ;;  %p11914_p7 = scmp.lt.s32.totalorder %s11908_s8, %s11908_s8 }
  0x11   :  { %p11915_p8 = por %p11914_p7, %p11913_p6 }
  0x13   :  { %p11916_p9 = pnand %p11915_p8, %p11909_p5 }
  0x15   :  { %11919 = shalt.err (!%p11916_p9)
}
  0x16   :  { %61 = dma.hbm_to_vmem [thread:$0]  %s12553_s4, 64, %s59_s27, [#allocation8]  }
  0x17   :  { %s12010_s11 = smov [#allocation2]  }
  0x18   :  { %s23_s12 = sshll.u32 %s12010_s11, 4  ;;  %s24_s12 = int_to_ptr.vmem [resolvable:$true] %s23_s12 }
  0x19   :  { %s11928_s13 = scalar_lea.vmem %s24_s12, 131072  ;;  %p11933_p11 = scmp.lt.s32.totalorder %s24_s12, %s24_s12 }
  0x1a   :  { %p11929_p10 = scmp.ne.s32.totalorder %s24_s12, %s11928_s13  ;;  %p11934_p12 = scmp.lt.s32.totalorder %s11928_s13, %s11928_s13 }
  0x1c   :  { %p11935_p13 = por %p11934_p12, %p11933_p11 }
  0x1e   :  { %p11936_p0 = pnand %p11935_p13, %p11929_p10 }
  0x20   :  { %11939 = shalt.err (!%p11936_p0)
}
  0x21   :  { %s12011_s2 = smov 512   ;;  %s12012_s14 = smov 32  }
  0x22   :  { %29 = dma.hbm_to_vmem [thread:$0]  %s12550_s1, 131072, %s24_s12, [#allocation3], %s12011_s2, %s12011_s2, %s12012_s14  }
  0x23   :  { %s12013_s17 = smov [#allocation6]  }
  0x24   :  { %s45_s18 = sshll.u32 %s12013_s17, 4  ;;  %s46_s18 = int_to_ptr.vmem [resolvable:$true] %s45_s18 }
  0x25   :  { %s11948_s4 = scalar_lea.vmem %s46_s18, 32768  ;;  %p11953_p2 = scmp.lt.s32.totalorder %s46_s18, %s46_s18 }
  0x26   :  { %p11949_p1 = scmp.ne.s32.totalorder %s46_s18, %s11948_s4  ;;  %p11954_p3 = scmp.lt.s32.totalorder %s11948_s4, %s11948_s4 }
  0x28   :  { %p11955_p4 = por %p11954_p3, %p11953_p2 }
  0x2a   :  { %p11956_p5 = pnand %p11955_p4, %p11949_p1 }
  0x2c   :  { %11959 = shalt.err (!%p11956_p5)
}
  0x2d   :  { %s12014_s19 = smov 256   ;;  %s12015_s20 = smov 16  }
  0x2e   :  { %51 = dma.hbm_to_vmem [thread:$0]  %s12552_s3, 32768, %s46_s18, [#allocation5], %s12014_s19, %s12014_s19, %s12015_s20  }
  0x2f   :  { %s12016_s23 = smov [#allocation9]  }
  0x30   :  { %s67_s24 = sshll.u32 %s12016_s23, 4  ;;  %s68_s24 = int_to_ptr.vmem [resolvable:$true] %s67_s24 }
  0x31   :  { %s11968_s1 = scalar_lea.vmem %s68_s24, 4096  ;;  %p11973_p7 = scmp.lt.s32.totalorder %s68_s24, %s68_s24 }
  0x32   :  { %p11969_p6 = scmp.ne.s32.totalorder %s68_s24, %s11968_s1  ;;  %p11974_p8 = scmp.lt.s32.totalorder %s11968_s1, %s11968_s1 }
  0x34   :  { %p11975_p9 = por %p11974_p8, %p11973_p7 }
  0x36   :  { %p11976_p10 = pnand %p11975_p9, %p11969_p6 }
  0x38   :  { %11979 = shalt.err (!%p11976_p10)
}
  0x39   :  { %s12017_s25 = smov 64   ;;  %s12018_s26 = smov 4  }
  0x3a   :  { %73 = dma.hbm_to_vmem [thread:$0]  %s12554_s5, 4096, %s68_s24, [#allocation8], %s12017_s25, %s12017_s25, %s12018_s26  }
  0x3b   :  { %s12019_s29 = smov [#allocation10]  }
  0x3c   :  { %s80_s30 = sshll.u32 %s12019_s29, 4  ;;  %s81_s30 = int_to_ptr.vmem [resolvable:$true] %s80_s30 }
  0x3d   :  { %s11988_s3 = scalar_lea.vmem %s81_s30, 16  ;;  %s11992_s8 = scalar_lea.vmem %s81_s30, 32 }
  0x3e   :  { %p11989_p11 = scmp.ne.s32.totalorder %s81_s30, %s11988_s3  ;;  %p11993_p12 = scmp.lt.s32.totalorder %s81_s30, %s81_s30 }
  0x3f   :  { %p11994_p13 = scmp.lt.s32.totalorder %s11992_s8, %s11988_s3 }
  0x41   :  { %p11995_p0 = por %p11994_p13, %p11993_p12 }
  0x43   :  { %p11996_p1 = pnand %p11995_p0, %p11989_p11 }
  0x45   :  { %11999 = shalt.err (!%p11996_p1)
}
  0x46   :  { %83 = dma.hbm_to_vmem [thread:$0]  %s12555_s6, 16, %s81_s30, [#allocation11]  }
  0x47   :  { %12000 = dma.done.wait [#allocation3], 131072  }
  0x48   :  { %12001 = vsyncadd [#allocation3], 4294836224 }
  0x49   :  { %12002 = dma.done.wait [#allocation5], 32896  }
  0x4a   :  { %12003 = vsyncadd [#allocation5], 4294934400 }
  0x4b   :  { %12004 = dma.done.wait [#allocation8], 4160  }
  0x4c   :  { %12005 = vsyncadd [#allocation8], 4294963136 }
  0x4d   :  { %12006 = dma.done.wait [#allocation11], 16  }
  0x4e   :  { %12007 = vsyncadd [#allocation11], 4294967280  ;;  %v175_v0 = vld [vmem:[#allocation2 + $0x1c0] sm:$0xff]  ;;  %v12095_v59 = vld [vmem:[%s12549_s0 + $0x8] sm:$0xff] }
  0x4f   :  { %v179_v1 = vld [vmem:[#allocation2 + $0x1e0] sm:$0xff]  ;;  %v12100_v60 = vld [vmem:[%s12549_s0 + $0x48] sm:$0xff] }
  0x50   :  { %v303_v2 = vld [vmem:[#allocation2 + $0x5c0] sm:$0xff]  ;;  %v10139_v3 = vcombine.high %v175_v0, %v179_v1  ;;  %v10138_v5 = vcombine.low %v175_v0, %v179_v1  ;;  %v12104_v63 = vcombine.high %v12095_v59, %v12100_v60 }
  0x51   :  { %v307_v4 = vld [vmem:[#allocation2 + $0x5e0] sm:$0xff] }
  0x52   :  { %v167_v6 = vld [vmem:[#allocation2 + $0x180] sm:$0xff]  ;;  %v10267_v8 = vcombine.high %v303_v2, %v307_v4  ;;  %v10266_v9 = vcombine.low %v303_v2, %v307_v4  ;;  %6385 = vmatprep.subr.bf16.mxu0 %v10139_v3  ;;  %6460 = vmatprep.mubr.bf16.mxu1 %v12104_v63 }
  0x53   :  { %v171_v7 = vld [vmem:[#allocation2 + $0x1a0] sm:$0xff]  ;;  %6386 = vmatpush1.bf16.msra.mxu0 %v10138_v5 }
  0x54   :  { %v10131_v10 = vcombine.high %v167_v6, %v171_v7  ;;  %v295_v11 = vld [vmem:[#allocation2 + $0x580] sm:$0xff]  ;;  %6428 = vmatprep.subr.bf16.mxu1 %v10267_v8  ;;  %v10130_v18 = vcombine.low %v167_v6, %v171_v7 }
  0x55   :  { %v299_v12 = vld [vmem:[#allocation2 + $0x5a0] sm:$0xff]  ;;  %6429 = vmatpush1.bf16.msra.mxu1 %v10266_v9 }
  0x56   :  { %v159_v13 = vld [vmem:[#allocation2 + $0x140] sm:$0xff]  ;;  %v10259_v14 = vcombine.high %v295_v11, %v299_v12  ;;  %6387 = vmatprep.subr.bf16.mxu0 %v10131_v10  ;;  %v10258_v19 = vcombine.low %v295_v11, %v299_v12 }
  0x57   :  { %v163_v15 = vld [vmem:[#allocation2 + $0x160] sm:$0xff]  ;;  %6388 = vmatpush1.bf16.msra.mxu0 %v10130_v18 }
  0x58   :  { %v287_v16 = vld [vmem:[#allocation2 + $0x540] sm:$0xff]  ;;  %v10123_v20 = vcombine.high %v159_v13, %v163_v15  ;;  %6430 = vmatprep.subr.bf16.mxu1 %v10259_v14  ;;  %v10122_v26 = vcombine.low %v159_v13, %v163_v15 }
  0x59   :  { %v291_v17 = vld [vmem:[#allocation2 + $0x560] sm:$0xff]  ;;  %6431 = vmatpush1.bf16.msra.mxu1 %v10258_v19 }
  0x5a   :  { %v10251_v21 = vcombine.high %v287_v16, %v291_v17  ;;  %v151_v22 = vld [vmem:[#allocation2 + $0x100] sm:$0xff]  ;;  %6389 = vmatprep.subr.bf16.mxu0 %v10123_v20  ;;  %v10250_v27 = vcombine.low %v287_v16, %v291_v17 }
  0x5b   :  { %v155_v23 = vld [vmem:[#allocation2 + $0x120] sm:$0xff]  ;;  %6390 = vmatpush1.bf16.msra.mxu0 %v10122_v26 }
  0x5c   :  { %v279_v24 = vld [vmem:[#allocation2 + $0x500] sm:$0xff]  ;;  %v10115_v28 = vcombine.high %v151_v22, %v155_v23  ;;  %6432 = vmatprep.subr.bf16.mxu1 %v10251_v21  ;;  %v10114_v34 = vcombine.low %v151_v22, %v155_v23 }
  0x5d   :  { %v283_v25 = vld [vmem:[#allocation2 + $0x520] sm:$0xff]  ;;  %6433 = vmatpush1.bf16.msra.mxu1 %v10250_v27 }
  0x5e   :  { %v10243_v29 = vcombine.high %v279_v24, %v283_v25  ;;  %v143_v30 = vld [vmem:[#allocation2 + $0xc0] sm:$0xff]  ;;  %6391 = vmatprep.subr.bf16.mxu0 %v10115_v28  ;;  %v10242_v35 = vcombine.low %v279_v24, %v283_v25 }
  0x5f   :  { %v147_v31 = vld [vmem:[#allocation2 + $0xe0] sm:$0xff]  ;;  %6392 = vmatpush1.bf16.msra.mxu0 %v10114_v34 }
  0x60   :  { %v271_v32 = vld [vmem:[#allocation2 + $0x4c0] sm:$0xff]  ;;  %v10107_v36 = vcombine.high %v143_v30, %v147_v31  ;;  %6434 = vmatprep.subr.bf16.mxu1 %v10243_v29  ;;  %v10106_v42 = vcombine.low %v143_v30, %v147_v31 }
  0x61   :  { %v275_v33 = vld [vmem:[#allocation2 + $0x4e0] sm:$0xff]  ;;  %6435 = vmatpush1.bf16.msra.mxu1 %v10242_v35 }
  0x62   :  { %v10235_v37 = vcombine.high %v271_v32, %v275_v33  ;;  %v135_v38 = vld [vmem:[#allocation2 + $0x80] sm:$0xff]  ;;  %6393 = vmatprep.subr.bf16.mxu0 %v10107_v36  ;;  %v10234_v43 = vcombine.low %v271_v32, %v275_v33 }
  0x63   :  { %v139_v39 = vld [vmem:[#allocation2 + $0xa0] sm:$0xff]  ;;  %6394 = vmatpush1.bf16.msra.mxu0 %v10106_v42 }
  0x64   :  { %v263_v40 = vld [vmem:[#allocation2 + $0x480] sm:$0xff]  ;;  %v10099_v44 = vcombine.high %v135_v38, %v139_v39  ;;  %6436 = vmatprep.subr.bf16.mxu1 %v10235_v37  ;;  %v10098_v50 = vcombine.low %v135_v38, %v139_v39 }
  0x65   :  { %v267_v41 = vld [vmem:[#allocation2 + $0x4a0] sm:$0xff]  ;;  %6437 = vmatpush1.bf16.msra.mxu1 %v10234_v43 }
  0x66   :  { %v10227_v45 = vcombine.high %v263_v40, %v267_v41  ;;  %v127_v46 = vld [vmem:[#allocation2 + $0x40] sm:$0xff]  ;;  %6395 = vmatprep.subr.bf16.mxu0 %v10099_v44  ;;  %v10226_v51 = vcombine.low %v263_v40, %v267_v41 }
  0x67   :  { %v131_v47 = vld [vmem:[#allocation2 + $0x60] sm:$0xff]  ;;  %6396 = vmatpush1.bf16.msra.mxu0 %v10098_v50 }
  0x68   :  { %v255_v48 = vld [vmem:[#allocation2 + $0x440] sm:$0xff]  ;;  %v10091_v52 = vcombine.high %v127_v46, %v131_v47  ;;  %6438 = vmatprep.subr.bf16.mxu1 %v10227_v45  ;;  %v10090_v0 = vcombine.low %v127_v46, %v131_v47 }
  0x69   :  { %v259_v49 = vld [vmem:[#allocation2 + $0x460] sm:$0xff]  ;;  %6439 = vmatpush1.bf16.msra.mxu1 %v10226_v51 }
  0x6a   :  { %v119_v53 = vld [vmem:[#allocation2] sm:$0xff]  ;;  %v10219_v56 = vcombine.high %v255_v48, %v259_v49  ;;  %6397 = vmatprep.subr.bf16.mxu0 %v10091_v52  ;;  %v10218_v1 = vcombine.low %v255_v48, %v259_v49 }
  0x6b   :  { %v12081_v54 = vld [vmem:[%s12549_s0] sm:$0xff]  ;;  %6398 = vmatpush1.bf16.msra.mxu0 %v10090_v0 }
  0x6c   :  { %v12086_v55 = vld [vmem:[%s12549_s0 + $0x40] sm:$0xff]  ;;  %6440 = vmatprep.subr.bf16.mxu1 %v10219_v56 }
  0x6d   :  { %v123_v57 = vld [vmem:[#allocation2 + $0x20] sm:$0xff]  ;;  %v12090_v58 = vcombine.high %v12081_v54, %v12086_v55  ;;  %6441 = vmatpush1.bf16.msra.mxu1 %v10218_v1 }
  0x6e   :  { %v247_v61 = vld [vmem:[#allocation2 + $0x400] sm:$0xff]  ;;  %v10083_v2 = vcombine.high %v119_v53, %v123_v57  ;;  %v10082_v8 = vcombine.low %v119_v53, %v123_v57 }
  0x6f   :  { %v251_v62 = vld [vmem:[#allocation2 + $0x420] sm:$0xff]  ;;  %6417 = vmatprep.mubr.bf16.mxu0 %v12090_v58 }
  0x70   :  { %v10211_v3 = vcombine.high %v247_v61, %v251_v62  ;;  %v239_v4 = vld [vmem:[#allocation2 + $0x3c0] sm:$0xff]  ;;  %6399 = vmatprep.subr.bf16.mxu0 %v10083_v2  ;;  %v10210_v9 = vcombine.low %v247_v61, %v251_v62 }
  0x71   :  { %v243_v5 = vld [vmem:[#allocation2 + $0x3e0] sm:$0xff]  ;;  %6400 = vmatpush1.bf16.msra.mxu0 %v10082_v8 }
  0x72   :  { %v367_v6 = vld [vmem:[#allocation2 + $0x7c0] sm:$0xff]  ;;  %v10203_v10 = vcombine.high %v239_v4, %v243_v5  ;;  %6442 = vmatprep.subr.bf16.mxu1 %v10211_v3  ;;  %v10202_v16 = vcombine.low %v239_v4, %v243_v5 }
  0x73   :  { %v371_v7 = vld [vmem:[#allocation2 + $0x7e0] sm:$0xff]  ;;  %6443 = vmatpush1.bf16.msra.mxu1 %v10210_v9 }
  0x74   :  { %v10331_v11 = vcombine.high %v367_v6, %v371_v7  ;;  %v231_v12 = vld [vmem:[#allocation2 + $0x380] sm:$0xff]  ;;  %6401 = vmatprep.subr.bf16.mxu0 %v10203_v10  ;;  %v10330_v17 = vcombine.low %v367_v6, %v371_v7 }
  0x75   :  { %v235_v13 = vld [vmem:[#allocation2 + $0x3a0] sm:$0xff]  ;;  %6402 = vmatpush2.bf16.msra.mxu0 %v10202_v16 }
  0x76   :  { %v359_v14 = vld [vmem:[#allocation2 + $0x780] sm:$0xff]  ;;  %v10195_v18 = vcombine.high %v231_v12, %v235_v13  ;;  %6444 = vmatprep.subr.bf16.mxu1 %v10331_v11  ;;  %v10194_v24 = vcombine.low %v231_v12, %v235_v13 }
  0x77   :  { %v363_v15 = vld [vmem:[#allocation2 + $0x7a0] sm:$0xff]  ;;  %6445 = vmatpush2.bf16.msra.mxu1 %v10330_v17 }
  0x78   :  { %v10323_v19 = vcombine.high %v359_v14, %v363_v15  ;;  %v223_v20 = vld [vmem:[#allocation2 + $0x340] sm:$0xff]  ;;  %6403 = vmatprep.subr.bf16.mxu0 %v10195_v18  ;;  %v10322_v25 = vcombine.low %v359_v14, %v363_v15 }
  0x79   :  { %v227_v21 = vld [vmem:[#allocation2 + $0x360] sm:$0xff]  ;;  %6404 = vmatpush2.bf16.msra.mxu0 %v10194_v24  ;;  %v12120_v24 = vld [vmem:[%s12549_s0 + $0x50] sm:$0xff] }
  0x7a   :  { %v351_v22 = vld [vmem:[#allocation2 + $0x740] sm:$0xff]  ;;  %v10187_v26 = vcombine.high %v223_v20, %v227_v21  ;;  %6446 = vmatprep.subr.bf16.mxu1 %v10323_v19  ;;  %v10186_v32 = vcombine.low %v223_v20, %v227_v21  ;;  %v12110_v21 = vcombine.low %v12081_v54, %v12086_v55  ;;  %v12129_v54 = vld [vmem:[%s12549_s0 + $0x18] sm:$0xff] }
  0x7b   :  { %v355_v23 = vld [vmem:[#allocation2 + $0x760] sm:$0xff]  ;;  %6447 = vmatpush2.bf16.msra.mxu1 %v10322_v25  ;;  %v12124_v25 = vcombine.low %v12095_v59, %v12100_v60  ;;  %v12134_v55 = vld [vmem:[%s12549_s0 + $0x58] sm:$0xff] }
  0x7c   :  { %v10315_v27 = vcombine.high %v351_v22, %v355_v23  ;;  %v215_v28 = vld [vmem:[#allocation2 + $0x300] sm:$0xff]  ;;  %6405 = vmatprep.subr.bf16.mxu0 %v10187_v26  ;;  %v10314_v33 = vcombine.low %v351_v22, %v355_v23  ;;  %v12115_v23 = vld [vmem:[%s12549_s0 + $0x10] sm:$0xff] }
  0x7d   :  { %v219_v29 = vld [vmem:[#allocation2 + $0x320] sm:$0xff]  ;;  %6406 = vmatpush2.bf16.msra.mxu0 %v10186_v32  ;;  %v12138_v60 = vcombine.high %v12115_v23, %v12120_v24 }
  0x7e   :  { %v343_v30 = vld [vmem:[#allocation2 + $0x700] sm:$0xff]  ;;  %v10179_v34 = vcombine.high %v215_v28, %v219_v29  ;;  %6448 = vmatprep.subr.bf16.mxu1 %v10315_v27  ;;  %v10178_v40 = vcombine.low %v215_v28, %v219_v29 }
  0x7f   :  { %v347_v31 = vld [vmem:[#allocation2 + $0x720] sm:$0xff]  ;;  %6449 = vmatpush2.bf16.msra.mxu1 %v10314_v33  ;;  %v12143_v33 = vcombine.high %v12129_v54, %v12134_v55 }
  0x80   :  { %v10307_v35 = vcombine.high %v343_v30, %v347_v31  ;;  %v207_v36 = vld [vmem:[#allocation2 + $0x2c0] sm:$0xff]  ;;  %6407 = vmatprep.subr.bf16.mxu0 %v10179_v34  ;;  %v10306_v41 = vcombine.low %v343_v30, %v347_v31 }
  0x81   :  { %v211_v37 = vld [vmem:[#allocation2 + $0x2e0] sm:$0xff]  ;;  %6408 = vmatpush2.bf16.msra.mxu0 %v10178_v40 }
  0x82   :  { %v335_v38 = vld [vmem:[#allocation2 + $0x6c0] sm:$0xff]  ;;  %v10171_v42 = vcombine.high %v207_v36, %v211_v37  ;;  %6450 = vmatprep.subr.bf16.mxu1 %v10307_v35  ;;  %v10170_v48 = vcombine.low %v207_v36, %v211_v37 }
  0x83   :  { %v339_v39 = vld [vmem:[#allocation2 + $0x6e0] sm:$0xff]  ;;  %6451 = vmatpush2.bf16.msra.mxu1 %v10306_v41 }
  0x84   :  { %v10299_v43 = vcombine.high %v335_v38, %v339_v39  ;;  %v199_v44 = vld [vmem:[#allocation2 + $0x280] sm:$0xff]  ;;  %6409 = vmatprep.subr.bf16.mxu0 %v10171_v42  ;;  %v10298_v49 = vcombine.low %v335_v38, %v339_v39 }
  0x85   :  { %v203_v45 = vld [vmem:[#allocation2 + $0x2a0] sm:$0xff]  ;;  %6410 = vmatpush2.bf16.msra.mxu0 %v10170_v48 }
  0x86   :  { %v327_v46 = vld [vmem:[#allocation2 + $0x680] sm:$0xff]  ;;  %v10163_v50 = vcombine.high %v199_v44, %v203_v45  ;;  %6452 = vmatprep.subr.bf16.mxu1 %v10299_v43  ;;  %v10162_v61 = vcombine.low %v199_v44, %v203_v45 }
  0x87   :  { %v331_v47 = vld [vmem:[#allocation2 + $0x6a0] sm:$0xff]  ;;  %6453 = vmatpush2.bf16.msra.mxu1 %v10298_v49 }
  0x88   :  { %v10291_v51 = vcombine.high %v327_v46, %v331_v47  ;;  %v191_v52 = vld [vmem:[#allocation2 + $0x240] sm:$0xff]  ;;  %6411 = vmatprep.subr.bf16.mxu0 %v10163_v50  ;;  %v10290_v62 = vcombine.low %v327_v46, %v331_v47 }
  0x89   :  { %v195_v53 = vld [vmem:[#allocation2 + $0x260] sm:$0xff]  ;;  %6412 = vmatpush2.bf16.msra.mxu0 %v10162_v61 }
  0x8a   :  { %v319_v56 = vld [vmem:[#allocation2 + $0x640] sm:$0xff]  ;;  %v10155_v0 = vcombine.high %v191_v52, %v195_v53  ;;  %6454 = vmatprep.subr.bf16.mxu1 %v10291_v51  ;;  %v10154_v6 = vcombine.low %v191_v52, %v195_v53 }
  0x8b   :  { %v323_v57 = vld [vmem:[#allocation2 + $0x660] sm:$0xff]  ;;  %6455 = vmatpush2.bf16.msra.mxu1 %v10290_v62 }
  0x8c   :  { %v10283_v1 = vcombine.high %v319_v56, %v323_v57  ;;  %v183_v2 = vld [vmem:[#allocation2 + $0x200] sm:$0xff]  ;;  %6413 = vmatprep.subr.bf16.mxu0 %v10155_v0  ;;  %v10282_v7 = vcombine.low %v319_v56, %v323_v57 }
  0x8d   :  { %v187_v3 = vld [vmem:[#allocation2 + $0x220] sm:$0xff]  ;;  %6414 = vmatpush2.bf16.msra.mxu0 %v10154_v6 }
  0x8e   :  { %v311_v4 = vld [vmem:[#allocation2 + $0x600] sm:$0xff]  ;;  %v10147_v8 = vcombine.high %v183_v2, %v187_v3  ;;  %6456 = vmatprep.subr.bf16.mxu1 %v10283_v1  ;;  %v10146_v14 = vcombine.low %v183_v2, %v187_v3 }
  0x8f   :  { %v315_v5 = vld [vmem:[#allocation2 + $0x620] sm:$0xff]  ;;  %6457 = vmatpush2.bf16.msra.mxu1 %v10282_v7 }
  0x90   :  { %v10275_v9 = vcombine.high %v311_v4, %v315_v5  ;;  %v431_v10 = vld [vmem:[#allocation2 + $0x9c0] sm:$0xff]  ;;  %6415 = vmatprep.subr.bf16.mxu0 %v10147_v8  ;;  %v10274_v15 = vcombine.low %v311_v4, %v315_v5 }
  0x91   :  { %v435_v11 = vld [vmem:[#allocation2 + $0x9e0] sm:$0xff]  ;;  %6416 = vmatpush2.bf16.msra.mxu0 %v10146_v14 }
  0x92   :  { %v559_v12 = vld [vmem:[#allocation2 + $0xdc0] sm:$0xff]  ;;  %v10395_v16 = vcombine.high %v431_v10, %v435_v11  ;;  %6458 = vmatprep.subr.bf16.mxu1 %v10275_v9  ;;  %v10394_v26 = vcombine.low %v431_v10, %v435_v11 }
  0x93   :  { %v563_v13 = vld [vmem:[#allocation2 + $0xde0] sm:$0xff]  ;;  %6459 = vmatpush2.bf16.msra.mxu1 %v10274_v15 }
  0x94   :  { %v10523_v17 = vcombine.high %v559_v12, %v563_v13  ;;  %v423_v18 = vld [vmem:[#allocation2 + $0x980] sm:$0xff]  ;;  %6471 = vmatprep.subr.bf16.mxu0 %v10395_v16  ;;  %v10522_v27 = vcombine.low %v559_v12, %v563_v13  ;;  %6418 = vmatmul.mubr.bf16.vlgmr.msra.gmra.mxu0 %v12110_v21 }
  0x95   :  { %v427_v19 = vld [vmem:[#allocation2 + $0x9a0] sm:$0xff]  ;;  %6472 = vmatpush1.bf16.msra.mxu0 %v10394_v26  ;;  %6503 = vmatprep.mubr.bf16.mxu0 %v12138_v60 }
  0x96   :  { %v551_v20 = vld [vmem:[#allocation2 + $0xd80] sm:$0xff]  ;;  %v10387_v28 = vcombine.high %v423_v18, %v427_v19  ;;  %6514 = vmatprep.subr.bf16.mxu1 %v10523_v17  ;;  %6461 = vmatmul.mubr.bf16.vlgmr.msra.gmra.mxu1 %v12124_v25  ;;  %v10386_v34 = vcombine.low %v423_v18, %v427_v19 }
  0x97   :  { %v555_v22 = vld [vmem:[#allocation2 + $0xda0] sm:$0xff]  ;;  %6515 = vmatpush1.bf16.msra.mxu1 %v10522_v27  ;;  %6546 = vmatprep.mubr.bf16.mxu1 %v12143_v33 }
  0x98   :  { %v10515_v29 = vcombine.high %v551_v20, %v555_v22  ;;  %v415_v30 = vld [vmem:[#allocation2 + $0x940] sm:$0xff]  ;;  %6473 = vmatprep.subr.bf16.mxu0 %v10387_v28  ;;  %v10514_v35 = vcombine.low %v551_v20, %v555_v22 }
  0x99   :  { %v419_v59 = vld [vmem:[#allocation2 + $0x960] sm:$0xff]  ;;  %6474 = vmatpush1.bf16.msra.mxu0 %v10386_v34 }
  0x9a   :  { %v543_v31 = vld [vmem:[#allocation2 + $0xd40] sm:$0xff]  ;;  %v10379_v36 = vcombine.high %v415_v30, %v419_v59  ;;  %6516 = vmatprep.subr.bf16.mxu1 %v10515_v29  ;;  %v10378_v42 = vcombine.low %v415_v30, %v419_v59 }
  0x9b   :  { %v547_v32 = vld [vmem:[#allocation2 + $0xd60] sm:$0xff]  ;;  %6517 = vmatpush1.bf16.msra.mxu1 %v10514_v35 }
  0x9c   :  { %v407_v37 = vld [vmem:[#allocation2 + $0x900] sm:$0xff]  ;;  %v10507_v39 = vcombine.high %v543_v31, %v547_v32  ;;  %6475 = vmatprep.subr.bf16.mxu0 %v10379_v36  ;;  %v10506_v43 = vcombine.low %v543_v31, %v547_v32 }
  0x9d   :  { %v411_v38 = vld [vmem:[#allocation2 + $0x920] sm:$0xff]  ;;  %6476 = vmatpush1.bf16.msra.mxu0 %v10378_v42 }
  0x9e   :  { %v535_v40 = vld [vmem:[#allocation2 + $0xd00] sm:$0xff]  ;;  %v10371_v44 = vcombine.high %v407_v37, %v411_v38  ;;  %6518 = vmatprep.subr.bf16.mxu1 %v10507_v39  ;;  %v10370_v50 = vcombine.low %v407_v37, %v411_v38 }
  0x9f   :  { %v539_v41 = vld [vmem:[#allocation2 + $0xd20] sm:$0xff]  ;;  %6519 = vmatpush1.bf16.msra.mxu1 %v10506_v43 }
  0xa0   :  { %v399_v45 = vld [vmem:[#allocation2 + $0x8c0] sm:$0xff]  ;;  %v10499_v48 = vcombine.high %v535_v40, %v539_v41  ;;  %6477 = vmatprep.subr.bf16.mxu0 %v10371_v44  ;;  %v10498_v51 = vcombine.low %v535_v40, %v539_v41 }
  0xa1   :  { %v403_v46 = vld [vmem:[#allocation2 + $0x8e0] sm:$0xff]  ;;  %6478 = vmatpush1.bf16.msra.mxu0 %v10370_v50 }
  0xa2   :  { %v527_v47 = vld [vmem:[#allocation2 + $0xcc0] sm:$0xff]  ;;  %v10363_v52 = vcombine.high %v399_v45, %v403_v46  ;;  %6520 = vmatprep.subr.bf16.mxu1 %v10499_v48  ;;  %v10362_v0 = vcombine.low %v399_v45, %v403_v46 }
  0xa3   :  { %v531_v49 = vld [vmem:[#allocation2 + $0xce0] sm:$0xff]  ;;  %6521 = vmatpush1.bf16.msra.mxu1 %v10498_v51 }
  0xa4   :  { %v391_v53 = vld [vmem:[#allocation2 + $0x880] sm:$0xff]  ;;  %v10491_v61 = vcombine.high %v527_v47, %v531_v49  ;;  %6479 = vmatprep.subr.bf16.mxu0 %v10363_v52  ;;  %v10490_v1 = vcombine.low %v527_v47, %v531_v49 }
  0xa5   :  { %v395_v56 = vld [vmem:[#allocation2 + $0x8a0] sm:$0xff]  ;;  %6480 = vmatpush1.bf16.msra.mxu0 %v10362_v0 }
  0xa6   :  { %v519_v57 = vld [vmem:[#allocation2 + $0xc80] sm:$0xff]  ;;  %v10355_v2 = vcombine.high %v391_v53, %v395_v56  ;;  %6522 = vmatprep.subr.bf16.mxu1 %v10491_v61  ;;  %v10354_v8 = vcombine.low %v391_v53, %v395_v56 }
  0xa7   :  { %v523_v62 = vld [vmem:[#allocation2 + $0xca0] sm:$0xff]  ;;  %6523 = vmatpush1.bf16.msra.mxu1 %v10490_v1 }
  0xa8   :  { %v383_v3 = vld [vmem:[#allocation2 + $0x840] sm:$0xff]  ;;  %v10483_v6 = vcombine.high %v519_v57, %v523_v62  ;;  %6481 = vmatprep.subr.bf16.mxu0 %v10355_v2  ;;  %v10482_v9 = vcombine.low %v519_v57, %v523_v62 }
  0xa9   :  { %v387_v4 = vld [vmem:[#allocation2 + $0x860] sm:$0xff]  ;;  %6482 = vmatpush1.bf16.msra.mxu0 %v10354_v8 }
  0xaa   :  { %v511_v5 = vld [vmem:[#allocation2 + $0xc40] sm:$0xff]  ;;  %v10347_v10 = vcombine.high %v383_v3, %v387_v4  ;;  %6524 = vmatprep.subr.bf16.mxu1 %v10483_v6  ;;  %v10346_v16 = vcombine.low %v383_v3, %v387_v4 }
  0xab   :  { %v515_v7 = vld [vmem:[#allocation2 + $0xc60] sm:$0xff]  ;;  %6525 = vmatpush1.bf16.msra.mxu1 %v10482_v9 }
  0xac   :  { %v375_v11 = vld [vmem:[#allocation2 + $0x800] sm:$0xff]  ;;  %v10475_v14 = vcombine.high %v511_v5, %v515_v7  ;;  %6483 = vmatprep.subr.bf16.mxu0 %v10347_v10  ;;  %v10474_v17 = vcombine.low %v511_v5, %v515_v7 }
  0xad   :  { %v379_v12 = vld [vmem:[#allocation2 + $0x820] sm:$0xff]  ;;  %6484 = vmatpush1.bf16.msra.mxu0 %v10346_v16 }
  0xae   :  { %v503_v13 = vld [vmem:[#allocation2 + $0xc00] sm:$0xff]  ;;  %v10339_v18 = vcombine.high %v375_v11, %v379_v12  ;;  %6526 = vmatprep.subr.bf16.mxu1 %v10475_v14  ;;  %v10338_v28 = vcombine.low %v375_v11, %v379_v12 }
  0xaf   :  { %v507_v15 = vld [vmem:[#allocation2 + $0xc20] sm:$0xff]  ;;  %6527 = vmatpush1.bf16.msra.mxu1 %v10474_v17 }
  0xb0   :  { %v495_v19 = vld [vmem:[#allocation2 + $0xbc0] sm:$0xff]  ;;  %v10467_v26 = vcombine.high %v503_v13, %v507_v15  ;;  %6485 = vmatprep.subr.bf16.mxu0 %v10339_v18  ;;  %v10466_v29 = vcombine.low %v503_v13, %v507_v15 }
  0xb1   :  { %v499_v20 = vld [vmem:[#allocation2 + $0xbe0] sm:$0xff]  ;;  %6486 = vmatpush1.bf16.msra.mxu0 %v10338_v28 }
  0xb2   :  { %v623_v22 = vld [vmem:[#allocation2 + $0xfc0] sm:$0xff]  ;;  %v10459_v30 = vcombine.high %v495_v19, %v499_v20  ;;  %6528 = vmatprep.subr.bf16.mxu1 %v10467_v26  ;;  %v10458_v36 = vcombine.low %v495_v19, %v499_v20 }
  0xb3   :  { %v627_v27 = vld [vmem:[#allocation2 + $0xfe0] sm:$0xff]  ;;  %6529 = vmatpush1.bf16.msra.mxu1 %v10466_v29 }
  0xb4   :  { %v487_v59 = vld [vmem:[#allocation2 + $0xb80] sm:$0xff]  ;;  %v10587_v34 = vcombine.high %v623_v22, %v627_v27  ;;  %6487 = vmatprep.subr.bf16.mxu0 %v10459_v30  ;;  %v10586_v37 = vcombine.low %v623_v22, %v627_v27 }
  0xb5   :  { %v491_v31 = vld [vmem:[#allocation2 + $0xba0] sm:$0xff]  ;;  %6488 = vmatpush2.bf16.msra.mxu0 %v10458_v36 }
  0xb6   :  { %v615_v32 = vld [vmem:[#allocation2 + $0xf80] sm:$0xff]  ;;  %v10451_v38 = vcombine.high %v487_v59, %v491_v31  ;;  %6530 = vmatprep.subr.bf16.mxu1 %v10587_v34  ;;  %v10450_v44 = vcombine.low %v487_v59, %v491_v31 }
  0xb7   :  { %v619_v35 = vld [vmem:[#allocation2 + $0xfa0] sm:$0xff]  ;;  %6531 = vmatpush2.bf16.msra.mxu1 %v10586_v37 }
  0xb8   :  { %v479_v39 = vld [vmem:[#allocation2 + $0xb40] sm:$0xff]  ;;  %v10579_v42 = vcombine.high %v615_v32, %v619_v35  ;;  %6489 = vmatprep.subr.bf16.mxu0 %v10451_v38  ;;  %v10578_v45 = vcombine.low %v615_v32, %v619_v35 }
  0xb9   :  { %v483_v40 = vld [vmem:[#allocation2 + $0xb60] sm:$0xff]  ;;  %6490 = vmatpush2.bf16.msra.mxu0 %v10450_v44 }
  0xba   :  { %v607_v41 = vld [vmem:[#allocation2 + $0xf40] sm:$0xff]  ;;  %v10443_v46 = vcombine.high %v479_v39, %v483_v40  ;;  %6532 = vmatprep.subr.bf16.mxu1 %v10579_v42  ;;  %v10442_v52 = vcombine.low %v479_v39, %v483_v40 }
  0xbb   :  { %v611_v43 = vld [vmem:[#allocation2 + $0xf60] sm:$0xff]  ;;  %6533 = vmatpush2.bf16.msra.mxu1 %v10578_v45 }
  0xbc   :  { %v471_v47 = vld [vmem:[#allocation2 + $0xb00] sm:$0xff]  ;;  %v10571_v50 = vcombine.high %v607_v41, %v611_v43  ;;  %6491 = vmatprep.subr.bf16.mxu0 %v10443_v46  ;;  %v10570_v53 = vcombine.low %v607_v41, %v611_v43 }
  0xbd   :  { %v475_v48 = vld [vmem:[#allocation2 + $0xb20] sm:$0xff]  ;;  %6492 = vmatpush2.bf16.msra.mxu0 %v10442_v52  ;;  %v12174_v52 = vld [vmem:[%s12549_s0 + $0x68] sm:$0xff] }
  0xbe   :  { %v599_v49 = vld [vmem:[#allocation2 + $0xf00] sm:$0xff]  ;;  %v10435_v56 = vcombine.high %v471_v47, %v475_v48  ;;  %6534 = vmatprep.subr.bf16.mxu1 %v10571_v50  ;;  %v10434_v2 = vcombine.low %v471_v47, %v475_v48  ;;  %v12160_v48 = vcombine.low %v12115_v23, %v12120_v24 }
  0xbf   :  { %v603_v51 = vld [vmem:[#allocation2 + $0xf20] sm:$0xff]  ;;  %6535 = vmatpush2.bf16.msra.mxu1 %v10570_v53 }
  0xc0   :  { %v463_v57 = vld [vmem:[#allocation2 + $0xac0] sm:$0xff]  ;;  %v10563_v0 = vcombine.high %v599_v49, %v603_v51  ;;  %6493 = vmatprep.subr.bf16.mxu0 %v10435_v56  ;;  %v10562_v3 = vcombine.low %v599_v49, %v603_v51  ;;  %v12164_v49 = vcombine.low %v12129_v54, %v12134_v55  ;;  %v12169_v51 = vld [vmem:[%s12549_s0 + $0x28] sm:$0xff] }
  0xc1   :  { %v467_v61 = vld [vmem:[#allocation2 + $0xae0] sm:$0xff]  ;;  %6494 = vmatpush2.bf16.msra.mxu0 %v10434_v2 }
  0xc2   :  { %v591_v62 = vld [vmem:[#allocation2 + $0xec0] sm:$0xff]  ;;  %v10427_v4 = vcombine.high %v463_v57, %v467_v61  ;;  %6536 = vmatprep.subr.bf16.mxu1 %v10563_v0  ;;  %v10426_v10 = vcombine.low %v463_v57, %v467_v61 }
  0xc3   :  { %v595_v1 = vld [vmem:[#allocation2 + $0xee0] sm:$0xff]  ;;  %6537 = vmatpush2.bf16.msra.mxu1 %v10562_v3 }
  0xc4   :  { %v455_v5 = vld [vmem:[#allocation2 + $0xa80] sm:$0xff]  ;;  %v10555_v8 = vcombine.high %v591_v62, %v595_v1  ;;  %6495 = vmatprep.subr.bf16.mxu0 %v10427_v4  ;;  %v10554_v11 = vcombine.low %v591_v62, %v595_v1  ;;  %v12183_v62 = vcombine.high %v12169_v51, %v12174_v52 }
  0xc5   :  { %v459_v6 = vld [vmem:[#allocation2 + $0xaa0] sm:$0xff]  ;;  %6496 = vmatpush2.bf16.msra.mxu0 %v10426_v10 }
  0xc6   :  { %v583_v7 = vld [vmem:[#allocation2 + $0xe80] sm:$0xff]  ;;  %v10419_v12 = vcombine.high %v455_v5, %v459_v6  ;;  %6538 = vmatprep.subr.bf16.mxu1 %v10555_v8  ;;  %v10418_v18 = vcombine.low %v455_v5, %v459_v6 }
  0xc7   :  { %v587_v9 = vld [vmem:[#allocation2 + $0xea0] sm:$0xff]  ;;  %6539 = vmatpush2.bf16.msra.mxu1 %v10554_v11 }
  0xc8   :  { %v447_v13 = vld [vmem:[#allocation2 + $0xa40] sm:$0xff]  ;;  %v10547_v16 = vcombine.high %v583_v7, %v587_v9  ;;  %6497 = vmatprep.subr.bf16.mxu0 %v10419_v12  ;;  %v10546_v19 = vcombine.low %v583_v7, %v587_v9 }
  0xc9   :  { %v451_v14 = vld [vmem:[#allocation2 + $0xa60] sm:$0xff]  ;;  %6498 = vmatpush2.bf16.msra.mxu0 %v10418_v18 }
  0xca   :  { %v575_v15 = vld [vmem:[#allocation2 + $0xe40] sm:$0xff]  ;;  %v10411_v20 = vcombine.high %v447_v13, %v451_v14  ;;  %6540 = vmatprep.subr.bf16.mxu1 %v10547_v16  ;;  %v10410_v30 = vcombine.low %v447_v13, %v451_v14 }
  0xcb   :  { %v579_v17 = vld [vmem:[#allocation2 + $0xe60] sm:$0xff]  ;;  %6541 = vmatpush2.bf16.msra.mxu1 %v10546_v19 }
  0xcc   :  { %v439_v22 = vld [vmem:[#allocation2 + $0xa00] sm:$0xff]  ;;  %v10539_v28 = vcombine.high %v575_v15, %v579_v17  ;;  %6499 = vmatprep.subr.bf16.mxu0 %v10411_v20  ;;  %v10538_v59 = vcombine.low %v575_v15, %v579_v17 }
  0xcd   :  { %v443_v26 = vld [vmem:[#allocation2 + $0xa20] sm:$0xff]  ;;  %6500 = vmatpush2.bf16.msra.mxu0 %v10410_v30 }
  0xce   :  { %v567_v27 = vld [vmem:[#allocation2 + $0xe00] sm:$0xff]  ;;  %v10403_v31 = vcombine.high %v439_v22, %v443_v26  ;;  %6542 = vmatprep.subr.bf16.mxu1 %v10539_v28  ;;  %v10402_v38 = vcombine.low %v439_v22, %v443_v26 }
  0xcf   :  { %v571_v29 = vld [vmem:[#allocation2 + $0xe20] sm:$0xff]  ;;  %6543 = vmatpush2.bf16.msra.mxu1 %v10538_v59 }
  0xd0   :  { %v687_v32 = vld [vmem:[#allocation2 + $0x11c0] sm:$0xff]  ;;  %v10531_v36 = vcombine.high %v567_v27, %v571_v29  ;;  %6501 = vmatprep.subr.bf16.mxu0 %v10403_v31  ;;  %v10530_v41 = vcombine.low %v567_v27, %v571_v29 }
  0xd1   :  { %v691_v34 = vld [vmem:[#allocation2 + $0x11e0] sm:$0xff]  ;;  %6502 = vmatpush2.bf16.msra.mxu0 %v10402_v38 }
  0xd2   :  { %v815_v35 = vld [vmem:[#allocation2 + $0x15c0] sm:$0xff]  ;;  %v10651_v42 = vcombine.high %v687_v32, %v691_v34  ;;  %6544 = vmatprep.subr.bf16.mxu1 %v10531_v36  ;;  %v10650_v50 = vcombine.low %v687_v32, %v691_v34 }
  0xd3   :  { %v819_v37 = vld [vmem:[#allocation2 + $0x15e0] sm:$0xff]  ;;  %6545 = vmatpush2.bf16.msra.mxu1 %v10530_v41 }
  0xd4   :  { %v679_v39 = vld [vmem:[#allocation2 + $0x1180] sm:$0xff]  ;;  %v10779_v46 = vcombine.high %v815_v35, %v819_v37  ;;  %6557 = vmatprep.subr.bf16.mxu0 %v10651_v42  ;;  %v10778_v23 = vcombine.low %v815_v35, %v819_v37  ;;  %6504 = vmatmul.mubr.bf16.vlgmr.msra.gmra.mxu0 %v12160_v48 }
  0xd5   :  { %v683_v40 = vld [vmem:[#allocation2 + $0x11a0] sm:$0xff]  ;;  %6558 = vmatpush1.bf16.msra.mxu0 %v10650_v50 }
  0xd6   :  { %v807_v43 = vld [vmem:[#allocation2 + $0x1580] sm:$0xff]  ;;  %v10643_v24 = vcombine.high %v679_v39, %v683_v40  ;;  %6600 = vmatprep.subr.bf16.mxu1 %v10779_v46  ;;  %6547 = vmatmul.mubr.bf16.vlgmr.msra.gmra.mxu1 %v12164_v49  ;;  %v10642_v0 = vcombine.low %v679_v39, %v683_v40 }
  0xd7   :  { %v811_v44 = vld [vmem:[#allocation2 + $0x15a0] sm:$0xff]  ;;  %6601 = vmatpush1.bf16.msra.mxu1 %v10778_v23  ;;  %6632 = vmatprep.mubr.bf16.mxu1 %v12183_v62 }
  0xd8   :  { %v12151_v45 = vld [vmem:[%s12549_s0 + $0x20] sm:$0xff]  ;;  %v10771_v56 = vcombine.high %v807_v43, %v811_v44  ;;  %6559 = vmatprep.subr.bf16.mxu0 %v10643_v24  ;;  %v10770_v1 = vcombine.low %v807_v43, %v811_v44 }
  0xd9   :  { %v12156_v47 = vld [vmem:[%s12549_s0 + $0x60] sm:$0xff]  ;;  %6560 = vmatpush1.bf16.msra.mxu0 %v10642_v0 }
  0xda   :  { %v671_v53 = vld [vmem:[#allocation2 + $0x1140] sm:$0xff]  ;;  %v12178_v61 = vcombine.high %v12151_v45, %v12156_v47  ;;  %6602 = vmatprep.subr.bf16.mxu1 %v10771_v56 }
  0xdb   :  { %v675_v54 = vld [vmem:[#allocation2 + $0x1160] sm:$0xff]  ;;  %6603 = vmatpush1.bf16.msra.mxu1 %v10770_v1 }
  0xdc   :  { %v799_v55 = vld [vmem:[#allocation2 + $0x1540] sm:$0xff]  ;;  %v10635_v2 = vcombine.high %v671_v53, %v675_v54  ;;  %6589 = vmatprep.mubr.bf16.mxu0 %v12178_v61  ;;  %v10634_v8 = vcombine.low %v671_v53, %v675_v54 }
  0xdd   :  { %v803_v57 = vld [vmem:[#allocation2 + $0x1560] sm:$0xff] }
  0xde   :  { %v663_v3 = vld [vmem:[#allocation2 + $0x1100] sm:$0xff]  ;;  %v10763_v6 = vcombine.high %v799_v55, %v803_v57  ;;  %6561 = vmatprep.subr.bf16.mxu0 %v10635_v2  ;;  %v10762_v9 = vcombine.low %v799_v55, %v803_v57 }
  0xdf   :  { %v667_v4 = vld [vmem:[#allocation2 + $0x1120] sm:$0xff]  ;;  %6562 = vmatpush1.bf16.msra.mxu0 %v10634_v8 }
  0xe0   :  { %v791_v5 = vld [vmem:[#allocation2 + $0x1500] sm:$0xff]  ;;  %v10627_v10 = vcombine.high %v663_v3, %v667_v4  ;;  %6604 = vmatprep.subr.bf16.mxu1 %v10763_v6  ;;  %v10626_v16 = vcombine.low %v663_v3, %v667_v4 }
  0xe1   :  { %v795_v7 = vld [vmem:[#allocation2 + $0x1520] sm:$0xff]  ;;  %6605 = vmatpush1.bf16.msra.mxu1 %v10762_v9 }
  0xe2   :  { %v655_v11 = vld [vmem:[#allocation2 + $0x10c0] sm:$0xff]  ;;  %v10755_v14 = vcombine.high %v791_v5, %v795_v7  ;;  %6563 = vmatprep.subr.bf16.mxu0 %v10627_v10  ;;  %v10754_v17 = vcombine.low %v791_v5, %v795_v7 }
  0xe3   :  { %v659_v12 = vld [vmem:[#allocation2 + $0x10e0] sm:$0xff]  ;;  %6564 = vmatpush1.bf16.msra.mxu0 %v10626_v16 }
  0xe4   :  { %v783_v13 = vld [vmem:[#allocation2 + $0x14c0] sm:$0xff]  ;;  %v10619_v18 = vcombine.high %v655_v11, %v659_v12  ;;  %6606 = vmatprep.subr.bf16.mxu1 %v10755_v14  ;;  %v10618_v28 = vcombine.low %v655_v11, %v659_v12 }
  0xe5   :  { %v787_v15 = vld [vmem:[#allocation2 + $0x14e0] sm:$0xff]  ;;  %6607 = vmatpush1.bf16.msra.mxu1 %v10754_v17 }
  0xe6   :  { %v647_v19 = vld [vmem:[#allocation2 + $0x1080] sm:$0xff]  ;;  %v10747_v26 = vcombine.high %v783_v13, %v787_v15  ;;  %6565 = vmatprep.subr.bf16.mxu0 %v10619_v18  ;;  %v10746_v29 = vcombine.low %v783_v13, %v787_v15 }
  0xe7   :  { %v651_v20 = vld [vmem:[#allocation2 + $0x10a0] sm:$0xff]  ;;  %6566 = vmatpush1.bf16.msra.mxu0 %v10618_v28 }
  0xe8   :  { %v775_v22 = vld [vmem:[#allocation2 + $0x1480] sm:$0xff]  ;;  %v10611_v30 = vcombine.high %v647_v19, %v651_v20  ;;  %6608 = vmatprep.subr.bf16.mxu1 %v10747_v26  ;;  %v10610_v36 = vcombine.low %v647_v19, %v651_v20 }
  0xe9   :  { %v779_v27 = vld [vmem:[#allocation2 + $0x14a0] sm:$0xff]  ;;  %6609 = vmatpush1.bf16.msra.mxu1 %v10746_v29 }
  0xea   :  { %v639_v59 = vld [vmem:[#allocation2 + $0x1040] sm:$0xff]  ;;  %v10739_v34 = vcombine.high %v775_v22, %v779_v27  ;;  %6567 = vmatprep.subr.bf16.mxu0 %v10611_v30  ;;  %v10738_v37 = vcombine.low %v775_v22, %v779_v27 }
  0xeb   :  { %v643_v31 = vld [vmem:[#allocation2 + $0x1060] sm:$0xff]  ;;  %6568 = vmatpush1.bf16.msra.mxu0 %v10610_v36 }
  0xec   :  { %v767_v32 = vld [vmem:[#allocation2 + $0x1440] sm:$0xff]  ;;  %v10603_v38 = vcombine.high %v639_v59, %v643_v31  ;;  %6610 = vmatprep.subr.bf16.mxu1 %v10739_v34  ;;  %v10602_v44 = vcombine.low %v639_v59, %v643_v31 }
  0xed   :  { %v771_v35 = vld [vmem:[#allocation2 + $0x1460] sm:$0xff]  ;;  %6611 = vmatpush1.bf16.msra.mxu1 %v10738_v37 }
  0xee   :  { %v631_v39 = vld [vmem:[#allocation2 + $0x1000] sm:$0xff]  ;;  %v10731_v42 = vcombine.high %v767_v32, %v771_v35  ;;  %6569 = vmatprep.subr.bf16.mxu0 %v10603_v38  ;;  %v10730_v46 = vcombine.low %v767_v32, %v771_v35 }
  0xef   :  { %v635_v40 = vld [vmem:[#allocation2 + $0x1020] sm:$0xff]  ;;  %6570 = vmatpush1.bf16.msra.mxu0 %v10602_v44 }
  0xf0   :  { %v759_v41 = vld [vmem:[#allocation2 + $0x1400] sm:$0xff]  ;;  %v10595_v50 = vcombine.high %v631_v39, %v635_v40  ;;  %6612 = vmatprep.subr.bf16.mxu1 %v10731_v42  ;;  %v10594_v55 = vcombine.low %v631_v39, %v635_v40 }
  0xf1   :  { %v763_v43 = vld [vmem:[#allocation2 + $0x1420] sm:$0xff]  ;;  %6613 = vmatpush1.bf16.msra.mxu1 %v10730_v46 }
  0xf2   :  { %v751_v23 = vld [vmem:[#allocation2 + $0x13c0] sm:$0xff]  ;;  %v10723_v56 = vcombine.high %v759_v41, %v763_v43  ;;  %6571 = vmatprep.subr.bf16.mxu0 %v10595_v50  ;;  %v10722_v57 = vcombine.low %v759_v41, %v763_v43 }
  0xf3   :  { %v755_v24 = vld [vmem:[#allocation2 + $0x13e0] sm:$0xff]  ;;  %6572 = vmatpush1.bf16.msra.mxu0 %v10594_v55 }
  0xf4   :  { %v879_v53 = vld [vmem:[#allocation2 + $0x17c0] sm:$0xff]  ;;  %v10715_v0 = vcombine.high %v751_v23, %v755_v24  ;;  %6614 = vmatprep.subr.bf16.mxu1 %v10723_v56  ;;  %v10714_v6 = vcombine.low %v751_v23, %v755_v24 }
  0xf5   :  { %v883_v54 = vld [vmem:[#allocation2 + $0x17e0] sm:$0xff]  ;;  %6615 = vmatpush1.bf16.msra.mxu1 %v10722_v57 }
  0xf6   :  { %v743_v1 = vld [vmem:[#allocation2 + $0x1380] sm:$0xff]  ;;  %v10843_v4 = vcombine.high %v879_v53, %v883_v54  ;;  %6573 = vmatprep.subr.bf16.mxu0 %v10715_v0  ;;  %v10842_v7 = vcombine.low %v879_v53, %v883_v54 }
  0xf7   :  { %v747_v2 = vld [vmem:[#allocation2 + $0x13a0] sm:$0xff]  ;;  %6574 = vmatpush2.bf16.msra.mxu0 %v10714_v6 }
  0xf8   :  { %v871_v3 = vld [vmem:[#allocation2 + $0x1780] sm:$0xff]  ;;  %v10707_v8 = vcombine.high %v743_v1, %v747_v2  ;;  %6616 = vmatprep.subr.bf16.mxu1 %v10843_v4  ;;  %v10706_v14 = vcombine.low %v743_v1, %v747_v2 }
  0xf9   :  { %v875_v5 = vld [vmem:[#allocation2 + $0x17a0] sm:$0xff]  ;;  %6617 = vmatpush2.bf16.msra.mxu1 %v10842_v7 }
  0xfa   :  { %v735_v9 = vld [vmem:[#allocation2 + $0x1340] sm:$0xff]  ;;  %v10835_v12 = vcombine.high %v871_v3, %v875_v5  ;;  %6575 = vmatprep.subr.bf16.mxu0 %v10707_v8  ;;  %v10834_v15 = vcombine.low %v871_v3, %v875_v5 }
  0xfb   :  { %v739_v10 = vld [vmem:[#allocation2 + $0x1360] sm:$0xff]  ;;  %6576 = vmatpush2.bf16.msra.mxu0 %v10706_v14 }
  0xfc   :  { %v863_v11 = vld [vmem:[#allocation2 + $0x1740] sm:$0xff]  ;;  %v10699_v16 = vcombine.high %v735_v9, %v739_v10  ;;  %6618 = vmatprep.subr.bf16.mxu1 %v10835_v12  ;;  %v10698_v26 = vcombine.low %v735_v9, %v739_v10 }
  0xfd   :  { %v867_v13 = vld [vmem:[#allocation2 + $0x1760] sm:$0xff]  ;;  %6619 = vmatpush2.bf16.msra.mxu1 %v10834_v15 }
  0xfe   :  { %v727_v17 = vld [vmem:[#allocation2 + $0x1300] sm:$0xff]  ;;  %v10827_v20 = vcombine.high %v863_v11, %v867_v13  ;;  %6577 = vmatprep.subr.bf16.mxu0 %v10699_v16  ;;  %v10826_v27 = vcombine.low %v863_v11, %v867_v13 }
  0xff   :  { %v731_v18 = vld [vmem:[#allocation2 + $0x1320] sm:$0xff]  ;;  %6578 = vmatpush2.bf16.msra.mxu0 %v10698_v26  ;;  %v12201_v26 = vld [vmem:[%s12549_s0 + $0x38] sm:$0xff] }
 0x100   :  { %v855_v19 = vld [vmem:[#allocation2 + $0x1700] sm:$0xff]  ;;  %v10691_v28 = vcombine.high %v727_v17, %v731_v18  ;;  %6620 = vmatprep.subr.bf16.mxu1 %v10827_v20  ;;  %v10690_v34 = vcombine.low %v727_v17, %v731_v18  ;;  %v12196_v20 = vld [vmem:[%s12549_s0 + $0x70] sm:$0xff] }
 0x101   :  { %v859_v22 = vld [vmem:[#allocation2 + $0x1720] sm:$0xff]  ;;  %6621 = vmatpush2.bf16.msra.mxu1 %v10826_v27  ;;  %v12206_v27 = vld [vmem:[%s12549_s0 + $0x78] sm:$0xff] }
 0x102   :  { %v719_v29 = vld [vmem:[#allocation2 + $0x12c0] sm:$0xff]  ;;  %v10819_v31 = vcombine.high %v855_v19, %v859_v22  ;;  %6579 = vmatprep.subr.bf16.mxu0 %v10691_v28  ;;  %v10818_v35 = vcombine.low %v855_v19, %v859_v22  ;;  %v12191_v19 = vld [vmem:[%s12549_s0 + $0x30] sm:$0xff]  ;;  %v12210_v28 = vcombine.low %v12151_v45, %v12156_v47  ;;  %v12223_v47 = vcombine.high %v12201_v26, %v12206_v27 }
 0x103   :  { %v723_v30 = vld [vmem:[#allocation2 + $0x12e0] sm:$0xff]  ;;  %6580 = vmatpush2.bf16.msra.mxu0 %v10690_v34  ;;  %v12218_v45 = vcombine.high %v12191_v19, %v12196_v20 }
 0x104   :  { %v847_v59 = vld [vmem:[#allocation2 + $0x16c0] sm:$0xff]  ;;  %v10683_v36 = vcombine.high %v719_v29, %v723_v30  ;;  %6622 = vmatprep.subr.bf16.mxu1 %v10819_v31  ;;  %v10682_v42 = vcombine.low %v719_v29, %v723_v30  ;;  %v12214_v29 = vcombine.low %v12169_v51, %v12174_v52 }
 0x105   :  { %v851_v32 = vld [vmem:[#allocation2 + $0x16e0] sm:$0xff]  ;;  %6623 = vmatpush2.bf16.msra.mxu1 %v10818_v35 }
 0x106   :  { %v711_v37 = vld [vmem:[#allocation2 + $0x1280] sm:$0xff]  ;;  %v10811_v40 = vcombine.high %v847_v59, %v851_v32  ;;  %6581 = vmatprep.subr.bf16.mxu0 %v10683_v36  ;;  %v10810_v43 = vcombine.low %v847_v59, %v851_v32 }
 0x107   :  { %v715_v38 = vld [vmem:[#allocation2 + $0x12a0] sm:$0xff]  ;;  %6582 = vmatpush2.bf16.msra.mxu0 %v10682_v42 }
 0x108   :  { %v839_v39 = vld [vmem:[#allocation2 + $0x1680] sm:$0xff]  ;;  %v10675_v44 = vcombine.high %v711_v37, %v715_v38  ;;  %6624 = vmatprep.subr.bf16.mxu1 %v10811_v40  ;;  %v10674_v56 = vcombine.low %v711_v37, %v715_v38 }
 0x109   :  { %v843_v41 = vld [vmem:[#allocation2 + $0x16a0] sm:$0xff]  ;;  %6625 = vmatpush2.bf16.msra.mxu1 %v10810_v43 }
 0x10a   :  { %v703_v46 = vld [vmem:[#allocation2 + $0x1240] sm:$0xff]  ;;  %v10803_v24 = vcombine.high %v839_v39, %v843_v41  ;;  %6583 = vmatprep.subr.bf16.mxu0 %v10675_v44  ;;  %v10802_v54 = vcombine.low %v839_v39, %v843_v41 }
 0x10b   :  { %v707_v50 = vld [vmem:[#allocation2 + $0x1260] sm:$0xff]  ;;  %6584 = vmatpush2.bf16.msra.mxu0 %v10674_v56 }
 0x10c   :  { %v831_v23 = vld [vmem:[#allocation2 + $0x1640] sm:$0xff]  ;;  %v10667_v55 = vcombine.high %v703_v46, %v707_v50  ;;  %6626 = vmatprep.subr.bf16.mxu1 %v10803_v24  ;;  %v10666_v4 = vcombine.low %v703_v46, %v707_v50 }
 0x10d   :  { %v835_v53 = vld [vmem:[#allocation2 + $0x1660] sm:$0xff]  ;;  %6627 = vmatpush2.bf16.msra.mxu1 %v10802_v54 }
 0x10e   :  { %v695_v57 = vld [vmem:[#allocation2 + $0x1200] sm:$0xff]  ;;  %v10795_v2 = vcombine.high %v831_v23, %v835_v53  ;;  %6585 = vmatprep.subr.bf16.mxu0 %v10667_v55  ;;  %v10794_v5 = vcombine.low %v831_v23, %v835_v53 }
 0x10f   :  { %v699_v0 = vld [vmem:[#allocation2 + $0x1220] sm:$0xff]  ;;  %6586 = vmatpush2.bf16.msra.mxu0 %v10666_v4 }
 0x110   :  { %v823_v1 = vld [vmem:[#allocation2 + $0x1600] sm:$0xff]  ;;  %v10659_v6 = vcombine.high %v695_v57, %v699_v0  ;;  %6628 = vmatprep.subr.bf16.mxu1 %v10795_v2  ;;  %v10658_v12 = vcombine.low %v695_v57, %v699_v0 }
 0x111   :  { %v827_v3 = vld [vmem:[#allocation2 + $0x1620] sm:$0xff]  ;;  %6629 = vmatpush2.bf16.msra.mxu1 %v10794_v5 }
 0x112   :  { %v943_v7 = vld [vmem:[#allocation2 + $0x19c0] sm:$0xff]  ;;  %v10787_v10 = vcombine.high %v823_v1, %v827_v3  ;;  %6587 = vmatprep.subr.bf16.mxu0 %v10659_v6  ;;  %v10786_v15 = vcombine.low %v823_v1, %v827_v3 }
 0x113   :  { %v947_v8 = vld [vmem:[#allocation2 + $0x19e0] sm:$0xff]  ;;  %6588 = vmatpush2.bf16.msra.mxu0 %v10658_v12 }
 0x114   :  { %v1071_v9 = vld [vmem:[#allocation2 + $0x1dc0] sm:$0xff]  ;;  %v10907_v16 = vcombine.high %v943_v7, %v947_v8  ;;  %6630 = vmatprep.subr.bf16.mxu1 %v10787_v10  ;;  %v10906_v30 = vcombine.low %v943_v7, %v947_v8 }
 0x115   :  { %v1075_v11 = vld [vmem:[#allocation2 + $0x1de0] sm:$0xff]  ;;  %6631 = vmatpush2.bf16.msra.mxu1 %v10786_v15 }
 0x116   :  { %v935_v13 = vld [vmem:[#allocation2 + $0x1980] sm:$0xff]  ;;  %v11035_v22 = vcombine.high %v1071_v9, %v1075_v11  ;;  %6643 = vmatprep.subr.bf16.mxu0 %v10907_v16  ;;  %v11034_v59 = vcombine.low %v1071_v9, %v1075_v11  ;;  %6590 = vmatmul.mubr.bf16.vlgmr.msra.gmra.mxu0 %v12210_v28 }
 0x117   :  { %v939_v14 = vld [vmem:[#allocation2 + $0x19a0] sm:$0xff]  ;;  %6644 = vmatpush1.bf16.msra.mxu0 %v10906_v30  ;;  %6675 = vmatprep.mubr.bf16.mxu0 %v12218_v45 }
 0x118   :  { %v1063_v17 = vld [vmem:[#allocation2 + $0x1d80] sm:$0xff]  ;;  %v10899_v31 = vcombine.high %v935_v13, %v939_v14  ;;  %6686 = vmatprep.subr.bf16.mxu1 %v11035_v22  ;;  %6633 = vmatmul.mubr.bf16.vlgmr.msra.gmra.mxu1 %v12214_v29  ;;  %v10898_v51 = vcombine.low %v935_v13, %v939_v14 }
 0x119   :  { %v1067_v18 = vld [vmem:[#allocation2 + $0x1da0] sm:$0xff]  ;;  %6687 = vmatpush1.bf16.msra.mxu1 %v11034_v59  ;;  %6718 = vmatprep.mubr.bf16.mxu1 %v12223_v47 }
 0x11a   :  { %v927_v32 = vld [vmem:[#allocation2 + $0x1940] sm:$0xff]  ;;  %v11027_v36 = vcombine.high %v1063_v17, %v1067_v18  ;;  %6645 = vmatprep.subr.bf16.mxu0 %v10899_v31  ;;  %v11026_v52 = vcombine.low %v1063_v17, %v1067_v18 }
 0x11b   :  { %v931_v34 = vld [vmem:[#allocation2 + $0x1960] sm:$0xff]  ;;  %6646 = vmatpush1.bf16.msra.mxu0 %v10898_v51 }
 0x11c   :  { %v1055_v35 = vld [vmem:[#allocation2 + $0x1d40] sm:$0xff]  ;;  %v10891_v38 = vcombine.high %v927_v32, %v931_v34  ;;  %6688 = vmatprep.subr.bf16.mxu1 %v11027_v36  ;;  %v10890_v44 = vcombine.low %v927_v32, %v931_v34 }
 0x11d   :  { %v1059_v37 = vld [vmem:[#allocation2 + $0x1d60] sm:$0xff]  ;;  %6689 = vmatpush1.bf16.msra.mxu1 %v11026_v52 }
 0x11e   :  { %v919_v39 = vld [vmem:[#allocation2 + $0x1900] sm:$0xff]  ;;  %v11019_v42 = vcombine.high %v1055_v35, %v1059_v37  ;;  %6647 = vmatprep.subr.bf16.mxu0 %v10891_v38  ;;  %v11018_v46 = vcombine.low %v1055_v35, %v1059_v37 }
 0x11f   :  { %v923_v40 = vld [vmem:[#allocation2 + $0x1920] sm:$0xff]  ;;  %6648 = vmatpush1.bf16.msra.mxu0 %v10890_v44 }
 0x120   :  { %v1047_v41 = vld [vmem:[#allocation2 + $0x1d00] sm:$0xff]  ;;  %v10883_v50 = vcombine.high %v919_v39, %v923_v40  ;;  %6690 = vmatprep.subr.bf16.mxu1 %v11019_v42  ;;  %v10882_v55 = vcombine.low %v919_v39, %v923_v40 }
 0x121   :  { %v1051_v43 = vld [vmem:[#allocation2 + $0x1d20] sm:$0xff]  ;;  %6691 = vmatpush1.bf16.msra.mxu1 %v11018_v46 }
 0x122   :  { %v911_v23 = vld [vmem:[#allocation2 + $0x18c0] sm:$0xff]  ;;  %v11011_v56 = vcombine.high %v1047_v41, %v1051_v43  ;;  %6649 = vmatprep.subr.bf16.mxu0 %v10883_v50  ;;  %v11010_v57 = vcombine.low %v1047_v41, %v1051_v43 }
 0x123   :  { %v915_v24 = vld [vmem:[#allocation2 + $0x18e0] sm:$0xff]  ;;  %6650 = vmatpush1.bf16.msra.mxu0 %v10882_v55 }
 0x124   :  { %v1039_v53 = vld [vmem:[#allocation2 + $0x1cc0] sm:$0xff]  ;;  %v10875_v0 = vcombine.high %v911_v23, %v915_v24  ;;  %6692 = vmatprep.subr.bf16.mxu1 %v11011_v56  ;;  %v10874_v6 = vcombine.low %v911_v23, %v915_v24 }
 0x125   :  { %v1043_v54 = vld [vmem:[#allocation2 + $0x1ce0] sm:$0xff]  ;;  %6693 = vmatpush1.bf16.msra.mxu1 %v11010_v57 }
 0x126   :  { %v903_v1 = vld [vmem:[#allocation2 + $0x1880] sm:$0xff]  ;;  %v11003_v4 = vcombine.high %v1039_v53, %v1043_v54  ;;  %6651 = vmatprep.subr.bf16.mxu0 %v10875_v0  ;;  %v11002_v7 = vcombine.low %v1039_v53, %v1043_v54 }
 0x127   :  { %v907_v2 = vld [vmem:[#allocation2 + $0x18a0] sm:$0xff]  ;;  %6652 = vmatpush1.bf16.msra.mxu0 %v10874_v6 }
 0x128   :  { %v1031_v3 = vld [vmem:[#allocation2 + $0x1c80] sm:$0xff]  ;;  %v10867_v8 = vcombine.high %v903_v1, %v907_v2  ;;  %6694 = vmatprep.subr.bf16.mxu1 %v11003_v4  ;;  %v10866_v14 = vcombine.low %v903_v1, %v907_v2 }
 0x129   :  { %v1035_v5 = vld [vmem:[#allocation2 + $0x1ca0] sm:$0xff]  ;;  %6695 = vmatpush1.bf16.msra.mxu1 %v11002_v7 }
 0x12a   :  { %v895_v9 = vld [vmem:[#allocation2 + $0x1840] sm:$0xff]  ;;  %v10995_v12 = vcombine.high %v1031_v3, %v1035_v5  ;;  %6653 = vmatprep.subr.bf16.mxu0 %v10867_v8  ;;  %v10994_v15 = vcombine.low %v1031_v3, %v1035_v5 }
 0x12b   :  { %v899_v10 = vld [vmem:[#allocation2 + $0x1860] sm:$0xff]  ;;  %6654 = vmatpush1.bf16.msra.mxu0 %v10866_v14 }
 0x12c   :  { %v1023_v11 = vld [vmem:[#allocation2 + $0x1c40] sm:$0xff]  ;;  %v10859_v16 = vcombine.high %v895_v9, %v899_v10  ;;  %6696 = vmatprep.subr.bf16.mxu1 %v10995_v12  ;;  %v10858_v31 = vcombine.low %v895_v9, %v899_v10 }
 0x12d   :  { %v1027_v13 = vld [vmem:[#allocation2 + $0x1c60] sm:$0xff]  ;;  %6697 = vmatpush1.bf16.msra.mxu1 %v10994_v15 }
 0x12e   :  { %v887_v17 = vld [vmem:[#allocation2 + $0x1800] sm:$0xff]  ;;  %v10987_v30 = vcombine.high %v1023_v11, %v1027_v13  ;;  %6655 = vmatprep.subr.bf16.mxu0 %v10859_v16  ;;  %v10986_v32 = vcombine.low %v1023_v11, %v1027_v13 }
 0x12f   :  { %v891_v18 = vld [vmem:[#allocation2 + $0x1820] sm:$0xff]  ;;  %6656 = vmatpush1.bf16.msra.mxu0 %v10858_v31 }
 0x130   :  { %v1015_v22 = vld [vmem:[#allocation2 + $0x1c00] sm:$0xff]  ;;  %v10851_v34 = vcombine.high %v887_v17, %v891_v18  ;;  %6698 = vmatprep.subr.bf16.mxu1 %v10987_v30  ;;  %v10850_v38 = vcombine.low %v887_v17, %v891_v18 }
 0x131   :  { %v1019_v59 = vld [vmem:[#allocation2 + $0x1c20] sm:$0xff]  ;;  %6699 = vmatpush1.bf16.msra.mxu1 %v10986_v32 }
 0x132   :  { %v1007_v35 = vld [vmem:[#allocation2 + $0x1bc0] sm:$0xff]  ;;  %v10979_v51 = vcombine.high %v1015_v22, %v1019_v59  ;;  %6657 = vmatprep.subr.bf16.mxu0 %v10851_v34  ;;  %v10978_v39 = vcombine.low %v1015_v22, %v1019_v59 }
 0x133   :  { %v1011_v36 = vld [vmem:[#allocation2 + $0x1be0] sm:$0xff]  ;;  %6658 = vmatpush1.bf16.msra.mxu0 %v10850_v38 }
 0x134   :  { %v1135_v37 = vld [vmem:[#allocation2 + $0x1fc0] sm:$0xff]  ;;  %v10971_v40 = vcombine.high %v1007_v35, %v1011_v36  ;;  %6700 = vmatprep.subr.bf16.mxu1 %v10979_v51  ;;  %v10970_v50 = vcombine.low %v1007_v35, %v1011_v36 }
 0x135   :  { %v1139_v52 = vld [vmem:[#allocation2 + $0x1fe0] sm:$0xff]  ;;  %6701 = vmatpush1.bf16.msra.mxu1 %v10978_v39 }
 0x136   :  { %v999_v41 = vld [vmem:[#allocation2 + $0x1b80] sm:$0xff]  ;;  %v11099_v44 = vcombine.high %v1135_v37, %v1139_v52  ;;  %6659 = vmatprep.subr.bf16.mxu0 %v10971_v40  ;;  %v11098_v23 = vcombine.low %v1135_v37, %v1139_v52 }
 0x137   :  { %v1003_v42 = vld [vmem:[#allocation2 + $0x1ba0] sm:$0xff]  ;;  %6660 = vmatpush2.bf16.msra.mxu0 %v10970_v50 }
 0x138   :  { %v1127_v43 = vld [vmem:[#allocation2 + $0x1f80] sm:$0xff]  ;;  %v10963_v24 = vcombine.high %v999_v41, %v1003_v42  ;;  %6702 = vmatprep.subr.bf16.mxu1 %v11099_v44  ;;  %v10962_v0 = vcombine.low %v999_v41, %v1003_v42  ;;  %v1145_v41 = vlaneseq }
 0x139   :  { %v1131_v46 = vld [vmem:[#allocation2 + $0x1fa0] sm:$0xff]  ;;  %6703 = vmatpush2.bf16.msra.mxu1 %v11098_v23 }
 0x13a   :  { %v991_v53 = vld [vmem:[#allocation2 + $0x1b40] sm:$0xff]  ;;  %v11091_v55 = vcombine.high %v1127_v43, %v1131_v46  ;;  %6661 = vmatprep.subr.bf16.mxu0 %v10963_v24  ;;  %v11090_v1 = vcombine.low %v1127_v43, %v1131_v46 }
 0x13b   :  { %v995_v56 = vld [vmem:[#allocation2 + $0x1b60] sm:$0xff]  ;;  %6662 = vmatpush2.bf16.msra.mxu0 %v10962_v0  ;;  %v176_v0 = vld [vmem:[#allocation2 + $0x1c8] sm:$0xff] }
 0x13c   :  { %v1119_v54 = vld [vmem:[#allocation2 + $0x1f40] sm:$0xff]  ;;  %v10955_v2 = vcombine.high %v991_v53, %v995_v56  ;;  %6704 = vmatprep.subr.bf16.mxu1 %v11091_v55  ;;  %v10954_v8 = vcombine.low %v991_v53, %v995_v56  ;;  %v12228_v56 = vshrl.u32 %v1145_v41, 7 }
 0x13d   :  { %v1123_v57 = vld [vmem:[#allocation2 + $0x1f60] sm:$0xff]  ;;  %6705 = vmatpush2.bf16.msra.mxu1 %v11090_v1  ;;  %v180_v1 = vld [vmem:[#allocation2 + $0x1e8] sm:$0xff] }
 0x13e   :  { %v983_v3 = vld [vmem:[#allocation2 + $0x1b00] sm:$0xff]  ;;  %v11083_v6 = vcombine.high %v1119_v54, %v1123_v57  ;;  %6663 = vmatprep.subr.bf16.mxu0 %v10955_v2  ;;  %v11082_v9 = vcombine.low %v1119_v54, %v1123_v57  ;;  %v304_v2 = vld [vmem:[#allocation2 + $0x5c8] sm:$0xff] }
 0x13f   :  { %v987_v4 = vld [vmem:[#allocation2 + $0x1b20] sm:$0xff]  ;;  %6664 = vmatpush2.bf16.msra.mxu0 %v10954_v8  ;;  %v10141_v8 = vcombine.high %v176_v0, %v180_v1 }
 0x140   :  { %v1111_v5 = vld [vmem:[#allocation2 + $0x1f00] sm:$0xff]  ;;  %v10947_v10 = vcombine.high %v983_v3, %v987_v4  ;;  %6706 = vmatprep.subr.bf16.mxu1 %v11083_v6  ;;  %v10946_v16 = vcombine.low %v983_v3, %v987_v4  ;;  %v308_v3 = vld [vmem:[#allocation2 + $0x5e8] sm:$0xff] }
 0x141   :  { %v1115_v7 = vld [vmem:[#allocation2 + $0x1f20] sm:$0xff]  ;;  %6707 = vmatpush2.bf16.msra.mxu1 %v11082_v9  ;;  %v10269_v9 = vcombine.high %v304_v2, %v308_v3 }
 0x142   :  { %v11075_v11 = vcombine.high %v1111_v5, %v1115_v7  ;;  %v975_v12 = vld [vmem:[#allocation2 + $0x1ac0] sm:$0xff]  ;;  %6665 = vmatprep.subr.bf16.mxu0 %v10947_v10  ;;  %v11074_v17 = vcombine.low %v1111_v5, %v1115_v7  ;;  %v12558_v5 = vsub.s32 0, %v12228_v56  ;;  %v168_v10 = vld [vmem:[#allocation2 + $0x188] sm:$0xff] }
 0x143   :  { %v979_v13 = vld [vmem:[#allocation2 + $0x1ae0] sm:$0xff]  ;;  %6666 = vmatpush2.bf16.msra.mxu0 %v10946_v16  ;;  %v12239_v16 = vcombine.low %v12201_v26, %v12206_v27 }
 0x144   :  { %v1103_v14 = vld [vmem:[#allocation2 + $0x1ec0] sm:$0xff]  ;;  %v10939_v18 = vcombine.high %v975_v12, %v979_v13  ;;  %6708 = vmatprep.subr.bf16.mxu1 %v11075_v11  ;;  %v10938_v34 = vcombine.low %v975_v12, %v979_v13  ;;  %v172_v11 = vld [vmem:[#allocation2 + $0x1a8] sm:$0xff]  ;;  %v12233_v12 = vcombine.low %v12191_v19, %v12196_v20 }
 0x145   :  { %v1107_v15 = vld [vmem:[#allocation2 + $0x1ee0] sm:$0xff]  ;;  %6709 = vmatpush2.bf16.msra.mxu1 %v11074_v17  ;;  %v296_v13 = vld [vmem:[#allocation2 + $0x588] sm:$0xff]  ;;  %v10140_v17 = vcombine.low %v176_v0, %v180_v1  ;;  %v10132_v26 = vcombine.low %v168_v10, %v172_v11 }
 0x146   :  { %v11067_v22 = vcombine.high %v1103_v14, %v1107_v15  ;;  %v967_v30 = vld [vmem:[#allocation2 + $0x1a80] sm:$0xff]  ;;  %6667 = vmatprep.subr.bf16.mxu0 %v10939_v18  ;;  %v11066_v35 = vcombine.low %v1103_v14, %v1107_v15  ;;  %v300_v14 = vld [vmem:[#allocation2 + $0x5a8] sm:$0xff]  ;;  %v10268_v18 = vcombine.low %v304_v2, %v308_v3 }
 0x147   :  { %v971_v59 = vld [vmem:[#allocation2 + $0x1aa0] sm:$0xff]  ;;  %6668 = vmatpush2.bf16.msra.mxu0 %v10938_v34  ;;  %v164_v19 = vld [vmem:[#allocation2 + $0x168] sm:$0xff] }
 0x148   :  { %v1095_v31 = vld [vmem:[#allocation2 + $0x1e80] sm:$0xff]  ;;  %v10931_v36 = vcombine.high %v967_v30, %v971_v59  ;;  %6710 = vmatprep.subr.bf16.mxu1 %v11067_v22  ;;  %v10930_v40 = vcombine.low %v967_v30, %v971_v59  ;;  %v10133_v22 = vcombine.high %v168_v10, %v172_v11  ;;  %v10261_v30 = vcombine.high %v296_v13, %v300_v14  ;;  %v160_v59 = vld [vmem:[#allocation2 + $0x148] sm:$0xff] }
 0x149   :  { %v1099_v32 = vld [vmem:[#allocation2 + $0x1ea0] sm:$0xff]  ;;  %6711 = vmatpush2.bf16.msra.mxu1 %v11066_v35  ;;  %v272_v0 = vld [vmem:[#allocation2 + $0x4c8] sm:$0xff] }
 0x14a   :  { %v11059_v37 = vcombine.high %v1095_v31, %v1099_v32  ;;  %v959_v51 = vld [vmem:[#allocation2 + $0x1a40] sm:$0xff]  ;;  %6669 = vmatprep.subr.bf16.mxu0 %v10931_v36  ;;  %v11058_v42 = vcombine.low %v1095_v31, %v1099_v32  ;;  %v288_v31 = vld [vmem:[#allocation2 + $0x548] sm:$0xff]  ;;  %v10260_v36 = vcombine.low %v296_v13, %v300_v14 }
 0x14b   :  { %v963_v52 = vld [vmem:[#allocation2 + $0x1a60] sm:$0xff]  ;;  %6670 = vmatpush2.bf16.msra.mxu0 %v10930_v40  ;;  %v292_v32 = vld [vmem:[#allocation2 + $0x568] sm:$0xff] }
 0x14c   :  { %v1087_v38 = vld [vmem:[#allocation2 + $0x1e40] sm:$0xff]  ;;  %v10923_v43 = vcombine.high %v959_v51, %v963_v52  ;;  %6712 = vmatprep.subr.bf16.mxu1 %v11059_v37  ;;  %v10922_v53 = vcombine.low %v959_v51, %v963_v52  ;;  %v10125_v37 = vcombine.high %v160_v59, %v164_v19  ;;  %v156_v40 = vld [vmem:[#allocation2 + $0x128] sm:$0xff] }
 0x14d   :  { %v1091_v39 = vld [vmem:[#allocation2 + $0x1e60] sm:$0xff]  ;;  %6713 = vmatpush2.bf16.msra.mxu1 %v11058_v42  ;;  %v280_v42 = vld [vmem:[#allocation2 + $0x508] sm:$0xff] }
 0x14e   :  { %v11051_v44 = vcombine.high %v1087_v38, %v1091_v39  ;;  %v951_v46 = vld [vmem:[#allocation2 + $0x1a00] sm:$0xff]  ;;  %6671 = vmatprep.subr.bf16.mxu0 %v10923_v43  ;;  %v11050_v54 = vcombine.low %v1087_v38, %v1091_v39  ;;  %v10253_v38 = vcombine.high %v288_v31, %v292_v32  ;;  %v152_v39 = vld [vmem:[#allocation2 + $0x108] sm:$0xff] }
 0x14f   :  { %v955_v50 = vld [vmem:[#allocation2 + $0x1a20] sm:$0xff]  ;;  %6672 = vmatpush2.bf16.msra.mxu0 %v10922_v53  ;;  %v284_v43 = vld [vmem:[#allocation2 + $0x528] sm:$0xff]  ;;  %v10116_v2 = vcombine.low %v152_v39, %v156_v40 }
 0x150   :  { %v1079_v23 = vld [vmem:[#allocation2 + $0x1e00] sm:$0xff]  ;;  %v10915_v55 = vcombine.high %v951_v46, %v955_v50  ;;  %6714 = vmatprep.subr.bf16.mxu1 %v11051_v44  ;;  %v10914_v4 = vcombine.low %v951_v46, %v955_v50  ;;  %v10124_v46 = vcombine.low %v160_v59, %v164_v19  ;;  %v276_v1 = vld [vmem:[#allocation2 + $0x4e8] sm:$0xff]  ;;  %v10244_v3 = vcombine.low %v280_v42, %v284_v43 }
 0x151   :  { %v1083_v24 = vld [vmem:[#allocation2 + $0x1e20] sm:$0xff]  ;;  %6715 = vmatpush2.bf16.msra.mxu1 %v11050_v54  ;;  %v10245_v54 = vcombine.high %v280_v42, %v284_v43  ;;  %v268_v10 = vld [vmem:[#allocation2 + $0x4a8] sm:$0xff]  ;;  %v10236_v13 = vcombine.low %v272_v0, %v276_v1 }
 0x152   :  { %v11043_v57 = vcombine.high %v1079_v23, %v1083_v24  ;;  %6673 = vmatprep.subr.bf16.mxu0 %v10915_v55  ;;  %v11042_v6 = vcombine.low %v1079_v23, %v1083_v24  ;;  %v1143_v7 = vld [vmem:[#allocation4] sm:$0xff]  ;;  %v10252_v23 = vcombine.low %v288_v31, %v292_v32  ;;  %v10117_v24 = vcombine.high %v152_v39, %v156_v40  ;;  %v144_v55 = vld [vmem:[#allocation2 + $0xc8] sm:$0xff] }
 0x153   :  { %6674 = vmatpush2.bf16.msra.mxu0 %v10914_v4  ;;  %v1148_v15 = vrot.slane %v1143_v7, %v12558_v5  ;;  %v136_v7 = vld [vmem:[#allocation2 + $0x88] sm:$0xff]  ;;  %v413_v5 = vld [vmem:[#allocation2 + $0x930] sm:$0xff] }
 0x154   :  { %6716 = vmatprep.subr.bf16.mxu1 %v11043_v57  ;;  %6729 = vmatprep.subr.bf16.mxu0 %v10141_v8  ;;  %v6419_v20 = vpop.f32.mrf.mxu0  ;;  %v148_v57 = vld [vmem:[#allocation2 + $0xe8] sm:$0xff] }
 0x155   :  { %6717 = vmatpush2.bf16.msra.mxu1 %v11042_v6  ;;  %v6420_v34 = vadd.f32 %v6419_v20, %v1148_v15  ;;  %v10109_v4 = vcombine.high %v144_v55, %v148_v57  ;;  %v10237_v6 = vcombine.high %v272_v0, %v276_v1  ;;  %v140_v8 = vld [vmem:[#allocation2 + $0xa8] sm:$0xff]  ;;  %v10108_v11 = vcombine.low %v144_v55, %v148_v57 }
 0x156   :  { %6772 = vmatprep.subr.bf16.mxu1 %v10269_v9  ;;  %6676 = vmatmul.mubr.bf16.vlgmr.msra.gmra.mxu0 %v12233_v12  ;;  %v6462_v35 = vpop.f32.mrf.mxu1  ;;  %v12243_v27 = vpop.f32.mrf.mxu0  ;;  %v264_v9 = vld [vmem:[#allocation2 + $0x488] sm:$0xff]  ;;  %v10101_v14 = vcombine.high %v136_v7, %v140_v8  ;;  %v10100_v59 = vcombine.low %v136_v7, %v140_v8 }
 0x157   :  { %6730 = vmatpush1.bf16.msra.mxu0 %v10140_v17  ;;  %v12245_v51 = vadd.f32 %v6462_v35, %v6420_v34  ;;  %6761 = vmatprep.mubr.bf16.mxu0 %v12090_v58  ;;  %v128_v17 = vld [vmem:[#allocation2 + $0x48] sm:$0xff]  ;;  %v10228_v19 = vcombine.low %v264_v9, %v268_v10 }
 0x158   :  { %6719 = vmatmul.mubr.bf16.vlgmr.msra.gmra.mxu1 %v12239_v16  ;;  %6731 = vmatprep.subr.bf16.mxu0 %v10133_v22  ;;  %v12247_v52 = vpop.f32.mrf.mxu1  ;;  %v6423_v41 = vpop.f32.mrf.mxu0  ;;  %v256_v22 = vld [vmem:[#allocation2 + $0x448] sm:$0xff] }
 0x159   :  { %6773 = vmatpush1.bf16.msra.mxu1 %v10268_v18  ;;  %6804 = vmatprep.mubr.bf16.mxu1 %v12104_v63  ;;  %v6424_v44 = vadd.f32 %v6423_v41, %v1148_v15  ;;  %v10229_v15 = vcombine.high %v264_v9, %v268_v10  ;;  %v132_v18 = vld [vmem:[#allocation2 + $0x68] sm:$0xff] }
 0x15a   :  { %6774 = vmatprep.subr.bf16.mxu1 %v10261_v30  ;;  %v6466_v50 = vpop.f32.mrf.mxu1  ;;  %v260_v30 = vld [vmem:[#allocation2 + $0x468] sm:$0xff]  ;;  %v10093_v20 = vcombine.high %v128_v17, %v132_v18 }
 0x15b   :  { %6732 = vmatpush1.bf16.msra.mxu0 %v10132_v26  ;;  %v12251_v53 = vadd.f32 %v6466_v50, %v6424_v44  ;;  %v10221_v31 = vcombine.high %v256_v22, %v260_v30  ;;  %v120_v32 = vld [vmem:[#allocation2 + $0x8] sm:$0xff] }
 0x15c   :  { %6733 = vmatprep.subr.bf16.mxu0 %v10125_v37  ;;  %v124_v34 = vld [vmem:[#allocation2 + $0x28] sm:$0xff]  ;;  %v10220_v37 = vcombine.low %v256_v22, %v260_v30 }
 0x15d   :  { %6775 = vmatpush1.bf16.msra.mxu1 %v10260_v36  ;;  %v248_v35 = vld [vmem:[#allocation2 + $0x408] sm:$0xff]  ;;  %v10092_v36 = vcombine.low %v128_v17, %v132_v18  ;;  %v10084_v44 = vcombine.low %v120_v32, %v124_v34 }
 0x15e   :  { %6776 = vmatprep.subr.bf16.mxu1 %v10253_v38  ;;  %v252_v26 = vld [vmem:[#allocation2 + $0x428] sm:$0xff]  ;;  %v10085_v38 = vcombine.high %v120_v32, %v124_v34 }
 0x15f   :  { %6734 = vmatpush1.bf16.msra.mxu0 %v10124_v46  ;;  %v10213_v39 = vcombine.high %v248_v35, %v252_v26  ;;  %v240_v40 = vld [vmem:[#allocation2 + $0x3c8] sm:$0xff]  ;;  %v10212_v46 = vcombine.low %v248_v35, %v252_v26 }
 0x160   :  { %6735 = vmatprep.subr.bf16.mxu0 %v10117_v24  ;;  %v244_v41 = vld [vmem:[#allocation2 + $0x3e8] sm:$0xff] }
 0x161   :  { %6777 = vmatpush1.bf16.msra.mxu1 %v10252_v23  ;;  %v368_v42 = vld [vmem:[#allocation2 + $0x7c8] sm:$0xff]  ;;  %v10205_v50 = vcombine.high %v240_v40, %v244_v41  ;;  %v10204_v0 = vcombine.low %v240_v40, %v244_v41 }
 0x162   :  { %6778 = vmatprep.subr.bf16.mxu1 %v10245_v54  ;;  %v372_v43 = vld [vmem:[#allocation2 + $0x7e8] sm:$0xff] }
 0x163   :  { %6736 = vmatpush1.bf16.msra.mxu0 %v10116_v2  ;;  %v10333_v23 = vcombine.high %v368_v42, %v372_v43  ;;  %v232_v24 = vld [vmem:[#allocation2 + $0x388] sm:$0xff]  ;;  %v10332_v1 = vcombine.low %v368_v42, %v372_v43 }
 0x164   :  { %6737 = vmatprep.subr.bf16.mxu0 %v10109_v4  ;;  %v236_v54 = vld [vmem:[#allocation2 + $0x3a8] sm:$0xff] }
 0x165   :  { %6779 = vmatpush1.bf16.msra.mxu1 %v10244_v3  ;;  %v360_v55 = vld [vmem:[#allocation2 + $0x788] sm:$0xff]  ;;  %v10197_v2 = vcombine.high %v232_v24, %v236_v54  ;;  %v10196_v9 = vcombine.low %v232_v24, %v236_v54 }
 0x166   :  { %6780 = vmatprep.subr.bf16.mxu1 %v10237_v6  ;;  %v364_v57 = vld [vmem:[#allocation2 + $0x7a8] sm:$0xff] }
 0x167   :  { %6738 = vmatpush1.bf16.msra.mxu0 %v10108_v11  ;;  %v10325_v3 = vcombine.high %v360_v55, %v364_v57  ;;  %v224_v4 = vld [vmem:[#allocation2 + $0x348] sm:$0xff]  ;;  %v10324_v10 = vcombine.low %v360_v55, %v364_v57 }
 0x168   :  { %6739 = vmatprep.subr.bf16.mxu0 %v10101_v14  ;;  %v228_v6 = vld [vmem:[#allocation2 + $0x368] sm:$0xff] }
 0x169   :  { %6781 = vmatpush1.bf16.msra.mxu1 %v10236_v13  ;;  %v352_v7 = vld [vmem:[#allocation2 + $0x748] sm:$0xff]  ;;  %v10189_v11 = vcombine.high %v224_v4, %v228_v6  ;;  %v10188_v22 = vcombine.low %v224_v4, %v228_v6 }
 0x16a   :  { %6782 = vmatprep.subr.bf16.mxu1 %v10229_v15  ;;  %v356_v8 = vld [vmem:[#allocation2 + $0x768] sm:$0xff] }
 0x16b   :  { %6740 = vmatpush1.bf16.msra.mxu0 %v10100_v59  ;;  %v10317_v13 = vcombine.high %v352_v7, %v356_v8  ;;  %v216_v14 = vld [vmem:[#allocation2 + $0x308] sm:$0xff]  ;;  %v10316_v30 = vcombine.low %v352_v7, %v356_v8 }
 0x16c   :  { %6741 = vmatprep.subr.bf16.mxu0 %v10093_v20  ;;  %v220_v15 = vld [vmem:[#allocation2 + $0x328] sm:$0xff] }
 0x16d   :  { %6783 = vmatpush1.bf16.msra.mxu1 %v10228_v19  ;;  %v344_v17 = vld [vmem:[#allocation2 + $0x708] sm:$0xff]  ;;  %v10181_v59 = vcombine.high %v216_v14, %v220_v15  ;;  %v10180_v35 = vcombine.low %v216_v14, %v220_v15 }
 0x16e   :  { %6784 = vmatprep.subr.bf16.mxu1 %v10221_v31  ;;  %v348_v18 = vld [vmem:[#allocation2 + $0x728] sm:$0xff] }
 0x16f   :  { %6742 = vmatpush1.bf16.msra.mxu0 %v10092_v36  ;;  %v10309_v19 = vcombine.high %v344_v17, %v348_v18  ;;  %v208_v20 = vld [vmem:[#allocation2 + $0x2c8] sm:$0xff]  ;;  %v10308_v26 = vcombine.low %v344_v17, %v348_v18 }
 0x170   :  { %6743 = vmatprep.subr.bf16.mxu0 %v10085_v38  ;;  %v212_v31 = vld [vmem:[#allocation2 + $0x2e8] sm:$0xff] }
 0x171   :  { %6785 = vmatpush1.bf16.msra.mxu1 %v10220_v37  ;;  %v336_v32 = vld [vmem:[#allocation2 + $0x6c8] sm:$0xff]  ;;  %v10173_v36 = vcombine.high %v208_v20, %v212_v31  ;;  %v10172_v42 = vcombine.low %v208_v20, %v212_v31 }
 0x172   :  { %6786 = vmatprep.subr.bf16.mxu1 %v10213_v39  ;;  %v340_v34 = vld [vmem:[#allocation2 + $0x6e8] sm:$0xff] }
 0x173   :  { %6744 = vmatpush1.bf16.msra.mxu0 %v10084_v44  ;;  %v10301_v37 = vcombine.high %v336_v32, %v340_v34  ;;  %v200_v38 = vld [vmem:[#allocation2 + $0x288] sm:$0xff]  ;;  %v10300_v43 = vcombine.low %v336_v32, %v340_v34  ;;  %v12253_v34 = vpop.f32.mrf.mxu0 }
 0x174   :  { %6745 = vmatprep.subr.bf16.mxu0 %v10205_v50  ;;  %v204_v39 = vld [vmem:[#allocation2 + $0x2a8] sm:$0xff] }
 0x175   :  { %6787 = vmatpush1.bf16.msra.mxu1 %v10212_v46  ;;  %v328_v40 = vld [vmem:[#allocation2 + $0x688] sm:$0xff]  ;;  %v10165_v44 = vcombine.high %v200_v38, %v204_v39  ;;  %v10164_v55 = vcombine.low %v200_v38, %v204_v39 }
 0x176   :  { %6788 = vmatprep.subr.bf16.mxu1 %v10333_v23  ;;  %v332_v41 = vld [vmem:[#allocation2 + $0x6a8] sm:$0xff] }
 0x177   :  { %6746 = vmatpush2.bf16.msra.mxu0 %v10204_v0  ;;  %v10293_v46 = vcombine.high %v328_v40, %v332_v41  ;;  %v192_v50 = vld [vmem:[#allocation2 + $0x248] sm:$0xff]  ;;  %v10292_v57 = vcombine.low %v328_v40, %v332_v41 }
 0x178   :  { %6747 = vmatprep.subr.bf16.mxu0 %v10197_v2  ;;  %v196_v23 = vld [vmem:[#allocation2 + $0x268] sm:$0xff] }
 0x179   :  { %6789 = vmatpush2.bf16.msra.mxu1 %v10332_v1  ;;  %v320_v24 = vld [vmem:[#allocation2 + $0x648] sm:$0xff]  ;;  %v10157_v0 = vcombine.high %v192_v50, %v196_v23  ;;  %v10156_v7 = vcombine.low %v192_v50, %v196_v23 }
 0x17a   :  { %6790 = vmatprep.subr.bf16.mxu1 %v10325_v3  ;;  %v324_v54 = vld [vmem:[#allocation2 + $0x668] sm:$0xff] }
 0x17b   :  { %6748 = vmatpush2.bf16.msra.mxu0 %v10196_v9  ;;  %v10285_v1 = vcombine.high %v320_v24, %v324_v54  ;;  %v184_v2 = vld [vmem:[#allocation2 + $0x208] sm:$0xff]  ;;  %v10284_v8 = vcombine.low %v320_v24, %v324_v54 }
 0x17c   :  { %6749 = vmatprep.subr.bf16.mxu0 %v10189_v11  ;;  %v188_v3 = vld [vmem:[#allocation2 + $0x228] sm:$0xff] }
 0x17d   :  { %6791 = vmatpush2.bf16.msra.mxu1 %v10324_v10  ;;  %v312_v4 = vld [vmem:[#allocation2 + $0x608] sm:$0xff]  ;;  %v10149_v9 = vcombine.high %v184_v2, %v188_v3  ;;  %v10148_v17 = vcombine.low %v184_v2, %v188_v3 }
 0x17e   :  { %6792 = vmatprep.subr.bf16.mxu1 %v10317_v13  ;;  %v316_v6 = vld [vmem:[#allocation2 + $0x628] sm:$0xff] }
 0x17f   :  { %6750 = vmatpush2.bf16.msra.mxu0 %v10188_v22  ;;  %v10277_v10 = vcombine.high %v312_v4, %v316_v6  ;;  %v432_v11 = vld [vmem:[#allocation2 + $0x9c8] sm:$0xff]  ;;  %v10276_v18 = vcombine.low %v312_v4, %v316_v6 }
 0x180   :  { %6751 = vmatprep.subr.bf16.mxu0 %v10181_v59  ;;  %v436_v13 = vld [vmem:[#allocation2 + $0x9e8] sm:$0xff] }
 0x181   :  { %6793 = vmatpush2.bf16.msra.mxu1 %v10316_v30  ;;  %v560_v14 = vld [vmem:[#allocation2 + $0xdc8] sm:$0xff]  ;;  %v10397_v22 = vcombine.high %v432_v11, %v436_v13  ;;  %v10396_v32 = vcombine.low %v432_v11, %v436_v13 }
 0x182   :  { %6794 = vmatprep.subr.bf16.mxu1 %v10309_v19  ;;  %v564_v15 = vld [vmem:[#allocation2 + $0xde8] sm:$0xff] }
 0x183   :  { %6752 = vmatpush2.bf16.msra.mxu0 %v10180_v35  ;;  %v10525_v30 = vcombine.high %v560_v14, %v564_v15  ;;  %v424_v59 = vld [vmem:[#allocation2 + $0x988] sm:$0xff]  ;;  %v10524_v35 = vcombine.low %v560_v14, %v564_v15 }
 0x184   :  { %6753 = vmatprep.subr.bf16.mxu0 %v10173_v36  ;;  %v428_v19 = vld [vmem:[#allocation2 + $0x9a8] sm:$0xff]  ;;  %v12255_v36 = vpop.f32.mrf.mxu1 }
 0x185   :  { %6795 = vmatpush2.bf16.msra.mxu1 %v10308_v26  ;;  %v552_v20 = vld [vmem:[#allocation2 + $0xd88] sm:$0xff]  ;;  %v10389_v26 = vcombine.high %v424_v59, %v428_v19 }
 0x186   :  { %6796 = vmatprep.subr.bf16.mxu1 %v10301_v37  ;;  %v556_v31 = vld [vmem:[#allocation2 + $0xda8] sm:$0xff] }
 0x187   :  { %6754 = vmatpush2.bf16.msra.mxu0 %v10172_v42  ;;  %v10517_v37 = vcombine.high %v552_v20, %v556_v31  ;;  %v416_v38 = vld [vmem:[#allocation2 + $0x948] sm:$0xff]  ;;  %v10516_v23 = vcombine.low %v552_v20, %v556_v31 }
 0x188   :  { %6755 = vmatprep.subr.bf16.mxu0 %v10165_v44  ;;  %v420_v39 = vld [vmem:[#allocation2 + $0x968] sm:$0xff] }
 0x189   :  { %6797 = vmatpush2.bf16.msra.mxu1 %v10300_v43  ;;  %v544_v41 = vld [vmem:[#allocation2 + $0xd48] sm:$0xff]  ;;  %v10381_v24 = vcombine.high %v416_v38, %v420_v39  ;;  %v10380_v6 = vcombine.low %v416_v38, %v420_v39 }
 0x18a   :  { %6798 = vmatprep.subr.bf16.mxu1 %v10293_v46  ;;  %v548_v42 = vld [vmem:[#allocation2 + $0xd68] sm:$0xff]  ;;  %v10388_v46 = vcombine.low %v424_v59, %v428_v19 }
 0x18b   :  { %6756 = vmatpush2.bf16.msra.mxu0 %v10164_v55  ;;  %v536_v2 = vld [vmem:[#allocation2 + $0xd08] sm:$0xff] }
 0x18c   :  { %6757 = vmatprep.subr.bf16.mxu0 %v10157_v0  ;;  %v408_v0 = vld [vmem:[#allocation2 + $0x908] sm:$0xff] }
 0x18d   :  { %6799 = vmatpush2.bf16.msra.mxu1 %v10292_v57  ;;  %v10509_v57 = vcombine.high %v544_v41, %v548_v42  ;;  %v540_v3 = vld [vmem:[#allocation2 + $0xd28] sm:$0xff] }
 0x18e   :  { %6800 = vmatprep.subr.bf16.mxu1 %v10285_v1  ;;  %v412_v1 = vld [vmem:[#allocation2 + $0x928] sm:$0xff]  ;;  %v10501_v11 = vcombine.high %v536_v2, %v540_v3 }
 0x18f   :  { %6758 = vmatpush2.bf16.msra.mxu0 %v10156_v7  ;;  %v400_v13 = vld [vmem:[#allocation2 + $0x8c8] sm:$0xff] }
 0x190   :  { %6759 = vmatprep.subr.bf16.mxu0 %v10149_v9  ;;  %v10373_v9 = vcombine.high %v408_v0, %v412_v1  ;;  %v404_v14 = vld [vmem:[#allocation2 + $0x8e8] sm:$0xff] }
 0x191   :  { %6801 = vmatpush2.bf16.msra.mxu1 %v10284_v8  ;;  %v10508_v8 = vcombine.low %v544_v41, %v548_v42  ;;  %v528_v15 = vld [vmem:[#allocation2 + $0xcc8] sm:$0xff] }
 0x192   :  { %6802 = vmatprep.subr.bf16.mxu1 %v10277_v10  ;;  %v392_v59 = vld [vmem:[#allocation2 + $0x888] sm:$0xff] }
 0x193   :  { %6760 = vmatpush2.bf16.msra.mxu0 %v10148_v17  ;;  %v532_v17 = vld [vmem:[#allocation2 + $0xce8] sm:$0xff] }
 0x194   :  { %6815 = vmatprep.subr.bf16.mxu0 %v10397_v22  ;;  %v6505_v40 = vpop.f32.mrf.mxu0  ;;  %v10365_v22 = vcombine.high %v400_v13, %v404_v14  ;;  %v396_v19 = vld [vmem:[#allocation2 + $0x8a8] sm:$0xff] }
 0x195   :  { %6803 = vmatpush2.bf16.msra.mxu1 %v10276_v18  ;;  %v6506_v43 = vadd.f32 %v6505_v40, %v12245_v51  ;;  %v10372_v18 = vcombine.low %v408_v0, %v412_v1  ;;  %v520_v20 = vld [vmem:[#allocation2 + $0xc88] sm:$0xff]  ;;  %v10356_v42 = vcombine.low %v392_v59, %v396_v19 }
 0x196   :  { %6858 = vmatprep.subr.bf16.mxu1 %v10525_v30  ;;  %6762 = vmatmul.mubr.bf16.vlgmr.msra.gmra.mxu0 %v12110_v21  ;;  %v6548_v44 = vpop.f32.mrf.mxu1  ;;  %v12260_v50 = vpop.f32.mrf.mxu0  ;;  %v10493_v30 = vcombine.high %v528_v15, %v532_v17  ;;  %v524_v31 = vld [vmem:[#allocation2 + $0xca8] sm:$0xff] }
 0x197   :  { %6816 = vmatpush1.bf16.msra.mxu0 %v10396_v32  ;;  %v12262_v54 = vadd.f32 %v6548_v44, %v6506_v43  ;;  %6847 = vmatprep.mubr.bf16.mxu0 %v12138_v60  ;;  %v10364_v32 = vcombine.low %v400_v13, %v404_v14  ;;  %v384_v38 = vld [vmem:[#allocation2 + $0x848] sm:$0xff]  ;;  %v10484_v43 = vcombine.low %v520_v20, %v524_v31 }
 0x198   :  { %6805 = vmatmul.mubr.bf16.vlgmr.msra.gmra.mxu1 %v12124_v25  ;;  %6817 = vmatprep.subr.bf16.mxu0 %v10389_v26  ;;  %v12264_v55 = vpop.f32.mrf.mxu1  ;;  %v6509_v51 = vpop.f32.mrf.mxu0  ;;  %v10357_v26 = vcombine.high %v392_v59, %v396_v19  ;;  %v388_v39 = vld [vmem:[#allocation2 + $0x868] sm:$0xff] }
 0x199   :  { %6859 = vmatpush1.bf16.msra.mxu1 %v10524_v35  ;;  %6890 = vmatprep.mubr.bf16.mxu1 %v12143_v33  ;;  %v6510_v4 = vadd.f32 %v6509_v51, %v12251_v53  ;;  %v10500_v53 = vcombine.low %v536_v2, %v540_v3  ;;  %v10492_v35 = vcombine.low %v528_v15, %v532_v17  ;;  %v512_v40 = vld [vmem:[#allocation2 + $0xc48] sm:$0xff] }
 0x19a   :  { %6860 = vmatprep.subr.bf16.mxu1 %v10517_v37  ;;  %v6552_v7 = vpop.f32.mrf.mxu1  ;;  %v10485_v37 = vcombine.high %v520_v20, %v524_v31  ;;  %v516_v41 = vld [vmem:[#allocation2 + $0xc68] sm:$0xff]  ;;  %v10349_v44 = vcombine.high %v384_v38, %v388_v39  ;;  %v10348_v1 = vcombine.low %v384_v38, %v388_v39 }
 0x19b   :  { %6818 = vmatpush1.bf16.msra.mxu0 %v10388_v46  ;;  %v12269_v10 = vadd.f32 %v6552_v7, %v6510_v4  ;;  %v10477_v46 = vcombine.high %v512_v40, %v516_v41  ;;  %v508_v0 = vld [vmem:[#allocation2 + $0xc28] sm:$0xff]  ;;  %v10476_v51 = vcombine.low %v512_v40, %v516_v41 }
 0x19c   :  { %6819 = vmatprep.subr.bf16.mxu0 %v10381_v24  ;;  %v380_v24 = vld [vmem:[#allocation2 + $0x828] sm:$0xff] }
 0x19d   :  { %6861 = vmatpush1.bf16.msra.mxu1 %v10516_v23  ;;  %v376_v23 = vld [vmem:[#allocation2 + $0x808] sm:$0xff] }
 0x19e   :  { %6862 = vmatprep.subr.bf16.mxu1 %v10509_v57  ;;  %v504_v57 = vld [vmem:[#allocation2 + $0xc08] sm:$0xff]  ;;  %v10341_v2 = vcombine.high %v376_v23, %v380_v24 }
 0x19f   :  { %6820 = vmatpush1.bf16.msra.mxu0 %v10380_v6  ;;  %v10469_v3 = vcombine.high %v504_v57, %v508_v0  ;;  %v496_v4 = vld [vmem:[#allocation2 + $0xbc8] sm:$0xff] }
 0x1a0   :  { %6821 = vmatprep.subr.bf16.mxu0 %v10373_v9  ;;  %v500_v6 = vld [vmem:[#allocation2 + $0xbe8] sm:$0xff]  ;;  %v10340_v9 = vcombine.low %v376_v23, %v380_v24 }
 0x1a1   :  { %6863 = vmatpush1.bf16.msra.mxu1 %v10508_v8  ;;  %v624_v7 = vld [vmem:[#allocation2 + $0xfc8] sm:$0xff]  ;;  %v10461_v13 = vcombine.high %v496_v4, %v500_v6 }
 0x1a2   :  { %6864 = vmatprep.subr.bf16.mxu1 %v10501_v11  ;;  %v628_v8 = vld [vmem:[#allocation2 + $0xfe8] sm:$0xff]  ;;  %v10468_v11 = vcombine.low %v504_v57, %v508_v0 }
 0x1a3   :  { %6822 = vmatpush1.bf16.msra.mxu0 %v10372_v18  ;;  %v10589_v14 = vcombine.high %v624_v7, %v628_v8  ;;  %v488_v15 = vld [vmem:[#allocation2 + $0xb88] sm:$0xff] }
 0x1a4   :  { %6823 = vmatprep.subr.bf16.mxu0 %v10365_v22  ;;  %v492_v17 = vld [vmem:[#allocation2 + $0xba8] sm:$0xff]  ;;  %v10460_v22 = vcombine.low %v496_v4, %v500_v6 }
 0x1a5   :  { %6865 = vmatpush1.bf16.msra.mxu1 %v10500_v53  ;;  %v616_v18 = vld [vmem:[#allocation2 + $0xf88] sm:$0xff]  ;;  %v10453_v59 = vcombine.high %v488_v15, %v492_v17 }
 0x1a6   :  { %6866 = vmatprep.subr.bf16.mxu1 %v10493_v30  ;;  %v620_v53 = vld [vmem:[#allocation2 + $0xfa8] sm:$0xff]  ;;  %v10588_v30 = vcombine.low %v624_v7, %v628_v8 }
 0x1a7   :  { %6824 = vmatpush1.bf16.msra.mxu0 %v10364_v32  ;;  %v10581_v19 = vcombine.high %v616_v18, %v620_v53  ;;  %v480_v20 = vld [vmem:[#allocation2 + $0xb48] sm:$0xff] }
 0x1a8   :  { %6825 = vmatprep.subr.bf16.mxu0 %v10357_v26  ;;  %v484_v31 = vld [vmem:[#allocation2 + $0xb68] sm:$0xff]  ;;  %v10452_v26 = vcombine.low %v488_v15, %v492_v17 }
 0x1a9   :  { %6867 = vmatpush1.bf16.msra.mxu1 %v10492_v35  ;;  %v608_v32 = vld [vmem:[#allocation2 + $0xf48] sm:$0xff]  ;;  %v10445_v38 = vcombine.high %v480_v20, %v484_v31 }
 0x1aa   :  { %6868 = vmatprep.subr.bf16.mxu1 %v10485_v37  ;;  %v612_v35 = vld [vmem:[#allocation2 + $0xf68] sm:$0xff]  ;;  %v10580_v37 = vcombine.low %v616_v18, %v620_v53 }
 0x1ab   :  { %6826 = vmatpush1.bf16.msra.mxu0 %v10356_v42  ;;  %v10573_v39 = vcombine.high %v608_v32, %v612_v35  ;;  %v472_v40 = vld [vmem:[#allocation2 + $0xb08] sm:$0xff] }
 0x1ac   :  { %6827 = vmatprep.subr.bf16.mxu0 %v10349_v44  ;;  %v476_v41 = vld [vmem:[#allocation2 + $0xb28] sm:$0xff]  ;;  %v10444_v44 = vcombine.low %v480_v20, %v484_v31 }
 0x1ad   :  { %6869 = vmatpush1.bf16.msra.mxu1 %v10484_v43  ;;  %v600_v42 = vld [vmem:[#allocation2 + $0xf08] sm:$0xff]  ;;  %v10437_v23 = vcombine.high %v472_v40, %v476_v41 }
 0x1ae   :  { %6870 = vmatprep.subr.bf16.mxu1 %v10477_v46  ;;  %v604_v43 = vld [vmem:[#allocation2 + $0xf28] sm:$0xff]  ;;  %v10572_v46 = vcombine.low %v608_v32, %v612_v35 }
 0x1af   :  { %6828 = vmatpush1.bf16.msra.mxu0 %v10348_v1  ;;  %v10565_v24 = vcombine.high %v600_v42, %v604_v43  ;;  %v464_v57 = vld [vmem:[#allocation2 + $0xac8] sm:$0xff] }
 0x1b0   :  { %6829 = vmatprep.subr.bf16.mxu0 %v10341_v2  ;;  %v468_v0 = vld [vmem:[#allocation2 + $0xae8] sm:$0xff]  ;;  %v10436_v2 = vcombine.low %v472_v40, %v476_v41 }
 0x1b1   :  { %6871 = vmatpush1.bf16.msra.mxu1 %v10476_v51  ;;  %v592_v1 = vld [vmem:[#allocation2 + $0xec8] sm:$0xff]  ;;  %v10429_v4 = vcombine.high %v464_v57, %v468_v0 }
 0x1b2   :  { %6872 = vmatprep.subr.bf16.mxu1 %v10469_v3  ;;  %v596_v51 = vld [vmem:[#allocation2 + $0xee8] sm:$0xff]  ;;  %v10564_v3 = vcombine.low %v600_v42, %v604_v43 }
 0x1b3   :  { %6830 = vmatpush1.bf16.msra.mxu0 %v10340_v9  ;;  %v10557_v6 = vcombine.high %v592_v1, %v596_v51  ;;  %v456_v7 = vld [vmem:[#allocation2 + $0xa88] sm:$0xff] }
 0x1b4   :  { %6831 = vmatprep.subr.bf16.mxu0 %v10461_v13  ;;  %v460_v8 = vld [vmem:[#allocation2 + $0xaa8] sm:$0xff]  ;;  %v10428_v13 = vcombine.low %v464_v57, %v468_v0 }
 0x1b5   :  { %6873 = vmatpush1.bf16.msra.mxu1 %v10468_v11  ;;  %v584_v9 = vld [vmem:[#allocation2 + $0xe88] sm:$0xff]  ;;  %v10421_v15 = vcombine.high %v456_v7, %v460_v8 }
 0x1b6   :  { %6874 = vmatprep.subr.bf16.mxu1 %v10589_v14  ;;  %v588_v11 = vld [vmem:[#allocation2 + $0xea8] sm:$0xff]  ;;  %v10556_v14 = vcombine.low %v592_v1, %v596_v51 }
 0x1b7   :  { %6832 = vmatpush2.bf16.msra.mxu0 %v10460_v22  ;;  %v10549_v17 = vcombine.high %v584_v9, %v588_v11  ;;  %v448_v18 = vld [vmem:[#allocation2 + $0xa48] sm:$0xff] }
 0x1b8   :  { %6833 = vmatprep.subr.bf16.mxu0 %v10453_v59  ;;  %v452_v53 = vld [vmem:[#allocation2 + $0xa68] sm:$0xff]  ;;  %v10420_v59 = vcombine.low %v456_v7, %v460_v8 }
 0x1b9   :  { %6875 = vmatpush2.bf16.msra.mxu1 %v10588_v30  ;;  %v576_v22 = vld [vmem:[#allocation2 + $0xe48] sm:$0xff]  ;;  %v10413_v20 = vcombine.high %v448_v18, %v452_v53 }
 0x1ba   :  { %6876 = vmatprep.subr.bf16.mxu1 %v10581_v19  ;;  %v580_v30 = vld [vmem:[#allocation2 + $0xe68] sm:$0xff]  ;;  %v10548_v19 = vcombine.low %v584_v9, %v588_v11  ;;  %v12273_v9 = vpop.f32.mrf.mxu1 }
 0x1bb   :  { %6834 = vmatpush2.bf16.msra.mxu0 %v10452_v26  ;;  %v10541_v31 = vcombine.high %v576_v22, %v580_v30  ;;  %v440_v32 = vld [vmem:[#allocation2 + $0xa08] sm:$0xff] }
 0x1bc   :  { %6835 = vmatprep.subr.bf16.mxu0 %v10445_v38  ;;  %v444_v35 = vld [vmem:[#allocation2 + $0xa28] sm:$0xff]  ;;  %v10412_v38 = vcombine.low %v448_v18, %v452_v53 }
 0x1bd   :  { %6877 = vmatpush2.bf16.msra.mxu1 %v10580_v37  ;;  %v568_v26 = vld [vmem:[#allocation2 + $0xe08] sm:$0xff]  ;;  %v10405_v40 = vcombine.high %v440_v32, %v444_v35 }
 0x1be   :  { %6878 = vmatprep.subr.bf16.mxu1 %v10573_v39  ;;  %v572_v37 = vld [vmem:[#allocation2 + $0xe28] sm:$0xff]  ;;  %v10540_v39 = vcombine.low %v576_v22, %v580_v30 }
 0x1bf   :  { %6836 = vmatpush2.bf16.msra.mxu0 %v10444_v44  ;;  %v10533_v41 = vcombine.high %v568_v26, %v572_v37  ;;  %v688_v42 = vld [vmem:[#allocation2 + $0x11c8] sm:$0xff] }
 0x1c0   :  { %6837 = vmatprep.subr.bf16.mxu0 %v10437_v23  ;;  %v692_v43 = vld [vmem:[#allocation2 + $0x11e8] sm:$0xff]  ;;  %v10404_v23 = vcombine.low %v440_v32, %v444_v35 }
 0x1c1   :  { %6879 = vmatpush2.bf16.msra.mxu1 %v10572_v46  ;;  %v816_v44 = vld [vmem:[#allocation2 + $0x15c8] sm:$0xff]  ;;  %v10653_v57 = vcombine.high %v688_v42, %v692_v43 }
 0x1c2   :  { %6880 = vmatprep.subr.bf16.mxu1 %v10565_v24  ;;  %v820_v46 = vld [vmem:[#allocation2 + $0x15e8] sm:$0xff]  ;;  %v10532_v24 = vcombine.low %v568_v26, %v572_v37 }
 0x1c3   :  { %6838 = vmatpush2.bf16.msra.mxu0 %v10436_v2  ;;  %v10781_v0 = vcombine.high %v816_v44, %v820_v46  ;;  %v680_v1 = vld [vmem:[#allocation2 + $0x1188] sm:$0xff]  ;;  %v10780_v7 = vcombine.low %v816_v44, %v820_v46 }
 0x1c4   :  { %6839 = vmatprep.subr.bf16.mxu0 %v10429_v4  ;;  %v684_v51 = vld [vmem:[#allocation2 + $0x11a8] sm:$0xff]  ;;  %v10652_v4 = vcombine.low %v688_v42, %v692_v43 }
 0x1c5   :  { %6881 = vmatpush2.bf16.msra.mxu1 %v10564_v3  ;;  %v808_v2 = vld [vmem:[#allocation2 + $0x1588] sm:$0xff]  ;;  %v10645_v8 = vcombine.high %v680_v1, %v684_v51  ;;  %v10644_v30 = vcombine.low %v680_v1, %v684_v51 }
 0x1c6   :  { %6882 = vmatprep.subr.bf16.mxu1 %v10557_v6  ;;  %v812_v3 = vld [vmem:[#allocation2 + $0x15a8] sm:$0xff]  ;;  %v12271_v6 = vpop.f32.mrf.mxu0 }
 0x1c7   :  { %6840 = vmatpush2.bf16.msra.mxu0 %v10428_v13  ;;  %v10773_v11 = vcombine.high %v808_v2, %v812_v3  ;;  %v672_v13 = vld [vmem:[#allocation2 + $0x1148] sm:$0xff] }
 0x1c8   :  { %6841 = vmatprep.subr.bf16.mxu0 %v10421_v15  ;;  %v804_v18 = vld [vmem:[#allocation2 + $0x1568] sm:$0xff] }
 0x1c9   :  { %6883 = vmatpush2.bf16.msra.mxu1 %v10556_v14  ;;  %v676_v14 = vld [vmem:[#allocation2 + $0x1168] sm:$0xff] }
 0x1ca   :  { %6884 = vmatprep.subr.bf16.mxu1 %v10549_v17  ;;  %v800_v17 = vld [vmem:[#allocation2 + $0x1548] sm:$0xff] }
 0x1cb   :  { %6842 = vmatpush2.bf16.msra.mxu0 %v10420_v59  ;;  %v10765_v35 = vcombine.high %v800_v17, %v804_v18  ;;  %v664_v26 = vld [vmem:[#allocation2 + $0x1108] sm:$0xff]  ;;  %v10764_v43 = vcombine.low %v800_v17, %v804_v18 }
 0x1cc   :  { %6843 = vmatprep.subr.bf16.mxu0 %v10413_v20  ;;  %v10637_v20 = vcombine.high %v672_v13, %v676_v14  ;;  %v668_v37 = vld [vmem:[#allocation2 + $0x1128] sm:$0xff] }
 0x1cd   :  { %6885 = vmatpush2.bf16.msra.mxu1 %v10548_v19  ;;  %v10772_v19 = vcombine.low %v808_v2, %v812_v3  ;;  %v10629_v44 = vcombine.high %v664_v26, %v668_v37  ;;  %v788_v1 = vld [vmem:[#allocation2 + $0x14e8] sm:$0xff]  ;;  %v10628_v51 = vcombine.low %v664_v26, %v668_v37 }
 0x1ce   :  { %6886 = vmatprep.subr.bf16.mxu1 %v10541_v31  ;;  %v640_v18 = vld [vmem:[#allocation2 + $0x1048] sm:$0xff] }
 0x1cf   :  { %6844 = vmatpush2.bf16.msra.mxu0 %v10412_v38  ;;  %v792_v38 = vld [vmem:[#allocation2 + $0x1508] sm:$0xff] }
 0x1d0   :  { %6845 = vmatprep.subr.bf16.mxu0 %v10405_v40  ;;  %v632_v37 = vld [vmem:[#allocation2 + $0x1008] sm:$0xff] }
 0x1d1   :  { %6887 = vmatpush2.bf16.msra.mxu1 %v10540_v39  ;;  %v796_v39 = vld [vmem:[#allocation2 + $0x1528] sm:$0xff] }
 0x1d2   :  { %6888 = vmatprep.subr.bf16.mxu1 %v10533_v41  ;;  %v10636_v41 = vcombine.low %v672_v13, %v676_v14 }
 0x1d3   :  { %6846 = vmatpush2.bf16.msra.mxu0 %v10404_v23  ;;  %v10757_v23 = vcombine.high %v792_v38, %v796_v39 }
 0x1d4   :  { %6901 = vmatprep.subr.bf16.mxu0 %v10653_v57  ;;  %v660_v57 = vld [vmem:[#allocation2 + $0x10e8] sm:$0xff] }
 0x1d5   :  { %6889 = vmatpush2.bf16.msra.mxu1 %v10532_v24  ;;  %v656_v24 = vld [vmem:[#allocation2 + $0x10c8] sm:$0xff] }
 0x1d6   :  { %6944 = vmatprep.subr.bf16.mxu1 %v10781_v0  ;;  %v6591_v15 = vpop.f32.mrf.mxu0  ;;  %6848 = vmatmul.mubr.bf16.vlgmr.msra.gmra.mxu0 %v12160_v48  ;;  %v784_v0 = vld [vmem:[#allocation2 + $0x14c8] sm:$0xff]  ;;  %v10621_v2 = vcombine.high %v656_v24, %v660_v57  ;;  %v10620_v13 = vcombine.low %v656_v24, %v660_v57 }
 0x1d7   :  { %v6592_v53 = vadd.f32 %v6591_v15, %v12262_v54  ;;  %6902 = vmatpush1.bf16.msra.mxu0 %v10652_v4  ;;  %6933 = vmatprep.mubr.bf16.mxu0 %v12178_v61  ;;  %v10749_v3 = vcombine.high %v784_v0, %v788_v1  ;;  %v648_v4 = vld [vmem:[#allocation2 + $0x1088] sm:$0xff]  ;;  %v10748_v14 = vcombine.low %v784_v0, %v788_v1 }
 0x1d8   :  { %v6634_v22 = vpop.f32.mrf.mxu1  ;;  %6891 = vmatmul.mubr.bf16.vlgmr.msra.gmra.mxu1 %v12164_v49  ;;  %v12278_v59 = vpop.f32.mrf.mxu0  ;;  %6903 = vmatprep.subr.bf16.mxu0 %v10645_v8  ;;  %v776_v8 = vld [vmem:[#allocation2 + $0x1488] sm:$0xff] }
 0x1d9   :  { %6945 = vmatpush1.bf16.msra.mxu1 %v10780_v7  ;;  %12562 = vst [vmem:[#allocation16_spill] sm:$0xff] %v12278_v59  ;;  %v12280_v31 = vadd.f32 %v6634_v22, %v6592_v53  ;;  %6976 = vmatprep.mubr.bf16.mxu1 %v12183_v62  ;;  %v652_v7 = vld [vmem:[#allocation2 + $0x10a8] sm:$0xff] }
 0x1da   :  { %v12282_v32 = vpop.f32.mrf.mxu1  ;;  %6946 = vmatprep.subr.bf16.mxu1 %v10773_v11  ;;  %v6595_v54 = vpop.f32.mrf.mxu0  ;;  %v780_v11 = vld [vmem:[#allocation2 + $0x14a8] sm:$0xff]  ;;  %v10613_v15 = vcombine.high %v648_v4, %v652_v7 }
 0x1db   :  { %12563 = vst [vmem:[#allocation17_spill] sm:$0xff] %v12282_v32  ;;  %v6596_v40 = vadd.f32 %v6595_v54, %v12269_v10  ;;  %6904 = vmatpush1.bf16.msra.mxu0 %v10644_v30  ;;  %v10756_v10 = vcombine.low %v792_v38, %v796_v39  ;;  %v10741_v17 = vcombine.high %v776_v8, %v780_v11  ;;  %v644_v53 = vld [vmem:[#allocation2 + $0x1068] sm:$0xff] }
 0x1dc   :  { %v6638_v42 = vpop.f32.mrf.mxu1  ;;  %6905 = vmatprep.subr.bf16.mxu0 %v10637_v20  ;;  %v768_v22 = vld [vmem:[#allocation2 + $0x1448] sm:$0xff]  ;;  %v10740_v20 = vcombine.low %v776_v8, %v780_v11 }
 0x1dd   :  { %6947 = vmatpush1.bf16.msra.mxu1 %v10772_v19  ;;  %v12287_v46 = vadd.f32 %v6638_v42, %v6596_v40  ;;  %v772_v30 = vld [vmem:[#allocation2 + $0x1468] sm:$0xff]  ;;  %v10612_v19 = vcombine.low %v648_v4, %v652_v7  ;;  %v10604_v40 = vcombine.low %v640_v18, %v644_v53 }
 0x1de   :  { %6948 = vmatprep.subr.bf16.mxu1 %v10765_v35  ;;  %v10605_v35 = vcombine.high %v640_v18, %v644_v53  ;;  %v10733_v26 = vcombine.high %v768_v22, %v772_v30  ;;  %v636_v54 = vld [vmem:[#allocation2 + $0x1028] sm:$0xff] }
 0x1df   :  { %6906 = vmatpush1.bf16.msra.mxu0 %v10636_v41  ;;  %v760_v38 = vld [vmem:[#allocation2 + $0x1408] sm:$0xff]  ;;  %v10732_v41 = vcombine.low %v768_v22, %v772_v30  ;;  %v10597_v42 = vcombine.high %v632_v37, %v636_v54  ;;  %v10596_v0 = vcombine.low %v632_v37, %v636_v54 }
 0x1e0   :  { %6907 = vmatprep.subr.bf16.mxu0 %v10629_v44  ;;  %v764_v39 = vld [vmem:[#allocation2 + $0x1428] sm:$0xff] }
 0x1e1   :  { %6949 = vmatpush1.bf16.msra.mxu1 %v10764_v43  ;;  %v10725_v43 = vcombine.high %v760_v38, %v764_v39  ;;  %v752_v44 = vld [vmem:[#allocation2 + $0x13c8] sm:$0xff]  ;;  %v10724_v1 = vcombine.low %v760_v38, %v764_v39 }
 0x1e2   :  { %6950 = vmatprep.subr.bf16.mxu1 %v10757_v23  ;;  %v756_v23 = vld [vmem:[#allocation2 + $0x13e8] sm:$0xff] }
 0x1e3   :  { %6908 = vmatpush1.bf16.msra.mxu0 %v10628_v51  ;;  %v880_v24 = vld [vmem:[#allocation2 + $0x17c8] sm:$0xff]  ;;  %v10717_v51 = vcombine.high %v752_v44, %v756_v23  ;;  %v10716_v8 = vcombine.low %v752_v44, %v756_v23 }
 0x1e4   :  { %6909 = vmatprep.subr.bf16.mxu0 %v10621_v2  ;;  %v884_v57 = vld [vmem:[#allocation2 + $0x17e8] sm:$0xff] }
 0x1e5   :  { %6951 = vmatpush1.bf16.msra.mxu1 %v10756_v10  ;;  %v10845_v10 = vcombine.high %v880_v24, %v884_v57  ;;  %v744_v2 = vld [vmem:[#allocation2 + $0x1388] sm:$0xff]  ;;  %v10844_v11 = vcombine.low %v880_v24, %v884_v57 }
 0x1e6   :  { %6952 = vmatprep.subr.bf16.mxu1 %v10749_v3  ;;  %v748_v3 = vld [vmem:[#allocation2 + $0x13a8] sm:$0xff] }
 0x1e7   :  { %6910 = vmatpush1.bf16.msra.mxu0 %v10620_v13  ;;  %v872_v4 = vld [vmem:[#allocation2 + $0x1788] sm:$0xff]  ;;  %v10709_v13 = vcombine.high %v744_v2, %v748_v3  ;;  %v10708_v22 = vcombine.low %v744_v2, %v748_v3 }
 0x1e8   :  { %6911 = vmatprep.subr.bf16.mxu0 %v10613_v15  ;;  %v876_v7 = vld [vmem:[#allocation2 + $0x17a8] sm:$0xff] }
 0x1e9   :  { %6953 = vmatpush1.bf16.msra.mxu1 %v10748_v14  ;;  %v10837_v14 = vcombine.high %v872_v4, %v876_v7  ;;  %v736_v15 = vld [vmem:[#allocation2 + $0x1348] sm:$0xff]  ;;  %v10836_v30 = vcombine.low %v872_v4, %v876_v7 }
 0x1ea   :  { %6954 = vmatprep.subr.bf16.mxu1 %v10741_v17  ;;  %v740_v17 = vld [vmem:[#allocation2 + $0x1368] sm:$0xff] }
 0x1eb   :  { %6912 = vmatpush1.bf16.msra.mxu0 %v10612_v19  ;;  %v864_v18 = vld [vmem:[#allocation2 + $0x1748] sm:$0xff]  ;;  %v10701_v19 = vcombine.high %v736_v15, %v740_v17  ;;  %v10700_v38 = vcombine.low %v736_v15, %v740_v17 }
 0x1ec   :  { %6913 = vmatprep.subr.bf16.mxu0 %v10605_v35  ;;  %v868_v53 = vld [vmem:[#allocation2 + $0x1768] sm:$0xff] }
 0x1ed   :  { %6955 = vmatpush1.bf16.msra.mxu1 %v10740_v20  ;;  %v10829_v20 = vcombine.high %v864_v18, %v868_v53  ;;  %v728_v35 = vld [vmem:[#allocation2 + $0x1308] sm:$0xff]  ;;  %v10828_v39 = vcombine.low %v864_v18, %v868_v53 }
 0x1ee   :  { %6956 = vmatprep.subr.bf16.mxu1 %v10733_v26  ;;  %v732_v26 = vld [vmem:[#allocation2 + $0x1328] sm:$0xff] }
 0x1ef   :  { %6914 = vmatpush1.bf16.msra.mxu0 %v10604_v40  ;;  %v856_v37 = vld [vmem:[#allocation2 + $0x1708] sm:$0xff]  ;;  %v10693_v40 = vcombine.high %v728_v35, %v732_v26  ;;  %v10692_v24 = vcombine.low %v728_v35, %v732_v26 }
 0x1f0   :  { %6915 = vmatprep.subr.bf16.mxu0 %v10597_v42  ;;  %v860_v54 = vld [vmem:[#allocation2 + $0x1728] sm:$0xff] }
 0x1f1   :  { %6957 = vmatpush1.bf16.msra.mxu1 %v10732_v41  ;;  %v10821_v41 = vcombine.high %v856_v37, %v860_v54  ;;  %v720_v42 = vld [vmem:[#allocation2 + $0x12c8] sm:$0xff]  ;;  %v10820_v57 = vcombine.low %v856_v37, %v860_v54 }
 0x1f2   :  { %6958 = vmatprep.subr.bf16.mxu1 %v10725_v43  ;;  %v724_v43 = vld [vmem:[#allocation2 + $0x12e8] sm:$0xff] }
 0x1f3   :  { %6916 = vmatpush1.bf16.msra.mxu0 %v10596_v0  ;;  %v848_v44 = vld [vmem:[#allocation2 + $0x16c8] sm:$0xff]  ;;  %v10685_v0 = vcombine.high %v720_v42, %v724_v43  ;;  %v10684_v4 = vcombine.low %v720_v42, %v724_v43 }
 0x1f4   :  { %6917 = vmatprep.subr.bf16.mxu0 %v10717_v51  ;;  %v852_v23 = vld [vmem:[#allocation2 + $0x16e8] sm:$0xff] }
 0x1f5   :  { %6959 = vmatpush1.bf16.msra.mxu1 %v10724_v1  ;;  %v10813_v1 = vcombine.high %v848_v44, %v852_v23  ;;  %v712_v51 = vld [vmem:[#allocation2 + $0x1288] sm:$0xff]  ;;  %v10812_v7 = vcombine.low %v848_v44, %v852_v23 }
 0x1f6   :  { %6960 = vmatprep.subr.bf16.mxu1 %v10845_v10  ;;  %v716_v10 = vld [vmem:[#allocation2 + $0x12a8] sm:$0xff] }
 0x1f7   :  { %6918 = vmatpush2.bf16.msra.mxu0 %v10716_v8  ;;  %v840_v2 = vld [vmem:[#allocation2 + $0x1688] sm:$0xff]  ;;  %v10677_v8 = vcombine.high %v712_v51, %v716_v10  ;;  %v10676_v18 = vcombine.low %v712_v51, %v716_v10 }
 0x1f8   :  { %6919 = vmatprep.subr.bf16.mxu0 %v10709_v13  ;;  %v844_v3 = vld [vmem:[#allocation2 + $0x16a8] sm:$0xff] }
 0x1f9   :  { %6961 = vmatpush2.bf16.msra.mxu1 %v10844_v11  ;;  %v10805_v11 = vcombine.high %v840_v2, %v844_v3  ;;  %v704_v13 = vld [vmem:[#allocation2 + $0x1248] sm:$0xff]  ;;  %v10804_v53 = vcombine.low %v840_v2, %v844_v3  ;;  %v12289_v3 = vpop.f32.mrf.mxu0 }
 0x1fa   :  { %6962 = vmatprep.subr.bf16.mxu1 %v10837_v14  ;;  %v708_v14 = vld [vmem:[#allocation2 + $0x1268] sm:$0xff] }
 0x1fb   :  { %6920 = vmatpush2.bf16.msra.mxu0 %v10708_v22  ;;  %v832_v15 = vld [vmem:[#allocation2 + $0x1648] sm:$0xff]  ;;  %v10669_v22 = vcombine.high %v704_v13, %v708_v14  ;;  %v10668_v37 = vcombine.low %v704_v13, %v708_v14 }
 0x1fc   :  { %6921 = vmatprep.subr.bf16.mxu0 %v10701_v19  ;;  %v836_v17 = vld [vmem:[#allocation2 + $0x1668] sm:$0xff] }
 0x1fd   :  { %6963 = vmatpush2.bf16.msra.mxu1 %v10836_v30  ;;  %v10797_v30 = vcombine.high %v832_v15, %v836_v17  ;;  %v696_v19 = vld [vmem:[#allocation2 + $0x1208] sm:$0xff]  ;;  %v10796_v54 = vcombine.low %v832_v15, %v836_v17 }
 0x1fe   :  { %6964 = vmatprep.subr.bf16.mxu1 %v10829_v20  ;;  %v700_v20 = vld [vmem:[#allocation2 + $0x1228] sm:$0xff] }
 0x1ff   :  { %6922 = vmatpush2.bf16.msra.mxu0 %v10700_v38  ;;  %v824_v35 = vld [vmem:[#allocation2 + $0x1608] sm:$0xff]  ;;  %v10661_v38 = vcombine.high %v696_v19, %v700_v20  ;;  %v10660_v44 = vcombine.low %v696_v19, %v700_v20 }
 0x200   :  { %6923 = vmatprep.subr.bf16.mxu0 %v10693_v40  ;;  %v828_v26 = vld [vmem:[#allocation2 + $0x1628] sm:$0xff] }
 0x201   :  { %6965 = vmatpush2.bf16.msra.mxu1 %v10828_v39  ;;  %v10789_v39 = vcombine.high %v824_v35, %v828_v26  ;;  %v944_v40 = vld [vmem:[#allocation2 + $0x19c8] sm:$0xff]  ;;  %v10788_v23 = vcombine.low %v824_v35, %v828_v26 }
 0x202   :  { %6966 = vmatprep.subr.bf16.mxu1 %v10821_v41  ;;  %v948_v41 = vld [vmem:[#allocation2 + $0x19e8] sm:$0xff] }
 0x203   :  { %6924 = vmatpush2.bf16.msra.mxu0 %v10692_v24  ;;  %v1072_v42 = vld [vmem:[#allocation2 + $0x1dc8] sm:$0xff]  ;;  %v10909_v24 = vcombine.high %v944_v40, %v948_v41  ;;  %v10908_v2 = vcombine.low %v944_v40, %v948_v41 }
 0x204   :  { %6925 = vmatprep.subr.bf16.mxu0 %v10685_v0  ;;  %v1076_v43 = vld [vmem:[#allocation2 + $0x1de8] sm:$0xff] }
 0x205   :  { %6967 = vmatpush2.bf16.msra.mxu1 %v10820_v57  ;;  %v11037_v57 = vcombine.high %v1072_v42, %v1076_v43  ;;  %v936_v0 = vld [vmem:[#allocation2 + $0x1988] sm:$0xff] }
 0x206   :  { %6968 = vmatprep.subr.bf16.mxu1 %v10813_v1  ;;  %v940_v1 = vld [vmem:[#allocation2 + $0x19a8] sm:$0xff] }
 0x207   :  { %6926 = vmatpush2.bf16.msra.mxu0 %v10684_v4  ;;  %v1064_v51 = vld [vmem:[#allocation2 + $0x1d88] sm:$0xff]  ;;  %v11036_v4 = vcombine.low %v1072_v42, %v1076_v43 }
 0x208   :  { %6927 = vmatprep.subr.bf16.mxu0 %v10677_v8  ;;  %v1068_v10 = vld [vmem:[#allocation2 + $0x1da8] sm:$0xff]  ;;  %v12291_v8 = vpop.f32.mrf.mxu1 }
 0x209   :  { %6969 = vmatpush2.bf16.msra.mxu1 %v10812_v7  ;;  %v10901_v7 = vcombine.high %v936_v0, %v940_v1  ;;  %12564 = vst [vmem:[#allocation18_spill] sm:$0xff] %v12291_v8  ;;  %v928_v13 = vld [vmem:[#allocation2 + $0x1948] sm:$0xff]  ;;  %v11028_v20 = vcombine.low %v1064_v51, %v1068_v10  ;;  %v1053_v8 = vld [vmem:[#allocation2 + $0x1d30] sm:$0xff] }
 0x20a   :  { %6970 = vmatprep.subr.bf16.mxu1 %v10805_v11  ;;  %v11029_v11 = vcombine.high %v1064_v51, %v1068_v10  ;;  %v932_v14 = vld [vmem:[#allocation2 + $0x1968] sm:$0xff] }
 0x20b   :  { %6928 = vmatpush2.bf16.msra.mxu0 %v10676_v18  ;;  %v1056_v17 = vld [vmem:[#allocation2 + $0x1d48] sm:$0xff]  ;;  %v10893_v35 = vcombine.high %v928_v13, %v932_v14  ;;  %v10892_v43 = vcombine.low %v928_v13, %v932_v14 }
 0x20c   :  { %6929 = vmatprep.subr.bf16.mxu0 %v10669_v22  ;;  %v1060_v18 = vld [vmem:[#allocation2 + $0x1d68] sm:$0xff] }
 0x20d   :  { %6971 = vmatpush2.bf16.msra.mxu1 %v10804_v53  ;;  %v1048_v40 = vld [vmem:[#allocation2 + $0x1d08] sm:$0xff] }
 0x20e   :  { %6972 = vmatprep.subr.bf16.mxu1 %v10797_v30  ;;  %v10900_v30 = vcombine.low %v936_v0, %v940_v1  ;;  %v1052_v41 = vld [vmem:[#allocation2 + $0x1d28] sm:$0xff] }
 0x20f   :  { %6930 = vmatpush2.bf16.msra.mxu0 %v10668_v37  ;;  %v11013_v0 = vcombine.high %v1048_v40, %v1052_v41  ;;  %v912_v1 = vld [vmem:[#allocation2 + $0x18c8] sm:$0xff] }
 0x210   :  { %6931 = vmatprep.subr.bf16.mxu0 %v10661_v38  ;;  %v920_v38 = vld [vmem:[#allocation2 + $0x1908] sm:$0xff] }
 0x211   :  { %6973 = vmatpush2.bf16.msra.mxu1 %v10796_v54  ;;  %v11021_v54 = vcombine.high %v1056_v17, %v1060_v18  ;;  %v916_v51 = vld [vmem:[#allocation2 + $0x18e8] sm:$0xff] }
 0x212   :  { %6974 = vmatprep.subr.bf16.mxu1 %v10789_v39  ;;  %v924_v39 = vld [vmem:[#allocation2 + $0x1928] sm:$0xff]  ;;  %v10877_v13 = vcombine.high %v912_v1, %v916_v51 }
 0x213   :  { %6932 = vmatpush2.bf16.msra.mxu0 %v10660_v44  ;;  %v1040_v10 = vld [vmem:[#allocation2 + $0x1cc8] sm:$0xff] }
 0x214   :  { %6987 = vmatprep.subr.bf16.mxu0 %v10909_v24  ;;  %v10885_v24 = vcombine.high %v920_v38, %v924_v39 }
 0x215   :  { %6975 = vmatpush2.bf16.msra.mxu1 %v10788_v23  ;;  %v11020_v23 = vcombine.low %v1056_v17, %v1060_v18  ;;  %v904_v17 = vld [vmem:[#allocation2 + $0x1888] sm:$0xff] }
 0x216   :  { %7030 = vmatprep.subr.bf16.mxu1 %v11037_v57  ;;  %v6677_v15 = vpop.f32.mrf.mxu0  ;;  %6934 = vmatmul.mubr.bf16.vlgmr.msra.gmra.mxu0 %v12210_v28  ;;  %v908_v18 = vld [vmem:[#allocation2 + $0x18a8] sm:$0xff] }
 0x217   :  { %v6678_v53 = vadd.f32 %v6677_v15, %v12280_v31  ;;  %6988 = vmatpush1.bf16.msra.mxu0 %v10908_v2  ;;  %7019 = vmatprep.mubr.bf16.mxu0 %v12218_v45  ;;  %v1044_v2 = vld [vmem:[#allocation2 + $0x1ce8] sm:$0xff] }
 0x218   :  { %v6720_v22 = vpop.f32.mrf.mxu1  ;;  %6977 = vmatmul.mubr.bf16.vlgmr.msra.gmra.mxu1 %v12214_v29  ;;  %v12296_v19 = vpop.f32.mrf.mxu0  ;;  %6989 = vmatprep.subr.bf16.mxu0 %v10901_v7  ;;  %v11005_v15 = vcombine.high %v1040_v10, %v1044_v2 }
 0x219   :  { %7031 = vmatpush1.bf16.msra.mxu1 %v11036_v4  ;;  %12565 = vst [vmem:[#allocation19_spill] sm:$0xff] %v12296_v19  ;;  %v6721_v26 = vadd.f32 %v6720_v22, %v6678_v53  ;;  %7062 = vmatprep.mubr.bf16.mxu1 %v12223_v47  ;;  %v1032_v53 = vld [vmem:[#allocation2 + $0x1c88] sm:$0xff]  ;;  %v669_v19 = vld [vmem:[#allocation2 + $0x1130] sm:$0xff] }
 0x21a   :  { %v12298_v37 = vpop.f32.mrf.mxu1  ;;  %7032 = vmatprep.subr.bf16.mxu1 %v11029_v11  ;;  %v6681_v31 = vpop.f32.mrf.mxu0  ;;  %v10884_v11 = vcombine.low %v920_v38, %v924_v39  ;;  %v1036_v22 = vld [vmem:[#allocation2 + $0x1ca8] sm:$0xff] }
 0x21b   :  { %12566 = vst [vmem:[#allocation20_spill] sm:$0xff] %v12298_v37  ;;  %v6682_v42 = vadd.f32 %v6681_v31, %v12287_v46  ;;  %6990 = vmatpush1.bf16.msra.mxu0 %v10900_v30  ;;  %v7761_v4 = vmax.f32 %v6721_v26, 0.0  ;;  %v11012_v46 = vcombine.low %v1048_v40, %v1052_v41  ;;  %v10876_v30 = vcombine.low %v912_v1, %v916_v51  ;;  %v900_v38 = vld [vmem:[#allocation2 + $0x1868] sm:$0xff]  ;;  %v533_v37 = vld [vmem:[#allocation2 + $0xcf0] sm:$0xff] }
 0x21c   :  { %v6724_v44 = vpop.f32.mrf.mxu1  ;;  %6991 = vmatprep.subr.bf16.mxu0 %v10893_v35  ;;  %v10869_v35 = vcombine.high %v904_v17, %v908_v18  ;;  %v10997_v26 = vcombine.high %v1032_v53, %v1036_v22  ;;  %v1024_v39 = vld [vmem:[#allocation2 + $0x1c48] sm:$0xff]  ;;  %v10868_v40 = vcombine.low %v904_v17, %v908_v18  ;;  %v10996_v41 = vcombine.low %v1032_v53, %v1036_v22 }
 0x21d   :  { %7033 = vmatpush1.bf16.msra.mxu1 %v11028_v20  ;;  %v6725_v57 = vadd.f32 %v6724_v44, %v6682_v42  ;;  %v11004_v20 = vcombine.low %v1040_v10, %v1044_v2  ;;  %v1028_v31 = vld [vmem:[#allocation2 + $0x1c68] sm:$0xff] }
 0x21e   :  { %7034 = vmatprep.subr.bf16.mxu1 %v11021_v54  ;;  %v896_v54 = vld [vmem:[#allocation2 + $0x1848] sm:$0xff]  ;;  %v10988_v1 = vcombine.low %v1024_v39, %v1028_v31 }
 0x21f   :  { %v7769_v7 = vmax.f32 %v6725_v57, 0.0  ;;  %6992 = vmatpush1.bf16.msra.mxu0 %v10892_v43  ;;  %v10861_v42 = vcombine.high %v896_v54, %v900_v38  ;;  %v10989_v43 = vcombine.high %v1024_v39, %v1028_v31  ;;  %v888_v44 = vld [vmem:[#allocation2 + $0x1808] sm:$0xff] }
 0x220   :  { %6993 = vmatprep.subr.bf16.mxu0 %v10885_v24  ;;  %v1016_v24 = vld [vmem:[#allocation2 + $0x1c08] sm:$0xff] }
 0x221   :  { %7035 = vmatpush1.bf16.msra.mxu1 %v11020_v23  ;;  %v12303_v14 = vpack.c.bf16 %v7769_v7, %v7761_v4  ;;  %v892_v23 = vld [vmem:[#allocation2 + $0x1828] sm:$0xff] }
 0x222   :  { %7036 = vmatprep.subr.bf16.mxu1 %v11013_v0  ;;  %v1020_v57 = vld [vmem:[#allocation2 + $0x1c28] sm:$0xff]  ;;  %v10860_v0 = vcombine.low %v896_v54, %v900_v38  ;;  %v10853_v51 = vcombine.high %v888_v44, %v892_v23 }
 0x223   :  { %12567 = vst [vmem:[#allocation21_spill] sm:$0xff] %v12303_v14  ;;  %6994 = vmatpush1.bf16.msra.mxu0 %v10884_v11  ;;  %v10981_v10 = vcombine.high %v1016_v24, %v1020_v57  ;;  %v1008_v2 = vld [vmem:[#allocation2 + $0x1bc8] sm:$0xff]  ;;  %v529_v14 = vld [vmem:[#allocation2 + $0xcd0] sm:$0xff] }
 0x224   :  { %6995 = vmatprep.subr.bf16.mxu0 %v10877_v13  ;;  %v1012_v4 = vld [vmem:[#allocation2 + $0x1be8] sm:$0xff]  ;;  %v10980_v13 = vcombine.low %v1016_v24, %v1020_v57 }
 0x225   :  { %7037 = vmatpush1.bf16.msra.mxu1 %v11012_v46  ;;  %v1136_v7 = vld [vmem:[#allocation2 + $0x1fc8] sm:$0xff]  ;;  %v10852_v46 = vcombine.low %v888_v44, %v892_v23 }
 0x226   :  { %7038 = vmatprep.subr.bf16.mxu1 %v11005_v15  ;;  %v1140_v11 = vld [vmem:[#allocation2 + $0x1fe8] sm:$0xff]  ;;  %v10973_v15 = vcombine.high %v1008_v2, %v1012_v4 }
 0x227   :  { %6996 = vmatpush1.bf16.msra.mxu0 %v10876_v30  ;;  %v11101_v17 = vcombine.high %v1136_v7, %v1140_v11  ;;  %v1000_v18 = vld [vmem:[#allocation2 + $0x1b88] sm:$0xff] }
 0x228   :  { %6997 = vmatprep.subr.bf16.mxu0 %v10869_v35  ;;  %v1004_v53 = vld [vmem:[#allocation2 + $0x1ba8] sm:$0xff]  ;;  %v11100_v35 = vcombine.low %v1136_v7, %v1140_v11 }
 0x229   :  { %7039 = vmatpush1.bf16.msra.mxu1 %v11004_v20  ;;  %v1128_v22 = vld [vmem:[#allocation2 + $0x1f88] sm:$0xff]  ;;  %v10972_v20 = vcombine.low %v1008_v2, %v1012_v4 }
 0x22a   :  { %7040 = vmatprep.subr.bf16.mxu1 %v10997_v26  ;;  %v1132_v30 = vld [vmem:[#allocation2 + $0x1fa8] sm:$0xff]  ;;  %v10965_v26 = vcombine.high %v1000_v18, %v1004_v53 }
 0x22b   :  { %6998 = vmatpush1.bf16.msra.mxu0 %v10868_v40  ;;  %v11093_v54 = vcombine.high %v1128_v22, %v1132_v30  ;;  %v992_v38 = vld [vmem:[#allocation2 + $0x1b48] sm:$0xff] }
 0x22c   :  { %6999 = vmatprep.subr.bf16.mxu0 %v10861_v42  ;;  %v996_v39 = vld [vmem:[#allocation2 + $0x1b68] sm:$0xff]  ;;  %v11092_v42 = vcombine.low %v1128_v22, %v1132_v30 }
 0x22d   :  { %7041 = vmatpush1.bf16.msra.mxu1 %v10996_v41  ;;  %v1120_v31 = vld [vmem:[#allocation2 + $0x1f48] sm:$0xff]  ;;  %v10964_v41 = vcombine.low %v1000_v18, %v1004_v53 }
 0x22e   :  { %7042 = vmatprep.subr.bf16.mxu1 %v10989_v43  ;;  %v1124_v40 = vld [vmem:[#allocation2 + $0x1f68] sm:$0xff]  ;;  %v10957_v43 = vcombine.high %v992_v38, %v996_v39 }
 0x22f   :  { %7000 = vmatpush1.bf16.msra.mxu0 %v10860_v0  ;;  %v11085_v44 = vcombine.high %v1120_v31, %v1124_v40  ;;  %v984_v23 = vld [vmem:[#allocation2 + $0x1b08] sm:$0xff] }
 0x230   :  { %7001 = vmatprep.subr.bf16.mxu0 %v10853_v51  ;;  %v988_v24 = vld [vmem:[#allocation2 + $0x1b28] sm:$0xff]  ;;  %v11084_v51 = vcombine.low %v1120_v31, %v1124_v40 }
 0x231   :  { %7043 = vmatpush1.bf16.msra.mxu1 %v10988_v1  ;;  %v1112_v57 = vld [vmem:[#allocation2 + $0x1f08] sm:$0xff]  ;;  %v10956_v1 = vcombine.low %v992_v38, %v996_v39 }
 0x232   :  { %7044 = vmatprep.subr.bf16.mxu1 %v10981_v10  ;;  %v1116_v0 = vld [vmem:[#allocation2 + $0x1f28] sm:$0xff]  ;;  %v10949_v10 = vcombine.high %v984_v23, %v988_v24 }
 0x233   :  { %7002 = vmatpush1.bf16.msra.mxu0 %v10852_v46  ;;  %v11077_v2 = vcombine.high %v1112_v57, %v1116_v0  ;;  %v976_v4 = vld [vmem:[#allocation2 + $0x1ac8] sm:$0xff] }
 0x234   :  { %7003 = vmatprep.subr.bf16.mxu0 %v10973_v15  ;;  %v980_v7 = vld [vmem:[#allocation2 + $0x1ae8] sm:$0xff]  ;;  %v11076_v15 = vcombine.low %v1112_v57, %v1116_v0 }
 0x235   :  { %7045 = vmatpush1.bf16.msra.mxu1 %v10980_v13  ;;  %v1104_v11 = vld [vmem:[#allocation2 + $0x1ec8] sm:$0xff]  ;;  %v10948_v13 = vcombine.low %v984_v23, %v988_v24 }
 0x236   :  { %7046 = vmatprep.subr.bf16.mxu1 %v11101_v17  ;;  %v1108_v46 = vld [vmem:[#allocation2 + $0x1ee8] sm:$0xff]  ;;  %v10941_v17 = vcombine.high %v976_v4, %v980_v7 }
 0x237   :  { %7004 = vmatpush2.bf16.msra.mxu0 %v10972_v20  ;;  %v11069_v18 = vcombine.high %v1104_v11, %v1108_v46  ;;  %v968_v53 = vld [vmem:[#allocation2 + $0x1a88] sm:$0xff] }
 0x238   :  { %7005 = vmatprep.subr.bf16.mxu0 %v10965_v26  ;;  %v972_v22 = vld [vmem:[#allocation2 + $0x1aa8] sm:$0xff]  ;;  %v11068_v26 = vcombine.low %v1104_v11, %v1108_v46  ;;  %v181_v11 = vld [vmem:[#allocation2 + $0x1f0] sm:$0xff] }
 0x239   :  { %7047 = vmatpush2.bf16.msra.mxu1 %v11100_v35  ;;  %v1096_v30 = vld [vmem:[#allocation2 + $0x1e88] sm:$0xff]  ;;  %v10940_v35 = vcombine.low %v976_v4, %v980_v7  ;;  %v177_v7 = vld [vmem:[#allocation2 + $0x1d0] sm:$0xff] }
 0x23a   :  { %7048 = vmatprep.subr.bf16.mxu1 %v11093_v54  ;;  %v1100_v20 = vld [vmem:[#allocation2 + $0x1ea8] sm:$0xff]  ;;  %v10933_v54 = vcombine.high %v968_v53, %v972_v22  ;;  %v305_v46 = vld [vmem:[#allocation2 + $0x5d0] sm:$0xff] }
 0x23b   :  { %7006 = vmatpush2.bf16.msra.mxu0 %v10964_v41  ;;  %v11061_v38 = vcombine.high %v1096_v30, %v1100_v20  ;;  %v960_v39 = vld [vmem:[#allocation2 + $0x1a48] sm:$0xff] }
 0x23c   :  { %7007 = vmatprep.subr.bf16.mxu0 %v10957_v43  ;;  %v964_v31 = vld [vmem:[#allocation2 + $0x1a68] sm:$0xff]  ;;  %v11060_v43 = vcombine.low %v1096_v30, %v1100_v20  ;;  %v169_v30 = vld [vmem:[#allocation2 + $0x190] sm:$0xff] }
 0x23d   :  { %7049 = vmatpush2.bf16.msra.mxu1 %v11092_v42  ;;  %v1088_v40 = vld [vmem:[#allocation2 + $0x1e48] sm:$0xff]  ;;  %v10932_v42 = vcombine.low %v968_v53, %v972_v22  ;;  %v10143_v53 = vcombine.high %v177_v7, %v181_v11  ;;  %v173_v20 = vld [vmem:[#allocation2 + $0x1b0] sm:$0xff] }
 0x23e   :  { %7050 = vmatprep.subr.bf16.mxu1 %v11085_v44  ;;  %v1092_v41 = vld [vmem:[#allocation2 + $0x1e68] sm:$0xff]  ;;  %v10925_v44 = vcombine.high %v960_v39, %v964_v31 }
 0x23f   :  { %7008 = vmatpush2.bf16.msra.mxu0 %v10956_v1  ;;  %v11053_v23 = vcombine.high %v1088_v40, %v1092_v41  ;;  %v952_v24 = vld [vmem:[#allocation2 + $0x1a08] sm:$0xff] }
 0x240   :  { %7009 = vmatprep.subr.bf16.mxu0 %v10949_v10  ;;  %v956_v57 = vld [vmem:[#allocation2 + $0x1a28] sm:$0xff]  ;;  %v11052_v10 = vcombine.low %v1088_v40, %v1092_v41  ;;  %v10135_v41 = vcombine.high %v169_v30, %v173_v20 }
 0x241   :  { %7051 = vmatpush2.bf16.msra.mxu1 %v11084_v51  ;;  %v1080_v0 = vld [vmem:[#allocation2 + $0x1e08] sm:$0xff]  ;;  %v10924_v51 = vcombine.low %v960_v39, %v964_v31  ;;  %v10142_v39 = vcombine.low %v177_v7, %v181_v11  ;;  %v12308_v31 = vpop.f32.mrf.mxu0 }
 0x242   :  { %7052 = vmatprep.subr.bf16.mxu1 %v11077_v2  ;;  %v1084_v1 = vld [vmem:[#allocation2 + $0x1e28] sm:$0xff]  ;;  %v10917_v2 = vcombine.high %v952_v24, %v956_v57  ;;  %12568 = vst [vmem:[#allocation22_spill] sm:$0xff] %v12308_v31  ;;  %v789_v31 = vld [vmem:[#allocation2 + $0x14f0] sm:$0xff] }
 0x243   :  { %7010 = vmatpush2.bf16.msra.mxu0 %v10948_v13  ;;  %v11045_v4 = vcombine.high %v1080_v0, %v1084_v1  ;;  %v309_v13 = vld [vmem:[#allocation2 + $0x5f0] sm:$0xff] }
 0x244   :  { %7011 = vmatprep.subr.bf16.mxu0 %v10941_v17  ;;  %v12557_v17 = vsub.s32 2, %v12228_v56  ;;  %v10271_v22 = vcombine.high %v305_v46, %v309_v13  ;;  %v10270_v40 = vcombine.low %v305_v46, %v309_v13 }
 0x245   :  { %7053 = vmatpush2.bf16.msra.mxu1 %v11076_v15  ;;  %v10916_v15 = vcombine.low %v952_v24, %v956_v57  ;;  %v289_v57 = vld [vmem:[#allocation2 + $0x550] sm:$0xff] }
 0x246   :  { %7054 = vmatprep.subr.bf16.mxu1 %v11069_v18  ;;  %v11044_v18 = vcombine.low %v1080_v0, %v1084_v1  ;;  %v293_v0 = vld [vmem:[#allocation2 + $0x570] sm:$0xff] }
 0x247   :  { %7012 = vmatpush2.bf16.msra.mxu0 %v10940_v35  ;;  %v297_v35 = vld [vmem:[#allocation2 + $0x590] sm:$0xff]  ;;  %v10255_v13 = vcombine.high %v289_v57, %v293_v0 }
 0x248   :  { %7013 = vmatprep.subr.bf16.mxu0 %v10933_v54  ;;  %v11877_v54 = vld [vmem:[#allocation4] sm:$0xff] }
 0x249   :  { %7055 = vmatpush2.bf16.msra.mxu1 %v11068_v26  ;;  %v301_v26 = vld [vmem:[#allocation2 + $0x5b0] sm:$0xff] }
 0x24a   :  { %7056 = vmatprep.subr.bf16.mxu1 %v11061_v38  ;;  %v1156_v38 = vrot.slane %v11877_v54, %v12557_v17  ;;  %v285_v54 = vld [vmem:[#allocation2 + $0x530] sm:$0xff] }
 0x24b   :  { %7014 = vmatpush2.bf16.msra.mxu0 %v10932_v42  ;;  %v12310_v42 = vpop.f32.mrf.mxu1 }
 0x24c   :  { %7015 = vmatprep.subr.bf16.mxu0 %v10925_v44  ;;  %12569 = vst [vmem:[#allocation23_spill] sm:$0xff] %v12310_v42  ;;  %v161_v44 = vld [vmem:[#allocation2 + $0x150] sm:$0xff] }
 0x24d   :  { %7057 = vmatpush2.bf16.msra.mxu1 %v11060_v43  ;;  %v10263_v43 = vcombine.high %v297_v35, %v301_v26 }
 0x24e   :  { %7058 = vmatprep.subr.bf16.mxu1 %v11053_v23  ;;  %v165_v23 = vld [vmem:[#allocation2 + $0x170] sm:$0xff] }
 0x24f   :  { %7016 = vmatpush2.bf16.msra.mxu0 %v10924_v51  ;;  %v10127_v7 = vcombine.high %v161_v44, %v165_v23 }
 0x250   :  { %7017 = vmatprep.subr.bf16.mxu0 %v10917_v2 }
 0x251   :  { %7059 = vmatpush2.bf16.msra.mxu1 %v11052_v10  ;;  %v10134_v10 = vcombine.low %v169_v30, %v173_v20  ;;  %v10126_v20 = vcombine.low %v161_v44, %v165_v23  ;;  %v137_v23 = vld [vmem:[#allocation2 + $0x90] sm:$0xff] }
 0x252   :  { %7060 = vmatprep.subr.bf16.mxu1 %v11045_v4  ;;  %v10262_v4 = vcombine.low %v297_v35, %v301_v26  ;;  %v10254_v26 = vcombine.low %v289_v57, %v293_v0  ;;  %v265_v57 = vld [vmem:[#allocation2 + $0x490] sm:$0xff] }
 0x253   :  { %7018 = vmatpush2.bf16.msra.mxu0 %v10916_v15  ;;  %v153_v15 = vld [vmem:[#allocation2 + $0x110] sm:$0xff] }
 0x254   :  { %7073 = vmatprep.subr.bf16.mxu0 %v10143_v53  ;;  %v269_v0 = vld [vmem:[#allocation2 + $0x4b0] sm:$0xff] }
 0x255   :  { %7061 = vmatpush2.bf16.msra.mxu1 %v11044_v18  ;;  %v157_v18 = vld [vmem:[#allocation2 + $0x130] sm:$0xff] }
 0x256   :  { %7116 = vmatprep.subr.bf16.mxu1 %v10271_v22  ;;  %v6763_v24 = vpop.f32.mrf.mxu0  ;;  %7020 = vmatmul.mubr.bf16.vlgmr.msra.gmra.mxu0 %v12233_v12  ;;  %v281_v22 = vld [vmem:[#allocation2 + $0x510] sm:$0xff]  ;;  %v10118_v17 = vcombine.low %v153_v15, %v157_v18 }
 0x257   :  { %v6764_v1 = vadd.f32 %v6763_v24, %v1156_v38  ;;  %7074 = vmatpush1.bf16.msra.mxu0 %v10142_v39  ;;  %7105 = vmatprep.mubr.bf16.mxu0 %v12090_v58  ;;  %v10119_v39 = vcombine.high %v153_v15, %v157_v18  ;;  %v149_v24 = vld [vmem:[#allocation2 + $0xf0] sm:$0xff] }
 0x258   :  { %v6806_v51 = vpop.f32.mrf.mxu1  ;;  %7063 = vmatmul.mubr.bf16.vlgmr.msra.gmra.mxu1 %v12239_v16  ;;  %v12314_v2 = vpop.f32.mrf.mxu0  ;;  %7075 = vmatprep.subr.bf16.mxu0 %v10135_v41  ;;  %v10247_v41 = vcombine.high %v281_v22, %v285_v54  ;;  %v133_v15 = vld [vmem:[#allocation2 + $0x70] sm:$0xff] }
 0x259   :  { %7117 = vmatpush1.bf16.msra.mxu1 %v10270_v40  ;;  %v12316_v11 = vadd.f32 %v6806_v51, %v6764_v1  ;;  %7148 = vmatprep.mubr.bf16.mxu1 %v12104_v63  ;;  %v273_v1 = vld [vmem:[#allocation2 + $0x4d0] sm:$0xff] }
 0x25a   :  { %v12318_v46 = vpop.f32.mrf.mxu1  ;;  %7118 = vmatprep.subr.bf16.mxu1 %v10263_v43  ;;  %v6767_v53 = vpop.f32.mrf.mxu0  ;;  %v145_v43 = vld [vmem:[#allocation2 + $0xd0] sm:$0xff] }
 0x25b   :  { %v6768_v30 = vadd.f32 %v6767_v53, %v1156_v38  ;;  %7076 = vmatpush1.bf16.msra.mxu0 %v10134_v10  ;;  %v277_v51 = vld [vmem:[#allocation2 + $0x4f0] sm:$0xff]  ;;  %v10246_v38 = vcombine.low %v281_v22, %v285_v54  ;;  %v10111_v10 = vcombine.high %v145_v43, %v149_v24  ;;  %v10230_v54 = vcombine.low %v265_v57, %v269_v0 }
 0x25c   :  { %v6810_v35 = vpop.f32.mrf.mxu1  ;;  %7077 = vmatprep.subr.bf16.mxu0 %v10127_v7  ;;  %v10239_v44 = vcombine.high %v273_v1, %v277_v51  ;;  %v10110_v7 = vcombine.low %v145_v43, %v149_v24  ;;  %v257_v18 = vld [vmem:[#allocation2 + $0x450] sm:$0xff] }
 0x25d   :  { %7119 = vmatpush1.bf16.msra.mxu1 %v10262_v4  ;;  %v12322_v40 = vadd.f32 %v6810_v35, %v6768_v30  ;;  %v141_v4 = vld [vmem:[#allocation2 + $0xb0] sm:$0xff]  ;;  %v10231_v30 = vcombine.high %v265_v57, %v269_v0 }
 0x25e   :  { %7120 = vmatprep.subr.bf16.mxu1 %v10255_v13  ;;  %v10238_v13 = vcombine.low %v273_v1, %v277_v51  ;;  %v10103_v53 = vcombine.high %v137_v23, %v141_v4  ;;  %v261_v35 = vld [vmem:[#allocation2 + $0x470] sm:$0xff]  ;;  %v10102_v22 = vcombine.low %v137_v23, %v141_v4 }
 0x25f   :  { %7078 = vmatpush1.bf16.msra.mxu0 %v10126_v20  ;;  %v129_v20 = vld [vmem:[#allocation2 + $0x50] sm:$0xff]  ;;  %v10222_v51 = vcombine.low %v257_v18, %v261_v35 }
 0x260   :  { %7079 = vmatprep.subr.bf16.mxu0 %v10119_v39  ;;  %v10223_v39 = vcombine.high %v257_v18, %v261_v35  ;;  %v249_v43 = vld [vmem:[#allocation2 + $0x410] sm:$0xff]  ;;  %v10094_v1 = vcombine.low %v129_v20, %v133_v15 }
 0x261   :  { %7121 = vmatpush1.bf16.msra.mxu1 %v10254_v26  ;;  %v10095_v26 = vcombine.high %v129_v20, %v133_v15  ;;  %v253_v24 = vld [vmem:[#allocation2 + $0x430] sm:$0xff] }
 0x262   :  { %7122 = vmatprep.subr.bf16.mxu1 %v10247_v41  ;;  %v125_v41 = vld [vmem:[#allocation2 + $0x30] sm:$0xff]  ;;  %v10214_v0 = vcombine.low %v249_v43, %v253_v24 }
 0x263   :  { %7080 = vmatpush1.bf16.msra.mxu0 %v10118_v17  ;;  %v121_v17 = vld [vmem:[#allocation2 + $0x10] sm:$0xff] }
 0x264   :  { %7081 = vmatprep.subr.bf16.mxu0 %v10111_v10  ;;  %v10215_v10 = vcombine.high %v249_v43, %v253_v24  ;;  %v245_v23 = vld [vmem:[#allocation2 + $0x3f0] sm:$0xff]  ;;  %v10086_v57 = vcombine.low %v121_v17, %v125_v41 }
 0x265   :  { %7123 = vmatpush1.bf16.msra.mxu1 %v10246_v38  ;;  %v10087_v38 = vcombine.high %v121_v17, %v125_v41  ;;  %v369_v4 = vld [vmem:[#allocation2 + $0x7d0] sm:$0xff] }
 0x266   :  { %7124 = vmatprep.subr.bf16.mxu1 %v10239_v44  ;;  %v241_v44 = vld [vmem:[#allocation2 + $0x3d0] sm:$0xff] }
 0x267   :  { %7082 = vmatpush1.bf16.msra.mxu0 %v10110_v7  ;;  %v373_v7 = vld [vmem:[#allocation2 + $0x7f0] sm:$0xff]  ;;  %v10206_v18 = vcombine.low %v241_v44, %v245_v23 }
 0x268   :  { %7083 = vmatprep.subr.bf16.mxu0 %v10103_v53  ;;  %v10335_v53 = vcombine.high %v369_v4, %v373_v7  ;;  %v237_v20 = vld [vmem:[#allocation2 + $0x3b0] sm:$0xff]  ;;  %v10334_v35 = vcombine.low %v369_v4, %v373_v7 }
 0x269   :  { %7125 = vmatpush1.bf16.msra.mxu1 %v10238_v13  ;;  %v10207_v13 = vcombine.high %v241_v44, %v245_v23  ;;  %v361_v15 = vld [vmem:[#allocation2 + $0x790] sm:$0xff] }
 0x26a   :  { %7126 = vmatprep.subr.bf16.mxu1 %v10231_v30  ;;  %v233_v30 = vld [vmem:[#allocation2 + $0x390] sm:$0xff] }
 0x26b   :  { %7084 = vmatpush1.bf16.msra.mxu0 %v10102_v22  ;;  %v365_v22 = vld [vmem:[#allocation2 + $0x7b0] sm:$0xff]  ;;  %v10198_v43 = vcombine.low %v233_v30, %v237_v20 }
 0x26c   :  { %7085 = vmatprep.subr.bf16.mxu0 %v10095_v26  ;;  %v10327_v26 = vcombine.high %v361_v15, %v365_v22  ;;  %v229_v17 = vld [vmem:[#allocation2 + $0x370] sm:$0xff]  ;;  %v10326_v24 = vcombine.low %v361_v15, %v365_v22 }
 0x26d   :  { %7127 = vmatpush1.bf16.msra.mxu1 %v10230_v54  ;;  %v10199_v54 = vcombine.high %v233_v30, %v237_v20  ;;  %v353_v41 = vld [vmem:[#allocation2 + $0x750] sm:$0xff] }
 0x26e   :  { %7128 = vmatprep.subr.bf16.mxu1 %v10223_v39  ;;  %v225_v39 = vld [vmem:[#allocation2 + $0x350] sm:$0xff] }
 0x26f   :  { %7086 = vmatpush1.bf16.msra.mxu0 %v10094_v1  ;;  %v357_v1 = vld [vmem:[#allocation2 + $0x770] sm:$0xff]  ;;  %v10190_v4 = vcombine.low %v225_v39, %v229_v17 }
 0x270   :  { %7087 = vmatprep.subr.bf16.mxu0 %v10087_v38  ;;  %v10319_v38 = vcombine.high %v353_v41, %v357_v1  ;;  %v221_v44 = vld [vmem:[#allocation2 + $0x330] sm:$0xff]  ;;  %v10318_v7 = vcombine.low %v353_v41, %v357_v1 }
 0x271   :  { %7129 = vmatpush1.bf16.msra.mxu1 %v10222_v51  ;;  %v10191_v51 = vcombine.high %v225_v39, %v229_v17  ;;  %v345_v23 = vld [vmem:[#allocation2 + $0x710] sm:$0xff] }
 0x272   :  { %7130 = vmatprep.subr.bf16.mxu1 %v10215_v10  ;;  %v217_v10 = vld [vmem:[#allocation2 + $0x310] sm:$0xff] }
 0x273   :  { %7088 = vmatpush1.bf16.msra.mxu0 %v10086_v57  ;;  %v349_v57 = vld [vmem:[#allocation2 + $0x730] sm:$0xff]  ;;  %v10182_v15 = vcombine.low %v217_v10, %v221_v44 }
 0x274   :  { %7089 = vmatprep.subr.bf16.mxu0 %v10207_v13  ;;  %v10311_v13 = vcombine.high %v345_v23, %v349_v57  ;;  %v213_v30 = vld [vmem:[#allocation2 + $0x2f0] sm:$0xff]  ;;  %v10310_v22 = vcombine.low %v345_v23, %v349_v57 }
 0x275   :  { %7131 = vmatpush1.bf16.msra.mxu1 %v10214_v0  ;;  %v10183_v0 = vcombine.high %v217_v10, %v221_v44  ;;  %v337_v20 = vld [vmem:[#allocation2 + $0x6d0] sm:$0xff] }
 0x276   :  { %7132 = vmatprep.subr.bf16.mxu1 %v10335_v53  ;;  %v209_v53 = vld [vmem:[#allocation2 + $0x2d0] sm:$0xff] }
 0x277   :  { %7090 = vmatpush2.bf16.msra.mxu0 %v10206_v18  ;;  %v341_v18 = vld [vmem:[#allocation2 + $0x6f0] sm:$0xff]  ;;  %v10174_v41 = vcombine.low %v209_v53, %v213_v30 }
 0x278   :  { %7091 = vmatprep.subr.bf16.mxu0 %v10199_v54  ;;  %v10303_v54 = vcombine.high %v337_v20, %v341_v18  ;;  %v205_v39 = vld [vmem:[#allocation2 + $0x2b0] sm:$0xff]  ;;  %v10302_v1 = vcombine.low %v337_v20, %v341_v18 }
 0x279   :  { %7133 = vmatpush2.bf16.msra.mxu1 %v10334_v35  ;;  %v10175_v35 = vcombine.high %v209_v53, %v213_v30  ;;  %v329_v17 = vld [vmem:[#allocation2 + $0x690] sm:$0xff] }
 0x27a   :  { %7134 = vmatprep.subr.bf16.mxu1 %v10327_v26  ;;  %v201_v26 = vld [vmem:[#allocation2 + $0x290] sm:$0xff] }
 0x27b   :  { %7092 = vmatpush2.bf16.msra.mxu0 %v10198_v43  ;;  %v333_v43 = vld [vmem:[#allocation2 + $0x6b0] sm:$0xff]  ;;  %v10166_v23 = vcombine.low %v201_v26, %v205_v39 }
 0x27c   :  { %7093 = vmatprep.subr.bf16.mxu0 %v10191_v51  ;;  %v10295_v51 = vcombine.high %v329_v17, %v333_v43  ;;  %v197_v10 = vld [vmem:[#allocation2 + $0x270] sm:$0xff]  ;;  %v10294_v57 = vcombine.low %v329_v17, %v333_v43 }
 0x27d   :  { %7135 = vmatpush2.bf16.msra.mxu1 %v10326_v24  ;;  %v10167_v24 = vcombine.high %v201_v26, %v205_v39  ;;  %v321_v44 = vld [vmem:[#allocation2 + $0x650] sm:$0xff] }
 0x27e   :  { %7136 = vmatprep.subr.bf16.mxu1 %v10319_v38  ;;  %v193_v38 = vld [vmem:[#allocation2 + $0x250] sm:$0xff] }
 0x27f   :  { %7094 = vmatpush2.bf16.msra.mxu0 %v10190_v4  ;;  %v325_v4 = vld [vmem:[#allocation2 + $0x670] sm:$0xff]  ;;  %v10158_v20 = vcombine.low %v193_v38, %v197_v10 }
 0x280   :  { %7095 = vmatprep.subr.bf16.mxu0 %v10183_v0  ;;  %v10287_v0 = vcombine.high %v321_v44, %v325_v4  ;;  %v189_v53 = vld [vmem:[#allocation2 + $0x230] sm:$0xff]  ;;  %v10286_v18 = vcombine.low %v321_v44, %v325_v4  ;;  %v12324_v4 = vpop.f32.mrf.mxu0 }
 0x281   :  { %7137 = vmatpush2.bf16.msra.mxu1 %v10318_v7  ;;  %v10159_v7 = vcombine.high %v193_v38, %v197_v10  ;;  %v313_v30 = vld [vmem:[#allocation2 + $0x610] sm:$0xff] }
 0x282   :  { %7138 = vmatprep.subr.bf16.mxu1 %v10311_v13  ;;  %v185_v13 = vld [vmem:[#allocation2 + $0x210] sm:$0xff] }
 0x283   :  { %7096 = vmatpush2.bf16.msra.mxu0 %v10182_v15  ;;  %v317_v15 = vld [vmem:[#allocation2 + $0x630] sm:$0xff]  ;;  %v10150_v17 = vcombine.low %v185_v13, %v189_v53 }
 0x284   :  { %7097 = vmatprep.subr.bf16.mxu0 %v10175_v35  ;;  %v10279_v35 = vcombine.high %v313_v30, %v317_v15  ;;  %v437_v26 = vld [vmem:[#allocation2 + $0x9f0] sm:$0xff]  ;;  %v10278_v43 = vcombine.low %v313_v30, %v317_v15 }
 0x285   :  { %7139 = vmatpush2.bf16.msra.mxu1 %v10310_v22  ;;  %v10151_v22 = vcombine.high %v185_v13, %v189_v53  ;;  %v561_v39 = vld [vmem:[#allocation2 + $0xdd0] sm:$0xff] }
 0x286   :  { %7140 = vmatprep.subr.bf16.mxu1 %v10303_v54  ;;  %v433_v54 = vld [vmem:[#allocation2 + $0x9d0] sm:$0xff] }
 0x287   :  { %7098 = vmatpush2.bf16.msra.mxu0 %v10174_v41  ;;  %v565_v41 = vld [vmem:[#allocation2 + $0xdf0] sm:$0xff]  ;;  %v10398_v44 = vcombine.low %v433_v54, %v437_v26 }
 0x288   :  { %7099 = vmatprep.subr.bf16.mxu0 %v10167_v24  ;;  %v10527_v24 = vcombine.high %v561_v39, %v565_v41  ;;  %v429_v38 = vld [vmem:[#allocation2 + $0x9b0] sm:$0xff] }
 0x289   :  { %7141 = vmatpush2.bf16.msra.mxu1 %v10302_v1  ;;  %v10399_v1 = vcombine.high %v433_v54, %v437_v26  ;;  %v553_v10 = vld [vmem:[#allocation2 + $0xd90] sm:$0xff] }
 0x28a   :  { %7142 = vmatprep.subr.bf16.mxu1 %v10295_v51  ;;  %v425_v51 = vld [vmem:[#allocation2 + $0x990] sm:$0xff] }
 0x28b   :  { %7100 = vmatpush2.bf16.msra.mxu0 %v10166_v23  ;;  %v557_v23 = vld [vmem:[#allocation2 + $0xdb0] sm:$0xff]  ;;  %v10390_v54 = vcombine.low %v425_v51, %v429_v38 }
 0x28c   :  { %7101 = vmatprep.subr.bf16.mxu0 %v10159_v7  ;;  %v10391_v7 = vcombine.high %v425_v51, %v429_v38  ;;  %v10519_v13 = vcombine.high %v553_v10, %v557_v23  ;;  %v417_v53 = vld [vmem:[#allocation2 + $0x950] sm:$0xff] }
 0x28d   :  { %7143 = vmatpush2.bf16.msra.mxu1 %v10294_v57  ;;  %v10526_v57 = vcombine.low %v561_v39, %v565_v41  ;;  %v421_v30 = vld [vmem:[#allocation2 + $0x970] sm:$0xff]  ;;  %v10518_v39 = vcombine.low %v553_v10, %v557_v23 }
 0x28e   :  { %7144 = vmatprep.subr.bf16.mxu1 %v10287_v0  ;;  %v12326_v0 = vpop.f32.mrf.mxu1  ;;  %v10383_v41 = vcombine.high %v417_v53, %v421_v30  ;;  %v10382_v38 = vcombine.low %v417_v53, %v421_v30  ;;  %v10495_v53 = vcombine.high %v529_v14, %v533_v37  ;;  %v393_v30 = vld [vmem:[#allocation2 + $0x890] sm:$0xff] }
 0x28f   :  { %7102 = vmatpush2.bf16.msra.mxu0 %v10158_v20  ;;  %v545_v20 = vld [vmem:[#allocation2 + $0xd50] sm:$0xff] }
 0x290   :  { %7103 = vmatprep.subr.bf16.mxu0 %v10151_v22 }
 0x291   :  { %7145 = vmatpush2.bf16.msra.mxu1 %v10286_v18  ;;  %v549_v18 = vld [vmem:[#allocation2 + $0xd70] sm:$0xff] }
 0x292   :  { %7146 = vmatprep.subr.bf16.mxu1 %v10279_v35  ;;  %v10510_v23 = vcombine.low %v545_v20, %v549_v18 }
 0x293   :  { %7104 = vmatpush2.bf16.msra.mxu0 %v10150_v17 }
 0x294   :  { %7159 = vmatprep.subr.bf16.mxu0 %v10399_v1  ;;  %v10511_v1 = vcombine.high %v545_v20, %v549_v18  ;;  %v521_v20 = vld [vmem:[#allocation2 + $0xc90] sm:$0xff] }
 0x295   :  { %7147 = vmatpush2.bf16.msra.mxu1 %v10278_v43  ;;  %v525_v18 = vld [vmem:[#allocation2 + $0xcb0] sm:$0xff] }
 0x296   :  { %7202 = vmatprep.subr.bf16.mxu1 %v10527_v24  ;;  %v6849_v15 = vpop.f32.mrf.mxu0  ;;  %7106 = vmatmul.mubr.bf16.vlgmr.msra.gmra.mxu0 %v12110_v21  ;;  %v409_v24 = vld [vmem:[#allocation2 + $0x910] sm:$0xff] }
 0x297   :  { %v6850_v22 = vadd.f32 %v6849_v15, %v12316_v11  ;;  %7160 = vmatpush1.bf16.msra.mxu0 %v10398_v44  ;;  %7191 = vmatprep.mubr.bf16.mxu0 %v12138_v60  ;;  %v537_v15 = vld [vmem:[#allocation2 + $0xd10] sm:$0xff]  ;;  %v10374_v42 = vcombine.low %v409_v24, %v413_v5 }
 0x298   :  { %v6892_v35 = vpop.f32.mrf.mxu1  ;;  %7149 = vmatmul.mubr.bf16.vlgmr.msra.gmra.mxu1 %v12124_v25  ;;  %v12331_v26 = vpop.f32.mrf.mxu0  ;;  %7161 = vmatprep.subr.bf16.mxu0 %v10391_v7  ;;  %v541_v44 = vld [vmem:[#allocation2 + $0xd30] sm:$0xff] }
 0x299   :  { %7203 = vmatpush1.bf16.msra.mxu1 %v10526_v57  ;;  %v12333_v17 = vadd.f32 %v6892_v35, %v6850_v22  ;;  %7234 = vmatprep.mubr.bf16.mxu1 %v12143_v33  ;;  %v10375_v57 = vcombine.high %v409_v24, %v413_v5  ;;  %v401_v22 = vld [vmem:[#allocation2 + $0x8d0] sm:$0xff] }
 0x29a   :  { %v12335_v43 = vpop.f32.mrf.mxu1  ;;  %7204 = vmatprep.subr.bf16.mxu1 %v10519_v13  ;;  %v6853_v11 = vpop.f32.mrf.mxu0  ;;  %v10503_v13 = vcombine.high %v537_v15, %v541_v44  ;;  %v405_v35 = vld [vmem:[#allocation2 + $0x8f0] sm:$0xff] }
 0x29b   :  { %v6854_v51 = vadd.f32 %v6853_v11, %v12322_v40  ;;  %7162 = vmatpush1.bf16.msra.mxu0 %v10390_v54  ;;  %v10502_v40 = vcombine.low %v537_v15, %v541_v44  ;;  %v10367_v54 = vcombine.high %v401_v22, %v405_v35  ;;  %v389_v5 = vld [vmem:[#allocation2 + $0x870] sm:$0xff]  ;;  %v10486_v44 = vcombine.low %v521_v20, %v525_v18 }
 0x29c   :  { %v6896_v10 = vpop.f32.mrf.mxu1  ;;  %7163 = vmatprep.subr.bf16.mxu0 %v10383_v41  ;;  %v10366_v41 = vcombine.low %v401_v22, %v405_v35  ;;  %v513_v24 = vld [vmem:[#allocation2 + $0xc50] sm:$0xff] }
 0x29d   :  { %7205 = vmatpush1.bf16.msra.mxu1 %v10518_v39  ;;  %v12340_v7 = vadd.f32 %v6896_v10, %v6854_v51  ;;  %v397_v39 = vld [vmem:[#allocation2 + $0x8b0] sm:$0xff]  ;;  %v10487_v51 = vcombine.high %v521_v20, %v525_v18 }
 0x29e   :  { %7206 = vmatprep.subr.bf16.mxu1 %v10511_v1  ;;  %v10494_v1 = vcombine.low %v529_v14, %v533_v37  ;;  %v10359_v11 = vcombine.high %v393_v30, %v397_v39  ;;  %v517_v10 = vld [vmem:[#allocation2 + $0xc70] sm:$0xff]  ;;  %v10358_v15 = vcombine.low %v393_v30, %v397_v39 }
 0x29f   :  { %7164 = vmatpush1.bf16.msra.mxu0 %v10382_v38  ;;  %v385_v38 = vld [vmem:[#allocation2 + $0x850] sm:$0xff]  ;;  %v10478_v14 = vcombine.low %v513_v24, %v517_v10 }
 0x2a0   :  { %7165 = vmatprep.subr.bf16.mxu0 %v10375_v57  ;;  %v10479_v57 = vcombine.high %v513_v24, %v517_v10  ;;  %v505_v22 = vld [vmem:[#allocation2 + $0xc10] sm:$0xff]  ;;  %v10350_v37 = vcombine.low %v385_v38, %v389_v5 }
 0x2a1   :  { %7207 = vmatpush1.bf16.msra.mxu1 %v10510_v23  ;;  %v10351_v23 = vcombine.high %v385_v38, %v389_v5  ;;  %v509_v35 = vld [vmem:[#allocation2 + $0xc30] sm:$0xff] }
 0x2a2   :  { %7208 = vmatprep.subr.bf16.mxu1 %v10503_v13  ;;  %v381_v13 = vld [vmem:[#allocation2 + $0x830] sm:$0xff]  ;;  %v10470_v18 = vcombine.low %v505_v22, %v509_v35 }
 0x2a3   :  { %7166 = vmatpush1.bf16.msra.mxu0 %v10374_v42  ;;  %v377_v42 = vld [vmem:[#allocation2 + $0x810] sm:$0xff] }
 0x2a4   :  { %7167 = vmatprep.subr.bf16.mxu0 %v10367_v54  ;;  %v10471_v54 = vcombine.high %v505_v22, %v509_v35  ;;  %v501_v30 = vld [vmem:[#allocation2 + $0xbf0] sm:$0xff]  ;;  %v10342_v20 = vcombine.low %v377_v42, %v381_v13 }
 0x2a5   :  { %7209 = vmatpush1.bf16.msra.mxu1 %v10502_v40  ;;  %v10343_v40 = vcombine.high %v377_v42, %v381_v13  ;;  %v625_v39 = vld [vmem:[#allocation2 + $0xfd0] sm:$0xff] }
 0x2a6   :  { %7210 = vmatprep.subr.bf16.mxu1 %v10495_v53  ;;  %v497_v53 = vld [vmem:[#allocation2 + $0xbd0] sm:$0xff] }
 0x2a7   :  { %7168 = vmatpush1.bf16.msra.mxu0 %v10366_v41  ;;  %v629_v41 = vld [vmem:[#allocation2 + $0xff0] sm:$0xff]  ;;  %v10462_v24 = vcombine.low %v497_v53, %v501_v30 }
 0x2a8   :  { %7169 = vmatprep.subr.bf16.mxu0 %v10359_v11  ;;  %v10591_v11 = vcombine.high %v625_v39, %v629_v41  ;;  %v493_v38 = vld [vmem:[#allocation2 + $0xbb0] sm:$0xff]  ;;  %v10590_v10 = vcombine.low %v625_v39, %v629_v41 }
 0x2a9   :  { %7211 = vmatpush1.bf16.msra.mxu1 %v10494_v1  ;;  %v10463_v1 = vcombine.high %v497_v53, %v501_v30  ;;  %v617_v5 = vld [vmem:[#allocation2 + $0xf90] sm:$0xff] }
 0x2aa   :  { %7212 = vmatprep.subr.bf16.mxu1 %v10487_v51  ;;  %v489_v51 = vld [vmem:[#allocation2 + $0xb90] sm:$0xff] }
 0x2ab   :  { %7170 = vmatpush1.bf16.msra.mxu0 %v10358_v15  ;;  %v621_v15 = vld [vmem:[#allocation2 + $0xfb0] sm:$0xff]  ;;  %v10454_v22 = vcombine.low %v489_v51, %v493_v38 }
 0x2ac   :  { %7171 = vmatprep.subr.bf16.mxu0 %v10351_v23  ;;  %v10583_v23 = vcombine.high %v617_v5, %v621_v15  ;;  %v485_v42 = vld [vmem:[#allocation2 + $0xb70] sm:$0xff]  ;;  %v10582_v35 = vcombine.low %v617_v5, %v621_v15 }
 0x2ad   :  { %7213 = vmatpush1.bf16.msra.mxu1 %v10486_v44  ;;  %v10455_v44 = vcombine.high %v489_v51, %v493_v38  ;;  %v609_v13 = vld [vmem:[#allocation2 + $0xf50] sm:$0xff] }
 0x2ae   :  { %7214 = vmatprep.subr.bf16.mxu1 %v10479_v57  ;;  %v481_v57 = vld [vmem:[#allocation2 + $0xb50] sm:$0xff] }
 0x2af   :  { %7172 = vmatpush1.bf16.msra.mxu0 %v10350_v37  ;;  %v613_v37 = vld [vmem:[#allocation2 + $0xf70] sm:$0xff]  ;;  %v10446_v39 = vcombine.low %v481_v57, %v485_v42 }
 0x2b0   :  { %7173 = vmatprep.subr.bf16.mxu0 %v10343_v40  ;;  %v10575_v40 = vcombine.high %v609_v13, %v613_v37  ;;  %v477_v53 = vld [vmem:[#allocation2 + $0xb30] sm:$0xff]  ;;  %v10574_v41 = vcombine.low %v609_v13, %v613_v37 }
 0x2b1   :  { %7215 = vmatpush1.bf16.msra.mxu1 %v10478_v14  ;;  %v10447_v14 = vcombine.high %v481_v57, %v485_v42  ;;  %v601_v30 = vld [vmem:[#allocation2 + $0xf10] sm:$0xff] }
 0x2b2   :  { %7216 = vmatprep.subr.bf16.mxu1 %v10471_v54  ;;  %v473_v54 = vld [vmem:[#allocation2 + $0xb10] sm:$0xff] }
 0x2b3   :  { %7174 = vmatpush1.bf16.msra.mxu0 %v10342_v20  ;;  %v605_v20 = vld [vmem:[#allocation2 + $0xf30] sm:$0xff]  ;;  %v10438_v5 = vcombine.low %v473_v54, %v477_v53 }
 0x2b4   :  { %7175 = vmatprep.subr.bf16.mxu0 %v10463_v1  ;;  %v10567_v1 = vcombine.high %v601_v30, %v605_v20  ;;  %v469_v51 = vld [vmem:[#allocation2 + $0xaf0] sm:$0xff]  ;;  %v10566_v15 = vcombine.low %v601_v30, %v605_v20 }
 0x2b5   :  { %7217 = vmatpush1.bf16.msra.mxu1 %v10470_v18  ;;  %v10439_v18 = vcombine.high %v473_v54, %v477_v53  ;;  %v593_v38 = vld [vmem:[#allocation2 + $0xed0] sm:$0xff] }
 0x2b6   :  { %7218 = vmatprep.subr.bf16.mxu1 %v10591_v11  ;;  %v465_v11 = vld [vmem:[#allocation2 + $0xad0] sm:$0xff] }
 0x2b7   :  { %7176 = vmatpush2.bf16.msra.mxu0 %v10462_v24  ;;  %v597_v24 = vld [vmem:[#allocation2 + $0xef0] sm:$0xff]  ;;  %v10430_v13 = vcombine.low %v465_v11, %v469_v51 }
 0x2b8   :  { %7177 = vmatprep.subr.bf16.mxu0 %v10455_v44  ;;  %v10559_v44 = vcombine.high %v593_v38, %v597_v24  ;;  %v461_v57 = vld [vmem:[#allocation2 + $0xab0] sm:$0xff]  ;;  %v10558_v37 = vcombine.low %v593_v38, %v597_v24 }
 0x2b9   :  { %7219 = vmatpush2.bf16.msra.mxu1 %v10590_v10  ;;  %v10431_v10 = vcombine.high %v465_v11, %v469_v51  ;;  %v585_v42 = vld [vmem:[#allocation2 + $0xe90] sm:$0xff] }
 0x2ba   :  { %7220 = vmatprep.subr.bf16.mxu1 %v10583_v23  ;;  %v457_v23 = vld [vmem:[#allocation2 + $0xa90] sm:$0xff] }
 0x2bb   :  { %7178 = vmatpush2.bf16.msra.mxu0 %v10454_v22  ;;  %v589_v22 = vld [vmem:[#allocation2 + $0xeb0] sm:$0xff]  ;;  %v10422_v30 = vcombine.low %v457_v23, %v461_v57 }
 0x2bc   :  { %7179 = vmatprep.subr.bf16.mxu0 %v10447_v14  ;;  %v10551_v14 = vcombine.high %v585_v42, %v589_v22  ;;  %v453_v54 = vld [vmem:[#allocation2 + $0xa70] sm:$0xff]  ;;  %v10550_v20 = vcombine.low %v585_v42, %v589_v22 }
 0x2bd   :  { %7221 = vmatpush2.bf16.msra.mxu1 %v10582_v35  ;;  %v10423_v35 = vcombine.high %v457_v23, %v461_v57  ;;  %v577_v53 = vld [vmem:[#allocation2 + $0xe50] sm:$0xff] }
 0x2be   :  { %7222 = vmatprep.subr.bf16.mxu1 %v10575_v40  ;;  %v449_v40 = vld [vmem:[#allocation2 + $0xa50] sm:$0xff] }
 0x2bf   :  { %7180 = vmatpush2.bf16.msra.mxu0 %v10446_v39  ;;  %v581_v39 = vld [vmem:[#allocation2 + $0xe70] sm:$0xff]  ;;  %v10414_v38 = vcombine.low %v449_v40, %v453_v54 }
 0x2c0   :  { %7181 = vmatprep.subr.bf16.mxu0 %v10439_v18  ;;  %v10543_v18 = vcombine.high %v577_v53, %v581_v39  ;;  %v445_v11 = vld [vmem:[#allocation2 + $0xa30] sm:$0xff]  ;;  %v10542_v24 = vcombine.low %v577_v53, %v581_v39  ;;  %v12342_v39 = vpop.f32.mrf.mxu0 }
 0x2c1   :  { %7223 = vmatpush2.bf16.msra.mxu1 %v10574_v41  ;;  %v10415_v41 = vcombine.high %v449_v40, %v453_v54  ;;  %v569_v51 = vld [vmem:[#allocation2 + $0xe10] sm:$0xff] }
 0x2c2   :  { %7224 = vmatprep.subr.bf16.mxu1 %v10567_v1  ;;  %v441_v1 = vld [vmem:[#allocation2 + $0xa10] sm:$0xff] }
 0x2c3   :  { %7182 = vmatpush2.bf16.msra.mxu0 %v10438_v5  ;;  %v573_v5 = vld [vmem:[#allocation2 + $0xe30] sm:$0xff]  ;;  %v10406_v42 = vcombine.low %v441_v1, %v445_v11 }
 0x2c4   :  { %7183 = vmatprep.subr.bf16.mxu0 %v10431_v10  ;;  %v10535_v10 = vcombine.high %v569_v51, %v573_v5  ;;  %v693_v23 = vld [vmem:[#allocation2 + $0x11f0] sm:$0xff]  ;;  %v10534_v22 = vcombine.low %v569_v51, %v573_v5 }
 0x2c5   :  { %7225 = vmatpush2.bf16.msra.mxu1 %v10566_v15  ;;  %v10407_v15 = vcombine.high %v441_v1, %v445_v11  ;;  %v817_v57 = vld [vmem:[#allocation2 + $0x15d0] sm:$0xff] }
 0x2c6   :  { %7226 = vmatprep.subr.bf16.mxu1 %v10559_v44  ;;  %v689_v44 = vld [vmem:[#allocation2 + $0x11d0] sm:$0xff] }
 0x2c7   :  { %7184 = vmatpush2.bf16.msra.mxu0 %v10430_v13  ;;  %v821_v13 = vld [vmem:[#allocation2 + $0x15f0] sm:$0xff]  ;;  %v10654_v53 = vcombine.low %v689_v44, %v693_v23 }
 0x2c8   :  { %7185 = vmatprep.subr.bf16.mxu0 %v10423_v35  ;;  %v10783_v35 = vcombine.high %v817_v57, %v821_v13  ;;  %v685_v40 = vld [vmem:[#allocation2 + $0x11b0] sm:$0xff] }
 0x2c9   :  { %7227 = vmatpush2.bf16.msra.mxu1 %v10558_v37  ;;  %v10655_v37 = vcombine.high %v689_v44, %v693_v23  ;;  %v809_v54 = vld [vmem:[#allocation2 + $0x1590] sm:$0xff] }
 0x2ca   :  { %7228 = vmatprep.subr.bf16.mxu1 %v10551_v14  ;;  %v681_v14 = vld [vmem:[#allocation2 + $0x1190] sm:$0xff] }
 0x2cb   :  { %7186 = vmatpush2.bf16.msra.mxu0 %v10422_v30  ;;  %v813_v30 = vld [vmem:[#allocation2 + $0x15b0] sm:$0xff]  ;;  %v10646_v44 = vcombine.low %v681_v14, %v685_v40 }
 0x2cc   :  { %7187 = vmatprep.subr.bf16.mxu0 %v10415_v41  ;;  %v10647_v41 = vcombine.high %v681_v14, %v685_v40  ;;  %v10775_v1 = vcombine.high %v809_v54, %v813_v30  ;;  %v673_v11 = vld [vmem:[#allocation2 + $0x1150] sm:$0xff] }
 0x2cd   :  { %7229 = vmatpush2.bf16.msra.mxu1 %v10550_v20  ;;  %v10782_v20 = vcombine.low %v817_v57, %v821_v13  ;;  %v677_v51 = vld [vmem:[#allocation2 + $0x1170] sm:$0xff]  ;;  %v10774_v57 = vcombine.low %v809_v54, %v813_v30 }
 0x2ce   :  { %7230 = vmatprep.subr.bf16.mxu1 %v10543_v18  ;;  %v12344_v18 = vpop.f32.mrf.mxu1  ;;  %v10639_v13 = vcombine.high %v673_v11, %v677_v51  ;;  %v10638_v40 = vcombine.low %v673_v11, %v677_v51  ;;  %v649_v51 = vld [vmem:[#allocation2 + $0x1090] sm:$0xff] }
 0x2cf   :  { %7188 = vmatpush2.bf16.msra.mxu0 %v10414_v38  ;;  %v801_v38 = vld [vmem:[#allocation2 + $0x1550] sm:$0xff] }
 0x2d0   :  { %7189 = vmatprep.subr.bf16.mxu0 %v10407_v15 }
 0x2d1   :  { %7231 = vmatpush2.bf16.msra.mxu1 %v10542_v24  ;;  %v805_v24 = vld [vmem:[#allocation2 + $0x1570] sm:$0xff] }
 0x2d2   :  { %7232 = vmatprep.subr.bf16.mxu1 %v10535_v10  ;;  %v10766_v30 = vcombine.low %v801_v38, %v805_v24 }
 0x2d3   :  { %7190 = vmatpush2.bf16.msra.mxu0 %v10406_v42 }
 0x2d4   :  { %7245 = vmatprep.subr.bf16.mxu0 %v10655_v37  ;;  %v10767_v37 = vcombine.high %v801_v38, %v805_v24  ;;  %v777_v38 = vld [vmem:[#allocation2 + $0x1490] sm:$0xff] }
 0x2d5   :  { %7233 = vmatpush2.bf16.msra.mxu1 %v10534_v22  ;;  %v781_v24 = vld [vmem:[#allocation2 + $0x14b0] sm:$0xff] }
 0x2d6   :  { %7288 = vmatprep.subr.bf16.mxu1 %v10783_v35  ;;  %v6935_v5 = vpop.f32.mrf.mxu0  ;;  %7192 = vmatmul.mubr.bf16.vlgmr.msra.gmra.mxu0 %v12160_v48  ;;  %v665_v35 = vld [vmem:[#allocation2 + $0x1110] sm:$0xff] }
 0x2d7   :  { %v6936_v15 = vadd.f32 %v6935_v5, %v12333_v17  ;;  %7246 = vmatpush1.bf16.msra.mxu0 %v10654_v53  ;;  %7277 = vmatprep.mubr.bf16.mxu0 %v12178_v61  ;;  %v793_v5 = vld [vmem:[#allocation2 + $0x1510] sm:$0xff]  ;;  %v10630_v32 = vcombine.low %v665_v35, %v669_v19 }
 0x2d8   :  { %v6978_v10 = vpop.f32.mrf.mxu1  ;;  %7235 = vmatmul.mubr.bf16.vlgmr.msra.gmra.mxu1 %v12164_v49  ;;  %v12349_v23 = vpop.f32.mrf.mxu0  ;;  %7247 = vmatprep.subr.bf16.mxu0 %v10647_v41  ;;  %v797_v53 = vld [vmem:[#allocation2 + $0x1530] sm:$0xff] }
 0x2d9   :  { %7289 = vmatpush1.bf16.msra.mxu1 %v10782_v20  ;;  %12570 = vst [vmem:[#allocation24_spill] sm:$0xff] %v12349_v23  ;;  %v12351_v42 = vadd.f32 %v6978_v10, %v6936_v15  ;;  %7320 = vmatprep.mubr.bf16.mxu1 %v12183_v62  ;;  %v10631_v20 = vcombine.high %v665_v35, %v669_v19  ;;  %v657_v15 = vld [vmem:[#allocation2 + $0x10d0] sm:$0xff] }
 0x2da   :  { %v12353_v22 = vpop.f32.mrf.mxu1  ;;  %7290 = vmatprep.subr.bf16.mxu1 %v10775_v1  ;;  %v6939_v17 = vpop.f32.mrf.mxu0  ;;  %v10759_v1 = vcombine.high %v793_v5, %v797_v53  ;;  %v661_v10 = vld [vmem:[#allocation2 + $0x10f0] sm:$0xff] }
 0x2db   :  { %12571 = vst [vmem:[#allocation25_spill] sm:$0xff] %v12353_v22  ;;  %v6940_v14 = vadd.f32 %v6939_v17, %v12340_v7  ;;  %7248 = vmatpush1.bf16.msra.mxu0 %v10646_v44  ;;  %v785_v22 = vld [vmem:[#allocation2 + $0x14d0] sm:$0xff]  ;;  %v10758_v7 = vcombine.low %v793_v5, %v797_v53  ;;  %v10623_v44 = vcombine.high %v657_v15, %v661_v10 }
 0x2dc   :  { %v6982_v54 = vpop.f32.mrf.mxu1  ;;  %7249 = vmatprep.subr.bf16.mxu0 %v10639_v13  ;;  %v10751_v11 = vcombine.high %v785_v22, %v789_v31  ;;  %v10622_v13 = vcombine.low %v657_v15, %v661_v10  ;;  %v645_v19 = vld [vmem:[#allocation2 + $0x1070] sm:$0xff]  ;;  %v10742_v53 = vcombine.low %v777_v38, %v781_v24 }
 0x2dd   :  { %7291 = vmatpush1.bf16.msra.mxu1 %v10774_v57  ;;  %v12358_v41 = vadd.f32 %v6982_v54, %v6940_v14  ;;  %v653_v57 = vld [vmem:[#allocation2 + $0x10b0] sm:$0xff]  ;;  %v10743_v14 = vcombine.high %v777_v38, %v781_v24 }
 0x2de   :  { %7292 = vmatprep.subr.bf16.mxu1 %v10767_v37  ;;  %v10750_v37 = vcombine.low %v785_v22, %v789_v31  ;;  %v10615_v17 = vcombine.high %v649_v51, %v653_v57  ;;  %v769_v35 = vld [vmem:[#allocation2 + $0x1450] sm:$0xff]  ;;  %v10614_v5 = vcombine.low %v649_v51, %v653_v57 }
 0x2df   :  { %7250 = vmatpush1.bf16.msra.mxu0 %v10638_v40  ;;  %v641_v40 = vld [vmem:[#allocation2 + $0x1050] sm:$0xff] }
 0x2e0   :  { %7251 = vmatprep.subr.bf16.mxu0 %v10631_v20  ;;  %v773_v54 = vld [vmem:[#allocation2 + $0x1470] sm:$0xff]  ;;  %v10606_v31 = vcombine.low %v641_v40, %v645_v19 }
 0x2e1   :  { %7293 = vmatpush1.bf16.msra.mxu1 %v10766_v30  ;;  %v10607_v30 = vcombine.high %v641_v40, %v645_v19  ;;  %v10735_v20 = vcombine.high %v769_v35, %v773_v54  ;;  %v761_v15 = vld [vmem:[#allocation2 + $0x1410] sm:$0xff]  ;;  %v10734_v22 = vcombine.low %v769_v35, %v773_v54 }
 0x2e2   :  { %7294 = vmatprep.subr.bf16.mxu1 %v10759_v1  ;;  %v637_v1 = vld [vmem:[#allocation2 + $0x1030] sm:$0xff] }
 0x2e3   :  { %7252 = vmatpush1.bf16.msra.mxu0 %v10630_v32  ;;  %v633_v32 = vld [vmem:[#allocation2 + $0x1010] sm:$0xff] }
 0x2e4   :  { %7253 = vmatprep.subr.bf16.mxu0 %v10623_v44  ;;  %v765_v10 = vld [vmem:[#allocation2 + $0x1430] sm:$0xff]  ;;  %v10598_v38 = vcombine.low %v633_v32, %v637_v1 }
 0x2e5   :  { %7295 = vmatpush1.bf16.msra.mxu1 %v10758_v7  ;;  %v10599_v7 = vcombine.high %v633_v32, %v637_v1  ;;  %v10727_v44 = vcombine.high %v761_v15, %v765_v10  ;;  %v757_v51 = vld [vmem:[#allocation2 + $0x13f0] sm:$0xff]  ;;  %v10726_v24 = vcombine.low %v761_v15, %v765_v10 }
 0x2e6   :  { %7296 = vmatprep.subr.bf16.mxu1 %v10751_v11  ;;  %v753_v11 = vld [vmem:[#allocation2 + $0x13d0] sm:$0xff] }
 0x2e7   :  { %7254 = vmatpush1.bf16.msra.mxu0 %v10622_v13  ;;  %v881_v57 = vld [vmem:[#allocation2 + $0x17d0] sm:$0xff]  ;;  %v10718_v35 = vcombine.low %v753_v11, %v757_v51 }
 0x2e8   :  { %7255 = vmatprep.subr.bf16.mxu0 %v10615_v17  ;;  %v885_v13 = vld [vmem:[#allocation2 + $0x17f0] sm:$0xff] }
 0x2e9   :  { %7297 = vmatpush1.bf16.msra.mxu1 %v10750_v37  ;;  %v10719_v37 = vcombine.high %v753_v11, %v757_v51  ;;  %v10847_v17 = vcombine.high %v881_v57, %v885_v13  ;;  %v749_v40 = vld [vmem:[#allocation2 + $0x13b0] sm:$0xff]  ;;  %v10846_v54 = vcombine.low %v881_v57, %v885_v13 }
 0x2ea   :  { %7298 = vmatprep.subr.bf16.mxu1 %v10743_v14  ;;  %v745_v14 = vld [vmem:[#allocation2 + $0x1390] sm:$0xff] }
 0x2eb   :  { %7256 = vmatpush1.bf16.msra.mxu0 %v10614_v5  ;;  %v873_v19 = vld [vmem:[#allocation2 + $0x1790] sm:$0xff]  ;;  %v10710_v15 = vcombine.low %v745_v14, %v749_v40 }
 0x2ec   :  { %7257 = vmatprep.subr.bf16.mxu0 %v10607_v30  ;;  %v877_v5 = vld [vmem:[#allocation2 + $0x17b0] sm:$0xff] }
 0x2ed   :  { %7299 = vmatpush1.bf16.msra.mxu1 %v10742_v53  ;;  %v10711_v53 = vcombine.high %v745_v14, %v749_v40  ;;  %v10839_v30 = vcombine.high %v873_v19, %v877_v5  ;;  %v741_v32 = vld [vmem:[#allocation2 + $0x1370] sm:$0xff]  ;;  %v10838_v10 = vcombine.low %v873_v19, %v877_v5 }
 0x2ee   :  { %7300 = vmatprep.subr.bf16.mxu1 %v10735_v20  ;;  %v737_v20 = vld [vmem:[#allocation2 + $0x1350] sm:$0xff] }
 0x2ef   :  { %7258 = vmatpush1.bf16.msra.mxu0 %v10606_v31  ;;  %v865_v1 = vld [vmem:[#allocation2 + $0x1750] sm:$0xff]  ;;  %v10702_v57 = vcombine.low %v737_v20, %v741_v32 }
 0x2f0   :  { %7259 = vmatprep.subr.bf16.mxu0 %v10599_v7  ;;  %v869_v31 = vld [vmem:[#allocation2 + $0x1770] sm:$0xff] }
 0x2f1   :  { %7301 = vmatpush1.bf16.msra.mxu1 %v10734_v22  ;;  %v10703_v22 = vcombine.high %v737_v20, %v741_v32  ;;  %v10831_v7 = vcombine.high %v865_v1, %v869_v31  ;;  %v733_v11 = vld [vmem:[#allocation2 + $0x1330] sm:$0xff]  ;;  %v10830_v13 = vcombine.low %v865_v1, %v869_v31 }
 0x2f2   :  { %7302 = vmatprep.subr.bf16.mxu1 %v10727_v44  ;;  %v729_v44 = vld [vmem:[#allocation2 + $0x1310] sm:$0xff] }
 0x2f3   :  { %7260 = vmatpush1.bf16.msra.mxu0 %v10598_v38  ;;  %v857_v51 = vld [vmem:[#allocation2 + $0x1710] sm:$0xff]  ;;  %v10694_v19 = vcombine.low %v729_v44, %v733_v11 }
 0x2f4   :  { %7261 = vmatprep.subr.bf16.mxu0 %v10719_v37  ;;  %v861_v38 = vld [vmem:[#allocation2 + $0x1730] sm:$0xff] }
 0x2f5   :  { %7303 = vmatpush1.bf16.msra.mxu1 %v10726_v24  ;;  %v10695_v24 = vcombine.high %v729_v44, %v733_v11  ;;  %v10823_v37 = vcombine.high %v857_v51, %v861_v38  ;;  %v725_v14 = vld [vmem:[#allocation2 + $0x12f0] sm:$0xff]  ;;  %v10822_v5 = vcombine.low %v857_v51, %v861_v38 }
 0x2f6   :  { %7304 = vmatprep.subr.bf16.mxu1 %v10847_v17  ;;  %v721_v17 = vld [vmem:[#allocation2 + $0x12d0] sm:$0xff] }
 0x2f7   :  { %7262 = vmatpush2.bf16.msra.mxu0 %v10718_v35  ;;  %v849_v40 = vld [vmem:[#allocation2 + $0x16d0] sm:$0xff]  ;;  %v10686_v1 = vcombine.low %v721_v17, %v725_v14 }
 0x2f8   :  { %7263 = vmatprep.subr.bf16.mxu0 %v10711_v53  ;;  %v853_v35 = vld [vmem:[#allocation2 + $0x16f0] sm:$0xff] }
 0x2f9   :  { %7305 = vmatpush2.bf16.msra.mxu1 %v10846_v54  ;;  %v10687_v54 = vcombine.high %v721_v17, %v725_v14  ;;  %v10815_v53 = vcombine.high %v849_v40, %v853_v35  ;;  %v717_v20 = vld [vmem:[#allocation2 + $0x12b0] sm:$0xff]  ;;  %v10814_v31 = vcombine.low %v849_v40, %v853_v35 }
 0x2fa   :  { %7306 = vmatprep.subr.bf16.mxu1 %v10839_v30  ;;  %v713_v30 = vld [vmem:[#allocation2 + $0x1290] sm:$0xff] }
 0x2fb   :  { %7264 = vmatpush2.bf16.msra.mxu0 %v10710_v15  ;;  %v841_v32 = vld [vmem:[#allocation2 + $0x1690] sm:$0xff]  ;;  %v10678_v51 = vcombine.low %v713_v30, %v717_v20 }
 0x2fc   :  { %7265 = vmatprep.subr.bf16.mxu0 %v10703_v22  ;;  %v845_v15 = vld [vmem:[#allocation2 + $0x16b0] sm:$0xff] }
 0x2fd   :  { %7307 = vmatpush2.bf16.msra.mxu1 %v10838_v10  ;;  %v10679_v10 = vcombine.high %v713_v30, %v717_v20  ;;  %v10807_v22 = vcombine.high %v841_v32, %v845_v15  ;;  %v709_v44 = vld [vmem:[#allocation2 + $0x1270] sm:$0xff]  ;;  %v10806_v38 = vcombine.low %v841_v32, %v845_v15 }
 0x2fe   :  { %7308 = vmatprep.subr.bf16.mxu1 %v10831_v7  ;;  %v705_v7 = vld [vmem:[#allocation2 + $0x1250] sm:$0xff] }
 0x2ff   :  { %7266 = vmatpush2.bf16.msra.mxu0 %v10702_v57  ;;  %v833_v11 = vld [vmem:[#allocation2 + $0x1650] sm:$0xff]  ;;  %v10670_v40 = vcombine.low %v705_v7, %v709_v44 }
 0x300   :  { %7267 = vmatprep.subr.bf16.mxu0 %v10695_v24  ;;  %v837_v57 = vld [vmem:[#allocation2 + $0x1670] sm:$0xff] }
 0x301   :  { %7309 = vmatpush2.bf16.msra.mxu1 %v10830_v13  ;;  %v10671_v13 = vcombine.high %v705_v7, %v709_v44  ;;  %v10799_v24 = vcombine.high %v833_v11, %v837_v57  ;;  %v701_v17 = vld [vmem:[#allocation2 + $0x1230] sm:$0xff]  ;;  %v10798_v35 = vcombine.low %v833_v11, %v837_v57  ;;  %v12360_v57 = vpop.f32.mrf.mxu0 }
 0x302   :  { %7310 = vmatprep.subr.bf16.mxu1 %v10823_v37  ;;  %v697_v37 = vld [vmem:[#allocation2 + $0x1210] sm:$0xff] }
 0x303   :  { %7268 = vmatpush2.bf16.msra.mxu0 %v10694_v19  ;;  %v825_v14 = vld [vmem:[#allocation2 + $0x1610] sm:$0xff]  ;;  %v10662_v32 = vcombine.low %v697_v37, %v701_v17 }
 0x304   :  { %7269 = vmatprep.subr.bf16.mxu0 %v10687_v54  ;;  %v829_v19 = vld [vmem:[#allocation2 + $0x1630] sm:$0xff] }
 0x305   :  { %7311 = vmatpush2.bf16.msra.mxu1 %v10822_v5  ;;  %v10663_v5 = vcombine.high %v697_v37, %v701_v17  ;;  %v10791_v54 = vcombine.high %v825_v14, %v829_v19  ;;  %v949_v30 = vld [vmem:[#allocation2 + $0x19f0] sm:$0xff]  ;;  %v10790_v15 = vcombine.low %v825_v14, %v829_v19 }
 0x306   :  { %7312 = vmatprep.subr.bf16.mxu1 %v10815_v53  ;;  %v945_v53 = vld [vmem:[#allocation2 + $0x19d0] sm:$0xff] }
 0x307   :  { %7270 = vmatpush2.bf16.msra.mxu0 %v10686_v1  ;;  %v1073_v20 = vld [vmem:[#allocation2 + $0x1dd0] sm:$0xff]  ;;  %v10910_v11 = vcombine.low %v945_v53, %v949_v30 }
 0x308   :  { %7271 = vmatprep.subr.bf16.mxu0 %v10679_v10  ;;  %v1077_v1 = vld [vmem:[#allocation2 + $0x1df0] sm:$0xff] }
 0x309   :  { %7313 = vmatpush2.bf16.msra.mxu1 %v10814_v31  ;;  %v10911_v31 = vcombine.high %v945_v53, %v949_v30  ;;  %v11039_v10 = vcombine.high %v1073_v20, %v1077_v1  ;;  %v941_v7 = vld [vmem:[#allocation2 + $0x19b0] sm:$0xff] }
 0x30a   :  { %7314 = vmatprep.subr.bf16.mxu1 %v10807_v22  ;;  %v937_v22 = vld [vmem:[#allocation2 + $0x1990] sm:$0xff] }
 0x30b   :  { %7272 = vmatpush2.bf16.msra.mxu0 %v10678_v51  ;;  %v1065_v44 = vld [vmem:[#allocation2 + $0x1d90] sm:$0xff]  ;;  %v10902_v53 = vcombine.low %v937_v22, %v941_v7 }
 0x30c   :  { %7273 = vmatprep.subr.bf16.mxu0 %v10671_v13  ;;  %v1069_v51 = vld [vmem:[#allocation2 + $0x1db0] sm:$0xff]  ;;  %v10903_v13 = vcombine.high %v937_v22, %v941_v7 }
 0x30d   :  { %7315 = vmatpush2.bf16.msra.mxu1 %v10806_v38  ;;  %v11038_v38 = vcombine.low %v1073_v20, %v1077_v1  ;;  %v11031_v37 = vcombine.high %v1065_v44, %v1069_v51  ;;  %v929_v17 = vld [vmem:[#allocation2 + $0x1950] sm:$0xff]  ;;  %v11030_v20 = vcombine.low %v1065_v44, %v1069_v51 }
 0x30e   :  { %7316 = vmatprep.subr.bf16.mxu1 %v10799_v24  ;;  %v12362_v24 = vpop.f32.mrf.mxu1  ;;  %v933_v14 = vld [vmem:[#allocation2 + $0x1970] sm:$0xff] }
 0x30f   :  { %7274 = vmatpush2.bf16.msra.mxu0 %v10670_v40  ;;  %12572 = vst [vmem:[#allocation26_spill] sm:$0xff] %v12362_v24  ;;  %v1057_v40 = vld [vmem:[#allocation2 + $0x1d50] sm:$0xff]  ;;  %v10895_v1 = vcombine.high %v929_v17, %v933_v14  ;;  %v10894_v7 = vcombine.low %v929_v17, %v933_v14 }
 0x310   :  { %7275 = vmatprep.subr.bf16.mxu0 %v10663_v5  ;;  %v925_v24 = vld [vmem:[#allocation2 + $0x1930] sm:$0xff] }
 0x311   :  { %7317 = vmatpush2.bf16.msra.mxu1 %v10798_v35  ;;  %v1061_v35 = vld [vmem:[#allocation2 + $0x1d70] sm:$0xff] }
 0x312   :  { %7318 = vmatprep.subr.bf16.mxu1 %v10791_v54  ;;  %v11022_v51 = vcombine.low %v1057_v40, %v1061_v35 }
 0x313   :  { %7276 = vmatpush2.bf16.msra.mxu0 %v10662_v32 }
 0x314   :  { %7331 = vmatprep.subr.bf16.mxu0 %v10911_v31  ;;  %v11023_v31 = vcombine.high %v1057_v40, %v1061_v35  ;;  %v905_v35 = vld [vmem:[#allocation2 + $0x1890] sm:$0xff] }
 0x315   :  { %7319 = vmatpush2.bf16.msra.mxu1 %v10790_v15 }
 0x316   :  { %7374 = vmatprep.subr.bf16.mxu1 %v11039_v10  ;;  %v7021_v19 = vpop.f32.mrf.mxu0  ;;  %7278 = vmatmul.mubr.bf16.vlgmr.msra.gmra.mxu0 %v12210_v28  ;;  %v921_v10 = vld [vmem:[#allocation2 + $0x1910] sm:$0xff] }
 0x317   :  { %v7022_v5 = vadd.f32 %v7021_v19, %v12351_v42  ;;  %7332 = vmatpush1.bf16.msra.mxu0 %v10910_v11  ;;  %7363 = vmatprep.mubr.bf16.mxu0 %v12218_v45  ;;  %v1049_v19 = vld [vmem:[#allocation2 + $0x1d10] sm:$0xff]  ;;  %v10887_v11 = vcombine.high %v921_v10, %v925_v24  ;;  %v10886_v59 = vcombine.low %v921_v10, %v925_v24 }
 0x318   :  { %v7064_v54 = vpop.f32.mrf.mxu1  ;;  %7321 = vmatmul.mubr.bf16.vlgmr.msra.gmra.mxu1 %v12214_v29  ;;  %v12367_v30 = vpop.f32.mrf.mxu0  ;;  %7333 = vmatprep.subr.bf16.mxu0 %v10903_v13  ;;  %v11015_v13 = vcombine.high %v1049_v19, %v1053_v8  ;;  %v897_v10 = vld [vmem:[#allocation2 + $0x1850] sm:$0xff] }
 0x319   :  { %7375 = vmatpush1.bf16.msra.mxu1 %v11038_v38  ;;  %12573 = vst [vmem:[#allocation27_spill] sm:$0xff] %v12367_v30  ;;  %v7065_v32 = vadd.f32 %v7064_v54, %v7022_v5  ;;  %7406 = vmatprep.mubr.bf16.mxu1 %v12223_v47  ;;  %v917_v5 = vld [vmem:[#allocation2 + $0x18f0] sm:$0xff] }
 0x31a   :  { %v12369_v15 = vpop.f32.mrf.mxu1  ;;  %7376 = vmatprep.subr.bf16.mxu1 %v11031_v37  ;;  %v7025_v42 = vpop.f32.mrf.mxu0  ;;  %v913_v37 = vld [vmem:[#allocation2 + $0x18d0] sm:$0xff] }
 0x31b   :  { %12574 = vst [vmem:[#allocation28_spill] sm:$0xff] %v12369_v15  ;;  %v7026_v22 = vadd.f32 %v7025_v42, %v12358_v41  ;;  %7334 = vmatpush1.bf16.msra.mxu0 %v10902_v53  ;;  %v1041_v54 = vld [vmem:[#allocation2 + $0x1cd0] sm:$0xff]  ;;  %v7763_v30 = vmax.f32 %v7065_v32, 0.0  ;;  %v11014_v41 = vcombine.low %v1049_v19, %v1053_v8  ;;  %v10879_v17 = vcombine.high %v913_v37, %v917_v5 }
 0x31c   :  { %v7068_v44 = vpop.f32.mrf.mxu1  ;;  %7335 = vmatprep.subr.bf16.mxu0 %v10895_v1  ;;  %v1045_v15 = vld [vmem:[#allocation2 + $0x1cf0] sm:$0xff] }
 0x31d   :  { %7377 = vmatpush1.bf16.msra.mxu1 %v11030_v20  ;;  %v7069_v38 = vadd.f32 %v7068_v44, %v7026_v22  ;;  %v11007_v40 = vcombine.high %v1041_v54, %v1045_v15  ;;  %v909_v53 = vld [vmem:[#allocation2 + $0x18b0] sm:$0xff]  ;;  %v11006_v32 = vcombine.low %v1041_v54, %v1045_v15 }
 0x31e   :  { %7378 = vmatprep.subr.bf16.mxu1 %v11023_v31  ;;  %v1033_v20 = vld [vmem:[#allocation2 + $0x1c90] sm:$0xff]  ;;  %v10878_v31 = vcombine.low %v913_v37, %v917_v5  ;;  %v10871_v42 = vcombine.high %v905_v35, %v909_v53 }
 0x31f   :  { %v7771_v23 = vmax.f32 %v7069_v38, 0.0  ;;  %7336 = vmatpush1.bf16.msra.mxu0 %v10894_v7  ;;  %v1037_v1 = vld [vmem:[#allocation2 + $0x1cb0] sm:$0xff] }
 0x320   :  { %7337 = vmatprep.subr.bf16.mxu0 %v10887_v11  ;;  %v10999_v24 = vcombine.high %v1033_v20, %v1037_v1  ;;  %v901_v22 = vld [vmem:[#allocation2 + $0x1870] sm:$0xff] }
 0x321   :  { %7379 = vmatpush1.bf16.msra.mxu1 %v11022_v51  ;;  %v12374_v14 = vpack.c.bf16 %v7771_v23, %v7763_v30  ;;  %v1025_v8 = vld [vmem:[#allocation2 + $0x1c50] sm:$0xff]  ;;  %v10870_v23 = vcombine.low %v905_v35, %v909_v53  ;;  %v10998_v30 = vcombine.low %v1033_v20, %v1037_v1  ;;  %v10863_v7 = vcombine.high %v897_v10, %v901_v22 }
 0x322   :  { %7380 = vmatprep.subr.bf16.mxu1 %v11015_v13  ;;  %v1029_v19 = vld [vmem:[#allocation2 + $0x1c70] sm:$0xff]  ;;  %v10862_v15 = vcombine.low %v897_v10, %v901_v22 }
 0x323   :  { %12575 = vst [vmem:[#allocation29_spill] sm:$0xff] %v12374_v14  ;;  %7338 = vmatpush1.bf16.msra.mxu0 %v10886_v59  ;;  %v10991_v44 = vcombine.high %v1025_v8, %v1029_v19  ;;  %v889_v59 = vld [vmem:[#allocation2 + $0x1810] sm:$0xff]  ;;  %v10990_v13 = vcombine.low %v1025_v8, %v1029_v19  ;;  %v278_v14 = vld [vmem:[#allocation2 + $0x4f8] sm:$0xff] }
 0x324   :  { %7339 = vmatprep.subr.bf16.mxu0 %v10879_v17  ;;  %v893_v51 = vld [vmem:[#allocation2 + $0x1830] sm:$0xff] }
 0x325   :  { %7381 = vmatpush1.bf16.msra.mxu1 %v11014_v41  ;;  %v1017_v11 = vld [vmem:[#allocation2 + $0x1c10] sm:$0xff]  ;;  %v10855_v37 = vcombine.high %v889_v59, %v893_v51  ;;  %v10854_v35 = vcombine.low %v889_v59, %v893_v51 }
 0x326   :  { %7382 = vmatprep.subr.bf16.mxu1 %v11007_v40  ;;  %v1021_v38 = vld [vmem:[#allocation2 + $0x1c30] sm:$0xff] }
 0x327   :  { %7340 = vmatpush1.bf16.msra.mxu0 %v10878_v31  ;;  %v10983_v5 = vcombine.high %v1017_v11, %v1021_v38  ;;  %v1009_v54 = vld [vmem:[#allocation2 + $0x1bd0] sm:$0xff]  ;;  %v10982_v53 = vcombine.low %v1017_v11, %v1021_v38 }
 0x328   :  { %7341 = vmatprep.subr.bf16.mxu0 %v10871_v42  ;;  %v1013_v41 = vld [vmem:[#allocation2 + $0x1bf0] sm:$0xff] }
 0x329   :  { %7383 = vmatpush1.bf16.msra.mxu1 %v11006_v32  ;;  %v1137_v17 = vld [vmem:[#allocation2 + $0x1fd0] sm:$0xff]  ;;  %v10975_v20 = vcombine.high %v1009_v54, %v1013_v41  ;;  %v10974_v10 = vcombine.low %v1009_v54, %v1013_v41 }
 0x32a   :  { %7384 = vmatprep.subr.bf16.mxu1 %v10999_v24  ;;  %v1141_v40 = vld [vmem:[#allocation2 + $0x1ff0] sm:$0xff] }
 0x32b   :  { %7342 = vmatpush1.bf16.msra.mxu0 %v10870_v23  ;;  %v11103_v1 = vcombine.high %v1137_v17, %v1141_v40  ;;  %v1001_v31 = vld [vmem:[#allocation2 + $0x1b90] sm:$0xff]  ;;  %v11102_v22 = vcombine.low %v1137_v17, %v1141_v40 }
 0x32c   :  { %7343 = vmatprep.subr.bf16.mxu0 %v10863_v7  ;;  %v1005_v32 = vld [vmem:[#allocation2 + $0x1bb0] sm:$0xff] }
 0x32d   :  { %7385 = vmatpush1.bf16.msra.mxu1 %v10998_v30  ;;  %v1129_v42 = vld [vmem:[#allocation2 + $0x1f90] sm:$0xff]  ;;  %v10967_v8 = vcombine.high %v1001_v31, %v1005_v32  ;;  %v10966_v59 = vcombine.low %v1001_v31, %v1005_v32 }
 0x32e   :  { %7386 = vmatprep.subr.bf16.mxu1 %v10991_v44  ;;  %v1133_v24 = vld [vmem:[#allocation2 + $0x1fb0] sm:$0xff] }
 0x32f   :  { %7344 = vmatpush1.bf16.msra.mxu0 %v10862_v15  ;;  %v11095_v19 = vcombine.high %v1129_v42, %v1133_v24  ;;  %v993_v23 = vld [vmem:[#allocation2 + $0x1b50] sm:$0xff]  ;;  %v11094_v51 = vcombine.low %v1129_v42, %v1133_v24 }
 0x330   :  { %7345 = vmatprep.subr.bf16.mxu0 %v10855_v37  ;;  %v997_v30 = vld [vmem:[#allocation2 + $0x1b70] sm:$0xff] }
 0x331   :  { %7387 = vmatpush1.bf16.msra.mxu1 %v10990_v13  ;;  %v1121_v7 = vld [vmem:[#allocation2 + $0x1f50] sm:$0xff]  ;;  %v10959_v11 = vcombine.high %v993_v23, %v997_v30  ;;  %v10958_v54 = vcombine.low %v993_v23, %v997_v30 }
 0x332   :  { %7388 = vmatprep.subr.bf16.mxu1 %v10983_v5  ;;  %v1125_v44 = vld [vmem:[#allocation2 + $0x1f70] sm:$0xff] }
 0x333   :  { %7346 = vmatpush1.bf16.msra.mxu0 %v10854_v35  ;;  %v11087_v38 = vcombine.high %v1121_v7, %v1125_v44  ;;  %v985_v15 = vld [vmem:[#allocation2 + $0x1b10] sm:$0xff]  ;;  %v11086_v41 = vcombine.low %v1121_v7, %v1125_v44 }
 0x334   :  { %7347 = vmatprep.subr.bf16.mxu0 %v10975_v20  ;;  %v989_v13 = vld [vmem:[#allocation2 + $0x1b30] sm:$0xff] }
 0x335   :  { %7389 = vmatpush1.bf16.msra.mxu1 %v10982_v53  ;;  %v1113_v37 = vld [vmem:[#allocation2 + $0x1f10] sm:$0xff]  ;;  %v10951_v17 = vcombine.high %v985_v15, %v989_v13  ;;  %v10950_v31 = vcombine.low %v985_v15, %v989_v13 }
 0x336   :  { %7390 = vmatprep.subr.bf16.mxu1 %v11103_v1  ;;  %v1117_v5 = vld [vmem:[#allocation2 + $0x1f30] sm:$0xff] }
 0x337   :  { %7348 = vmatpush2.bf16.msra.mxu0 %v10974_v10  ;;  %v11079_v40 = vcombine.high %v1113_v37, %v1117_v5  ;;  %v977_v35 = vld [vmem:[#allocation2 + $0x1ad0] sm:$0xff]  ;;  %v11078_v32 = vcombine.low %v1113_v37, %v1117_v5 }
 0x338   :  { %7349 = vmatprep.subr.bf16.mxu0 %v10967_v8  ;;  %v981_v53 = vld [vmem:[#allocation2 + $0x1af0] sm:$0xff] }
 0x339   :  { %7391 = vmatpush2.bf16.msra.mxu1 %v11102_v22  ;;  %v1105_v20 = vld [vmem:[#allocation2 + $0x1ed0] sm:$0xff]  ;;  %v10943_v42 = vcombine.high %v977_v35, %v981_v53  ;;  %v10942_v23 = vcombine.low %v977_v35, %v981_v53 }
 0x33a   :  { %7392 = vmatprep.subr.bf16.mxu1 %v11095_v19  ;;  %v1109_v1 = vld [vmem:[#allocation2 + $0x1ef0] sm:$0xff] }
 0x33b   :  { %7350 = vmatpush2.bf16.msra.mxu0 %v10966_v59  ;;  %v11071_v24 = vcombine.high %v1105_v20, %v1109_v1  ;;  %v969_v10 = vld [vmem:[#allocation2 + $0x1a90] sm:$0xff]  ;;  %v11070_v30 = vcombine.low %v1105_v20, %v1109_v1 }
 0x33c   :  { %7351 = vmatprep.subr.bf16.mxu0 %v10959_v11  ;;  %v973_v22 = vld [vmem:[#allocation2 + $0x1ab0] sm:$0xff] }
 0x33d   :  { %7393 = vmatpush2.bf16.msra.mxu1 %v11094_v51  ;;  %v1097_v8 = vld [vmem:[#allocation2 + $0x1e90] sm:$0xff]  ;;  %v10935_v7 = vcombine.high %v969_v10, %v973_v22  ;;  %v10934_v15 = vcombine.low %v969_v10, %v973_v22  ;;  %v1163_v22 = vsub.s32 4, %v12228_v56 }
 0x33e   :  { %7394 = vmatprep.subr.bf16.mxu1 %v11087_v38  ;;  %v1101_v19 = vld [vmem:[#allocation2 + $0x1eb0] sm:$0xff] }
 0x33f   :  { %7352 = vmatpush2.bf16.msra.mxu0 %v10958_v54  ;;  %v11063_v44 = vcombine.high %v1097_v8, %v1101_v19  ;;  %v961_v59 = vld [vmem:[#allocation2 + $0x1a50] sm:$0xff]  ;;  %v11062_v13 = vcombine.low %v1097_v8, %v1101_v19 }
 0x340   :  { %7353 = vmatprep.subr.bf16.mxu0 %v10951_v17  ;;  %v965_v51 = vld [vmem:[#allocation2 + $0x1a70] sm:$0xff] }
 0x341   :  { %7395 = vmatpush2.bf16.msra.mxu1 %v11086_v41  ;;  %v1089_v11 = vld [vmem:[#allocation2 + $0x1e50] sm:$0xff]  ;;  %v10927_v37 = vcombine.high %v961_v59, %v965_v51  ;;  %v10926_v35 = vcombine.low %v961_v59, %v965_v51  ;;  %v302_v59 = vld [vmem:[#allocation2 + $0x5b8] sm:$0xff]  ;;  %v11878_v51 = vld [vmem:[#allocation4] sm:$0xff] }
 0x342   :  { %7396 = vmatprep.subr.bf16.mxu1 %v11079_v40  ;;  %v1093_v38 = vld [vmem:[#allocation2 + $0x1e70] sm:$0xff] }
 0x343   :  { %7354 = vmatpush2.bf16.msra.mxu0 %v10950_v31  ;;  %v11055_v5 = vcombine.high %v1089_v11, %v1093_v38  ;;  %v953_v54 = vld [vmem:[#allocation2 + $0x1a10] sm:$0xff]  ;;  %v11054_v53 = vcombine.low %v1089_v11, %v1093_v38  ;;  %v178_v31 = vld [vmem:[#allocation2 + $0x1d8] sm:$0xff]  ;;  %v1164_v11 = vrot.slane %v11878_v51, %v1163_v22 }
 0x344   :  { %7355 = vmatprep.subr.bf16.mxu0 %v10943_v42  ;;  %v957_v41 = vld [vmem:[#allocation2 + $0x1a30] sm:$0xff]  ;;  %v306_v42 = vld [vmem:[#allocation2 + $0x5d8] sm:$0xff] }
 0x345   :  { %7397 = vmatpush2.bf16.msra.mxu1 %v11078_v32  ;;  %v1081_v17 = vld [vmem:[#allocation2 + $0x1e10] sm:$0xff]  ;;  %v10919_v20 = vcombine.high %v953_v54, %v957_v41  ;;  %v182_v32 = vld [vmem:[#allocation2 + $0x1f8] sm:$0xff]  ;;  %v10918_v10 = vcombine.low %v953_v54, %v957_v41 }
 0x346   :  { %7398 = vmatprep.subr.bf16.mxu1 %v11071_v24  ;;  %v1085_v40 = vld [vmem:[#allocation2 + $0x1e30] sm:$0xff]  ;;  %v310_v24 = vld [vmem:[#allocation2 + $0x5f8] sm:$0xff]  ;;  %v10145_v19 = vcombine.high %v178_v31, %v182_v32  ;;  %v10144_v38 = vcombine.low %v178_v31, %v182_v32 }
 0x347   :  { %7356 = vmatpush2.bf16.msra.mxu0 %v10942_v23  ;;  %v11047_v1 = vcombine.high %v1081_v17, %v1085_v40  ;;  %v11046_v8 = vcombine.low %v1081_v17, %v1085_v40  ;;  %v10273_v23 = vcombine.high %v306_v42, %v310_v24  ;;  %v162_v41 = vld [vmem:[#allocation2 + $0x158] sm:$0xff] }
 0x348   :  { %7357 = vmatprep.subr.bf16.mxu0 %v10935_v7  ;;  %v174_v7 = vld [vmem:[#allocation2 + $0x1b8] sm:$0xff] }
 0x349   :  { %7399 = vmatpush2.bf16.msra.mxu1 %v11070_v30  ;;  %v170_v30 = vld [vmem:[#allocation2 + $0x198] sm:$0xff] }
 0x34a   :  { %7400 = vmatprep.subr.bf16.mxu1 %v11063_v44  ;;  %v298_v44 = vld [vmem:[#allocation2 + $0x598] sm:$0xff]  ;;  %v10136_v31 = vcombine.low %v170_v30, %v174_v7 }
 0x34b   :  { %7358 = vmatpush2.bf16.msra.mxu0 %v10934_v15  ;;  %v12377_v15 = vpop.f32.mrf.mxu0  ;;  %v10265_v54 = vcombine.high %v298_v44, %v302_v59  ;;  %v166_v17 = vld [vmem:[#allocation2 + $0x178] sm:$0xff] }
 0x34c   :  { %7359 = vmatprep.subr.bf16.mxu0 %v10927_v37  ;;  %v10137_v37 = vcombine.high %v170_v30, %v174_v7  ;;  %v10128_v7 = vcombine.low %v162_v41, %v166_v17 }
 0x34d   :  { %7401 = vmatpush2.bf16.msra.mxu1 %v11062_v13  ;;  %v10272_v13 = vcombine.low %v306_v42, %v310_v24  ;;  %v10264_v42 = vcombine.low %v298_v44, %v302_v59  ;;  %v10129_v24 = vcombine.high %v162_v41, %v166_v17  ;;  %v138_v17 = vld [vmem:[#allocation2 + $0x98] sm:$0xff] }
 0x34e   :  { %7402 = vmatprep.subr.bf16.mxu1 %v11055_v5  ;;  %v12379_v5 = vpop.f32.mrf.mxu1 }
 0x34f   :  { %7360 = vmatpush2.bf16.msra.mxu0 %v10926_v35  ;;  %v290_v35 = vld [vmem:[#allocation2 + $0x558] sm:$0xff] }
 0x350   :  { %7361 = vmatprep.subr.bf16.mxu0 %v10919_v20 }
 0x351   :  { %7403 = vmatpush2.bf16.msra.mxu1 %v11054_v53  ;;  %v294_v53 = vld [vmem:[#allocation2 + $0x578] sm:$0xff] }
 0x352   :  { %7404 = vmatprep.subr.bf16.mxu1 %v11047_v1  ;;  %v10256_v59 = vcombine.low %v290_v35, %v294_v53 }
 0x353   :  { %7362 = vmatpush2.bf16.msra.mxu0 %v10918_v10 }
 0x354   :  { %7417 = vmatprep.subr.bf16.mxu0 %v10145_v19  ;;  %v154_v19 = vld [vmem:[#allocation2 + $0x118] sm:$0xff] }
 0x355   :  { %7405 = vmatpush2.bf16.msra.mxu1 %v11046_v8  ;;  %v10257_v8 = vcombine.high %v290_v35, %v294_v53  ;;  %v266_v35 = vld [vmem:[#allocation2 + $0x498] sm:$0xff] }
 0x356   :  { %7460 = vmatprep.subr.bf16.mxu1 %v10273_v23  ;;  %v7107_v40 = vpop.f32.mrf.mxu0  ;;  %7364 = vmatmul.mubr.bf16.vlgmr.msra.gmra.mxu0 %v12233_v12  ;;  %v158_v23 = vld [vmem:[#allocation2 + $0x138] sm:$0xff] }
 0x357   :  { %v7108_v20 = vadd.f32 %v7107_v40, %v1164_v11  ;;  %7418 = vmatpush1.bf16.msra.mxu0 %v10144_v38  ;;  %7449 = vmatprep.mubr.bf16.mxu0 %v12090_v58  ;;  %v282_v40 = vld [vmem:[#allocation2 + $0x518] sm:$0xff] }
 0x358   :  { %v7150_v1 = vpop.f32.mrf.mxu1  ;;  %7407 = vmatmul.mubr.bf16.vlgmr.msra.gmra.mxu1 %v12239_v16  ;;  %v12383_v32 = vpop.f32.mrf.mxu0  ;;  %7419 = vmatprep.subr.bf16.mxu0 %v10137_v37  ;;  %v286_v38 = vld [vmem:[#allocation2 + $0x538] sm:$0xff] }
 0x359   :  { %7461 = vmatpush1.bf16.msra.mxu1 %v10272_v13  ;;  %v12385_v10 = vadd.f32 %v7150_v1, %v7108_v20  ;;  %7492 = vmatprep.mubr.bf16.mxu1 %v12104_v63  ;;  %v10121_v13 = vcombine.high %v154_v19, %v158_v23  ;;  %v146_v20 = vld [vmem:[#allocation2 + $0xd8] sm:$0xff]  ;;  %v10248_v63 = vcombine.low %v282_v40, %v286_v38 }
 0x35a   :  { %v12387_v22 = vpop.f32.mrf.mxu1  ;;  %7462 = vmatprep.subr.bf16.mxu1 %v10265_v54  ;;  %v7111_v51 = vpop.f32.mrf.mxu0  ;;  %v10249_v54 = vcombine.high %v282_v40, %v286_v38  ;;  %v150_v1 = vld [vmem:[#allocation2 + $0xf8] sm:$0xff] }
 0x35b   :  { %12576 = vst [vmem:[#allocation30_spill] sm:$0xff] %v12387_v22  ;;  %v7112_v30 = vadd.f32 %v7111_v51, %v1164_v11  ;;  %7420 = vmatpush1.bf16.msra.mxu0 %v10136_v31  ;;  %v274_v58 = vld [vmem:[#allocation2 + $0x4d8] sm:$0xff]  ;;  %v10120_v22 = vcombine.low %v154_v19, %v158_v23  ;;  %v10113_v11 = vcombine.high %v146_v20, %v150_v1 }
 0x35c   :  { %v7154_v44 = vpop.f32.mrf.mxu1  ;;  %7421 = vmatprep.subr.bf16.mxu0 %v10129_v24  ;;  %v10241_v41 = vcombine.high %v274_v58, %v278_v14  ;;  %v142_v31 = vld [vmem:[#allocation2 + $0xb8] sm:$0xff]  ;;  %v10240_v24 = vcombine.low %v274_v58, %v278_v14 }
 0x35d   :  { %7463 = vmatpush1.bf16.msra.mxu1 %v10264_v42  ;;  %v12391_v37 = vadd.f32 %v7154_v44, %v7112_v30  ;;  %v270_v53 = vld [vmem:[#allocation2 + $0x4b8] sm:$0xff]  ;;  %v10112_v42 = vcombine.low %v146_v20, %v150_v1  ;;  %v10104_v40 = vcombine.low %v138_v17, %v142_v31 }
 0x35e   :  { %7464 = vmatprep.subr.bf16.mxu1 %v10257_v8  ;;  %v10105_v8 = vcombine.high %v138_v17, %v142_v31  ;;  %v10233_v51 = vcombine.high %v266_v35, %v270_v53  ;;  %v130_v30 = vld [vmem:[#allocation2 + $0x58] sm:$0xff]  ;;  %v10232_v38 = vcombine.low %v266_v35, %v270_v53 }
 0x35f   :  { %7422 = vmatpush1.bf16.msra.mxu0 %v10128_v7  ;;  %v134_v19 = vld [vmem:[#allocation2 + $0x78] sm:$0xff] }
 0x360   :  { %7423 = vmatprep.subr.bf16.mxu0 %v10121_v13  ;;  %v258_v23 = vld [vmem:[#allocation2 + $0x458] sm:$0xff]  ;;  %v10097_v44 = vcombine.high %v130_v30, %v134_v19  ;;  %v10096_v14 = vcombine.low %v130_v30, %v134_v19 }
 0x361   :  { %7465 = vmatpush1.bf16.msra.mxu1 %v10256_v59  ;;  %v262_v7 = vld [vmem:[#allocation2 + $0x478] sm:$0xff] }
 0x362   :  { %7466 = vmatprep.subr.bf16.mxu1 %v10249_v54  ;;  %v10225_v59 = vcombine.high %v258_v23, %v262_v7  ;;  %v126_v13 = vld [vmem:[#allocation2 + $0x38] sm:$0xff]  ;;  %v10224_v1 = vcombine.low %v258_v23, %v262_v7 }
 0x363   :  { %7424 = vmatpush1.bf16.msra.mxu0 %v10120_v22  ;;  %v122_v22 = vld [vmem:[#allocation2 + $0x18] sm:$0xff] }
 0x364   :  { %7425 = vmatprep.subr.bf16.mxu0 %v10113_v11  ;;  %v250_v54 = vld [vmem:[#allocation2 + $0x418] sm:$0xff]  ;;  %v10089_v58 = vcombine.high %v122_v22, %v126_v13  ;;  %v10088_v35 = vcombine.low %v122_v22, %v126_v13 }
 0x365   :  { %7467 = vmatpush1.bf16.msra.mxu1 %v10248_v63  ;;  %v254_v20 = vld [vmem:[#allocation2 + $0x438] sm:$0xff] }
 0x366   :  { %7468 = vmatprep.subr.bf16.mxu1 %v10241_v41  ;;  %v10217_v63 = vcombine.high %v250_v54, %v254_v20  ;;  %v242_v11 = vld [vmem:[#allocation2 + $0x3d8] sm:$0xff]  ;;  %v10216_v53 = vcombine.low %v250_v54, %v254_v20 }
 0x367   :  { %7426 = vmatpush1.bf16.msra.mxu0 %v10112_v42  ;;  %v246_v41 = vld [vmem:[#allocation2 + $0x3f8] sm:$0xff] }
 0x368   :  { %7427 = vmatprep.subr.bf16.mxu0 %v10105_v8  ;;  %v370_v17 = vld [vmem:[#allocation2 + $0x7d8] sm:$0xff]  ;;  %v10209_v42 = vcombine.high %v242_v11, %v246_v41  ;;  %v10208_v23 = vcombine.low %v242_v11, %v246_v41 }
 0x369   :  { %7469 = vmatpush1.bf16.msra.mxu1 %v10240_v24  ;;  %v374_v31 = vld [vmem:[#allocation2 + $0x7f8] sm:$0xff] }
 0x36a   :  { %7470 = vmatprep.subr.bf16.mxu1 %v10233_v51  ;;  %v10337_v24 = vcombine.high %v370_v17, %v374_v31  ;;  %v234_v8 = vld [vmem:[#allocation2 + $0x398] sm:$0xff]  ;;  %v10336_v7 = vcombine.low %v370_v17, %v374_v31 }
 0x36b   :  { %7428 = vmatpush1.bf16.msra.mxu0 %v10104_v40  ;;  %v238_v51 = vld [vmem:[#allocation2 + $0x3b8] sm:$0xff] }
 0x36c   :  { %7429 = vmatprep.subr.bf16.mxu0 %v10097_v44  ;;  %v362_v30 = vld [vmem:[#allocation2 + $0x798] sm:$0xff]  ;;  %v10201_v40 = vcombine.high %v234_v8, %v238_v51  ;;  %v10200_v54 = vcombine.low %v234_v8, %v238_v51 }
 0x36d   :  { %7471 = vmatpush1.bf16.msra.mxu1 %v10232_v38  ;;  %v366_v19 = vld [vmem:[#allocation2 + $0x7b8] sm:$0xff] }
 0x36e   :  { %7472 = vmatprep.subr.bf16.mxu1 %v10225_v59  ;;  %v10329_v38 = vcombine.high %v362_v30, %v366_v19  ;;  %v226_v44 = vld [vmem:[#allocation2 + $0x358] sm:$0xff]  ;;  %v10328_v20 = vcombine.low %v362_v30, %v366_v19 }
 0x36f   :  { %7430 = vmatpush1.bf16.msra.mxu0 %v10096_v14  ;;  %v230_v59 = vld [vmem:[#allocation2 + $0x378] sm:$0xff] }
 0x370   :  { %7431 = vmatprep.subr.bf16.mxu0 %v10089_v58  ;;  %v354_v22 = vld [vmem:[#allocation2 + $0x758] sm:$0xff]  ;;  %v10193_v14 = vcombine.high %v226_v44, %v230_v59  ;;  %v10192_v17 = vcombine.low %v226_v44, %v230_v59 }
 0x371   :  { %7473 = vmatpush1.bf16.msra.mxu1 %v10224_v1  ;;  %v358_v13 = vld [vmem:[#allocation2 + $0x778] sm:$0xff] }
 0x372   :  { %7474 = vmatprep.subr.bf16.mxu1 %v10217_v63  ;;  %v10321_v1 = vcombine.high %v354_v22, %v358_v13  ;;  %v218_v58 = vld [vmem:[#allocation2 + $0x318] sm:$0xff]  ;;  %v10320_v31 = vcombine.low %v354_v22, %v358_v13 }
 0x373   :  { %7432 = vmatpush1.bf16.msra.mxu0 %v10088_v35  ;;  %v222_v63 = vld [vmem:[#allocation2 + $0x338] sm:$0xff] }
 0x374   :  { %7433 = vmatprep.subr.bf16.mxu0 %v10209_v42  ;;  %v346_v11 = vld [vmem:[#allocation2 + $0x718] sm:$0xff]  ;;  %v10185_v35 = vcombine.high %v218_v58, %v222_v63  ;;  %v10184_v30 = vcombine.low %v218_v58, %v222_v63 }
 0x375   :  { %7475 = vmatpush1.bf16.msra.mxu1 %v10216_v53  ;;  %v350_v41 = vld [vmem:[#allocation2 + $0x738] sm:$0xff] }
 0x376   :  { %7476 = vmatprep.subr.bf16.mxu1 %v10337_v24  ;;  %v10313_v53 = vcombine.high %v346_v11, %v350_v41  ;;  %v210_v42 = vld [vmem:[#allocation2 + $0x2d8] sm:$0xff]  ;;  %v10312_v19 = vcombine.low %v346_v11, %v350_v41 }
 0x377   :  { %7434 = vmatpush2.bf16.msra.mxu0 %v10208_v23  ;;  %v214_v24 = vld [vmem:[#allocation2 + $0x2f8] sm:$0xff] }
 0x378   :  { %7435 = vmatprep.subr.bf16.mxu0 %v10201_v40  ;;  %v338_v8 = vld [vmem:[#allocation2 + $0x6d8] sm:$0xff]  ;;  %v10177_v23 = vcombine.high %v210_v42, %v214_v24  ;;  %v10176_v22 = vcombine.low %v210_v42, %v214_v24 }
 0x379   :  { %7477 = vmatpush2.bf16.msra.mxu1 %v10336_v7  ;;  %v342_v51 = vld [vmem:[#allocation2 + $0x6f8] sm:$0xff] }
 0x37a   :  { %7478 = vmatprep.subr.bf16.mxu1 %v10329_v38  ;;  %v10305_v7 = vcombine.high %v338_v8, %v342_v51  ;;  %v202_v40 = vld [vmem:[#allocation2 + $0x298] sm:$0xff]  ;;  %v10304_v13 = vcombine.low %v338_v8, %v342_v51 }
 0x37b   :  { %7436 = vmatpush2.bf16.msra.mxu0 %v10200_v54  ;;  %v206_v38 = vld [vmem:[#allocation2 + $0x2b8] sm:$0xff] }
 0x37c   :  { %7437 = vmatprep.subr.bf16.mxu0 %v10193_v14  ;;  %v330_v44 = vld [vmem:[#allocation2 + $0x698] sm:$0xff]  ;;  %v10169_v54 = vcombine.high %v202_v40, %v206_v38  ;;  %v10168_v11 = vcombine.low %v202_v40, %v206_v38 }
 0x37d   :  { %7479 = vmatpush2.bf16.msra.mxu1 %v10328_v20  ;;  %v334_v59 = vld [vmem:[#allocation2 + $0x6b8] sm:$0xff] }
 0x37e   :  { %7480 = vmatprep.subr.bf16.mxu1 %v10321_v1  ;;  %v10297_v20 = vcombine.high %v330_v44, %v334_v59  ;;  %v194_v14 = vld [vmem:[#allocation2 + $0x258] sm:$0xff]  ;;  %v10296_v41 = vcombine.low %v330_v44, %v334_v59 }
 0x37f   :  { %7438 = vmatpush2.bf16.msra.mxu0 %v10192_v17  ;;  %v198_v1 = vld [vmem:[#allocation2 + $0x278] sm:$0xff] }
 0x380   :  { %7439 = vmatprep.subr.bf16.mxu0 %v10185_v35  ;;  %v322_v58 = vld [vmem:[#allocation2 + $0x658] sm:$0xff]  ;;  %v10161_v17 = vcombine.high %v194_v14, %v198_v1  ;;  %v10160_v8 = vcombine.low %v194_v14, %v198_v1 }
 0x381   :  { %7481 = vmatpush2.bf16.msra.mxu1 %v10320_v31  ;;  %v326_v63 = vld [vmem:[#allocation2 + $0x678] sm:$0xff] }
 0x382   :  { %7482 = vmatprep.subr.bf16.mxu1 %v10313_v53  ;;  %v10289_v31 = vcombine.high %v322_v58, %v326_v63  ;;  %v186_v35 = vld [vmem:[#allocation2 + $0x218] sm:$0xff]  ;;  %v10288_v51 = vcombine.low %v322_v58, %v326_v63  ;;  %v12393_v63 = vpop.f32.mrf.mxu0 }
 0x383   :  { %7440 = vmatpush2.bf16.msra.mxu0 %v10184_v30  ;;  %v190_v53 = vld [vmem:[#allocation2 + $0x238] sm:$0xff] }
 0x384   :  { %7441 = vmatprep.subr.bf16.mxu0 %v10177_v23  ;;  %v314_v42 = vld [vmem:[#allocation2 + $0x618] sm:$0xff]  ;;  %v10153_v30 = vcombine.high %v186_v35, %v190_v53  ;;  %v10152_v44 = vcombine.low %v186_v35, %v190_v53 }
 0x385   :  { %7483 = vmatpush2.bf16.msra.mxu1 %v10312_v19  ;;  %v318_v24 = vld [vmem:[#allocation2 + $0x638] sm:$0xff] }
 0x386   :  { %7484 = vmatprep.subr.bf16.mxu1 %v10305_v7  ;;  %v10281_v19 = vcombine.high %v314_v42, %v318_v24  ;;  %v434_v23 = vld [vmem:[#allocation2 + $0x9d8] sm:$0xff]  ;;  %v10280_v59 = vcombine.low %v314_v42, %v318_v24 }
 0x387   :  { %7442 = vmatpush2.bf16.msra.mxu0 %v10176_v22  ;;  %v438_v7 = vld [vmem:[#allocation2 + $0x9f8] sm:$0xff] }
 0x388   :  { %7443 = vmatprep.subr.bf16.mxu0 %v10169_v54  ;;  %v562_v40 = vld [vmem:[#allocation2 + $0xdd8] sm:$0xff]  ;;  %v10401_v22 = vcombine.high %v434_v23, %v438_v7  ;;  %v10400_v58 = vcombine.low %v434_v23, %v438_v7 }
 0x389   :  { %7485 = vmatpush2.bf16.msra.mxu1 %v10304_v13  ;;  %v566_v38 = vld [vmem:[#allocation2 + $0xdf8] sm:$0xff] }
 0x38a   :  { %7486 = vmatprep.subr.bf16.mxu1 %v10297_v20  ;;  %v10529_v13 = vcombine.high %v562_v40, %v566_v38  ;;  %v426_v54 = vld [vmem:[#allocation2 + $0x998] sm:$0xff] }
 0x38b   :  { %7444 = vmatpush2.bf16.msra.mxu0 %v10168_v11  ;;  %v430_v20 = vld [vmem:[#allocation2 + $0x9b8] sm:$0xff]  ;;  %v10528_v11 = vcombine.low %v562_v40, %v566_v38 }
 0x38c   :  { %7445 = vmatprep.subr.bf16.mxu0 %v10161_v17  ;;  %v554_v14 = vld [vmem:[#allocation2 + $0xd98] sm:$0xff]  ;;  %v12395_v17 = vpop.f32.mrf.mxu1 }
 0x38d   :  { %7487 = vmatpush2.bf16.msra.mxu1 %v10296_v41  ;;  %v558_v1 = vld [vmem:[#allocation2 + $0xdb8] sm:$0xff]  ;;  %v10393_v41 = vcombine.high %v426_v54, %v430_v20 }
 0x38e   :  { %7488 = vmatprep.subr.bf16.mxu1 %v10289_v31  ;;  %v10521_v31 = vcombine.high %v554_v14, %v558_v1  ;;  %v418_v35 = vld [vmem:[#allocation2 + $0x958] sm:$0xff]  ;;  %v10520_v7 = vcombine.low %v554_v14, %v558_v1 }
 0x38f   :  { %7446 = vmatpush2.bf16.msra.mxu0 %v10160_v8  ;;  %v422_v53 = vld [vmem:[#allocation2 + $0x978] sm:$0xff] }
 0x390   :  { %7447 = vmatprep.subr.bf16.mxu0 %v10153_v30  ;;  %v546_v24 = vld [vmem:[#allocation2 + $0xd58] sm:$0xff]  ;;  %v10385_v40 = vcombine.high %v418_v35, %v422_v53 }
 0x391   :  { %7489 = vmatpush2.bf16.msra.mxu1 %v10288_v51  ;;  %v550_v8 = vld [vmem:[#allocation2 + $0xd78] sm:$0xff] }
 0x392   :  { %7490 = vmatprep.subr.bf16.mxu1 %v10281_v19  ;;  %v10392_v19 = vcombine.low %v426_v54, %v430_v20  ;;  %v10384_v20 = vcombine.low %v418_v35, %v422_v53  ;;  %v10512_v1 = vcombine.low %v546_v24, %v550_v8  ;;  %v394_v53 = vld [vmem:[#allocation2 + $0x898] sm:$0xff] }
 0x393   :  { %7448 = vmatpush2.bf16.msra.mxu0 %v10152_v44 }
 0x394   :  { %7503 = vmatprep.subr.bf16.mxu0 %v10401_v22  ;;  %v414_v22 = vld [vmem:[#allocation2 + $0x938] sm:$0xff] }
 0x395   :  { %7491 = vmatpush2.bf16.msra.mxu1 %v10280_v59  ;;  %v410_v59 = vld [vmem:[#allocation2 + $0x918] sm:$0xff] }
 0x396   :  { %7546 = vmatprep.subr.bf16.mxu1 %v10529_v13  ;;  %v7193_v42 = vpop.f32.mrf.mxu0  ;;  %7450 = vmatmul.mubr.bf16.vlgmr.msra.gmra.mxu0 %v12110_v21  ;;  %v10513_v21 = vcombine.high %v546_v24, %v550_v8  ;;  %v542_v13 = vld [vmem:[#allocation2 + $0xd38] sm:$0xff] }
 0x397   :  { %v7194_v51 = vadd.f32 %v7193_v42, %v12385_v10  ;;  %7504 = vmatpush1.bf16.msra.mxu0 %v10400_v58  ;;  %7535 = vmatprep.mubr.bf16.mxu0 %v12138_v60  ;;  %v10377_v58 = vcombine.high %v410_v59, %v414_v22  ;;  %v406_v60 = vld [vmem:[#allocation2 + $0x8f8] sm:$0xff] }
 0x398   :  { %v7236_v30 = vpop.f32.mrf.mxu1  ;;  %7493 = vmatmul.mubr.bf16.vlgmr.msra.gmra.mxu1 %v12124_v25  ;;  %v12400_v23 = vpop.f32.mrf.mxu0  ;;  %7505 = vmatprep.subr.bf16.mxu0 %v10393_v41  ;;  %v538_v25 = vld [vmem:[#allocation2 + $0xd18] sm:$0xff] }
 0x399   :  { %7547 = vmatpush1.bf16.msra.mxu1 %v10528_v11  ;;  %v12402_v38 = vadd.f32 %v7236_v30, %v7194_v51  ;;  %7578 = vmatprep.mubr.bf16.mxu1 %v12143_v33  ;;  %v10505_v41 = vcombine.high %v538_v25, %v542_v13  ;;  %v530_v42 = vld [vmem:[#allocation2 + $0xcd8] sm:$0xff]  ;;  %v10376_v30 = vcombine.low %v410_v59, %v414_v22 }
 0x39a   :  { %v12404_v44 = vpop.f32.mrf.mxu1  ;;  %7548 = vmatprep.subr.bf16.mxu1 %v10521_v31  ;;  %v7197_v10 = vpop.f32.mrf.mxu0  ;;  %v402_v31 = vld [vmem:[#allocation2 + $0x8d8] sm:$0xff]  ;;  %v10504_v33 = vcombine.low %v538_v25, %v542_v13 }
 0x39b   :  { %v7198_v54 = vadd.f32 %v7197_v10, %v12391_v37  ;;  %7506 = vmatpush1.bf16.msra.mxu0 %v10392_v19  ;;  %v534_v51 = vld [vmem:[#allocation2 + $0xcf8] sm:$0xff]  ;;  %v10369_v37 = vcombine.high %v402_v31, %v406_v60 }
 0x39c   :  { %v7240_v14 = vpop.f32.mrf.mxu1  ;;  %7507 = vmatprep.subr.bf16.mxu0 %v10385_v40  ;;  %v10497_v35 = vcombine.high %v530_v42, %v534_v51  ;;  %v398_v19 = vld [vmem:[#allocation2 + $0x8b8] sm:$0xff]  ;;  %v10496_v40 = vcombine.low %v530_v42, %v534_v51 }
 0x39d   :  { %7549 = vmatpush1.bf16.msra.mxu1 %v10520_v7  ;;  %v12409_v11 = vadd.f32 %v7240_v14, %v7198_v54  ;;  %v522_v24 = vld [vmem:[#allocation2 + $0xc98] sm:$0xff]  ;;  %v10368_v7 = vcombine.low %v402_v31, %v406_v60  ;;  %v10360_v25 = vcombine.low %v394_v53, %v398_v19 }
 0x39e   :  { %7550 = vmatprep.subr.bf16.mxu1 %v10513_v21  ;;  %v526_v8 = vld [vmem:[#allocation2 + $0xcb8] sm:$0xff]  ;;  %v10361_v21 = vcombine.high %v394_v53, %v398_v19 }
 0x39f   :  { %7508 = vmatpush1.bf16.msra.mxu0 %v10384_v20  ;;  %v10489_v10 = vcombine.high %v522_v24, %v526_v8  ;;  %v386_v54 = vld [vmem:[#allocation2 + $0x858] sm:$0xff]  ;;  %v10488_v13 = vcombine.low %v522_v24, %v526_v8 }
 0x3a0   :  { %7509 = vmatprep.subr.bf16.mxu0 %v10377_v58  ;;  %v390_v59 = vld [vmem:[#allocation2 + $0x878] sm:$0xff] }
 0x3a1   :  { %7551 = vmatpush1.bf16.msra.mxu1 %v10512_v1  ;;  %v514_v22 = vld [vmem:[#allocation2 + $0xc58] sm:$0xff]  ;;  %v10353_v14 = vcombine.high %v386_v54, %v390_v59  ;;  %v10352_v42 = vcombine.low %v386_v54, %v390_v59 }
 0x3a2   :  { %7552 = vmatprep.subr.bf16.mxu1 %v10505_v41  ;;  %v518_v20 = vld [vmem:[#allocation2 + $0xc78] sm:$0xff] }
 0x3a3   :  { %7510 = vmatpush1.bf16.msra.mxu0 %v10376_v30  ;;  %v10481_v1 = vcombine.high %v514_v22, %v518_v20  ;;  %v378_v58 = vld [vmem:[#allocation2 + $0x818] sm:$0xff]  ;;  %v10480_v51 = vcombine.low %v514_v22, %v518_v20 }
 0x3a4   :  { %7511 = vmatprep.subr.bf16.mxu0 %v10369_v37  ;;  %v382_v41 = vld [vmem:[#allocation2 + $0x838] sm:$0xff] }
 0x3a5   :  { %7553 = vmatpush1.bf16.msra.mxu1 %v10504_v33  ;;  %v506_v31 = vld [vmem:[#allocation2 + $0xc18] sm:$0xff]  ;;  %v10345_v30 = vcombine.high %v378_v58, %v382_v41  ;;  %v10344_v24 = vcombine.low %v378_v58, %v382_v41 }
 0x3a6   :  { %7554 = vmatprep.subr.bf16.mxu1 %v10497_v35  ;;  %v510_v60 = vld [vmem:[#allocation2 + $0xc38] sm:$0xff] }
 0x3a7   :  { %7512 = vmatpush1.bf16.msra.mxu0 %v10368_v7  ;;  %v10473_v33 = vcombine.high %v506_v31, %v510_v60  ;;  %v498_v37 = vld [vmem:[#allocation2 + $0xbd8] sm:$0xff]  ;;  %v10472_v8 = vcombine.low %v506_v31, %v510_v60 }
 0x3a8   :  { %7513 = vmatprep.subr.bf16.mxu0 %v10361_v21  ;;  %v502_v35 = vld [vmem:[#allocation2 + $0xbf8] sm:$0xff] }
 0x3a9   :  { %7555 = vmatpush1.bf16.msra.mxu1 %v10496_v40  ;;  %v626_v53 = vld [vmem:[#allocation2 + $0xfd8] sm:$0xff]  ;;  %v10465_v7 = vcombine.high %v498_v37, %v502_v35  ;;  %v10464_v22 = vcombine.low %v498_v37, %v502_v35 }
 0x3aa   :  { %7556 = vmatprep.subr.bf16.mxu1 %v10489_v10  ;;  %v630_v19 = vld [vmem:[#allocation2 + $0xff8] sm:$0xff] }
 0x3ab   :  { %7514 = vmatpush1.bf16.msra.mxu0 %v10360_v25  ;;  %v10593_v40 = vcombine.high %v626_v53, %v630_v19  ;;  %v490_v21 = vld [vmem:[#allocation2 + $0xb98] sm:$0xff]  ;;  %v10592_v20 = vcombine.low %v626_v53, %v630_v19 }
 0x3ac   :  { %7515 = vmatprep.subr.bf16.mxu0 %v10353_v14  ;;  %v494_v10 = vld [vmem:[#allocation2 + $0xbb8] sm:$0xff] }
 0x3ad   :  { %7557 = vmatpush1.bf16.msra.mxu1 %v10488_v13  ;;  %v618_v54 = vld [vmem:[#allocation2 + $0xf98] sm:$0xff]  ;;  %v10457_v25 = vcombine.high %v490_v21, %v494_v10  ;;  %v10456_v31 = vcombine.low %v490_v21, %v494_v10 }
 0x3ae   :  { %7558 = vmatprep.subr.bf16.mxu1 %v10481_v1  ;;  %v622_v59 = vld [vmem:[#allocation2 + $0xfb8] sm:$0xff] }
 0x3af   :  { %7516 = vmatpush1.bf16.msra.mxu0 %v10352_v42  ;;  %v10585_v13 = vcombine.high %v618_v54, %v622_v59  ;;  %v482_v14 = vld [vmem:[#allocation2 + $0xb58] sm:$0xff]  ;;  %v10584_v60 = vcombine.low %v618_v54, %v622_v59 }
 0x3b0   :  { %7517 = vmatprep.subr.bf16.mxu0 %v10345_v30  ;;  %v486_v1 = vld [vmem:[#allocation2 + $0xb78] sm:$0xff] }
 0x3b1   :  { %7559 = vmatpush1.bf16.msra.mxu1 %v10480_v51  ;;  %v610_v58 = vld [vmem:[#allocation2 + $0xf58] sm:$0xff]  ;;  %v10449_v42 = vcombine.high %v482_v14, %v486_v1  ;;  %v10448_v53 = vcombine.low %v482_v14, %v486_v1 }
 0x3b2   :  { %7560 = vmatprep.subr.bf16.mxu1 %v10473_v33  ;;  %v614_v41 = vld [vmem:[#allocation2 + $0xf78] sm:$0xff] }
 0x3b3   :  { %7518 = vmatpush1.bf16.msra.mxu0 %v10344_v24  ;;  %v10577_v51 = vcombine.high %v610_v58, %v614_v41  ;;  %v474_v30 = vld [vmem:[#allocation2 + $0xb18] sm:$0xff]  ;;  %v10576_v19 = vcombine.low %v610_v58, %v614_v41 }
 0x3b4   :  { %7519 = vmatprep.subr.bf16.mxu0 %v10465_v7  ;;  %v478_v33 = vld [vmem:[#allocation2 + $0xb38] sm:$0xff] }
 0x3b5   :  { %7561 = vmatpush1.bf16.msra.mxu1 %v10472_v8  ;;  %v602_v37 = vld [vmem:[#allocation2 + $0xf18] sm:$0xff]  ;;  %v10441_v24 = vcombine.high %v474_v30, %v478_v33  ;;  %v10440_v54 = vcombine.low %v474_v30, %v478_v33 }
 0x3b6   :  { %7562 = vmatprep.subr.bf16.mxu1 %v10593_v40  ;;  %v606_v35 = vld [vmem:[#allocation2 + $0xf38] sm:$0xff] }
 0x3b7   :  { %7520 = vmatpush2.bf16.msra.mxu0 %v10464_v22  ;;  %v10569_v8 = vcombine.high %v602_v37, %v606_v35  ;;  %v466_v7 = vld [vmem:[#allocation2 + $0xad8] sm:$0xff]  ;;  %v10568_v59 = vcombine.low %v602_v37, %v606_v35 }
 0x3b8   :  { %7521 = vmatprep.subr.bf16.mxu0 %v10457_v25  ;;  %v470_v40 = vld [vmem:[#allocation2 + $0xaf8] sm:$0xff] }
 0x3b9   :  { %7563 = vmatpush2.bf16.msra.mxu1 %v10592_v20  ;;  %v594_v21 = vld [vmem:[#allocation2 + $0xed8] sm:$0xff]  ;;  %v10433_v22 = vcombine.high %v466_v7, %v470_v40  ;;  %v10432_v58 = vcombine.low %v466_v7, %v470_v40 }
 0x3ba   :  { %7564 = vmatprep.subr.bf16.mxu1 %v10585_v13  ;;  %v598_v10 = vld [vmem:[#allocation2 + $0xef8] sm:$0xff] }
 0x3bb   :  { %7522 = vmatpush2.bf16.msra.mxu0 %v10456_v31  ;;  %v10561_v20 = vcombine.high %v594_v21, %v598_v10  ;;  %v458_v25 = vld [vmem:[#allocation2 + $0xa98] sm:$0xff]  ;;  %v10560_v41 = vcombine.low %v594_v21, %v598_v10 }
 0x3bc   :  { %7523 = vmatprep.subr.bf16.mxu0 %v10449_v42  ;;  %v462_v13 = vld [vmem:[#allocation2 + $0xab8] sm:$0xff] }
 0x3bd   :  { %7565 = vmatpush2.bf16.msra.mxu1 %v10584_v60  ;;  %v586_v14 = vld [vmem:[#allocation2 + $0xe98] sm:$0xff]  ;;  %v10425_v31 = vcombine.high %v458_v25, %v462_v13  ;;  %v10424_v37 = vcombine.low %v458_v25, %v462_v13 }
 0x3be   :  { %7566 = vmatprep.subr.bf16.mxu1 %v10577_v51  ;;  %v590_v1 = vld [vmem:[#allocation2 + $0xeb8] sm:$0xff] }
 0x3bf   :  { %7524 = vmatpush2.bf16.msra.mxu0 %v10448_v53  ;;  %v10553_v60 = vcombine.high %v586_v14, %v590_v1  ;;  %v450_v42 = vld [vmem:[#allocation2 + $0xa58] sm:$0xff]  ;;  %v10552_v35 = vcombine.low %v586_v14, %v590_v1 }
 0x3c0   :  { %7525 = vmatprep.subr.bf16.mxu0 %v10441_v24  ;;  %v454_v51 = vld [vmem:[#allocation2 + $0xa78] sm:$0xff] }
 0x3c1   :  { %7567 = vmatpush2.bf16.msra.mxu1 %v10576_v19  ;;  %v578_v30 = vld [vmem:[#allocation2 + $0xe58] sm:$0xff]  ;;  %v10417_v53 = vcombine.high %v450_v42, %v454_v51  ;;  %v10416_v21 = vcombine.low %v450_v42, %v454_v51 }
 0x3c2   :  { %7568 = vmatprep.subr.bf16.mxu1 %v10569_v8  ;;  %v582_v33 = vld [vmem:[#allocation2 + $0xe78] sm:$0xff] }
 0x3c3   :  { %7526 = vmatpush2.bf16.msra.mxu0 %v10440_v54  ;;  %v10545_v19 = vcombine.high %v578_v30, %v582_v33  ;;  %v442_v24 = vld [vmem:[#allocation2 + $0xa18] sm:$0xff]  ;;  %v10544_v10 = vcombine.low %v578_v30, %v582_v33  ;;  %v12411_v33 = vpop.f32.mrf.mxu0 }
 0x3c4   :  { %7527 = vmatprep.subr.bf16.mxu0 %v10433_v22  ;;  %v446_v8 = vld [vmem:[#allocation2 + $0xa38] sm:$0xff] }
 0x3c5   :  { %7569 = vmatpush2.bf16.msra.mxu1 %v10568_v59  ;;  %v570_v7 = vld [vmem:[#allocation2 + $0xe18] sm:$0xff]  ;;  %v10409_v54 = vcombine.high %v442_v24, %v446_v8  ;;  %v10408_v14 = vcombine.low %v442_v24, %v446_v8 }
 0x3c6   :  { %7570 = vmatprep.subr.bf16.mxu1 %v10561_v20  ;;  %v574_v40 = vld [vmem:[#allocation2 + $0xe38] sm:$0xff] }
 0x3c7   :  { %7528 = vmatpush2.bf16.msra.mxu0 %v10432_v58  ;;  %v10537_v59 = vcombine.high %v570_v7, %v574_v40  ;;  %v690_v22 = vld [vmem:[#allocation2 + $0x11d8] sm:$0xff]  ;;  %v10536_v1 = vcombine.low %v570_v7, %v574_v40 }
 0x3c8   :  { %7529 = vmatprep.subr.bf16.mxu0 %v10425_v31  ;;  %v694_v20 = vld [vmem:[#allocation2 + $0x11f8] sm:$0xff] }
 0x3c9   :  { %7571 = vmatpush2.bf16.msra.mxu1 %v10560_v41  ;;  %v818_v25 = vld [vmem:[#allocation2 + $0x15d8] sm:$0xff]  ;;  %v10657_v58 = vcombine.high %v690_v22, %v694_v20  ;;  %v10656_v30 = vcombine.low %v690_v22, %v694_v20 }
 0x3ca   :  { %7572 = vmatprep.subr.bf16.mxu1 %v10553_v60  ;;  %v822_v13 = vld [vmem:[#allocation2 + $0x15f8] sm:$0xff] }
 0x3cb   :  { %7530 = vmatpush2.bf16.msra.mxu0 %v10424_v37  ;;  %v10785_v41 = vcombine.high %v818_v25, %v822_v13  ;;  %v682_v31 = vld [vmem:[#allocation2 + $0x1198] sm:$0xff]  ;;  %v10784_v37 = vcombine.low %v818_v25, %v822_v13 }
 0x3cc   :  { %7531 = vmatprep.subr.bf16.mxu0 %v10417_v53  ;;  %v686_v60 = vld [vmem:[#allocation2 + $0x11b8] sm:$0xff]  ;;  %v12413_v53 = vpop.f32.mrf.mxu1 }
 0x3cd   :  { %7573 = vmatpush2.bf16.msra.mxu1 %v10552_v35  ;;  %v810_v42 = vld [vmem:[#allocation2 + $0x1598] sm:$0xff]  ;;  %v10649_v35 = vcombine.high %v682_v31, %v686_v60 }
 0x3ce   :  { %7574 = vmatprep.subr.bf16.mxu1 %v10545_v19  ;;  %v814_v51 = vld [vmem:[#allocation2 + $0x15b8] sm:$0xff] }
 0x3cf   :  { %7532 = vmatpush2.bf16.msra.mxu0 %v10416_v21  ;;  %v10777_v19 = vcombine.high %v810_v42, %v814_v51  ;;  %v674_v24 = vld [vmem:[#allocation2 + $0x1158] sm:$0xff]  ;;  %v10776_v20 = vcombine.low %v810_v42, %v814_v51 }
 0x3d0   :  { %7533 = vmatprep.subr.bf16.mxu0 %v10409_v54  ;;  %v678_v8 = vld [vmem:[#allocation2 + $0x1178] sm:$0xff] }
 0x3d1   :  { %7575 = vmatpush2.bf16.msra.mxu1 %v10544_v10  ;;  %v802_v40 = vld [vmem:[#allocation2 + $0x1558] sm:$0xff]  ;;  %v10641_v25 = vcombine.high %v674_v24, %v678_v8 }
 0x3d2   :  { %7576 = vmatprep.subr.bf16.mxu1 %v10537_v59  ;;  %v806_v21 = vld [vmem:[#allocation2 + $0x1578] sm:$0xff]  ;;  %v10648_v59 = vcombine.low %v682_v31, %v686_v60  ;;  %v10640_v60 = vcombine.low %v674_v24, %v678_v8 }
 0x3d3   :  { %7534 = vmatpush2.bf16.msra.mxu0 %v10408_v14  ;;  %v10768_v51 = vcombine.low %v802_v40, %v806_v21  ;;  %v650_v8 = vld [vmem:[#allocation2 + $0x1098] sm:$0xff] }
 0x3d4   :  { %7589 = vmatprep.subr.bf16.mxu0 %v10657_v58  ;;  %v670_v58 = vld [vmem:[#allocation2 + $0x1138] sm:$0xff] }
 0x3d5   :  { %7577 = vmatpush2.bf16.msra.mxu1 %v10536_v1  ;;  %v666_v1 = vld [vmem:[#allocation2 + $0x1118] sm:$0xff] }
 0x3d6   :  { %7632 = vmatprep.subr.bf16.mxu1 %v10785_v41  ;;  %v7279_v7 = vpop.f32.mrf.mxu0  ;;  %7536 = vmatmul.mubr.bf16.vlgmr.msra.gmra.mxu0 %v12160_v48  ;;  %v10769_v48 = vcombine.high %v802_v40, %v806_v21  ;;  %v798_v41 = vld [vmem:[#allocation2 + $0x1538] sm:$0xff] }
 0x3d7   :  { %v7280_v10 = vadd.f32 %v7279_v7, %v12402_v38  ;;  %7590 = vmatpush1.bf16.msra.mxu0 %v10656_v30  ;;  %7621 = vmatprep.mubr.bf16.mxu0 %v12178_v61  ;;  %v10633_v30 = vcombine.high %v666_v1, %v670_v58  ;;  %v662_v61 = vld [vmem:[#allocation2 + $0x10f8] sm:$0xff] }
 0x3d8   :  { %v7322_v54 = vpop.f32.mrf.mxu1  ;;  %7579 = vmatmul.mubr.bf16.vlgmr.msra.gmra.mxu1 %v12164_v49  ;;  %v12418_v22 = vpop.f32.mrf.mxu0  ;;  %7591 = vmatprep.subr.bf16.mxu0 %v10649_v35  ;;  %v794_v49 = vld [vmem:[#allocation2 + $0x1518] sm:$0xff] }
 0x3d9   :  { %7633 = vmatpush1.bf16.msra.mxu1 %v10784_v37  ;;  %v12420_v13 = vadd.f32 %v7322_v54, %v7280_v10  ;;  %7664 = vmatprep.mubr.bf16.mxu1 %v12183_v62  ;;  %v10761_v35 = vcombine.high %v794_v49, %v798_v41  ;;  %v786_v7 = vld [vmem:[#allocation2 + $0x14d8] sm:$0xff]  ;;  %v10632_v54 = vcombine.low %v666_v1, %v670_v58 }
 0x3da   :  { %v12422_v14 = vpop.f32.mrf.mxu1  ;;  %7634 = vmatprep.subr.bf16.mxu1 %v10777_v19  ;;  %v7283_v38 = vpop.f32.mrf.mxu0  ;;  %v658_v19 = vld [vmem:[#allocation2 + $0x10d8] sm:$0xff]  ;;  %v10760_v62 = vcombine.low %v794_v49, %v798_v41 }
 0x3db   :  { %v7284_v31 = vadd.f32 %v7283_v38, %v12409_v11  ;;  %7592 = vmatpush1.bf16.msra.mxu0 %v10648_v59  ;;  %v790_v10 = vld [vmem:[#allocation2 + $0x14f8] sm:$0xff]  ;;  %v10625_v11 = vcombine.high %v658_v19, %v662_v61 }
 0x3dc   :  { %v7326_v42 = vpop.f32.mrf.mxu1  ;;  %7593 = vmatprep.subr.bf16.mxu0 %v10641_v25  ;;  %v10753_v24 = vcombine.high %v786_v7, %v790_v10  ;;  %v654_v59 = vld [vmem:[#allocation2 + $0x10b8] sm:$0xff]  ;;  %v10752_v25 = vcombine.low %v786_v7, %v790_v10 }
 0x3dd   :  { %7635 = vmatpush1.bf16.msra.mxu1 %v10776_v20  ;;  %v12427_v37 = vadd.f32 %v7326_v42, %v7284_v31  ;;  %v778_v40 = vld [vmem:[#allocation2 + $0x1498] sm:$0xff]  ;;  %v10624_v20 = vcombine.low %v658_v19, %v662_v61  ;;  %v10616_v49 = vcombine.low %v650_v8, %v654_v59 }
 0x3de   :  { %7636 = vmatprep.subr.bf16.mxu1 %v10769_v48  ;;  %v782_v21 = vld [vmem:[#allocation2 + $0x14b8] sm:$0xff]  ;;  %v10617_v48 = vcombine.high %v650_v8, %v654_v59 }
 0x3df   :  { %7594 = vmatpush1.bf16.msra.mxu0 %v10640_v60  ;;  %v10745_v38 = vcombine.high %v778_v40, %v782_v21  ;;  %v642_v31 = vld [vmem:[#allocation2 + $0x1058] sm:$0xff]  ;;  %v10744_v41 = vcombine.low %v778_v40, %v782_v21 }
 0x3e0   :  { %7595 = vmatprep.subr.bf16.mxu0 %v10633_v30  ;;  %v646_v1 = vld [vmem:[#allocation2 + $0x1078] sm:$0xff] }
 0x3e1   :  { %7637 = vmatpush1.bf16.msra.mxu1 %v10768_v51  ;;  %v770_v58 = vld [vmem:[#allocation2 + $0x1458] sm:$0xff]  ;;  %v10609_v42 = vcombine.high %v642_v31, %v646_v1  ;;  %v10608_v7 = vcombine.low %v642_v31, %v646_v1 }
 0x3e2   :  { %7638 = vmatprep.subr.bf16.mxu1 %v10761_v35  ;;  %v774_v60 = vld [vmem:[#allocation2 + $0x1478] sm:$0xff] }
 0x3e3   :  { %7596 = vmatpush1.bf16.msra.mxu0 %v10632_v54  ;;  %v10737_v51 = vcombine.high %v770_v58, %v774_v60  ;;  %v634_v30 = vld [vmem:[#allocation2 + $0x1018] sm:$0xff]  ;;  %v10736_v10 = vcombine.low %v770_v58, %v774_v60 }
 0x3e4   :  { %7597 = vmatprep.subr.bf16.mxu0 %v10625_v11  ;;  %v638_v35 = vld [vmem:[#allocation2 + $0x1038] sm:$0xff] }
 0x3e5   :  { %7639 = vmatpush1.bf16.msra.mxu1 %v10760_v62  ;;  %v762_v19 = vld [vmem:[#allocation2 + $0x1418] sm:$0xff]  ;;  %v10601_v54 = vcombine.high %v634_v30, %v638_v35  ;;  %v10600_v40 = vcombine.low %v634_v30, %v638_v35 }
 0x3e6   :  { %7640 = vmatprep.subr.bf16.mxu1 %v10753_v24  ;;  %v766_v61 = vld [vmem:[#allocation2 + $0x1438] sm:$0xff] }
 0x3e7   :  { %7598 = vmatpush1.bf16.msra.mxu0 %v10624_v20  ;;  %v10729_v62 = vcombine.high %v762_v19, %v766_v61  ;;  %v754_v11 = vld [vmem:[#allocation2 + $0x13d8] sm:$0xff]  ;;  %v10728_v21 = vcombine.low %v762_v19, %v766_v61 }
 0x3e8   :  { %7599 = vmatprep.subr.bf16.mxu0 %v10617_v48  ;;  %v758_v24 = vld [vmem:[#allocation2 + $0x13f8] sm:$0xff] }
 0x3e9   :  { %7641 = vmatpush1.bf16.msra.mxu1 %v10752_v25  ;;  %v882_v8 = vld [vmem:[#allocation2 + $0x17d8] sm:$0xff]  ;;  %v10721_v20 = vcombine.high %v754_v11, %v758_v24  ;;  %v10720_v58 = vcombine.low %v754_v11, %v758_v24 }
 0x3ea   :  { %7642 = vmatprep.subr.bf16.mxu1 %v10745_v38  ;;  %v886_v59 = vld [vmem:[#allocation2 + $0x17f8] sm:$0xff] }
 0x3eb   :  { %7600 = vmatpush1.bf16.msra.mxu0 %v10616_v49  ;;  %v10849_v25 = vcombine.high %v882_v8, %v886_v59  ;;  %v746_v48 = vld [vmem:[#allocation2 + $0x1398] sm:$0xff]  ;;  %v10848_v60 = vcombine.low %v882_v8, %v886_v59 }
 0x3ec   :  { %7601 = vmatprep.subr.bf16.mxu0 %v10609_v42  ;;  %v750_v38 = vld [vmem:[#allocation2 + $0x13b8] sm:$0xff] }
 0x3ed   :  { %7643 = vmatpush1.bf16.msra.mxu1 %v10744_v41  ;;  %v874_v31 = vld [vmem:[#allocation2 + $0x1798] sm:$0xff]  ;;  %v10713_v49 = vcombine.high %v746_v48, %v750_v38  ;;  %v10712_v19 = vcombine.low %v746_v48, %v750_v38 }
 0x3ee   :  { %7644 = vmatprep.subr.bf16.mxu1 %v10737_v51  ;;  %v878_v1 = vld [vmem:[#allocation2 + $0x17b8] sm:$0xff] }
 0x3ef   :  { %7602 = vmatpush1.bf16.msra.mxu0 %v10608_v7  ;;  %v10841_v41 = vcombine.high %v874_v31, %v878_v1  ;;  %v738_v42 = vld [vmem:[#allocation2 + $0x1358] sm:$0xff]  ;;  %v10840_v61 = vcombine.low %v874_v31, %v878_v1 }
 0x3f0   :  { %7603 = vmatprep.subr.bf16.mxu0 %v10601_v54  ;;  %v742_v51 = vld [vmem:[#allocation2 + $0x1378] sm:$0xff] }
 0x3f1   :  { %7645 = vmatpush1.bf16.msra.mxu1 %v10736_v10  ;;  %v866_v30 = vld [vmem:[#allocation2 + $0x1758] sm:$0xff]  ;;  %v10705_v7 = vcombine.high %v738_v42, %v742_v51  ;;  %v10704_v8 = vcombine.low %v738_v42, %v742_v51 }
 0x3f2   :  { %7646 = vmatprep.subr.bf16.mxu1 %v10729_v62  ;;  %v870_v35 = vld [vmem:[#allocation2 + $0x1778] sm:$0xff] }
 0x3f3   :  { %7604 = vmatpush1.bf16.msra.mxu0 %v10600_v40  ;;  %v10833_v10 = vcombine.high %v866_v30, %v870_v35  ;;  %v730_v54 = vld [vmem:[#allocation2 + $0x1318] sm:$0xff]  ;;  %v10832_v59 = vcombine.low %v866_v30, %v870_v35 }
 0x3f4   :  { %7605 = vmatprep.subr.bf16.mxu0 %v10721_v20  ;;  %v734_v62 = vld [vmem:[#allocation2 + $0x1338] sm:$0xff] }
 0x3f5   :  { %7647 = vmatpush1.bf16.msra.mxu1 %v10728_v21  ;;  %v858_v11 = vld [vmem:[#allocation2 + $0x1718] sm:$0xff]  ;;  %v10697_v40 = vcombine.high %v730_v54, %v734_v62  ;;  %v10696_v31 = vcombine.low %v730_v54, %v734_v62 }
 0x3f6   :  { %7648 = vmatprep.subr.bf16.mxu1 %v10849_v25  ;;  %v862_v24 = vld [vmem:[#allocation2 + $0x1738] sm:$0xff] }
 0x3f7   :  { %7606 = vmatpush2.bf16.msra.mxu0 %v10720_v58  ;;  %v10825_v21 = vcombine.high %v858_v11, %v862_v24  ;;  %v722_v20 = vld [vmem:[#allocation2 + $0x12d8] sm:$0xff]  ;;  %v10824_v1 = vcombine.low %v858_v11, %v862_v24 }
 0x3f8   :  { %7607 = vmatprep.subr.bf16.mxu0 %v10713_v49  ;;  %v726_v25 = vld [vmem:[#allocation2 + $0x12f8] sm:$0xff] }
 0x3f9   :  { %7649 = vmatpush2.bf16.msra.mxu1 %v10848_v60  ;;  %v850_v48 = vld [vmem:[#allocation2 + $0x16d8] sm:$0xff]  ;;  %v10689_v58 = vcombine.high %v722_v20, %v726_v25  ;;  %v10688_v30 = vcombine.low %v722_v20, %v726_v25 }
 0x3fa   :  { %7650 = vmatprep.subr.bf16.mxu1 %v10841_v41  ;;  %v854_v38 = vld [vmem:[#allocation2 + $0x16f8] sm:$0xff] }
 0x3fb   :  { %7608 = vmatpush2.bf16.msra.mxu0 %v10712_v19  ;;  %v10817_v60 = vcombine.high %v850_v48, %v854_v38  ;;  %v714_v49 = vld [vmem:[#allocation2 + $0x1298] sm:$0xff]  ;;  %v10816_v35 = vcombine.low %v850_v48, %v854_v38 }
 0x3fc   :  { %7609 = vmatprep.subr.bf16.mxu0 %v10705_v7  ;;  %v718_v41 = vld [vmem:[#allocation2 + $0x12b8] sm:$0xff] }
 0x3fd   :  { %7651 = vmatpush2.bf16.msra.mxu1 %v10840_v61  ;;  %v842_v42 = vld [vmem:[#allocation2 + $0x1698] sm:$0xff]  ;;  %v10681_v19 = vcombine.high %v714_v49, %v718_v41  ;;  %v10680_v11 = vcombine.low %v714_v49, %v718_v41 }
 0x3fe   :  { %7652 = vmatprep.subr.bf16.mxu1 %v10833_v10  ;;  %v846_v51 = vld [vmem:[#allocation2 + $0x16b8] sm:$0xff] }
 0x3ff   :  { %7610 = vmatpush2.bf16.msra.mxu0 %v10704_v8  ;;  %v10809_v61 = vcombine.high %v842_v42, %v846_v51  ;;  %v706_v7 = vld [vmem:[#allocation2 + $0x1258] sm:$0xff]  ;;  %v10808_v24 = vcombine.low %v842_v42, %v846_v51 }
 0x400   :  { %7611 = vmatprep.subr.bf16.mxu0 %v10697_v40  ;;  %v710_v10 = vld [vmem:[#allocation2 + $0x1278] sm:$0xff] }
 0x401   :  { %7653 = vmatpush2.bf16.msra.mxu1 %v10832_v59  ;;  %v834_v54 = vld [vmem:[#allocation2 + $0x1658] sm:$0xff]  ;;  %v10673_v8 = vcombine.high %v706_v7, %v710_v10  ;;  %v10672_v48 = vcombine.low %v706_v7, %v710_v10 }
 0x402   :  { %7654 = vmatprep.subr.bf16.mxu1 %v10825_v21  ;;  %v838_v62 = vld [vmem:[#allocation2 + $0x1678] sm:$0xff] }
 0x403   :  { %7612 = vmatpush2.bf16.msra.mxu0 %v10696_v31  ;;  %v10801_v59 = vcombine.high %v834_v54, %v838_v62  ;;  %v698_v40 = vld [vmem:[#allocation2 + $0x1218] sm:$0xff]  ;;  %v10800_v38 = vcombine.low %v834_v54, %v838_v62  ;;  %v12429_v62 = vpop.f32.mrf.mxu0 }
 0x404   :  { %7613 = vmatprep.subr.bf16.mxu0 %v10689_v58  ;;  %v702_v21 = vld [vmem:[#allocation2 + $0x1238] sm:$0xff] }
 0x405   :  { %7655 = vmatpush2.bf16.msra.mxu1 %v10824_v1  ;;  %v826_v20 = vld [vmem:[#allocation2 + $0x1618] sm:$0xff]  ;;  %v10665_v31 = vcombine.high %v698_v40, %v702_v21  ;;  %v10664_v42 = vcombine.low %v698_v40, %v702_v21 }
 0x406   :  { %7656 = vmatprep.subr.bf16.mxu1 %v10817_v60  ;;  %v830_v25 = vld [vmem:[#allocation2 + $0x1638] sm:$0xff] }
 0x407   :  { %7614 = vmatpush2.bf16.msra.mxu0 %v10688_v30  ;;  %v10793_v1 = vcombine.high %v826_v20, %v830_v25  ;;  %v946_v58 = vld [vmem:[#allocation2 + $0x19d8] sm:$0xff]  ;;  %v10792_v51 = vcombine.low %v826_v20, %v830_v25 }
 0x408   :  { %7615 = vmatprep.subr.bf16.mxu0 %v10681_v19  ;;  %v950_v60 = vld [vmem:[#allocation2 + $0x19f8] sm:$0xff] }
 0x409   :  { %7657 = vmatpush2.bf16.msra.mxu1 %v10816_v35  ;;  %v1074_v49 = vld [vmem:[#allocation2 + $0x1dd8] sm:$0xff]  ;;  %v10913_v30 = vcombine.high %v946_v58, %v950_v60  ;;  %v10912_v54 = vcombine.low %v946_v58, %v950_v60 }
 0x40a   :  { %7658 = vmatprep.subr.bf16.mxu1 %v10809_v61  ;;  %v1078_v41 = vld [vmem:[#allocation2 + $0x1df8] sm:$0xff] }
 0x40b   :  { %7616 = vmatpush2.bf16.msra.mxu0 %v10680_v11  ;;  %v11041_v35 = vcombine.high %v1074_v49, %v1078_v41  ;;  %v938_v19 = vld [vmem:[#allocation2 + $0x1998] sm:$0xff]  ;;  %v11040_v11 = vcombine.low %v1074_v49, %v1078_v41 }
 0x40c   :  { %7617 = vmatprep.subr.bf16.mxu0 %v10673_v8  ;;  %v942_v61 = vld [vmem:[#allocation2 + $0x19b8] sm:$0xff]  ;;  %v12431_v8 = vpop.f32.mrf.mxu1 }
 0x40d   :  { %7659 = vmatpush2.bf16.msra.mxu1 %v10808_v24  ;;  %v1066_v7 = vld [vmem:[#allocation2 + $0x1d98] sm:$0xff]  ;;  %v10905_v24 = vcombine.high %v938_v19, %v942_v61 }
 0x40e   :  { %7660 = vmatprep.subr.bf16.mxu1 %v10801_v59  ;;  %v1070_v10 = vld [vmem:[#allocation2 + $0x1db8] sm:$0xff] }
 0x40f   :  { %7618 = vmatpush2.bf16.msra.mxu0 %v10672_v48  ;;  %v11033_v59 = vcombine.high %v1066_v7, %v1070_v10  ;;  %v930_v40 = vld [vmem:[#allocation2 + $0x1958] sm:$0xff]  ;;  %v11032_v60 = vcombine.low %v1066_v7, %v1070_v10 }
 0x410   :  { %7619 = vmatprep.subr.bf16.mxu0 %v10665_v31  ;;  %v934_v21 = vld [vmem:[#allocation2 + $0x1978] sm:$0xff] }
 0x411   :  { %7661 = vmatpush2.bf16.msra.mxu1 %v10800_v38  ;;  %v1058_v25 = vld [vmem:[#allocation2 + $0x1d58] sm:$0xff]  ;;  %v10897_v49 = vcombine.high %v930_v40, %v934_v21 }
 0x412   :  { %7662 = vmatprep.subr.bf16.mxu1 %v10793_v1  ;;  %v1062_v48 = vld [vmem:[#allocation2 + $0x1d78] sm:$0xff]  ;;  %v10904_v1 = vcombine.low %v938_v19, %v942_v61  ;;  %v10896_v61 = vcombine.low %v930_v40, %v934_v21 }
 0x413   :  { %7620 = vmatpush2.bf16.msra.mxu0 %v10664_v42  ;;  %v11024_v10 = vcombine.low %v1058_v25, %v1062_v48 }
 0x414   :  { %7675 = vmatprep.subr.bf16.mxu0 %v10913_v30  ;;  %v926_v30 = vld [vmem:[#allocation2 + $0x1938] sm:$0xff] }
 0x415   :  { %7663 = vmatpush2.bf16.msra.mxu1 %v10792_v51  ;;  %v922_v51 = vld [vmem:[#allocation2 + $0x1918] sm:$0xff] }
 0x416   :  { %7718 = vmatprep.subr.bf16.mxu1 %v11041_v35  ;;  %v7365_v20 = vpop.f32.mrf.mxu0  ;;  %7622 = vmatmul.mubr.bf16.vlgmr.msra.gmra.mxu0 %v12210_v28  ;;  %v11025_v28 = vcombine.high %v1058_v25, %v1062_v48  ;;  %v1050_v35 = vld [vmem:[#allocation2 + $0x1d18] sm:$0xff] }
 0x417   :  { %v7366_v38 = vadd.f32 %v7365_v20, %v12420_v13  ;;  %7676 = vmatpush1.bf16.msra.mxu0 %v10912_v54  ;;  %7707 = vmatprep.mubr.bf16.mxu0 %v12218_v45  ;;  %v10889_v54 = vcombine.high %v922_v51, %v926_v30  ;;  %v918_v20 = vld [vmem:[#allocation2 + $0x18f8] sm:$0xff] }
 0x418   :  { %v7408_v31 = vpop.f32.mrf.mxu1  ;;  %7665 = vmatmul.mubr.bf16.vlgmr.msra.gmra.mxu1 %v12214_v29  ;;  %v12436_v58 = vpop.f32.mrf.mxu0  ;;  %7677 = vmatprep.subr.bf16.mxu0 %v10905_v24  ;;  %v1054_v29 = vld [vmem:[#allocation2 + $0x1d38] sm:$0xff] }
 0x419   :  { %7719 = vmatpush1.bf16.msra.mxu1 %v11040_v11  ;;  %v7409_v41 = vadd.f32 %v7408_v31, %v7366_v38  ;;  %7750 = vmatprep.mubr.bf16.mxu1 %v12223_v47  ;;  %v11017_v24 = vcombine.high %v1050_v35, %v1054_v29  ;;  %v1042_v45 = vld [vmem:[#allocation2 + $0x1cd8] sm:$0xff]  ;;  %v10888_v47 = vcombine.low %v922_v51, %v926_v30 }
 0x41a   :  { %v12438_v42 = vpop.f32.mrf.mxu1  ;;  %7720 = vmatprep.subr.bf16.mxu1 %v11033_v59  ;;  %v7369_v13 = vpop.f32.mrf.mxu0  ;;  %v914_v59 = vld [vmem:[#allocation2 + $0x18d8] sm:$0xff] }
 0x41b   :  { %12577 = vst [vmem:[#allocation31_spill] sm:$0xff] %v12438_v42  ;;  %v7370_v19 = vadd.f32 %v7369_v13, %v12427_v37  ;;  %7678 = vmatpush1.bf16.msra.mxu0 %v10904_v1  ;;  %v1046_v38 = vld [vmem:[#allocation2 + $0x1cf8] sm:$0xff]  ;;  %v7765_v31 = vmax.f32 %v7409_v41, 0.0  ;;  %v11016_v37 = vcombine.low %v1050_v35, %v1054_v29  ;;  %v10881_v40 = vcombine.high %v914_v59, %v918_v20 }
 0x41c   :  { %v7412_v7 = vpop.f32.mrf.mxu1  ;;  %7679 = vmatprep.subr.bf16.mxu0 %v10897_v49  ;;  %v11009_v25 = vcombine.high %v1042_v45, %v1046_v38  ;;  %v906_v48 = vld [vmem:[#allocation2 + $0x1898] sm:$0xff]  ;;  %v11008_v41 = vcombine.low %v1042_v45, %v1046_v38 }
 0x41d   :  { %7721 = vmatpush1.bf16.msra.mxu1 %v11032_v60  ;;  %v7413_v11 = vadd.f32 %v7412_v7, %v7370_v19  ;;  %v910_v1 = vld [vmem:[#allocation2 + $0x18b8] sm:$0xff] }
 0x41e   :  { %7722 = vmatprep.subr.bf16.mxu1 %v11025_v28  ;;  %v1034_v60 = vld [vmem:[#allocation2 + $0x1c98] sm:$0xff]  ;;  %v10880_v28 = vcombine.low %v914_v59, %v918_v20  ;;  %v10873_v13 = vcombine.high %v906_v48, %v910_v1 }
 0x41f   :  { %v7773_v42 = vmax.f32 %v7413_v11, 0.0  ;;  %7680 = vmatpush1.bf16.msra.mxu0 %v10896_v61  ;;  %v1038_v49 = vld [vmem:[#allocation2 + $0x1cb8] sm:$0xff] }
 0x420   :  { %7681 = vmatprep.subr.bf16.mxu0 %v10889_v54  ;;  %v11001_v51 = vcombine.high %v1034_v60, %v1038_v49  ;;  %v898_v30 = vld [vmem:[#allocation2 + $0x1858] sm:$0xff]  ;;  %v11000_v61 = vcombine.low %v1034_v60, %v1038_v49  ;;  %v1151_v49 = vsub.s32 1, %v12228_v56 }
 0x421   :  { %7723 = vmatpush1.bf16.msra.mxu1 %v11024_v10  ;;  %v12443_v21 = vpack.c.bf16 %v7773_v42, %v7765_v31  ;;  %v902_v19 = vld [vmem:[#allocation2 + $0x1878] sm:$0xff]  ;;  %v10872_v42 = vcombine.low %v906_v48, %v910_v1 }
 0x422   :  { %7724 = vmatprep.subr.bf16.mxu1 %v11017_v24  ;;  %v1026_v35 = vld [vmem:[#allocation2 + $0x1c58] sm:$0xff]  ;;  %v10865_v7 = vcombine.high %v898_v30, %v902_v19  ;;  %v10864_v20 = vcombine.low %v898_v30, %v902_v19  ;;  %v12561_v19 = vsub.s32 3, %v12228_v56 }
 0x423   :  { %7682 = vmatpush1.bf16.msra.mxu0 %v10888_v47  ;;  %v1030_v29 = vld [vmem:[#allocation2 + $0x1c78] sm:$0xff] }
 0x424   :  { %7683 = vmatprep.subr.bf16.mxu0 %v10881_v40  ;;  %v10993_v10 = vcombine.high %v1026_v35, %v1030_v29  ;;  %v890_v54 = vld [vmem:[#allocation2 + $0x1818] sm:$0xff]  ;;  %v10992_v45 = vcombine.low %v1026_v35, %v1030_v29 }
 0x425   :  { %7725 = vmatpush1.bf16.msra.mxu1 %v11016_v37  ;;  %v894_v11 = vld [vmem:[#allocation2 + $0x1838] sm:$0xff] }
 0x426   :  { %7726 = vmatprep.subr.bf16.mxu1 %v11009_v25  ;;  %v1018_v24 = vld [vmem:[#allocation2 + $0x1c18] sm:$0xff]  ;;  %v10857_v38 = vcombine.high %v890_v54, %v894_v11  ;;  %v10856_v48 = vcombine.low %v890_v54, %v894_v11 }
 0x427   :  { %7684 = vmatpush1.bf16.msra.mxu0 %v10880_v28  ;;  %v1022_v59 = vld [vmem:[#allocation2 + $0x1c38] sm:$0xff] }
 0x428   :  { %7685 = vmatprep.subr.bf16.mxu0 %v10873_v13  ;;  %v10985_v31 = vcombine.high %v1018_v24, %v1022_v59  ;;  %v1010_v47 = vld [vmem:[#allocation2 + $0x1bd8] sm:$0xff]  ;;  %v10984_v1 = vcombine.low %v1018_v24, %v1022_v59 }
 0x429   :  { %7727 = vmatpush1.bf16.msra.mxu1 %v11008_v41  ;;  %v1014_v37 = vld [vmem:[#allocation2 + $0x1bf8] sm:$0xff] }
 0x42a   :  { %7728 = vmatprep.subr.bf16.mxu1 %v11001_v51  ;;  %v1138_v40 = vld [vmem:[#allocation2 + $0x1fd8] sm:$0xff]  ;;  %v10977_v60 = vcombine.high %v1010_v47, %v1014_v37  ;;  %v10976_v35 = vcombine.low %v1010_v47, %v1014_v37 }
 0x42b   :  { %7686 = vmatpush1.bf16.msra.mxu0 %v10872_v42  ;;  %v1142_v25 = vld [vmem:[#allocation2 + $0x1ff8] sm:$0xff] }
 0x42c   :  { %7687 = vmatprep.subr.bf16.mxu0 %v10865_v7  ;;  %v11105_v28 = vcombine.high %v1138_v40, %v1142_v25  ;;  %v1002_v41 = vld [vmem:[#allocation2 + $0x1b98] sm:$0xff]  ;;  %v11104_v29 = vcombine.low %v1138_v40, %v1142_v25 }
 0x42d   :  { %7729 = vmatpush1.bf16.msra.mxu1 %v11000_v61  ;;  %v1006_v13 = vld [vmem:[#allocation2 + $0x1bb8] sm:$0xff]  ;;  %v12447_v61 = vld [vmem:[#allocation4] sm:$0xff] }
 0x42e   :  { %7730 = vmatprep.subr.bf16.mxu1 %v10993_v10  ;;  %v1130_v51 = vld [vmem:[#allocation2 + $0x1f98] sm:$0xff]  ;;  %v10969_v42 = vcombine.high %v1002_v41, %v1006_v13  ;;  %v1152_v7 = vrot.slane %v12447_v61, %v1151_v49 }
 0x42f   :  { %7688 = vmatpush1.bf16.msra.mxu0 %v10864_v20  ;;  %v1134_v30 = vld [vmem:[#allocation2 + $0x1fb8] sm:$0xff]  ;;  %v1160_v20 = vrot.slane %v12447_v61, %v12561_v19 }
 0x430   :  { %7689 = vmatprep.subr.bf16.mxu0 %v10857_v38  ;;  %v11097_v10 = vcombine.high %v1130_v51, %v1134_v30  ;;  %v994_v54 = vld [vmem:[#allocation2 + $0x1b58] sm:$0xff]  ;;  %v6426_v38 = vadd.f32 %v12253_v34, %v1152_v7  ;;  %v6422_v37 = vadd.f32 %v12243_v27, %v1152_v7 }
 0x431   :  { %7731 = vmatpush1.bf16.msra.mxu1 %v10992_v45  ;;  %v998_v11 = vld [vmem:[#allocation2 + $0x1b78] sm:$0xff]  ;;  %v10968_v45 = vcombine.low %v1002_v41, %v1006_v13  ;;  %v6770_v40 = vadd.f32 %v12324_v4, %v1160_v20  ;;  %v6766_v19 = vadd.f32 %v12314_v2, %v1160_v20 }
 0x432   :  { %7732 = vmatprep.subr.bf16.mxu1 %v10985_v31  ;;  %v1122_v24 = vld [vmem:[#allocation2 + $0x1f58] sm:$0xff]  ;;  %v11096_v31 = vcombine.low %v1130_v51, %v1134_v30  ;;  %v10961_v47 = vcombine.high %v994_v54, %v998_v11  ;;  %v10960_v41 = vcombine.low %v994_v54, %v998_v11  ;;  %v6469_v34 = vadd.f32 %v12255_v36, %v6426_v38 }
 0x433   :  { %7690 = vmatpush1.bf16.msra.mxu0 %v10856_v48  ;;  %v1126_v59 = vld [vmem:[#allocation2 + $0x1f78] sm:$0xff]  ;;  %v6465_v27 = vadd.f32 %v12247_v52, %v6422_v37  ;;  %v6813_v4 = vadd.f32 %v12326_v0, %v6770_v40  ;;  %v6809_v36 = vadd.f32 %v12318_v46, %v6766_v19 }
 0x434   :  { %7691 = vmatprep.subr.bf16.mxu0 %v10977_v60  ;;  %v11089_v25 = vcombine.high %v1122_v24, %v1126_v59  ;;  %v986_v48 = vld [vmem:[#allocation2 + $0x1b18] sm:$0xff]  ;;  %v11088_v13 = vcombine.low %v1122_v24, %v1126_v59 }
 0x435   :  { %7733 = vmatpush1.bf16.msra.mxu1 %v10984_v1  ;;  %v990_v1 = vld [vmem:[#allocation2 + $0x1b38] sm:$0xff]  ;;  %v6856_v54 = vadd.f32 %v12342_v39, %v6813_v4  ;;  %v6852_v24 = vadd.f32 %v12331_v26, %v6809_v36 }
 0x436   :  { %7734 = vmatprep.subr.bf16.mxu1 %v11105_v28  ;;  %v1114_v60 = vld [vmem:[#allocation2 + $0x1f18] sm:$0xff]  ;;  %v10953_v51 = vcombine.high %v986_v48, %v990_v1  ;;  %v10952_v11 = vcombine.low %v986_v48, %v990_v1  ;;  %v12578_v1 = vld [vmem:[#allocation16_spill] sm:$0xff] }
 0x437   :  { %7692 = vmatpush2.bf16.msra.mxu0 %v10976_v35  ;;  %v1118_v28 = vld [vmem:[#allocation2 + $0x1f38] sm:$0xff]  ;;  %v6899_v39 = vadd.f32 %v12344_v18, %v6856_v54  ;;  %v6895_v37 = vadd.f32 %v12335_v43, %v6852_v24  ;;  %v12585_v24 = vld [vmem:[#allocation19_spill] sm:$0xff] }
 0x438   :  { %7693 = vmatprep.subr.bf16.mxu0 %v10969_v42  ;;  %v11081_v30 = vcombine.high %v1114_v60, %v1118_v28  ;;  %v978_v35 = vld [vmem:[#allocation2 + $0x1ad8] sm:$0xff]  ;;  %v6512_v42 = vadd.f32 %v12271_v6, %v6469_v34  ;;  %v11080_v52 = vcombine.low %v1114_v60, %v1118_v28  ;;  %v12579_v28 = vld [vmem:[#allocation24_spill] sm:$0xff] }
 0x439   :  { %7735 = vmatpush2.bf16.msra.mxu1 %v11104_v29  ;;  %v982_v29 = vld [vmem:[#allocation2 + $0x1af8] sm:$0xff]  ;;  %v6942_v40 = vadd.f32 %v12360_v57, %v6899_v39 }
 0x43a   :  { %7736 = vmatprep.subr.bf16.mxu1 %v11097_v10  ;;  %v1106_v7 = vld [vmem:[#allocation2 + $0x1ed8] sm:$0xff]  ;;  %v6508_v10 = vadd.f32 %v12260_v50, %v6465_v27  ;;  %v10945_v0 = vcombine.high %v978_v35, %v982_v29  ;;  %v10944_v19 = vcombine.low %v978_v35, %v982_v29 }
 0x43b   :  { %7694 = vmatpush2.bf16.msra.mxu0 %v10968_v45  ;;  %v1110_v2 = vld [vmem:[#allocation2 + $0x1ef8] sm:$0xff]  ;;  %v6555_v45 = vadd.f32 %v12273_v9, %v6512_v42 }
 0x43c   :  { %7695 = vmatprep.subr.bf16.mxu0 %v10961_v47  ;;  %v11073_v59 = vcombine.high %v1106_v7, %v1110_v2  ;;  %v970_v20 = vld [vmem:[#allocation2 + $0x1a98] sm:$0xff]  ;;  %v6551_v46 = vadd.f32 %v12264_v55, %v6508_v10  ;;  %v11072_v47 = vcombine.low %v1106_v7, %v1110_v2 }
 0x43d   :  { %7737 = vmatpush2.bf16.msra.mxu1 %v11096_v31  ;;  %v974_v6 = vld [vmem:[#allocation2 + $0x1ab8] sm:$0xff]  ;;  %v6598_v31 = vadd.f32 %v12289_v3, %v6555_v45  ;;  %v12586_v45 = vld [vmem:[#allocation27_spill] sm:$0xff] }
 0x43e   :  { %7738 = vmatprep.subr.bf16.mxu1 %v11089_v25  ;;  %v1098_v38 = vld [vmem:[#allocation2 + $0x1e98] sm:$0xff]  ;;  %v10937_v26 = vcombine.high %v970_v20, %v974_v6  ;;  %v6594_v55 = vadd.f32 %v12578_v1, %v6551_v46  ;;  %v10936_v3 = vcombine.low %v970_v20, %v974_v6  ;;  %v12587_v46 = vld [vmem:[#allocation23_spill] sm:$0xff] }
 0x43f   :  { %7696 = vmatpush2.bf16.msra.mxu0 %v10960_v41  ;;  %v1102_v50 = vld [vmem:[#allocation2 + $0x1eb8] sm:$0xff]  ;;  %v6938_v41 = vadd.f32 %v12579_v28, %v6895_v37 }
 0x440   :  { %7697 = vmatprep.subr.bf16.mxu0 %v10953_v51  ;;  %v11065_v9 = vcombine.high %v1098_v38, %v1102_v50  ;;  %v962_v25 = vld [vmem:[#allocation2 + $0x1a58] sm:$0xff]  ;;  %v11064_v51 = vcombine.low %v1098_v38, %v1102_v50 }
 0x441   :  { %7739 = vmatpush2.bf16.msra.mxu1 %v11088_v13  ;;  %v966_v48 = vld [vmem:[#allocation2 + $0x1a78] sm:$0xff] }
 0x442   :  { %7740 = vmatprep.subr.bf16.mxu1 %v11081_v30  ;;  %v1090_v60 = vld [vmem:[#allocation2 + $0x1e58] sm:$0xff]  ;;  %v10929_v43 = vcombine.high %v962_v25, %v966_v48 }
 0x443   :  { %7698 = vmatpush2.bf16.msra.mxu0 %v10952_v11  ;;  %v1094_v18 = vld [vmem:[#allocation2 + $0x1e78] sm:$0xff] }
 0x444   :  { %7699 = vmatprep.subr.bf16.mxu0 %v10945_v0  ;;  %v12580_v34 = vld [vmem:[#allocation18_spill] sm:$0xff]  ;;  %v11057_v4 = vcombine.high %v1090_v60, %v1094_v18  ;;  %v12582_v29 = vld [vmem:[#allocation17_spill] sm:$0xff]  ;;  %v10928_v0 = vcombine.low %v962_v25, %v966_v48  ;;  %v11056_v20 = vcombine.low %v1090_v60, %v1094_v18 }
 0x445   :  { %7741 = vmatpush2.bf16.msra.mxu1 %v11080_v52  ;;  %v6641_v13 = vadd.f32 %v12580_v34, %v6598_v31  ;;  %v12581_v27 = vld [vmem:[#allocation26_spill] sm:$0xff]  ;;  %v6637_v42 = vadd.f32 %v12582_v29, %v6594_v55  ;;  %v12584_v54 = vld [vmem:[#allocation25_spill] sm:$0xff] }
 0x446   :  { %7742 = vmatprep.subr.bf16.mxu1 %v11073_v59  ;;  %v6985_v57 = vadd.f32 %v12581_v27, %v6942_v40  ;;  %v954_v30 = vld [vmem:[#allocation2 + $0x1a18] sm:$0xff]  ;;  %v6981_v11 = vadd.f32 %v12584_v54, %v6938_v41  ;;  %v12589_v40 = vld [vmem:[#allocation28_spill] sm:$0xff] }
 0x447   :  { %7700 = vmatpush2.bf16.msra.mxu0 %v10944_v19  ;;  %v958_v35 = vld [vmem:[#allocation2 + $0x1a38] sm:$0xff]  ;;  %v6680_v59 = vadd.f32 %v12585_v24, %v6637_v42 }
 0x448   :  { %7701 = vmatprep.subr.bf16.mxu0 %v10937_v26  ;;  %v12583_v7 = vld [vmem:[#allocation22_spill] sm:$0xff]  ;;  %v7028_v52 = vadd.f32 %v12377_v15, %v6985_v57  ;;  %v10921_v6 = vcombine.high %v954_v30, %v958_v35  ;;  %v7024_v38 = vadd.f32 %v12586_v45, %v6981_v11  ;;  %v10920_v31 = vcombine.low %v954_v30, %v958_v35  ;;  %v11453_v55 = vld [vmem:[#allocation6 + $0xe0] ss:$16 sps:$4 sm:$0xff]  }
 0x449   :  { %7743 = vmatpush2.bf16.msra.mxu1 %v11072_v47  ;;  %v6684_v2 = vadd.f32 %v12583_v7, %v6641_v13  ;;  %v1082_v10 = vld [vmem:[#allocation2 + $0x1e18] sm:$0xff]  ;;  %v12588_v47 = vld [vmem:[#allocation20_spill] sm:$0xff] }
 0x44a   :  { %7744 = vmatprep.subr.bf16.mxu1 %v11065_v9  ;;  %v1086_v36 = vld [vmem:[#allocation2 + $0x1e38] sm:$0xff]  ;;  %v7071_v19 = vadd.f32 %v12379_v5, %v7028_v52  ;;  %v6723_v15 = vadd.f32 %v12588_v47, %v6680_v59  ;;  %v7067_v9 = vadd.f32 %v12589_v40, %v7024_v38 }
 0x44b   :  { %7702 = vmatpush2.bf16.msra.mxu0 %v10936_v3  ;;  %v11049_v50 = vcombine.high %v1082_v10, %v1086_v36  ;;  %v6727_v39 = vadd.f32 %v12587_v46, %v6684_v2  ;;  %v11048_v26 = vcombine.low %v1082_v10, %v1086_v36  ;;  %v11455_v37 = vld [vmem:[#allocation6 + $0xe4] ss:$16 sps:$4 sm:$0xff]   ;;  %v11456_v5 = vld [vmem:[#allocation6 + $0x2e0] ss:$16 sps:$4 sm:$0xff]  }
 0x44c   :  { %7703 = vmatprep.subr.bf16.mxu0 %v10929_v43  ;;  %v11458_v25 = vld [vmem:[#allocation6 + $0x2e4] ss:$16 sps:$4 sm:$0xff]   ;;  %v7772_v1 = vmax.f32 %v7071_v19, 0.0  ;;  %v7762_v60 = vmax.f32 %v6723_v15, 0.0  ;;  %v7764_v18 = vmax.f32 %v7067_v9, 0.0 }
 0x44d   :  { %7745 = vmatpush2.bf16.msra.mxu1 %v11064_v51  ;;  %v7770_v48 = vmax.f32 %v6727_v39, 0.0  ;;  %v11461_v28 = vld [vmem:[#allocation6 + $0xc4] ss:$16 sps:$4 sm:$0xff]   ;;  %v11459_v13 = vld [vmem:[#allocation6 + $0xc0] ss:$16 sps:$4 sm:$0xff]   ;;  %v1167_v39 = vsub.s32 5, %v12228_v56 }
 0x44e   :  { %7746 = vmatprep.subr.bf16.mxu1 %v11057_v4  ;;  %v11464_v3 = vld [vmem:[#allocation6 + $0x2c4] ss:$16 sps:$4 sm:$0xff]   ;;  %v12490_v34 = vpack.c.bf16 %v7772_v1, %v7764_v18  ;;  %v11462_v51 = vld [vmem:[#allocation6 + $0x2c0] ss:$16 sps:$4 sm:$0xff]  }
 0x44f   :  { %7704 = vmatpush2.bf16.msra.mxu0 %v10928_v0  ;;  %v12487_v41 = vpack.c.bf16 %v7770_v48, %v7762_v60  ;;  %v11467_v43 = vld [vmem:[#allocation6 + $0xa4] ss:$16 sps:$4 sm:$0xff]   ;;  %v11465_v57 = vld [vmem:[#allocation6 + $0xa0] ss:$16 sps:$4 sm:$0xff]  }
 0x450   :  { %7705 = vmatprep.subr.bf16.mxu0 %v10921_v6  ;;  %v11470_v27 = vld [vmem:[#allocation6 + $0x2a4] ss:$16 sps:$4 sm:$0xff]   ;;  %v11471_v30 = vld [vmem:[#allocation6 + $0x80] ss:$16 sps:$4 sm:$0xff]  }
 0x451   :  { %7747 = vmatpush2.bf16.msra.mxu1 %v11056_v20  ;;  %v11473_v4 = vld [vmem:[#allocation6 + $0x84] ss:$16 sps:$4 sm:$0xff]   ;;  %v11474_v35 = vld [vmem:[#allocation6 + $0x280] ss:$16 sps:$4 sm:$0xff]  }
 0x452   :  { %7748 = vmatprep.subr.bf16.mxu1 %v11049_v50  ;;  %v11479_v29 = vld [vmem:[#allocation6 + $0x64] ss:$16 sps:$4 sm:$0xff]   ;;  %v11477_v7 = vld [vmem:[#allocation6 + $0x60] ss:$16 sps:$4 sm:$0xff]  }
 0x453   :  { %7706 = vmatpush2.bf16.msra.mxu0 %v10920_v31  ;;  %v11482_v42 = vld [vmem:[#allocation6 + $0x264] ss:$16 sps:$4 sm:$0xff]   ;;  %v11480_v2 = vld [vmem:[#allocation6 + $0x260] ss:$16 sps:$4 sm:$0xff]  }
 0x454   :  { %9343 = vmatprep.subr.bf16.mxu0 %v11455_v37  ;;  %v11485_v10 = vld [vmem:[#allocation6 + $0x44] ss:$16 sps:$4 sm:$0xff]   ;;  %v11483_v54 = vld [vmem:[#allocation6 + $0x40] ss:$16 sps:$4 sm:$0xff]  }
 0x455   :  { %7749 = vmatpush2.bf16.msra.mxu1 %v11048_v26  ;;  %v11488_v36 = vld [vmem:[#allocation6 + $0x244] ss:$16 sps:$4 sm:$0xff]   ;;  %v11486_v11 = vld [vmem:[#allocation6 + $0x240] ss:$16 sps:$4 sm:$0xff]   ;;  %v1168_v26 = vrot.slane %v12447_v61, %v1167_v39 }
 0x456   :  { %9386 = vmatprep.subr.bf16.mxu1 %v11458_v25  ;;  %7708 = vmatmul.mubr.bf16.vlgmr.msra.gmra.mxu0 %v12233_v12  ;;  %v11468_v12 = vld [vmem:[#allocation6 + $0x2a0] ss:$16 sps:$4 sm:$0xff]   ;;  %v11491_v52 = vld [vmem:[#allocation6 + $0x24] ss:$16 sps:$4 sm:$0xff]  }
 0x457   :  { %9344 = vmatpush1.bf16.msra.mxu0 %v11453_v55  ;;  %9375 = vmatprep.mubr.bf16.mxu0 %v12487_v41  ;;  %v11494_v0 = vld [vmem:[#allocation6 + $0x224] ss:$16 sps:$4 sm:$0xff]   ;;  %v11489_v24 = vld [vmem:[#allocation6 + $0x20] ss:$16 sps:$4 sm:$0xff]   ;;  %v7114_v40 = vadd.f32 %v12393_v63, %v1168_v26  ;;  %v7110_v1 = vadd.f32 %v12383_v32, %v1168_v26 }
 0x458   :  { %7751 = vmatmul.mubr.bf16.vlgmr.msra.gmra.mxu1 %v12239_v16  ;;  %9345 = vmatprep.subr.bf16.mxu0 %v11461_v28  ;;  %v11476_v16 = vld [vmem:[#allocation6 + $0x284] ss:$16 sps:$4 sm:$0xff]   ;;  %v11492_v59 = vld [vmem:[#allocation6 + $0x220] ss:$16 sps:$4 sm:$0xff]  }
 0x459   :  { %9387 = vmatpush1.bf16.msra.mxu1 %v11456_v5  ;;  %9418 = vmatprep.mubr.bf16.mxu1 %v12490_v34  ;;  %v11497_v20 = vld [vmem:[#allocation6 + $0x4] ss:$16 sps:$4 sm:$0xff]   ;;  %v11495_v45 = vld [vmem:[#allocation6] ss:$16 sps:$4 sm:$0xff]   ;;  %v7157_v60 = vadd.f32 %v12395_v17, %v7114_v40 }
 0x45a   :  { %9388 = vmatprep.subr.bf16.mxu1 %v11464_v3  ;;  %v11500_v6 = vld [vmem:[#allocation6 + $0x204] ss:$16 sps:$4 sm:$0xff]   ;;  %v11498_v38 = vld [vmem:[#allocation6 + $0x200] ss:$16 sps:$4 sm:$0xff]  }
 0x45b   :  { %9346 = vmatpush1.bf16.msra.mxu0 %v11459_v13  ;;  %v11503_v50 = vld [vmem:[#allocation6 + $0x1e4] ss:$16 sps:$4 sm:$0xff]   ;;  %v11501_v19 = vld [vmem:[#allocation6 + $0x1e0] ss:$16 sps:$4 sm:$0xff]   ;;  %v7200_v13 = vadd.f32 %v12411_v33, %v7157_v60 }
 0x45c   :  { %9347 = vmatprep.subr.bf16.mxu0 %v11467_v43  ;;  %v11506_v46 = vld [vmem:[#allocation6 + $0x3e4] ss:$16 sps:$4 sm:$0xff]   ;;  %v11504_v31 = vld [vmem:[#allocation6 + $0x3e0] ss:$16 sps:$4 sm:$0xff]  }
 0x45d   :  { %9389 = vmatpush1.bf16.msra.mxu1 %v11462_v51  ;;  %v11509_v47 = vld [vmem:[#allocation6 + $0x1c4] ss:$16 sps:$4 sm:$0xff]   ;;  %v11507_v37 = vld [vmem:[#allocation6 + $0x1c0] ss:$16 sps:$4 sm:$0xff]  }
 0x45e   :  { %9390 = vmatprep.subr.bf16.mxu1 %v11470_v27  ;;  %v11512_v15 = vld [vmem:[#allocation6 + $0x3c4] ss:$16 sps:$4 sm:$0xff]   ;;  %v11510_v9 = vld [vmem:[#allocation6 + $0x3c0] ss:$16 sps:$4 sm:$0xff]  }
 0x45f   :  { %9348 = vmatpush1.bf16.msra.mxu0 %v11465_v57  ;;  %v11515_v25 = vld [vmem:[#allocation6 + $0x1a4] ss:$16 sps:$4 sm:$0xff]   ;;  %v11513_v55 = vld [vmem:[#allocation6 + $0x1a0] ss:$16 sps:$4 sm:$0xff]   ;;  %v7243_v57 = vadd.f32 %v12413_v53, %v7200_v13 }
 0x460   :  { %9349 = vmatprep.subr.bf16.mxu0 %v11473_v4  ;;  %v11518_v48 = vld [vmem:[#allocation6 + $0x3a4] ss:$16 sps:$4 sm:$0xff]   ;;  %v11516_v5 = vld [vmem:[#allocation6 + $0x3a0] ss:$16 sps:$4 sm:$0xff]  }
 0x461   :  { %9391 = vmatpush1.bf16.msra.mxu1 %v11468_v12  ;;  %v11521_v18 = vld [vmem:[#allocation6 + $0x184] ss:$16 sps:$4 sm:$0xff]   ;;  %v11519_v51 = vld [vmem:[#allocation6 + $0x180] ss:$16 sps:$4 sm:$0xff]  }
 0x462   :  { %9392 = vmatprep.subr.bf16.mxu1 %v11476_v16  ;;  %v11524_v28 = vld [vmem:[#allocation6 + $0x384] ss:$16 sps:$4 sm:$0xff]   ;;  %v11522_v32 = vld [vmem:[#allocation6 + $0x380] ss:$16 sps:$4 sm:$0xff]   ;;  %v7286_v16 = vadd.f32 %v12429_v62, %v7243_v57 }
 0x463   :  { %9350 = vmatpush1.bf16.msra.mxu0 %v11471_v30  ;;  %v12590_v3 = vld [vmem:[#allocation30_spill] sm:$0xff]  ;;  %v11525_v12 = vld [vmem:[#allocation6 + $0x160] ss:$16 sps:$4 sm:$0xff]  }
 0x464   :  { %9351 = vmatprep.subr.bf16.mxu0 %v11479_v29  ;;  %v7153_v63 = vadd.f32 %v12590_v3, %v7110_v1  ;;  %v11527_v27 = vld [vmem:[#allocation6 + $0x164] ss:$16 sps:$4 sm:$0xff]   ;;  %v11528_v33 = vld [vmem:[#allocation6 + $0x360] ss:$16 sps:$4 sm:$0xff]   ;;  %v7371_v29 = vpop.f32.mrf.mxu0 }
 0x465   :  { %9393 = vmatpush1.bf16.msra.mxu1 %v11474_v35  ;;  %v11530_v17 = vld [vmem:[#allocation6 + $0x364] ss:$16 sps:$4 sm:$0xff]   ;;  %v11534_v53 = vld [vmem:[#allocation6 + $0x340] ss:$16 sps:$4 sm:$0xff]  }
 0x466   :  { %9394 = vmatprep.subr.bf16.mxu1 %v11482_v42  ;;  %v7196_v43 = vadd.f32 %v12400_v23, %v7153_v63  ;;  %v11533_v30 = vld [vmem:[#allocation6 + $0x144] ss:$16 sps:$4 sm:$0xff]   ;;  %v11531_v42 = vld [vmem:[#allocation6 + $0x140] ss:$16 sps:$4 sm:$0xff]  }
 0x467   :  { %9352 = vmatpush1.bf16.msra.mxu0 %v11477_v7  ;;  %v11536_v23 = vld [vmem:[#allocation6 + $0x344] ss:$16 sps:$4 sm:$0xff]   ;;  %v7329_v7 = vadd.f32 %v12431_v8, %v7286_v16  ;;  %v11609_v39 = vld [vmem:[#allocation6 + $0x6e0] ss:$16 sps:$4 sm:$0xff]  }
 0x468   :  { %9353 = vmatprep.subr.bf16.mxu0 %v11485_v10  ;;  %v7239_v4 = vadd.f32 %v12404_v44, %v7196_v43  ;;  %v11542_v44 = vld [vmem:[#allocation6 + $0x324] ss:$16 sps:$4 sm:$0xff]   ;;  %v11552_v26 = vld [vmem:[#allocation6 + $0x4c0] ss:$16 sps:$4 sm:$0xff]  }
 0x469   :  { %9395 = vmatpush1.bf16.msra.mxu1 %v11480_v2  ;;  %v11539_v2 = vld [vmem:[#allocation6 + $0x124] ss:$16 sps:$4 sm:$0xff]   ;;  %v7372_v10 = vadd.f32 %v7371_v29, %v7329_v7  ;;  %v11615_v40 = vld [vmem:[#allocation6 + $0x6c0] ss:$16 sps:$4 sm:$0xff]  }
 0x46a   :  { %9396 = vmatprep.subr.bf16.mxu1 %v11488_v36  ;;  %v7282_v35 = vadd.f32 %v12418_v22, %v7239_v4  ;;  %v11537_v36 = vld [vmem:[#allocation6 + $0x120] ss:$16 sps:$4 sm:$0xff]   ;;  %v11548_v8 = vld [vmem:[#allocation6 + $0x304] ss:$16 sps:$4 sm:$0xff]  }
 0x46b   :  { %9354 = vmatpush1.bf16.msra.mxu0 %v11483_v54  ;;  %v11540_v22 = vld [vmem:[#allocation6 + $0x320] ss:$16 sps:$4 sm:$0xff]   ;;  %v11566_v63 = vld [vmem:[#allocation6 + $0x444] ss:$16 sps:$4 sm:$0xff]  }
 0x46c   :  { %9355 = vmatprep.subr.bf16.mxu0 %v11491_v52  ;;  %v7325_v62 = vadd.f32 %v12422_v14, %v7282_v35  ;;  %v7414_v52 = vpop.f32.mrf.mxu1  ;;  %v11546_v14 = vld [vmem:[#allocation6 + $0x300] ss:$16 sps:$4 sm:$0xff]   ;;  %v11653_v16 = vld [vmem:[#allocation6 + $0x604] ss:$16 sps:$4 sm:$0xff]  }
 0x46d   :  { %9397 = vmatpush1.bf16.msra.mxu1 %v11486_v11  ;;  %v11545_v11 = vld [vmem:[#allocation6 + $0x104] ss:$16 sps:$4 sm:$0xff]   ;;  %v11621_v1 = vld [vmem:[#allocation6 + $0x6a0] ss:$16 sps:$4 sm:$0xff]  }
 0x46e   :  { %9398 = vmatprep.subr.bf16.mxu1 %v11494_v0  ;;  %v7368_v54 = vadd.f32 %v12436_v58, %v7325_v62  ;;  %v7415_v0 = vadd.f32 %v7414_v52, %v7372_v10  ;;  %v11549_v58 = vld [vmem:[#allocation6 + $0x4e0] ss:$16 sps:$4 sm:$0xff]   ;;  %v11659_v35 = vld [vmem:[#allocation6 + $0x7e4] ss:$16 sps:$4 sm:$0xff]  }
 0x46f   :  { %9356 = vmatpush1.bf16.msra.mxu0 %v11489_v24  ;;  %v11543_v24 = vld [vmem:[#allocation6 + $0x100] ss:$16 sps:$4 sm:$0xff]   ;;  %v11671_v10 = vld [vmem:[#allocation6 + $0x7a4] ss:$16 sps:$4 sm:$0xff]  }
 0x470   :  { %9357 = vmatprep.subr.bf16.mxu0 %v11497_v20  ;;  %v11558_v60 = vld [vmem:[#allocation6 + $0x480] ss:$16 sps:$4 sm:$0xff]  }
 0x471   :  { %9399 = vmatpush1.bf16.msra.mxu1 %v11492_v59  ;;  %v12591_v59 = vld [vmem:[#allocation31_spill] sm:$0xff] }
 0x472   :  { %9400 = vmatprep.subr.bf16.mxu1 %v11500_v6  ;;  %v7411_v20 = vadd.f32 %v12591_v59, %v7368_v54  ;;  %v11551_v6 = vld [vmem:[#allocation6 + $0x4e4] ss:$16 sps:$4 sm:$0xff]   ;;  %v11561_v3 = vld [vmem:[#allocation6 + $0x460] ss:$16 sps:$4 sm:$0xff]  }
 0x473   :  { %9358 = vmatpush1.bf16.msra.mxu0 %v11495_v45  ;;  %v11611_v45 = vld [vmem:[#allocation6 + $0x6e4] ss:$16 sps:$4 sm:$0xff]   ;;  %v11633_v13 = vld [vmem:[#allocation6 + $0x660] ss:$16 sps:$4 sm:$0xff]  }
 0x474   :  { %9359 = vmatprep.subr.bf16.mxu0 %v11503_v50  ;;  %v7766_v50 = vmax.f32 %v7411_v20, 0.0  ;;  %v11564_v43 = vld [vmem:[#allocation6 + $0x440] ss:$16 sps:$4 sm:$0xff]   ;;  %v11584_v54 = vld [vmem:[#allocation6 + $0x584] ss:$16 sps:$4 sm:$0xff]  }
 0x475   :  { %9401 = vmatpush1.bf16.msra.mxu1 %v11498_v38  ;;  %v7774_v38 = vmax.f32 %v7415_v0, 0.0  ;;  %v11567_v57 = vld [vmem:[#allocation6 + $0x420] ss:$16 sps:$4 sm:$0xff]   ;;  %v11590_v20 = vld [vmem:[#allocation6 + $0x544] ss:$16 sps:$4 sm:$0xff]  }
 0x476   :  { %9402 = vmatprep.subr.bf16.mxu1 %v11506_v46  ;;  %v11554_v46 = vld [vmem:[#allocation6 + $0x4c4] ss:$16 sps:$4 sm:$0xff]   ;;  %v11645_v4 = vld [vmem:[#allocation6 + $0x620] ss:$16 sps:$4 sm:$0xff]  }
 0x477   :  { %9360 = vmatpush2.bf16.msra.mxu0 %v11501_v19  ;;  %v12511_v19 = vpack.c.bf16 %v7774_v38, %v7766_v50  ;;  %v11573_v29 = vld [vmem:[#allocation6 + $0x5e0] ss:$16 sps:$4 sm:$0xff]   ;;  %v11593_v38 = vld [vmem:[#allocation6 + $0x524] ss:$16 sps:$4 sm:$0xff]  }
 0x478   :  { %9361 = vmatprep.subr.bf16.mxu0 %v11509_v47  ;;  %v11617_v47 = vld [vmem:[#allocation6 + $0x6c4] ss:$16 sps:$4 sm:$0xff]   ;;  %v11657_v7 = vld [vmem:[#allocation6 + $0x7e0] ss:$16 sps:$4 sm:$0xff]  }
 0x479   :  { %9403 = vmatpush2.bf16.msra.mxu1 %v11504_v31  ;;  %v12592_v31 = vld [vmem:[#allocation21_spill] sm:$0xff] }
 0x47a   :  { %9404 = vmatprep.subr.bf16.mxu1 %v11512_v15  ;;  %v12593_v15 = vld [vmem:[#allocation29_spill] sm:$0xff] }
 0x47b   :  { %9362 = vmatpush2.bf16.msra.mxu0 %v11507_v37  ;;  %v11557_v37 = vld [vmem:[#allocation6 + $0x4a4] ss:$16 sps:$4 sm:$0xff]   ;;  %v11663_v62 = vld [vmem:[#allocation6 + $0x7c0] ss:$16 sps:$4 sm:$0xff]  }
 0x47c   :  { %9363 = vmatprep.subr.bf16.mxu0 %v11515_v25  ;;  %v11555_v25 = vld [vmem:[#allocation6 + $0x4a0] ss:$16 sps:$4 sm:$0xff]   ;;  %v11695_v50 = vld [vmem:[#allocation6 + $0x724] ss:$16 sps:$4 sm:$0xff]  }
 0x47d   :  { %9405 = vmatpush2.bf16.msra.mxu1 %v11510_v9  ;;  %v11623_v9 = vld [vmem:[#allocation6 + $0x6a4] ss:$16 sps:$4 sm:$0xff]   ;;  %v11582_v52 = vld [vmem:[#allocation6 + $0x580] ss:$16 sps:$4 sm:$0xff]  }
 0x47e   :  { %9406 = vmatprep.subr.bf16.mxu1 %v11518_v48  ;;  %v11560_v48 = vld [vmem:[#allocation6 + $0x484] ss:$16 sps:$4 sm:$0xff]   ;;  %v11675_v0 = vld [vmem:[#allocation6 + $0x780] ss:$16 sps:$4 sm:$0xff]  }
 0x47f   :  { %9364 = vmatpush2.bf16.msra.mxu0 %v11513_v55  ;;  %v11629_v55 = vld [vmem:[#allocation6 + $0x684] ss:$16 sps:$4 sm:$0xff]   ;;  %v11585_v59 = vld [vmem:[#allocation6 + $0x560] ss:$16 sps:$4 sm:$0xff]  }
 0x480   :  { %9365 = vmatprep.subr.bf16.mxu0 %v11521_v18  ;;  %v11627_v18 = vld [vmem:[#allocation6 + $0x680] ss:$16 sps:$4 sm:$0xff]  }
 0x481   :  { %9407 = vmatpush2.bf16.msra.mxu1 %v11516_v5  ;;  %v11563_v5 = vld [vmem:[#allocation6 + $0x464] ss:$16 sps:$4 sm:$0xff]  }
 0x482   :  { %9408 = vmatprep.subr.bf16.mxu1 %v11524_v28  ;;  %v11635_v28 = vld [vmem:[#allocation6 + $0x664] ss:$16 sps:$4 sm:$0xff]  }
 0x483   :  { %9366 = vmatpush2.bf16.msra.mxu0 %v11519_v51  ;;  %v11641_v51 = vld [vmem:[#allocation6 + $0x644] ss:$16 sps:$4 sm:$0xff]  }
 0x484   :  { %9367 = vmatprep.subr.bf16.mxu0 %v11527_v27  ;;  %v11639_v27 = vld [vmem:[#allocation6 + $0x640] ss:$16 sps:$4 sm:$0xff]  }
 0x485   :  { %9409 = vmatpush2.bf16.msra.mxu1 %v11522_v32  ;;  %v11569_v32 = vld [vmem:[#allocation6 + $0x424] ss:$16 sps:$4 sm:$0xff]  }
 0x486   :  { %9410 = vmatprep.subr.bf16.mxu1 %v11530_v17  ;;  %v11647_v17 = vld [vmem:[#allocation6 + $0x624] ss:$16 sps:$4 sm:$0xff]  }
 0x487   :  { %9368 = vmatpush2.bf16.msra.mxu0 %v11525_v12  ;;  %v11572_v12 = vld [vmem:[#allocation6 + $0x404] ss:$16 sps:$4 sm:$0xff]  }
 0x488   :  { %9369 = vmatprep.subr.bf16.mxu0 %v11533_v30  ;;  %v11575_v30 = vld [vmem:[#allocation6 + $0x5e4] ss:$16 sps:$4 sm:$0xff]  }
 0x489   :  { %9411 = vmatpush2.bf16.msra.mxu1 %v11528_v33  ;;  %v11570_v33 = vld [vmem:[#allocation6 + $0x400] ss:$16 sps:$4 sm:$0xff]  }
 0x48a   :  { %9412 = vmatprep.subr.bf16.mxu1 %v11536_v23  ;;  %v11651_v23 = vld [vmem:[#allocation6 + $0x600] ss:$16 sps:$4 sm:$0xff]  }
 0x48b   :  { %9370 = vmatpush2.bf16.msra.mxu0 %v11531_v42  ;;  %v11578_v42 = vld [vmem:[#allocation6 + $0x5c4] ss:$16 sps:$4 sm:$0xff]  }
 0x48c   :  { %9371 = vmatprep.subr.bf16.mxu0 %v11539_v2  ;;  %v11576_v2 = vld [vmem:[#allocation6 + $0x5c0] ss:$16 sps:$4 sm:$0xff]  }
 0x48d   :  { %9413 = vmatpush2.bf16.msra.mxu1 %v11534_v53  ;;  %v11665_v53 = vld [vmem:[#allocation6 + $0x7c4] ss:$16 sps:$4 sm:$0xff]  }
 0x48e   :  { %9414 = vmatprep.subr.bf16.mxu1 %v11542_v44  ;;  %v11581_v44 = vld [vmem:[#allocation6 + $0x5a4] ss:$16 sps:$4 sm:$0xff]  }
 0x48f   :  { %9372 = vmatpush2.bf16.msra.mxu0 %v11537_v36  ;;  %v11579_v36 = vld [vmem:[#allocation6 + $0x5a0] ss:$16 sps:$4 sm:$0xff]  }
 0x490   :  { %9373 = vmatprep.subr.bf16.mxu0 %v11545_v11  ;;  %v11677_v11 = vld [vmem:[#allocation6 + $0x784] ss:$16 sps:$4 sm:$0xff]  }
 0x491   :  { %9415 = vmatpush2.bf16.msra.mxu1 %v11540_v22  ;;  %v11669_v22 = vld [vmem:[#allocation6 + $0x7a0] ss:$16 sps:$4 sm:$0xff]  }
 0x492   :  { %9416 = vmatprep.subr.bf16.mxu1 %v11548_v8  ;;  %v11587_v8 = vld [vmem:[#allocation6 + $0x564] ss:$16 sps:$4 sm:$0xff]  }
 0x493   :  { %9374 = vmatpush2.bf16.msra.mxu0 %v11543_v24  ;;  %v11683_v24 = vld [vmem:[#allocation6 + $0x764] ss:$16 sps:$4 sm:$0xff]  }
 0x494   :  { %9429 = vmatprep.subr.bf16.mxu0 %v11551_v6  ;;  %v11689_v6 = vld [vmem:[#allocation6 + $0x744] ss:$16 sps:$4 sm:$0xff]  }
 0x495   :  { %9417 = vmatpush2.bf16.msra.mxu1 %v11546_v14  ;;  %v11681_v14 = vld [vmem:[#allocation6 + $0x760] ss:$16 sps:$4 sm:$0xff]  }
 0x496   :  { %9472 = vmatprep.subr.bf16.mxu1 %v11611_v45  ;;  %9376 = vmatmul.mubr.bf16.vlgmr.msra.gmra.mxu0 %v12592_v31  ;;  %v11588_v45 = vld [vmem:[#allocation6 + $0x540] ss:$16 sps:$4 sm:$0xff]  }
 0x497   :  { %9430 = vmatpush1.bf16.msra.mxu0 %v11549_v58  ;;  %9461 = vmatprep.mubr.bf16.mxu0 %v12511_v19  ;;  %v11687_v58 = vld [vmem:[#allocation6 + $0x740] ss:$16 sps:$4 sm:$0xff]  }
 0x498   :  { %9419 = vmatmul.mubr.bf16.vlgmr.msra.gmra.mxu1 %v12593_v15  ;;  %9431 = vmatprep.subr.bf16.mxu0 %v11554_v46  ;;  %v11591_v46 = vld [vmem:[#allocation6 + $0x520] ss:$16 sps:$4 sm:$0xff]  }
 0x499   :  { %9473 = vmatpush1.bf16.msra.mxu1 %v11609_v39  ;;  %v11596_v39 = vld [vmem:[#allocation6 + $0x504] ss:$16 sps:$4 sm:$0xff]  }
 0x49a   :  { %9474 = vmatprep.subr.bf16.mxu1 %v11617_v47  ;;  %v11693_v47 = vld [vmem:[#allocation6 + $0x720] ss:$16 sps:$4 sm:$0xff]  }
 0x49b   :  { %9432 = vmatpush1.bf16.msra.mxu0 %v11552_v26  ;;  %v11701_v26 = vld [vmem:[#allocation6 + $0x704] ss:$16 sps:$4 sm:$0xff]  }
 0x49c   :  { %9433 = vmatprep.subr.bf16.mxu0 %v11557_v37  ;;  %v11594_v37 = vld [vmem:[#allocation6 + $0x500] ss:$16 sps:$4 sm:$0xff]  }
 0x49d   :  { %9475 = vmatpush1.bf16.msra.mxu1 %v11615_v40  ;;  %v11599_v40 = vld [vmem:[#allocation6 + $0xec] ss:$16 sps:$4 sm:$0xff]  }
 0x49e   :  { %9476 = vmatprep.subr.bf16.mxu1 %v11623_v9  ;;  %v11699_v9 = vld [vmem:[#allocation6 + $0x700] ss:$16 sps:$4 sm:$0xff]  }
 0x49f   :  { %9434 = vmatpush1.bf16.msra.mxu0 %v11555_v25  ;;  %v11707_v25 = vld [vmem:[#allocation6 + $0x2ec] ss:$16 sps:$4 sm:$0xff]  }
 0x4a0   :  { %9435 = vmatprep.subr.bf16.mxu0 %v11560_v48  ;;  %v11597_v48 = vld [vmem:[#allocation6 + $0xe8] ss:$16 sps:$4 sm:$0xff]  }
 0x4a1   :  { %9477 = vmatpush1.bf16.msra.mxu1 %v11621_v1  ;;  %v11602_v1 = vld [vmem:[#allocation6 + $0xcc] ss:$16 sps:$4 sm:$0xff]  }
 0x4a2   :  { %9478 = vmatprep.subr.bf16.mxu1 %v11629_v55  ;;  %v11600_v55 = vld [vmem:[#allocation6 + $0xc8] ss:$16 sps:$4 sm:$0xff]  }
 0x4a3   :  { %9436 = vmatpush1.bf16.msra.mxu0 %v11558_v60  ;;  %v11605_v60 = vld [vmem:[#allocation6 + $0xac] ss:$16 sps:$4 sm:$0xff]  }
 0x4a4   :  { %9437 = vmatprep.subr.bf16.mxu0 %v11563_v5  ;;  %v11603_v5 = vld [vmem:[#allocation6 + $0xa8] ss:$16 sps:$4 sm:$0xff]  }
 0x4a5   :  { %9479 = vmatpush1.bf16.msra.mxu1 %v11627_v18  ;;  %v11608_v18 = vld [vmem:[#allocation6 + $0x8c] ss:$16 sps:$4 sm:$0xff]  }
 0x4a6   :  { %9480 = vmatprep.subr.bf16.mxu1 %v11635_v28  ;;  %v11606_v28 = vld [vmem:[#allocation6 + $0x88] ss:$16 sps:$4 sm:$0xff]  }
 0x4a7   :  { %9438 = vmatpush1.bf16.msra.mxu0 %v11561_v3  ;;  %v11614_v3 = vld [vmem:[#allocation6 + $0x6c] ss:$16 sps:$4 sm:$0xff]  }
 0x4a8   :  { %9439 = vmatprep.subr.bf16.mxu0 %v11566_v63  ;;  %v11612_v63 = vld [vmem:[#allocation6 + $0x68] ss:$16 sps:$4 sm:$0xff]  }
 0x4a9   :  { %9481 = vmatpush1.bf16.msra.mxu1 %v11633_v13  ;;  %v11620_v13 = vld [vmem:[#allocation6 + $0x4c] ss:$16 sps:$4 sm:$0xff]  }
 0x4aa   :  { %9482 = vmatprep.subr.bf16.mxu1 %v11641_v51  ;;  %v11618_v51 = vld [vmem:[#allocation6 + $0x48] ss:$16 sps:$4 sm:$0xff]  }
 0x4ab   :  { %9440 = vmatpush1.bf16.msra.mxu0 %v11564_v43  ;;  %v11626_v43 = vld [vmem:[#allocation6 + $0x2c] ss:$16 sps:$4 sm:$0xff]  }
 0x4ac   :  { %9441 = vmatprep.subr.bf16.mxu0 %v11569_v32  ;;  %v7451_v32 = vpop.f32.mrf.mxu0 }
 0x4ad   :  { %9483 = vmatpush1.bf16.msra.mxu1 %v11639_v27  ;;  %v11632_v27 = vld [vmem:[#allocation6 + $0xc] ss:$16 sps:$4 sm:$0xff]  }
 0x4ae   :  { %9484 = vmatprep.subr.bf16.mxu1 %v11647_v17  ;;  %v7494_v17 = vpop.f32.mrf.mxu1 }
 0x4af   :  { %9442 = vmatpush1.bf16.msra.mxu0 %v11567_v57  ;;  %v11630_v57 = vld [vmem:[#allocation6 + $0x8] ss:$16 sps:$4 sm:$0xff]  }
 0x4b0   :  { %9443 = vmatprep.subr.bf16.mxu0 %v11572_v12  ;;  %v7453_v12 = vpop.f32.mrf.mxu0 }
 0x4b1   :  { %9485 = vmatpush1.bf16.msra.mxu1 %v11645_v4  ;;  %v11638_v4 = vld [vmem:[#allocation6 + $0x1ec] ss:$16 sps:$4 sm:$0xff]  }
 0x4b2   :  { %9486 = vmatprep.subr.bf16.mxu1 %v11653_v16  ;;  %v7496_v16 = vpop.f32.mrf.mxu1 }
 0x4b3   :  { %9444 = vmatpush1.bf16.msra.mxu0 %v11570_v33  ;;  %v11636_v33 = vld [vmem:[#allocation6 + $0x1e8] ss:$16 sps:$4 sm:$0xff]  }
 0x4b4   :  { %9445 = vmatprep.subr.bf16.mxu0 %v11575_v30  ;;  %v7455_v30 = vpop.f32.mrf.mxu0 }
 0x4b5   :  { %9487 = vmatpush1.bf16.msra.mxu1 %v11651_v23  ;;  %v11644_v23 = vld [vmem:[#allocation6 + $0x1cc] ss:$16 sps:$4 sm:$0xff]  }
 0x4b6   :  { %9488 = vmatprep.subr.bf16.mxu1 %v11659_v35  ;;  %v7498_v35 = vpop.f32.mrf.mxu1 }
 0x4b7   :  { %9446 = vmatpush2.bf16.msra.mxu0 %v11573_v29  ;;  %v11642_v29 = vld [vmem:[#allocation6 + $0x1c8] ss:$16 sps:$4 sm:$0xff]  }
 0x4b8   :  { %9447 = vmatprep.subr.bf16.mxu0 %v11578_v42  ;;  %v7457_v42 = vpop.f32.mrf.mxu0 }
 0x4b9   :  { %9489 = vmatpush2.bf16.msra.mxu1 %v11657_v7  ;;  %v11650_v7 = vld [vmem:[#allocation6 + $0x1ac] ss:$16 sps:$4 sm:$0xff]  }
 0x4ba   :  { %9490 = vmatprep.subr.bf16.mxu1 %v11665_v53  ;;  %v7500_v53 = vpop.f32.mrf.mxu1 }
 0x4bb   :  { %9448 = vmatpush2.bf16.msra.mxu0 %v11576_v2  ;;  %v7537_v2 = vpop.f32.mrf.mxu0 }
 0x4bc   :  { %9449 = vmatprep.subr.bf16.mxu0 %v11581_v44  ;;  %v7580_v44 = vpop.f32.mrf.mxu1 }
 0x4bd   :  { %9491 = vmatpush2.bf16.msra.mxu1 %v11663_v62  ;;  %v11648_v62 = vld [vmem:[#allocation6 + $0x1a8] ss:$16 sps:$4 sm:$0xff]  }
 0x4be   :  { %9492 = vmatprep.subr.bf16.mxu1 %v11671_v10  ;;  %v11656_v10 = vld [vmem:[#allocation6 + $0x18c] ss:$16 sps:$4 sm:$0xff]  }
 0x4bf   :  { %9450 = vmatpush2.bf16.msra.mxu0 %v11579_v36  ;;  %v7539_v36 = vpop.f32.mrf.mxu0 }
 0x4c0   :  { %9451 = vmatprep.subr.bf16.mxu0 %v11584_v54  ;;  %v1175_v54 = vsub.s32 7, %v12228_v56 }
 0x4c1   :  { %9493 = vmatpush2.bf16.msra.mxu1 %v11669_v22  ;;  %v7582_v22 = vpop.f32.mrf.mxu1 }
 0x4c2   :  { %9494 = vmatprep.subr.bf16.mxu1 %v11677_v11  ;;  %v11654_v11 = vld [vmem:[#allocation6 + $0x188] ss:$16 sps:$4 sm:$0xff]  }
 0x4c3   :  { %9452 = vmatpush2.bf16.msra.mxu0 %v11582_v52  ;;  %v1171_v52 = vsub.s32 6, %v12228_v56 }
 0x4c4   :  { %9453 = vmatprep.subr.bf16.mxu0 %v11587_v8  ;;  %v11662_v8 = vld [vmem:[#allocation6 + $0x16c] ss:$16 sps:$4 sm:$0xff]  }
 0x4c5   :  { %9495 = vmatpush2.bf16.msra.mxu1 %v11675_v0  ;;  %v7541_v0 = vpop.f32.mrf.mxu0 }
 0x4c6   :  { %9496 = vmatprep.subr.bf16.mxu1 %v11683_v24  ;;  %v1176_v24 = vrot.slane %v12447_v61, %v1175_v54 }
 0x4c7   :  { %9454 = vmatpush2.bf16.msra.mxu0 %v11585_v59  ;;  %v7584_v59 = vpop.f32.mrf.mxu1 }
 0x4c8   :  { %9455 = vmatprep.subr.bf16.mxu0 %v11590_v20  ;;  %v11660_v20 = vld [vmem:[#allocation6 + $0x168] ss:$16 sps:$4 sm:$0xff]  }
 0x4c9   :  { %9497 = vmatpush2.bf16.msra.mxu1 %v11681_v14  ;;  %v1172_v14 = vrot.slane %v12447_v61, %v1171_v52  ;;  %v11680_v61 = vld [vmem:[#allocation6 + $0x10c] ss:$16 sps:$4 sm:$0xff]  }
 0x4ca   :  { %9498 = vmatprep.subr.bf16.mxu1 %v11689_v6  ;;  %v11668_v6 = vld [vmem:[#allocation6 + $0x14c] ss:$16 sps:$4 sm:$0xff]  }
 0x4cb   :  { %9456 = vmatpush2.bf16.msra.mxu0 %v11588_v45  ;;  %v7543_v45 = vpop.f32.mrf.mxu0 }
 0x4cc   :  { %9457 = vmatprep.subr.bf16.mxu0 %v11593_v38  ;;  %v7454_v38 = vadd.f32 %v7453_v12, %v1176_v24  ;;  %v11684_v12 = vld [vmem:[#allocation6 + $0x4e8] ss:$16 sps:$4 sm:$0xff]  }
 0x4cd   :  { %9499 = vmatpush2.bf16.msra.mxu1 %v11687_v58  ;;  %v7586_v58 = vpop.f32.mrf.mxu1 }
 0x4ce   :  { %9500 = vmatprep.subr.bf16.mxu1 %v11695_v50  ;;  %v11666_v50 = vld [vmem:[#allocation6 + $0x148] ss:$16 sps:$4 sm:$0xff]  }
 0x4cf   :  { %9458 = vmatpush2.bf16.msra.mxu0 %v11591_v46  ;;  %v7452_v46 = vadd.f32 %v7451_v32, %v1172_v14 }
 0x4d0   :  { %9459 = vmatprep.subr.bf16.mxu0 %v11596_v39 }
 0x4d1   :  { %9501 = vmatpush2.bf16.msra.mxu1 %v11693_v47  ;;  %v11674_v47 = vld [vmem:[#allocation6 + $0x12c] ss:$16 sps:$4 sm:$0xff]  }
 0x4d2   :  { %9502 = vmatprep.subr.bf16.mxu1 %v11701_v26  ;;  %v7456_v26 = vadd.f32 %v7455_v30, %v1172_v14 }
 0x4d3   :  { %9460 = vmatpush2.bf16.msra.mxu0 %v11594_v37 }
 0x4d4   :  { %9515 = vmatprep.subr.bf16.mxu0 %v11599_v40  ;;  %v7497_v40 = vadd.f32 %v7496_v16, %v7454_v38 }
 0x4d5   :  { %9503 = vmatpush2.bf16.msra.mxu1 %v11699_v9  ;;  %v7458_v9 = vadd.f32 %v7457_v42, %v1176_v24 }
 0x4d6   :  { %9462 = vmatmul.mubr.bf16.vlgmr.msra.gmra.mxu0 %v12443_v21  ;;  %9558 = vmatprep.subr.bf16.mxu1 %v11707_v25  ;;  %v7623_v39 = vpop.f32.mrf.mxu0  ;;  %v11672_v25 = vld [vmem:[#allocation6 + $0x128] ss:$16 sps:$4 sm:$0xff]  }
 0x4d7   :  { %9516 = vmatpush1.bf16.msra.mxu0 %v11597_v48  ;;  %9547 = vmatprep.mubr.bf16.mxu0 %v12487_v41  ;;  %v11624_v41 = vld [vmem:[#allocation6 + $0x28] ss:$16 sps:$4 sm:$0xff]   ;;  %v7495_v48 = vadd.f32 %v7494_v17, %v7452_v46 }
 0x4d8   :  { %9517 = vmatprep.subr.bf16.mxu0 %v11602_v1  ;;  %v7666_v37 = vpop.f32.mrf.mxu1  ;;  %v7625_v1 = vpop.f32.mrf.mxu0 }
 0x4db   :  { %9518 = vmatpush1.bf16.msra.mxu0 %v11600_v55  ;;  %v7499_v55 = vadd.f32 %v7498_v35, %v7456_v26 }
 0x4dc   :  { %9519 = vmatprep.subr.bf16.mxu0 %v11605_v60  ;;  %v7540_v60 = vadd.f32 %v7539_v36, %v7497_v40 }
 0x4df   :  { %9520 = vmatpush1.bf16.msra.mxu0 %v11603_v5  ;;  %v7668_v5 = vpop.f32.mrf.mxu1 }
 0x4e0   :  { %9521 = vmatprep.subr.bf16.mxu0 %v11608_v18  ;;  %v7538_v18 = vadd.f32 %v7537_v2, %v7495_v48  ;;  %v11690_v2 = vld [vmem:[#allocation6 + $0x4c8] ss:$16 sps:$4 sm:$0xff]  }
 0x4e1   :  { %v7670_v32 = vpop.f32.mrf.mxu1  ;;  %v11708_v48 = vld [vmem:[#allocation6 + $0x468] ss:$16 sps:$4 sm:$0xff]  }
 0x4e3   :  { %9522 = vmatpush1.bf16.msra.mxu0 %v11606_v28  ;;  %v7501_v28 = vadd.f32 %v7500_v53, %v7458_v9  ;;  %v7672_v35 = vpop.f32.mrf.mxu1  ;;  %v11705_v9 = vld [vmem:[#allocation6 + $0x2e8] ss:$16 sps:$4 sm:$0xff]  }
 0x4e4   :  { %9523 = vmatprep.subr.bf16.mxu0 %v11614_v3  ;;  %v7542_v3 = vadd.f32 %v7541_v0, %v7499_v55  ;;  %v11711_v55 = vld [vmem:[#allocation6 + $0x2c8] ss:$16 sps:$4 sm:$0xff]  }
 0x4e7   :  { %9524 = vmatpush1.bf16.msra.mxu0 %v11612_v63  ;;  %v11678_v63 = vld [vmem:[#allocation6 + $0x108] ss:$16 sps:$4 sm:$0xff]  }
 0x4e8   :  { %9525 = vmatprep.subr.bf16.mxu0 %v11620_v13  ;;  %v7627_v13 = vpop.f32.mrf.mxu0 }
 0x4ea   :  { %v7629_v16 = vpop.f32.mrf.mxu0 }
 0x4eb   :  { %9526 = vmatpush1.bf16.msra.mxu0 %v11618_v51  ;;  %v11686_v51 = vld [vmem:[#allocation6 + $0x4ec] ss:$16 sps:$4 sm:$0xff]  }
 0x4ec   :  { %9527 = vmatprep.subr.bf16.mxu0 %v11626_v43  ;;  %v7583_v43 = vadd.f32 %v7582_v22, %v7540_v60  ;;  %v11714_v60 = vld [vmem:[#allocation6 + $0x448] ss:$16 sps:$4 sm:$0xff]  }
 0x4ee   :  { %v7626_v17 = vadd.f32 %v7625_v1, %v7583_v43  ;;  %v11713_v1 = vld [vmem:[#allocation6 + $0x2cc] ss:$16 sps:$4 sm:$0xff]  }
 0x4ef   :  { %9528 = vmatpush1.bf16.msra.mxu0 %v11624_v41  ;;  %v7544_v41 = vadd.f32 %v7543_v45, %v7501_v28  ;;  %v11717_v28 = vld [vmem:[#allocation6 + $0x2a8] ss:$16 sps:$4 sm:$0xff]   ;;  %v11731_v43 = vld [vmem:[#allocation6 + $0x26c] ss:$16 sps:$4 sm:$0xff]  }
 0x4f0   :  { %9529 = vmatprep.subr.bf16.mxu0 %v11632_v27  ;;  %v7581_v27 = vadd.f32 %v7580_v44, %v7538_v18  ;;  %v7669_v42 = vadd.f32 %v7668_v5, %v7626_v17  ;;  %v11719_v5 = vld [vmem:[#allocation6 + $0x2ac] ss:$16 sps:$4 sm:$0xff]  }
 0x4f1   :  { %v7587_v30 = vadd.f32 %v7586_v58, %v7544_v41  ;;  %v11722_v18 = vld [vmem:[#allocation6 + $0x42c] ss:$16 sps:$4 sm:$0xff]  }
 0x4f2   :  { %v11734_v41 = vld [vmem:[#allocation6 + $0x5ec] ss:$16 sps:$4 sm:$0xff]  }
 0x4f3   :  { %9530 = vmatpush1.bf16.msra.mxu0 %v11630_v57  ;;  %v7585_v57 = vadd.f32 %v7584_v59, %v7542_v3  ;;  %v11720_v3 = vld [vmem:[#allocation6 + $0x428] ss:$16 sps:$4 sm:$0xff]   ;;  %v11740_v17 = vld [vmem:[#allocation6 + $0x5cc] ss:$16 sps:$4 sm:$0xff]  }
 0x4f4   :  { %9531 = vmatprep.subr.bf16.mxu0 %v11638_v4  ;;  %v7624_v4 = vadd.f32 %v7623_v39, %v7581_v27  ;;  %v11710_v39 = vld [vmem:[#allocation6 + $0x46c] ss:$16 sps:$4 sm:$0xff]   ;;  %v11732_v27 = vld [vmem:[#allocation6 + $0x5e8] ss:$16 sps:$4 sm:$0xff]  }
 0x4f6   :  { %v7667_v44 = vadd.f32 %v7666_v37, %v7624_v4  ;;  %v11738_v4 = vld [vmem:[#allocation6 + $0x5c8] ss:$16 sps:$4 sm:$0xff]  }
 0x4f7   :  { %9532 = vmatpush2.bf16.msra.mxu0 %v11636_v33  ;;  %v11692_v33 = vld [vmem:[#allocation6 + $0x4cc] ss:$16 sps:$4 sm:$0xff]  }
 0x4f8   :  { %9533 = vmatprep.subr.bf16.mxu0 %v11644_v23  ;;  %v7628_v23 = vadd.f32 %v7627_v13, %v7585_v57  ;;  %v11728_v13 = vld [vmem:[#allocation6 + $0x40c] ss:$16 sps:$4 sm:$0xff]  }
 0x4f9   :  { %v11737_v57 = vld [vmem:[#allocation6 + $0x24c] ss:$16 sps:$4 sm:$0xff]  }
 0x4fa   :  { %v7671_v36 = vadd.f32 %v7670_v32, %v7628_v23  ;;  %v11729_v32 = vld [vmem:[#allocation6 + $0x268] ss:$16 sps:$4 sm:$0xff]  }
 0x4fb   :  { %9534 = vmatpush2.bf16.msra.mxu0 %v11642_v29  ;;  %v11744_v23 = vld [vmem:[#allocation6 + $0x5a8] ss:$16 sps:$4 sm:$0xff]  }
 0x4fc   :  { %9535 = vmatprep.subr.bf16.mxu0 %v11650_v7  ;;  %v7630_v7 = vadd.f32 %v7629_v16, %v7587_v30  ;;  %v11743_v16 = vld [vmem:[#allocation6 + $0x22c] ss:$16 sps:$4 sm:$0xff]   ;;  %v11741_v30 = vld [vmem:[#allocation6 + $0x228] ss:$16 sps:$4 sm:$0xff]  }
 0x4ff   :  { %9536 = vmatpush2.bf16.msra.mxu0 %v11648_v62 }
 0x500   :  { %9537 = vmatprep.subr.bf16.mxu0 %v11656_v10  ;;  %v11698_v10 = vld [vmem:[#allocation6 + $0x4ac] ss:$16 sps:$4 sm:$0xff]  }
 0x503   :  { %9538 = vmatpush2.bf16.msra.mxu0 %v11654_v11 }
 0x504   :  { %9539 = vmatprep.subr.bf16.mxu0 %v11662_v8  ;;  %v7673_v8 = vadd.f32 %v7672_v35, %v7630_v7  ;;  %v11749_v35 = vld [vmem:[#allocation6 + $0x20c] ss:$16 sps:$4 sm:$0xff]   ;;  %v11750_v7 = vld [vmem:[#allocation6 + $0x588] ss:$16 sps:$4 sm:$0xff]  }
 0x507   :  { %9540 = vmatpush2.bf16.msra.mxu0 %v11660_v20  ;;  %v11704_v20 = vld [vmem:[#allocation6 + $0x48c] ss:$16 sps:$4 sm:$0xff]  }
 0x508   :  { %9541 = vmatprep.subr.bf16.mxu0 %v11668_v6 }
 0x50b   :  { %9542 = vmatpush2.bf16.msra.mxu0 %v11666_v50  ;;  %v11702_v50 = vld [vmem:[#allocation6 + $0x488] ss:$16 sps:$4 sm:$0xff]  }
 0x50c   :  { %9543 = vmatprep.subr.bf16.mxu0 %v11674_v47 }
 0x50f   :  { %9544 = vmatpush2.bf16.msra.mxu0 %v11672_v25 }
 0x510   :  { %9545 = vmatprep.subr.bf16.mxu0 %v11680_v61  ;;  %v11716_v61 = vld [vmem:[#allocation6 + $0x44c] ss:$16 sps:$4 sm:$0xff]  }
 0x513   :  { %9546 = vmatpush2.bf16.msra.mxu0 %v11678_v63  ;;  %v11725_v63 = vld [vmem:[#allocation6 + $0x28c] ss:$16 sps:$4 sm:$0xff]  }
 0x514   :  { %9601 = vmatprep.subr.bf16.mxu0 %v11686_v51  ;;  %v11723_v51 = vld [vmem:[#allocation6 + $0x288] ss:$16 sps:$4 sm:$0xff]  }
 0x516   :  { %v7709_v29 = vpop.f32.mrf.mxu0  ;;  %9548 = vmatmul.mubr.bf16.vlgmr.msra.gmra.mxu0 %v12592_v31  ;;  %v11696_v31 = vld [vmem:[#allocation6 + $0x4a8] ss:$16 sps:$4 sm:$0xff]  }
 0x517   :  { %9602 = vmatpush1.bf16.msra.mxu0 %v11684_v12  ;;  %9633 = vmatprep.mubr.bf16.mxu0 %v12511_v19  ;;  %v7710_v11 = vadd.f32 %v7709_v29, %v7667_v44  ;;  %v11735_v12 = vld [vmem:[#allocation6 + $0x248] ss:$16 sps:$4 sm:$0xff]   ;;  %v11752_v29 = vld [vmem:[#allocation6 + $0x58c] ss:$16 sps:$4 sm:$0xff]  }
 0x518   :  { %v7752_v53 = vpop.f32.mrf.mxu1  ;;  %v7711_v62 = vpop.f32.mrf.mxu0  ;;  %9603 = vmatprep.subr.bf16.mxu0 %v11692_v33  ;;  %v11746_v33 = vld [vmem:[#allocation6 + $0x5ac] ss:$16 sps:$4 sm:$0xff]   ;;  %v11753_v44 = vld [vmem:[#allocation6 + $0x3e8] ss:$16 sps:$4 sm:$0xff]  }
 0x519   :  { %v7712_v54 = vadd.f32 %v7711_v62, %v7669_v42  ;;  %v7753_v45 = vadd.f32 %v7752_v53, %v7710_v11  ;;  %v11747_v42 = vld [vmem:[#allocation6 + $0x208] ss:$16 sps:$4 sm:$0xff]   ;;  %v11755_v53 = vld [vmem:[#allocation6 + $0x3ec] ss:$16 sps:$4 sm:$0xff]  }
 0x51a   :  { %v7754_v22 = vpop.f32.mrf.mxu1  ;;  %v7713_v52 = vpop.f32.mrf.mxu0  ;;  %v11756_v62 = vld [vmem:[#allocation6 + $0x568] ss:$16 sps:$4 sm:$0xff]   ;;  %v11767_v11 = vld [vmem:[#allocation6 + $0x3ac] ss:$16 sps:$4 sm:$0xff]  }
 0x51b   :  { %v7714_v0 = vadd.f32 %v7713_v52, %v7671_v36  ;;  %9604 = vmatpush1.bf16.msra.mxu0 %v11690_v2  ;;  %v7755_v14 = vadd.f32 %v7754_v22, %v7712_v54  ;;  %v7767_v37 = vmax.f32 %v7753_v45, 0.0  ;;  %v11758_v2 = vld [vmem:[#allocation6 + $0x56c] ss:$16 sps:$4 sm:$0xff]   ;;  %v11759_v54 = vld [vmem:[#allocation6 + $0x3c8] ss:$16 sps:$4 sm:$0xff]  }
 0x51c   :  { %v7756_v24 = vpop.f32.mrf.mxu1  ;;  %v7715_v59 = vpop.f32.mrf.mxu0  ;;  %9605 = vmatprep.subr.bf16.mxu0 %v11698_v10  ;;  %v11761_v10 = vld [vmem:[#allocation6 + $0x3cc] ss:$16 sps:$4 sm:$0xff]   ;;  %v11762_v22 = vld [vmem:[#allocation6 + $0x548] ss:$16 sps:$4 sm:$0xff]  }
 0x51d   :  { %v7757_v19 = vadd.f32 %v7756_v24, %v7714_v0  ;;  %v7716_v6 = vadd.f32 %v7715_v59, %v7673_v8  ;;  %v7768_v47 = vmax.f32 %v7755_v14, 0.0  ;;  %v11764_v36 = vld [vmem:[#allocation6 + $0x54c] ss:$16 sps:$4 sm:$0xff]   ;;  %v11765_v8 = vld [vmem:[#allocation6 + $0x3a8] ss:$16 sps:$4 sm:$0xff]  }
 0x51e   :  { %v7758_v38 = vpop.f32.mrf.mxu1  ;;  %v11770_v52 = vld [vmem:[#allocation6 + $0x52c] ss:$16 sps:$4 sm:$0xff]   ;;  %v11768_v0 = vld [vmem:[#allocation6 + $0x528] ss:$16 sps:$4 sm:$0xff]  }
 0x51f   :  { %v7759_v58 = vadd.f32 %v7758_v38, %v7716_v6  ;;  %9606 = vmatpush1.bf16.msra.mxu0 %v11696_v31  ;;  %v7775_v46 = vmax.f32 %v7757_v19, 0.0  ;;  %v11773_v24 = vld [vmem:[#allocation6 + $0x38c] ss:$16 sps:$4 sm:$0xff]   ;;  %v11771_v59 = vld [vmem:[#allocation6 + $0x388] ss:$16 sps:$4 sm:$0xff]  }
 0x520   :  { %9607 = vmatprep.subr.bf16.mxu0 %v11704_v20  ;;  %v11776_v31 = vld [vmem:[#allocation6 + $0x50c] ss:$16 sps:$4 sm:$0xff]   ;;  %v11774_v20 = vld [vmem:[#allocation6 + $0x508] ss:$16 sps:$4 sm:$0xff]  }
 0x521   :  { %v7776_v26 = vmax.f32 %v7759_v58, 0.0  ;;  %v12526_v25 = vpack.c.bf16 %v7775_v46, %v7767_v37  ;;  %v11779_v14 = vld [vmem:[#allocation6 + $0x36c] ss:$16 sps:$4 sm:$0xff]   ;;  %v11777_v6 = vld [vmem:[#allocation6 + $0x368] ss:$16 sps:$4 sm:$0xff]  }
 0x522   :  { %v11837_v19 = vld [vmem:[#allocation9 + $0x78] sm:$0xff]   ;;  %v11780_v58 = vld [vmem:[#allocation6 + $0x348] ss:$16 sps:$4 sm:$0xff]   ;;  %v11841_v37 = vld [vmem:[#allocation9 + $0x68] sm:$0xff]  }
 0x523   :  { %v12524_v40 = vpack.c.bf16 %v7776_v26, %v7768_v47  ;;  %9608 = vmatpush1.bf16.msra.mxu0 %v11702_v50  ;;  %v11782_v45 = vld [vmem:[#allocation6 + $0x34c] ss:$16 sps:$4 sm:$0xff]   ;;  %v11839_v46 = vld [vmem:[#allocation9 + $0x70] sm:$0xff]  }
 0x524   :  { %9609 = vmatprep.subr.bf16.mxu0 %v11710_v39  ;;  %v11838_v38 = vld [vmem:[#allocation9 + $0x38] sm:$0xff]   ;;  %v11840_v39 = vld [vmem:[#allocation9 + $0x30] sm:$0xff]  }
 0x525   :  { %9504 = vmatprep.mubr.bf16.mxu1 %v12524_v40  ;;  %v11785_v50 = vld [vmem:[#allocation6 + $0x32c] ss:$16 sps:$4 sm:$0xff]   ;;  %v11783_v47 = vld [vmem:[#allocation6 + $0x328] ss:$16 sps:$4 sm:$0xff]  }
 0x526   :  { %9505 = vmatmul.mubr.bf16.vlgmr.msra.gmra.mxu1 %v12526_v25  ;;  %v11788_v26 = vld [vmem:[#allocation6 + $0x30c] ss:$16 sps:$4 sm:$0xff]  }
 0x527   :  { %9559 = vmatpush1.bf16.msra.mxu1 %v11705_v9  ;;  %9590 = vmatprep.mubr.bf16.mxu1 %v12490_v34  ;;  %v11726_v34 = vld [vmem:[#allocation6 + $0x408] ss:$16 sps:$4 sm:$0xff]   ;;  %v11842_v9 = vld [vmem:[#allocation9 + $0x28] sm:$0xff]  }
 0x528   :  { %9610 = vmatpush1.bf16.msra.mxu0 %v11708_v48  ;;  %9560 = vmatprep.subr.bf16.mxu1 %v11713_v1  ;;  %v11843_v48 = vld [vmem:[#allocation9 + $0x60] sm:$0xff]  }
 0x529   :  { %9611 = vmatprep.subr.bf16.mxu0 %v11716_v61  ;;  %v11786_v1 = vld [vmem:[#allocation6 + $0x308] ss:$16 sps:$4 sm:$0xff]  }
 0x52a   :  { %v11844_v61 = vld [vmem:[#allocation9 + $0x20] sm:$0xff]  }
 0x52b   :  { %9561 = vmatpush1.bf16.msra.mxu1 %v11711_v55  ;;  %v11845_v55 = vld [vmem:[#allocation9 + $0x58] sm:$0xff]  }
 0x52c   :  { %9612 = vmatpush1.bf16.msra.mxu0 %v11714_v60  ;;  %9562 = vmatprep.subr.bf16.mxu1 %v11719_v5  ;;  %v11789_v60 = vld [vmem:[#allocation6 + $0x6e8] ss:$16 sps:$4 sm:$0xff]   ;;  %v11794_v5 = vld [vmem:[#allocation6 + $0x6cc] ss:$16 sps:$4 sm:$0xff]  }
 0x52d   :  { %9613 = vmatprep.subr.bf16.mxu0 %v11722_v18  ;;  %v11846_v18 = vld [vmem:[#allocation9 + $0x18] sm:$0xff]  }
 0x52f   :  { %9563 = vmatpush1.bf16.msra.mxu1 %v11717_v28  ;;  %v11792_v28 = vld [vmem:[#allocation6 + $0x6c8] ss:$16 sps:$4 sm:$0xff]  }
 0x530   :  { %9614 = vmatpush1.bf16.msra.mxu0 %v11720_v3  ;;  %9564 = vmatprep.subr.bf16.mxu1 %v11725_v63  ;;  %v11797_v3 = vld [vmem:[#allocation6 + $0x6ac] ss:$16 sps:$4 sm:$0xff]   ;;  %v11847_v63 = vld [vmem:[#allocation9 + $0x50] sm:$0xff]  }
 0x531   :  { %9615 = vmatprep.subr.bf16.mxu0 %v11728_v13  ;;  %v11848_v13 = vld [vmem:[#allocation9 + $0x10] sm:$0xff]  }
 0x533   :  { %9565 = vmatpush1.bf16.msra.mxu1 %v11723_v51  ;;  %v11795_v51 = vld [vmem:[#allocation6 + $0x6a8] ss:$16 sps:$4 sm:$0xff]  }
 0x534   :  { %9616 = vmatpush1.bf16.msra.mxu0 %v11726_v34  ;;  %9566 = vmatprep.subr.bf16.mxu1 %v11731_v43  ;;  %v11800_v34 = vld [vmem:[#allocation6 + $0x68c] ss:$16 sps:$4 sm:$0xff]  }
 0x535   :  { %9617 = vmatprep.subr.bf16.mxu0 %v11734_v41  ;;  %v11849_v43 = vld [vmem:[#allocation9 + $0x48] sm:$0xff]  }
 0x536   :  { %v11850_v41 = vld [vmem:[#allocation9 + $0x8] sm:$0xff]  }
 0x537   :  { %9567 = vmatpush1.bf16.msra.mxu1 %v11729_v32  ;;  %v11803_v32 = vld [vmem:[#allocation6 + $0x66c] ss:$16 sps:$4 sm:$0xff]  }
 0x538   :  { %9618 = vmatpush2.bf16.msra.mxu0 %v11732_v27  ;;  %9568 = vmatprep.subr.bf16.mxu1 %v11737_v57  ;;  %v11852_v27 = vld [vmem:[#allocation9] sm:$0xff]  }
 0x539   :  { %9619 = vmatprep.subr.bf16.mxu0 %v11740_v17  ;;  %v11801_v57 = vld [vmem:[#allocation6 + $0x668] ss:$16 sps:$4 sm:$0xff]   ;;  %v11806_v17 = vld [vmem:[#allocation6 + $0x64c] ss:$16 sps:$4 sm:$0xff]  }
 0x53b   :  { %9569 = vmatpush1.bf16.msra.mxu1 %v11735_v12  ;;  %v11804_v12 = vld [vmem:[#allocation6 + $0x648] ss:$16 sps:$4 sm:$0xff]  }
 0x53c   :  { %9620 = vmatpush2.bf16.msra.mxu0 %v11738_v4  ;;  %9570 = vmatprep.subr.bf16.mxu1 %v11743_v16  ;;  %v11809_v4 = vld [vmem:[#allocation6 + $0x62c] ss:$16 sps:$4 sm:$0xff]   ;;  %v11807_v16 = vld [vmem:[#allocation6 + $0x628] ss:$16 sps:$4 sm:$0xff]  }
 0x53d   :  { %9621 = vmatprep.subr.bf16.mxu0 %v11746_v33  ;;  %v11812_v33 = vld [vmem:[#allocation6 + $0x60c] ss:$16 sps:$4 sm:$0xff]  }
 0x53f   :  { %9571 = vmatpush1.bf16.msra.mxu1 %v11741_v30  ;;  %v11810_v30 = vld [vmem:[#allocation6 + $0x608] ss:$16 sps:$4 sm:$0xff]  }
 0x540   :  { %9622 = vmatpush2.bf16.msra.mxu0 %v11744_v23  ;;  %9572 = vmatprep.subr.bf16.mxu1 %v11749_v35  ;;  %v11815_v23 = vld [vmem:[#allocation6 + $0x7ec] ss:$16 sps:$4 sm:$0xff]   ;;  %v11813_v35 = vld [vmem:[#allocation6 + $0x7e8] ss:$16 sps:$4 sm:$0xff]  }
 0x541   :  { %9623 = vmatprep.subr.bf16.mxu0 %v11752_v29  ;;  %v11818_v29 = vld [vmem:[#allocation6 + $0x7cc] ss:$16 sps:$4 sm:$0xff]  }
 0x543   :  { %9573 = vmatpush1.bf16.msra.mxu1 %v11747_v42  ;;  %v11816_v42 = vld [vmem:[#allocation6 + $0x7c8] ss:$16 sps:$4 sm:$0xff]  }
 0x544   :  { %9624 = vmatpush2.bf16.msra.mxu0 %v11750_v7  ;;  %9574 = vmatprep.subr.bf16.mxu1 %v11755_v53  ;;  %v11821_v7 = vld [vmem:[#allocation6 + $0x7ac] ss:$16 sps:$4 sm:$0xff]   ;;  %v11819_v53 = vld [vmem:[#allocation6 + $0x7a8] ss:$16 sps:$4 sm:$0xff]  }
 0x545   :  { %9625 = vmatprep.subr.bf16.mxu0 %v11758_v2  ;;  %v11824_v2 = vld [vmem:[#allocation6 + $0x78c] ss:$16 sps:$4 sm:$0xff]  }
 0x547   :  { %9575 = vmatpush2.bf16.msra.mxu1 %v11753_v44  ;;  %v11822_v44 = vld [vmem:[#allocation6 + $0x788] ss:$16 sps:$4 sm:$0xff]  }
 0x548   :  { %9626 = vmatpush2.bf16.msra.mxu0 %v11756_v62  ;;  %9576 = vmatprep.subr.bf16.mxu1 %v11761_v10  ;;  %v11827_v62 = vld [vmem:[#allocation6 + $0x76c] ss:$16 sps:$4 sm:$0xff]   ;;  %v11825_v10 = vld [vmem:[#allocation6 + $0x768] ss:$16 sps:$4 sm:$0xff]  }
 0x549   :  { %9627 = vmatprep.subr.bf16.mxu0 %v11764_v36  ;;  %v11830_v36 = vld [vmem:[#allocation6 + $0x74c] ss:$16 sps:$4 sm:$0xff]  }
 0x54b   :  { %9577 = vmatpush2.bf16.msra.mxu1 %v11759_v54  ;;  %v11828_v54 = vld [vmem:[#allocation6 + $0x748] ss:$16 sps:$4 sm:$0xff]  }
 0x54c   :  { %9628 = vmatpush2.bf16.msra.mxu0 %v11762_v22  ;;  %9578 = vmatprep.subr.bf16.mxu1 %v11767_v11  ;;  %v11833_v22 = vld [vmem:[#allocation6 + $0x72c] ss:$16 sps:$4 sm:$0xff]   ;;  %v11831_v11 = vld [vmem:[#allocation6 + $0x728] ss:$16 sps:$4 sm:$0xff]  }
 0x54d   :  { %9629 = vmatprep.subr.bf16.mxu0 %v11770_v52  ;;  %v11836_v52 = vld [vmem:[#allocation6 + $0x70c] ss:$16 sps:$4 sm:$0xff]  }
 0x54f   :  { %9579 = vmatpush2.bf16.msra.mxu1 %v11765_v8  ;;  %v11834_v8 = vld [vmem:[#allocation6 + $0x708] ss:$16 sps:$4 sm:$0xff]  }
 0x550   :  { %9630 = vmatpush2.bf16.msra.mxu0 %v11768_v0  ;;  %9580 = vmatprep.subr.bf16.mxu1 %v11773_v24  ;;  %v11853_v0 = vld [vmem:[#allocation9 + $0xf8] sm:$0xff]  }
 0x551   :  { %9631 = vmatprep.subr.bf16.mxu0 %v11776_v31  ;;  %v11854_v24 = vld [vmem:[#allocation9 + $0xb8] sm:$0xff]   ;;  %v11855_v31 = vld [vmem:[#allocation9 + $0xf0] sm:$0xff]  }
 0x553   :  { %9581 = vmatpush2.bf16.msra.mxu1 %v11771_v59  ;;  %v11856_v59 = vld [vmem:[#allocation9 + $0xb0] sm:$0xff]  }
 0x554   :  { %9632 = vmatpush2.bf16.msra.mxu0 %v11774_v20  ;;  %9582 = vmatprep.subr.bf16.mxu1 %v11779_v14  ;;  %v11857_v20 = vld [vmem:[#allocation9 + $0xe8] sm:$0xff]  }
 0x555   :  { %11397 = vmatprep.subr.bf16.mxu0 %v11837_v19  ;;  %v11858_v14 = vld [vmem:[#allocation9 + $0xa8] sm:$0xff]   ;;  %v11859_v19 = vld [vmem:[#allocation9 + $0xe0] sm:$0xff]  }
 0x557   :  { %9583 = vmatpush2.bf16.msra.mxu1 %v11777_v6  ;;  %9634 = vmatmul.mubr.bf16.vlgmr.msra.gmra.mxu0 %v12443_v21  ;;  %v11791_v21 = vld [vmem:[#allocation6 + $0x6ec] ss:$16 sps:$4 sm:$0xff]   ;;  %v11860_v6 = vld [vmem:[#allocation9 + $0xa0] sm:$0xff]  }
 0x558   :  { %9584 = vmatprep.subr.bf16.mxu1 %v11782_v45  ;;  %11398 = vmatpush3.bf16.msra.mxu0 %v11838_v38  ;;  %v11861_v45 = vld [vmem:[#allocation9 + $0xd8] sm:$0xff]  }
 0x559   :  { %11399 = vmatprep.subr.bf16.mxu0 %v11839_v46  ;;  %v11862_v38 = vld [vmem:[#allocation9 + $0x98] sm:$0xff]   ;;  %v9420_v46 = vpop.f32.mrf.mxu1 }
 0x55b   :  { %9585 = vmatpush2.bf16.msra.mxu1 %v11780_v58 }
 0x55c   :  { %9586 = vmatprep.subr.bf16.mxu1 %v11785_v50  ;;  %11400 = vmatpush3.bf16.msra.mxu0 %v11840_v39 }
 0x55d   :  { %11401 = vmatprep.subr.bf16.mxu0 %v11841_v37  ;;  %v8041_v37 = vld [vmem:[#allocation7] sm:$0xf] }
 0x55f   :  { %9587 = vmatpush2.bf16.msra.mxu1 %v11783_v47  ;;  %v9422_v47 = vpop.f32.mrf.mxu1 }
 0x560   :  { %9588 = vmatprep.subr.bf16.mxu1 %v11788_v26  ;;  %11402 = vmatpush3.bf16.msra.mxu0 %v11842_v9  ;;  %v8050_v9 = vrot.slane %v8041_v37, %v1151_v49 }
 0x561   :  { %11403 = vmatprep.subr.bf16.mxu0 %v11843_v48  ;;  %v12594_v48 = vsub.s32 0, %v12228_v56 }
 0x563   :  { %9589 = vmatpush2.bf16.msra.mxu1 %v11786_v1  ;;  %v8046_v1 = vrot.slane %v8041_v37, %v12594_v48 }
 0x564   :  { %9644 = vmatprep.subr.bf16.mxu1 %v11791_v21  ;;  %11404 = vmatpush3.bf16.msra.mxu0 %v11844_v61  ;;  %v9424_v21 = vpop.f32.mrf.mxu1 }
 0x565   :  { %11405 = vmatprep.subr.bf16.mxu0 %v11845_v55 }
 0x566   :  { %9591 = vmatmul.mubr.bf16.vlgmr.msra.gmra.mxu1 %v12593_v15  ;;  %v11798_v15 = vld [vmem:[#allocation6 + $0x688] ss:$16 sps:$4 sm:$0xff]  }
 0x567   :  { %9645 = vmatpush1.bf16.msra.mxu1 %v11789_v60  ;;  %9676 = vmatprep.mubr.bf16.mxu1 %v12524_v40  ;;  %v11851_v40 = vld [vmem:[#allocation9 + $0x40] sm:$0xff]  }
 0x568   :  { %9646 = vmatprep.subr.bf16.mxu1 %v11794_v5  ;;  %11406 = vmatpush3.bf16.msra.mxu0 %v11846_v18  ;;  %v9426_v18 = vpop.f32.mrf.mxu1 }
 0x569   :  { %11407 = vmatprep.subr.bf16.mxu0 %v11847_v63 }
 0x56b   :  { %9647 = vmatpush1.bf16.msra.mxu1 %v11792_v28 }
 0x56c   :  { %9648 = vmatprep.subr.bf16.mxu1 %v11797_v3  ;;  %11408 = vmatpush3.bf16.msra.mxu0 %v11848_v13 }
 0x56d   :  { %11409 = vmatprep.subr.bf16.mxu0 %v11849_v43 }
 0x56f   :  { %9649 = vmatpush1.bf16.msra.mxu1 %v11795_v51 }
 0x570   :  { %9650 = vmatprep.subr.bf16.mxu1 %v11800_v34  ;;  %11410 = vmatpush3.bf16.msra.mxu0 %v11850_v41  ;;  %v11863_v34 = vld [vmem:[#allocation9 + $0xd0] sm:$0xff]  }
 0x571   :  { %11411 = vmatprep.subr.bf16.mxu0 %v11851_v40 }
 0x573   :  { %9651 = vmatpush1.bf16.msra.mxu1 %v11798_v15 }
 0x574   :  { %9652 = vmatprep.subr.bf16.mxu1 %v11803_v32  ;;  %11412 = vmatpush3.bf16.msra.mxu0 %v11852_v27  ;;  %v11864_v32 = vld [vmem:[#allocation9 + $0x90] sm:$0xff]  }
 0x577   :  { %9653 = vmatpush1.bf16.msra.mxu1 %v11801_v57 }
 0x578   :  { %9654 = vmatprep.subr.bf16.mxu1 %v11806_v17 }
 0x57b   :  { %9655 = vmatpush1.bf16.msra.mxu1 %v11804_v12 }
 0x57c   :  { %9656 = vmatprep.subr.bf16.mxu1 %v11809_v4 }
 0x57f   :  { %9657 = vmatpush1.bf16.msra.mxu1 %v11807_v16 }
 0x580   :  { %9658 = vmatprep.subr.bf16.mxu1 %v11812_v33  ;;  %v11865_v33 = vld [vmem:[#allocation9 + $0xc8] sm:$0xff]  }
 0x583   :  { %9659 = vmatpush1.bf16.msra.mxu1 %v11810_v30 }
 0x584   :  { %9660 = vmatprep.subr.bf16.mxu1 %v11815_v23 }
 0x587   :  { %9661 = vmatpush2.bf16.msra.mxu1 %v11813_v35  ;;  %v11866_v35 = vld [vmem:[#allocation9 + $0x88] sm:$0xff]  }
 0x588   :  { %9662 = vmatprep.subr.bf16.mxu1 %v11818_v29 }
 0x58b   :  { %9663 = vmatpush2.bf16.msra.mxu1 %v11816_v42 }
 0x58c   :  { %9664 = vmatprep.subr.bf16.mxu1 %v11821_v7 }
 0x58f   :  { %9665 = vmatpush2.bf16.msra.mxu1 %v11819_v53 }
 0x590   :  { %9666 = vmatprep.subr.bf16.mxu1 %v11824_v2  ;;  %v11867_v2 = vld [vmem:[#allocation9 + $0xc0] sm:$0xff]  }
 0x593   :  { %9667 = vmatpush2.bf16.msra.mxu1 %v11822_v44 }
 0x594   :  { %9668 = vmatprep.subr.bf16.mxu1 %v11827_v62  ;;  %v11868_v62 = vld [vmem:[#allocation9 + $0x80] sm:$0xff]  }
 0x597   :  { %9669 = vmatpush2.bf16.msra.mxu1 %v11825_v10 }
 0x598   :  { %9670 = vmatprep.subr.bf16.mxu1 %v11830_v36 }
 0x59b   :  { %9671 = vmatpush2.bf16.msra.mxu1 %v11828_v54 }
 0x59c   :  { %9672 = vmatprep.subr.bf16.mxu1 %v11833_v22 }
 0x59f   :  { %9673 = vmatpush2.bf16.msra.mxu1 %v11831_v11 }
 0x5a0   :  { %9674 = vmatprep.subr.bf16.mxu1 %v11836_v52 }
 0x5a3   :  { %9675 = vmatpush2.bf16.msra.mxu1 %v11834_v8 }
 0x5a4   :  { %11419 = vmatprep.subr.bf16.mxu1 %v11853_v0 }
 0x5a6   :  { %9677 = vmatmul.mubr.bf16.vlgmr.msra.gmra.mxu1 %v12526_v25  ;;  %v9377_v25 = vpop.f32.mrf.mxu0 }
 0x5a7   :  { %11420 = vmatpush3.bf16.msra.mxu1 %v11854_v24  ;;  %v9378_v5 = vadd.f32 %v9377_v25, %v8046_v1 }
 0x5a8   :  { %11421 = vmatprep.subr.bf16.mxu1 %v11855_v31  ;;  %v9379_v58 = vpop.f32.mrf.mxu0  ;;  %v12595_v31 = vsub.s32 3, %v12228_v56 }
 0x5a9   :  { %v9380_v55 = vadd.f32 %v9379_v58, %v8050_v9  ;;  %v9421_v43 = vadd.f32 %v9420_v46, %v9378_v5 }
 0x5aa   :  { %v9381_v50 = vpop.f32.mrf.mxu0 }
 0x5ab   :  { %11422 = vmatpush3.bf16.msra.mxu1 %v11856_v59  ;;  %v9382_v60 = vadd.f32 %v9381_v50, %v8046_v1  ;;  %v9423_v13 = vadd.f32 %v9422_v47, %v9380_v55  ;;  %v8058_v59 = vrot.slane %v8041_v37, %v12595_v31 }
 0x5ac   :  { %11423 = vmatprep.subr.bf16.mxu1 %v11857_v20  ;;  %v9383_v39 = vpop.f32.mrf.mxu0  ;;  %v12596_v20 = vsub.s32 2, %v12228_v56 }
 0x5ad   :  { %v9384_v3 = vadd.f32 %v9383_v39, %v8050_v9  ;;  %v9425_v51 = vadd.f32 %v9424_v21, %v9382_v60 }
 0x5ae   :  { %v9463_v26 = vpop.f32.mrf.mxu0 }
 0x5af   :  { %11424 = vmatpush3.bf16.msra.mxu1 %v11858_v14  ;;  %v9427_v49 = vadd.f32 %v9426_v18, %v9384_v3  ;;  %v9464_v57 = vadd.f32 %v9463_v26, %v9421_v43  ;;  %v8054_v14 = vrot.slane %v8041_v37, %v12596_v20 }
 0x5b0   :  { %11425 = vmatprep.subr.bf16.mxu1 %v11859_v19  ;;  %v9465_v61 = vpop.f32.mrf.mxu0 }
 0x5b1   :  { %v9466_v40 = vadd.f32 %v9465_v61, %v9423_v13 }
 0x5b2   :  { %v9467_v28 = vpop.f32.mrf.mxu0 }
 0x5b3   :  { %11426 = vmatpush3.bf16.msra.mxu1 %v11860_v6  ;;  %v9468_v27 = vadd.f32 %v9467_v28, %v9425_v51 }
 0x5b4   :  { %11427 = vmatprep.subr.bf16.mxu1 %v11861_v45  ;;  %v9469_v41 = vpop.f32.mrf.mxu0 }
 0x5b5   :  { %v9470_v12 = vadd.f32 %v9469_v41, %v9427_v49 }
 0x5b7   :  { %11428 = vmatpush3.bf16.msra.mxu1 %v11862_v38 }
 0x5b8   :  { %11429 = vmatprep.subr.bf16.mxu1 %v11863_v34 }
 0x5bb   :  { %11430 = vmatpush3.bf16.msra.mxu1 %v11864_v32 }
 0x5bc   :  { %11431 = vmatprep.subr.bf16.mxu1 %v11865_v33 }
 0x5bf   :  { %11432 = vmatpush3.bf16.msra.mxu1 %v11866_v35 }
 0x5c0   :  { %11433 = vmatprep.subr.bf16.mxu1 %v11867_v2 }
 0x5c3   :  { %11434 = vmatpush3.bf16.msra.mxu1 %v11868_v62 }
 0x5d6   :  { %v9549_v54 = vpop.f32.mrf.mxu0 }
 0x5d7   :  { %v9550_v25 = vadd.f32 %v9549_v54, %v8054_v14 }
 0x5d8   :  { %v9551_v22 = vpop.f32.mrf.mxu0 }
 0x5d9   :  { %v9552_v45 = vadd.f32 %v9551_v22, %v8058_v59 }
 0x5da   :  { %v9553_v11 = vpop.f32.mrf.mxu0 }
 0x5db   :  { %v9554_v38 = vadd.f32 %v9553_v11, %v8054_v14 }
 0x5dc   :  { %v9555_v8 = vpop.f32.mrf.mxu0 }
 0x5dd   :  { %v9556_v50 = vadd.f32 %v9555_v8, %v8058_v59 }
 0x5e6   :  { %v9506_v63 = vpop.f32.mrf.mxu1 }
 0x5e7   :  { %v9507_v30 = vadd.f32 %v9506_v63, %v9464_v57  ;;  %v11362_v57 = vld [vmem:[#allocation10] ss:$0 sm:$0xff] }
 0x5e8   :  { %v9508_v15 = vpop.f32.mrf.mxu1 }
 0x5e9   :  { %v9509_v4 = vadd.f32 %v9508_v15, %v9466_v40  ;;  %v9687_v44 = vmax.f32 %v9507_v30, 0.0 }
 0x5ea   :  { %v9510_v17 = vpop.f32.mrf.mxu1 }
 0x5eb   :  { %v9511_v16 = vadd.f32 %v9510_v17, %v9468_v27  ;;  %v9688_v7 = vmax.f32 %v9509_v4, 0.0 }
 0x5ec   :  { %v9512_v23 = vpop.f32.mrf.mxu1 }
 0x5ed   :  { %v9513_v29 = vadd.f32 %v9512_v23, %v9470_v12  ;;  %v9691_v42 = vmax.f32 %v9511_v16, 0.0 }
 0x5ef   :  { %v9692_v53 = vmax.f32 %v9513_v29, 0.0  ;;  %v9695_v36 = vpack.c.bf16 %v9691_v42, %v9687_v44 }
 0x5f1   :  { %v9696_v10 = vpack.c.bf16 %v9692_v53, %v9688_v7 }
 0x5f3   :  { %9994 = vmatprep.mubr.bf16.mxu0 %v9696_v10 }
 0x5f4   :  { %9995 = vmatmul.mubr.bf16.vlgmr.msra.gmra.mxu0 %v9695_v36 }
 0x617   :  { %v9635_v24 = vpop.f32.mrf.mxu0 }
 0x619   :  { %v9637_v6 = vpop.f32.mrf.mxu0 }
 0x61b   :  { %v9639_v47 = vpop.f32.mrf.mxu0 }
 0x61d   :  { %v9641_v55 = vpop.f32.mrf.mxu0 }
 0x626   :  { %v9592_v52 = vpop.f32.mrf.mxu1 }
 0x627   :  { %v9593_v26 = vadd.f32 %v9592_v52, %v9550_v25 }
 0x628   :  { %v9594_v0 = vpop.f32.mrf.mxu1 }
 0x629   :  { %v9595_v46 = vadd.f32 %v9594_v0, %v9552_v45  ;;  %v9636_v60 = vadd.f32 %v9635_v24, %v9593_v26 }
 0x62a   :  { %v9596_v19 = vpop.f32.mrf.mxu1 }
 0x62b   :  { %v9597_v39 = vadd.f32 %v9596_v19, %v9554_v38  ;;  %v9638_v21 = vadd.f32 %v9637_v6, %v9595_v46 }
 0x62c   :  { %v9598_v58 = vpop.f32.mrf.mxu1 }
 0x62d   :  { %v9599_v48 = vadd.f32 %v9598_v58, %v9556_v50  ;;  %v9640_v61 = vadd.f32 %v9639_v47, %v9597_v39 }
 0x62f   :  { %v9642_v18 = vadd.f32 %v9641_v55, %v9599_v48 }
 0x666   :  { %v9678_v9 = vpop.f32.mrf.mxu1 }
 0x667   :  { %v9679_v28 = vadd.f32 %v9678_v9, %v9636_v60 }
 0x668   :  { %v9680_v1 = vpop.f32.mrf.mxu1 }
 0x669   :  { %v9681_v37 = vadd.f32 %v9680_v1, %v9638_v21  ;;  %v9689_v43 = vmax.f32 %v9679_v28, 0.0 }
 0x66a   :  { %v9682_v56 = vpop.f32.mrf.mxu1 }
 0x66b   :  { %v9683_v5 = vadd.f32 %v9682_v56, %v9640_v61  ;;  %v9690_v51 = vmax.f32 %v9681_v37, 0.0 }
 0x66c   :  { %v9684_v3 = vpop.f32.mrf.mxu1 }
 0x66d   :  { %v9685_v63 = vadd.f32 %v9684_v3, %v9642_v18  ;;  %v9693_v13 = vmax.f32 %v9683_v5, 0.0 }
 0x66f   :  { %v9694_v34 = vmax.f32 %v9685_v63, 0.0  ;;  %v9697_v15 = vpack.c.bf16 %v9693_v13, %v9689_v43 }
 0x671   :  { %v9698_v41 = vpack.c.bf16 %v9694_v34, %v9690_v51 }
 0x673   :  { %10035 = vmatprep.mubr.bf16.mxu1 %v9698_v41 }
 0x674   :  { %10036 = vmatmul.mubr.bf16.vlgmr.msra.gmra.mxu1 %v9697_v15 }
 0x6b4   :  { %v11413_v32 = vpop.f32.mrf.mxu0 }
 0x6b6   :  { %v11414_v49 = vpop.f32.mrf.mxu0 }
 0x6b7   :  { %v11415_v27 = vadd.f32 %v11414_v49, %v11413_v32 }
 0x6b8   :  { %v11416_v40 = vpop.f32.mrf.mxu0 }
 0x6b9   :  { %v9997_v16 = vadd.f32 %v11415_v27, %v11362_v57 }
 0x6ba   :  { %v11417_v17 = vpop.f32.mrf.mxu0 }
 0x6bb   :  { %v11418_v33 = vadd.f32 %v11417_v17, %v11416_v40 }
 0x6bd   :  { %v10000_v42 = vadd.f32 %v11418_v33, %v11362_v57 }
 0x734   :  { %v11435_v12 = vpop.f32.mrf.mxu1 }
 0x736   :  { %v11436_v4 = vpop.f32.mrf.mxu1 }
 0x737   :  { %v11437_v30 = vadd.f32 %v11436_v4, %v11435_v12 }
 0x738   :  { %v11438_v23 = vpop.f32.mrf.mxu1 }
 0x739   :  { %v10038_v35 = vadd.f32 %v11437_v30, %v9997_v16 }
 0x73a   :  { %v11439_v29 = vpop.f32.mrf.mxu1 }
 0x73b   :  { %v11395_v7 = vmul.f32 -1.442695, %v10038_v35  ;;  %v11440_v53 = vadd.f32 %v11439_v29, %v11438_v23 }
 0x73d   :  { %11869 = vpow2.f32 %v11395_v7  ;;  %v10041_v2 = vadd.f32 %v11440_v53, %v10000_v42 }
 0x73f   :  { %v11396_v44 = vmul.f32 -1.442695, %v10041_v2 }
 0x741   :  { %11871 = vpow2.f32 %v11396_v44 }
 0x74a   :  { %v11870_v62 = vpop.eup %11869 }
 0x74b   :  { %v10050_v10 = vadd.f32 1.0, %v11870_v62 }
 0x74d   :  { %11873 = vrcp.f32 %v10050_v10 }
 0x74e   :  { %v11872_v36 = vpop.eup %11871 }
 0x74f   :  { %v10051_v54 = vadd.f32 1.0, %v11872_v36 }
 0x751   :  { %11875 = vrcp.f32 %v10051_v54 }
 0x75a   :  { %v11874_v22 = vpop.eup %11873 }
 0x75b   :  { %10056 = vst [vmem:[%s12556_s7] sm:$0xff] %v11874_v22 }
 0x75e   :  { %v11876_v11 = vpop.eup %11875 }
 0x75f   :  { %10057 = vst [vmem:[%s12556_s7 + $0x8] sm:$0xff] %v11876_v11 }
 0x760   :  { %10062 = vsyncpa [#allocation3], 1 }
 0x761   :  { %10063 = vsyncpa [#allocation5], 1 }
 0x762   :  { %10064 = vsyncpa [#allocation8], 1 }
 0x763   :  { %10065 = vsyncpa [#allocation11], 1 }

</bundles_post_ra>
